<compile_context>
chip_gen: v7x
topology: tpu7x:2x2x1
jax: 0.10.0
libtpu: 0.0.40
codegen_flags: <defaults>
</compile_context>

<pallas_src>
import functools

import jax
import jax.numpy as jnp
from jax.experimental import pallas as pl
from jax.experimental.pallas import tpu as pltpu

BN_EPS = 1e-5

# (Cin, Cout, K, stride) -- STATIC (never traced).
CONV_CFG = (
    (1, 32, 5, 2),
    (32, 64, 5, 2),
    (64, 64, 5, 2),
    (64, 64, 5, 2),
    (64, 64, 3, 1),
)

VMEM_LIMIT = 32 * 1024 * 1024  # scoped-VMEM cap (safe on v5e/v6e and v7x's 64 MiB)


def _round_up(x, m):
    return ((x + m - 1) // m) * m


def _cdiv(a, b):
    return (a + b - 1) // b


# ---------------------------------------------------------------------------
# Pallas kernels
# ---------------------------------------------------------------------------
def gemm_relu_stats_kernel(p_ref, w_ref, b_ref, y_ref, st_ref, *, tm, m_real, cp):
    """One M-tile: y = ReLU(patches @ W + b); store y in bf16 and per-channel
    partial sum / sum-of-squares (single full-tile (8, Cp) store, f32).
    Padded rows exist only in the last tile, so only that tile pays for masking."""
    i = pl.program_id(0)
    last = pl.num_programs(0) - 1

    y = jnp.dot(p_ref[...], w_ref[...], preferred_element_type=jnp.float32)
    y = jnp.maximum(y + b_ref[0:1, :], 0.0)
    y_ref[...] = y.astype(y_ref.dtype)

    pad_rows = jnp.zeros((6, cp), jnp.float32)

    @pl.when(i < last)
    def _():
        s = jnp.sum(y, axis=0, keepdims=True)
        ss = jnp.sum(y * y, axis=0, keepdims=True)
        st_ref[...] = jnp.concatenate([s, ss, pad_rows], axis=0)

    @pl.when(i == last)
    def _():
        row = jax.lax.broadcasted_iota(jnp.int32, (tm, 1), 0) + i * tm
        valid = (row < m_real).astype(jnp.float32)
        ym = y * valid
        s = jnp.sum(ym, axis=0, keepdims=True)
        ss = jnp.sum(ym * y, axis=0, keepdims=True)
        st_ref[...] = jnp.concatenate([s, ss, pad_rows], axis=0)


def linear_kernel(x_ref, w_ref, b_ref, o_ref):
    o_ref[...] = (
        jnp.dot(x_ref[...], w_ref[...], preferred_element_type=jnp.float32)
        + b_ref[0:1, :]
    )


# ---------------------------------------------------------------------------
# Layer wrappers
# ---------------------------------------------------------------------------
def conv_relu_stats_layer(x_nhwc, w, b, gamma, beta, k, stride):
    """Returns (pre-BN ReLU activation in bf16 NHWC, BN scale, BN shift)."""
    N, H, W, Cin = x_nhwc.shape
    Cout = w.shape[0]
    Ho = (H - k) // stride + 1
    Wo = (W - k) // stride + 1
    M = N * Ho * Wo
    Kdim = k * k * Cin

    # --- im2col in NHWC, feature order (kh, kw, cin), built directly in bf16 ---
    # TODO(synk): fuse im2col into the Pallas kernel (shifted-slice accumulation
    # over NHWC kept in HBM) to remove the k*k patch HBM blow-up entirely.
    x_bf16 = x_nhwc.astype(jnp.bfloat16)
    cols = []
    for kh in range(k):
        for kw in range(k):
            cols.append(
                x_bf16[
                    :,
                    kh : kh + stride * (Ho - 1) + 1 : stride,
                    kw : kw + stride * (Wo - 1) + 1 : stride,
                    :,
                ]
            )  # (N, Ho, Wo, Cin)
    p = jnp.stack(cols, axis=3).reshape(M, Kdim)

    # --- M tiling: >=2 tiles when possible (both v7x TCs), <=512 rows/tile ---
    TM = min(512, _round_up(max(_cdiv(M, 2), 1), 16))
    M_pad = _round_up(M, TM)
    if M_pad != M:
        p = jnp.pad(p, ((0, M_pad - M), (0, 0)))
    n_tiles = M_pad // TM

    # --- lane-dense channel padding + bf16 MXU operands ---
    Cp = _round_up(Cout, 128)
    w_mat = w.transpose(2, 3, 1, 0).reshape(Kdim, Cout)          # (kh,kw,cin) x cout
    w_mat = jnp.pad(w_mat, ((0, 0), (0, Cp - Cout))).astype(jnp.bfloat16)
    bvec = jnp.zeros((8, Cp), jnp.float32).at[0, :Cout].set(b)   # packed (8,128) tile

    kernel_a = functools.partial(gemm_relu_stats_kernel, tm=TM, m_real=M, cp=Cp)
    y, stats = pl.pallas_call(
        kernel_a,
        out_shape=(
            jax.ShapeDtypeStruct((M_pad, Cp), jnp.bfloat16),     # bf16 activations
            jax.ShapeDtypeStruct((8 * n_tiles, Cp), jnp.float32),
        ),
        grid=(n_tiles,),
        in_specs=[
            pl.BlockSpec((TM, Kdim), lambda i: (i, 0)),
            pl.BlockSpec((Kdim, Cp), lambda i: (0, 0)),
            pl.BlockSpec((8, Cp), lambda i: (0, 0)),
        ],
        out_specs=(
            pl.BlockSpec((TM, Cp), lambda i: (i, 0)),
            pl.BlockSpec((8, Cp), lambda i: (i, 0)),
        ),
        compiler_params=pltpu.CompilerParams(
            dimension_semantics=("parallel",),
            vmem_limit_bytes=VMEM_LIMIT,
        ),
    )(p, w_mat, bvec)

    # --- cross-tile BN stat reduction (tiny, in JAX) -> scale/shift ---
    st = stats.reshape(n_tiles, 8, Cp)
    total = jnp.sum(st[:, 0, :Cout], axis=0)
    total_sq = jnp.sum(st[:, 1, :Cout], axis=0)
    mean = total / M
    var = jnp.maximum(total_sq / M - mean * mean, 0.0)  # biased var (train-mode BN)
    scale = gamma * jax.lax.rsqrt(var + BN_EPS)
    shift = beta - mean * scale

    y_real = y[:M, :Cout].reshape(N, Ho, Wo, Cout)  # pre-BN ReLU activation (bf16)
    return y_real, scale, shift


def linear_pallas(feat, w_mat, bias):
    """feat (N,F) x w_mat (F,Z) + bias; padded to (8, 128) for a lane-dense store."""
    N, F = feat.shape
    Z = w_mat.shape[1]
    Np = _round_up(N, 8)
    Zp = _round_up(Z, 128)
    x_p = jnp.pad(feat.astype(jnp.float32), ((0, Np - N), (0, 0)))
    w_p = jnp.pad(w_mat.astype(jnp.float32), ((0, 0), (0, Zp - Z)))
    b_p = jnp.zeros((8, Zp), jnp.float32).at[0, :Z].set(bias)
    vmem = pl.BlockSpec(memory_space=pltpu.MemorySpace.VMEM)
    out = pl.pallas_call(
        linear_kernel,
        out_shape=jax.ShapeDtypeStruct((Np, Zp), jnp.float32),
        in_specs=[vmem, vmem, vmem],
        out_specs=vmem,
        compiler_params=pltpu.CompilerParams(vmem_limit_bytes=VMEM_LIMIT),
    )(x_p, w_p, b_p)
    return out[:N, :Z]


# ---------------------------------------------------------------------------
# Full encoder forward
# ---------------------------------------------------------------------------
def init_params(key, flatten_dim, z_dim):
    params = {"convs": []}
    for (cin, cout, k, _s) in CONV_CFG:
        key, k_w = jax.random.split(key)
        fan_in = cin * k * k
        w = jax.random.normal(k_w, (cout, cin, k, k), jnp.float32) * jnp.sqrt(
            2.0 / fan_in
        )
        b = jnp.zeros((cout,), jnp.float32)
        gamma = jnp.ones((cout,), jnp.float32)   # BatchNorm weight init
        beta = jnp.zeros((cout,), jnp.float32)   # BatchNorm bias init
        params["convs"].append((w, b, gamma, beta))
    key, k_lw, k_lb = jax.random.split(key, 3)
    bound = 1.0 / jnp.sqrt(flatten_dim)
    params["lin_w"] = jax.random.uniform(
        k_lw, (z_dim, flatten_dim), jnp.float32, -bound, bound
    )
    params["lin_b"] = jax.random.uniform(k_lb, (z_dim,), jnp.float32, -bound, bound)
    return params


@jax.jit
def encoder_forward(x_nchw, params):
    x = x_nchw.astype(jnp.float32).transpose(0, 2, 3, 1)  # NCHW -> NHWC (once)
    N = x.shape[0]
    scale = shift = None
    for (w, b, gamma, beta), (_cin, _cout, k, stride) in zip(
        params["convs"], CONV_CFG
    ):
        if scale is not None:
            # Fold previous block's BN affine into this conv (exact: no padding).
            # Bias fold uses the ORIGINAL weights, then the weights get scaled.
            b = b + jnp.einsum("oikl,i->o", w, shift)
            w = w * scale[None, :, None, None]
        x, scale, shift = conv_relu_stats_layer(x, w, b, gamma, beta, k, stride)

    # Fold the last block's BN affine into the Linear (NCHW flatten order).
    C = x.shape[-1]
    HW = x.shape[1] * x.shape[2]
    lin_w_r = params["lin_w"].reshape(-1, C, HW)            # (z, C, H*W)
    lin_b_f = params["lin_b"] + jnp.einsum("zch,c->z", lin_w_r, shift)
    lin_w_f = (lin_w_r * scale[None, :, None]).reshape(params["lin_w"].shape)

    # Flatten in PyTorch NCHW order (final spatial extent here is 1x1 anyway).
    feat = x.transpose(0, 3, 1, 2).reshape(N, -1)
    z = linear_pallas(feat, lin_w_f.T, lin_b_f)
    return z


if __name__ == "__main__":
    key = jax.random.PRNGKey(0)
    key, k_x = jax.random.split(key)

    # Smallest input surviving four stride-2 5x5 convs + one 3x3 conv:
    # 96 -> 46 -> 21 -> 9 -> 3 -> 1   => flatten_dim = 64 * 1 * 1 = 64
    N, H, W = 2, 96, 96
    flatten_dim, z_dim = 64, 32

    x = jax.random.normal(k_x, (N, 1, H, W), jnp.float32)
    params = init_params(key, flatten_dim, z_dim)

    z = encoder_forward(x, params)
    jax.block_until_ready(z)
    assert z.shape == (N, z_dim), z.shape
    print("KERNEL_OK")
</pallas_src>

<mosaic_0001>
module attributes {stable_mosaic.version = 11 : i64} {
  func.func @gemm_relu_stats_kernel(%arg0: i32, %arg1: memref<512x25xbf16, #tpu.memory_space<vmem>>, %arg2: memref<25x128xbf16, #tpu.memory_space<vmem>>, %arg3: memref<8x128xf32, #tpu.memory_space<vmem>>, %arg4: memref<512x128xbf16, #tpu.memory_space<vmem>>, %arg5: memref<8x128xf32, #tpu.memory_space<vmem>>) attributes {dimension_semantics = [#tpu.dimension_semantics<parallel>], iteration_bounds = array<i64: 9>, scalar_prefetch = 0 : i64, scratch_operands = 0 : i64, tpu.core_type = #tpu.core_type<tc>, window_params = [{transform_indices = @transform_0, window_bounds = array<i64: 512, 25>}, {pipeline_mode = #tpu.pipeline_mode<synchronous>, transform_indices = @transform_1, window_bounds = array<i64: 25, 128>}, {pipeline_mode = #tpu.pipeline_mode<synchronous>, transform_indices = @transform_2, window_bounds = array<i64: 8, 128>}, {transform_indices = @transform_3, window_bounds = array<i64: 512, 128>}, {transform_indices = @transform_4, window_bounds = array<i64: 8, 128>}]} {
    %c0 = arith.constant 0 : index
    %c0_0 = arith.constant 0 : index
    %0 = vector.load %arg1[%c0, %c0_0] : memref<512x25xbf16, #tpu.memory_space<vmem>>, vector<512x25xbf16>
    %c0_1 = arith.constant 0 : index
    %c0_2 = arith.constant 0 : index
    %1 = vector.load %arg2[%c0_1, %c0_2] : memref<25x128xbf16, #tpu.memory_space<vmem>>, vector<25x128xbf16>
    %cst = arith.constant dense<0.000000e+00> : vector<512x128xf32>
    %2 = tpu.matmul %0, %1, %cst {dimension_numbers = #tpu.dot_dimension_numbers<[1], [0], [0], [1], [0, 0, 1, 1], [], []>} : vector<512x25xbf16>, vector<25x128xbf16>, vector<512x128xf32> -> vector<512x128xf32>
    %c0_3 = arith.constant 0 : index
    %c0_4 = arith.constant 0 : index
    %3 = vector.load %arg3[%c0_3, %c0_4] : memref<8x128xf32, #tpu.memory_space<vmem>>, vector<1x128xf32>
    %4 = vector.broadcast %3 : vector<1x128xf32> to vector<512x128xf32>
    %5 = arith.addf %2, %4 : vector<512x128xf32>
    %cst_5 = arith.constant 0.000000e+00 : f32
    %6 = vector.broadcast %cst_5 : f32 to vector<512x128xf32>
    %7 = arith.maximumf %5, %6 : vector<512x128xf32>
    %8 = arith.truncf %7 : vector<512x128xf32> to vector<512x128xbf16>
    %c0_6 = arith.constant 0 : index
    %c0_7 = arith.constant 0 : index
    %9 = vector.load %arg4[%c0_6, %c0_7] : memref<512x128xbf16, #tpu.memory_space<vmem>>, vector<512x128xbf16>
    tpu.vector_store %arg4[%c0_6, %c0_7], %8 {strides = array<i32>} : memref<512x128xbf16, #tpu.memory_space<vmem>>, vector<512x128xbf16>,
    %cst_8 = arith.constant 0.000000e+00 : f32
    %10 = vector.broadcast %cst_8 : f32 to vector<6x128xf32>
    %c8_i32 = arith.constant 8 : i32
    %11 = arith.cmpi slt, %arg0, %c8_i32 : i32
    %12 = arith.extui %11 : i1 to i32
    %c0_i32 = arith.constant 0 : i32
    %13 = arith.cmpi ne, %12, %c0_i32 : i32
    scf.if %13 {
      %cst_11 = arith.constant dense<0.000000e+00> : vector<128xf32>
      %17 = vector.multi_reduction <add>, %7, %cst_11 [0] : vector<512x128xf32> to vector<128xf32>
      %18 = vector.shape_cast %17 : vector<128xf32> to vector<1x128xf32>
      %19 = arith.mulf %7, %7 : vector<512x128xf32>
      %cst_12 = arith.constant dense<0.000000e+00> : vector<128xf32>
      %20 = vector.multi_reduction <add>, %19, %cst_12 [0] : vector<512x128xf32> to vector<128xf32>
      %21 = vector.shape_cast %20 : vector<128xf32> to vector<1x128xf32>
      %22 = tpu.concatenate %18, %21, %10 in 0 : vector<1x128xf32>, vector<1x128xf32>, vector<6x128xf32> -> vector<8x128xf32>
      %c0_13 = arith.constant 0 : index
      %c0_14 = arith.constant 0 : index
      %23 = vector.load %arg5[%c0_13, %c0_14] : memref<8x128xf32, #tpu.memory_space<vmem>>, vector<8x128xf32>
      tpu.vector_store %arg5[%c0_13, %c0_14], %22 {strides = array<i32>} : memref<8x128xf32, #tpu.memory_space<vmem>>, vector<8x128xf32>,
    } else {
    }
    %c8_i32_9 = arith.constant 8 : i32
    %14 = arith.cmpi eq, %arg0, %c8_i32_9 : i32
    %15 = arith.extui %14 : i1 to i32
    %c0_i32_10 = arith.constant 0 : i32
    %16 = arith.cmpi ne, %15, %c0_i32_10 : i32
    scf.if %16 {
      %17 = tpu.iota {dimensions = array<i32: 0>} : vector<512x1xi32>
      %c512_i32 = arith.constant 512 : i32
      %18 = arith.muli %arg0, %c512_i32 : i32
      %19 = vector.broadcast %18 : i32 to vector<512x1xi32>
      %20 = arith.addi %17, %19 : vector<512x1xi32>
      %c4232_i32 = arith.constant 4232 : i32
      %21 = vector.broadcast %c4232_i32 : i32 to vector<512x1xi32>
      %22 = arith.cmpi slt, %20, %21 : vector<512x1xi32>
      %23 = arith.extui %22 : vector<512x1xi1> to vector<512x1xi32>
      %24 = arith.sitofp %23 : vector<512x1xi32> to vector<512x1xf32>
      %25 = vector.broadcast %24 : vector<512x1xf32> to vector<512x128xf32>
      %26 = arith.mulf %7, %25 : vector<512x128xf32>
      %cst_11 = arith.constant dense<0.000000e+00> : vector<128xf32>
      %27 = vector.multi_reduction <add>, %26, %cst_11 [0] : vector<512x128xf32> to vector<128xf32>
      %28 = vector.shape_cast %27 : vector<128xf32> to vector<1x128xf32>
      %29 = arith.mulf %26, %7 : vector<512x128xf32>
      %cst_12 = arith.constant dense<0.000000e+00> : vector<128xf32>
      %30 = vector.multi_reduction <add>, %29, %cst_12 [0] : vector<512x128xf32> to vector<128xf32>
      %31 = vector.shape_cast %30 : vector<128xf32> to vector<1x128xf32>
      %32 = tpu.concatenate %28, %31, %10 in 0 : vector<1x128xf32>, vector<1x128xf32>, vector<6x128xf32> -> vector<8x128xf32>
      %c0_13 = arith.constant 0 : index
      %c0_14 = arith.constant 0 : index
      %33 = vector.load %arg5[%c0_13, %c0_14] : memref<8x128xf32, #tpu.memory_space<vmem>>, vector<8x128xf32>
      tpu.vector_store %arg5[%c0_13, %c0_14], %32 {strides = array<i32>} : memref<8x128xf32, #tpu.memory_space<vmem>>, vector<8x128xf32>,
    } else {
    }
    return
  }
  func.func @transform_0(%arg0: i32) -> (i32, i32) {
    %c0_i32 = arith.constant 0 : i32
    %c0_i32_0 = arith.constant 0 : i32
    return %arg0, %c0_i32 : i32, i32
  }
  func.func @transform_1(%arg0: i32) -> (i32, i32) {
    %c0_i32 = arith.constant 0 : i32
    %c0_i32_0 = arith.constant 0 : i32
    %c0_i32_1 = arith.constant 0 : i32
    return %c0_i32, %c0_i32_0 : i32, i32
  }
  func.func @transform_2(%arg0: i32) -> (i32, i32) {
    %c0_i32 = arith.constant 0 : i32
    %c0_i32_0 = arith.constant 0 : i32
    %c0_i32_1 = arith.constant 0 : i32
    return %c0_i32, %c0_i32_0 : i32, i32
  }
  func.func @transform_3(%arg0: i32) -> (i32, i32) {
    %c0_i32 = arith.constant 0 : i32
    %c0_i32_0 = arith.constant 0 : i32
    return %arg0, %c0_i32 : i32, i32
  }
  func.func @transform_4(%arg0: i32) -> (i32, i32) {
    %c0_i32 = arith.constant 0 : i32
    %c0_i32_0 = arith.constant 0 : i32
    return %arg0, %c0_i32 : i32, i32
  }
}

module attributes {stable_mosaic.version = 11 : i64} {
  func.func @gemm_relu_stats_kernel(%arg0: i32, %arg1: memref<448x800xbf16, #tpu.memory_space<vmem>>, %arg2: memref<800x128xbf16, #tpu.memory_space<vmem>>, %arg3: memref<8x128xf32, #tpu.memory_space<vmem>>, %arg4: memref<448x128xbf16, #tpu.memory_space<vmem>>, %arg5: memref<8x128xf32, #tpu.memory_space<vmem>>) attributes {dimension_semantics = [#tpu.dimension_semantics<parallel>], iteration_bounds = array<i64: 2>, scalar_prefetch = 0 : i64, scratch_operands = 0 : i64, tpu.core_type = #tpu.core_type<tc>, window_params = [{transform_indices = @transform_0, window_bounds = array<i64: 448, 800>}, {pipeline_mode = #tpu.pipeline_mode<synchronous>, transform_indices = @transform_1, window_bounds = array<i64: 800, 128>}, {pipeline_mode = #tpu.pipeline_mode<synchronous>, transform_indices = @transform_2, window_bounds = array<i64: 8, 128>}, {transform_indices = @transform_3, window_bounds = array<i64: 448, 128>}, {transform_indices = @transform_4, window_bounds = array<i64: 8, 128>}]} {
    %c0 = arith.constant 0 : index
    %c0_0 = arith.constant 0 : index
    %0 = vector.load %arg1[%c0, %c0_0] : memref<448x800xbf16, #tpu.memory_space<vmem>>, vector<448x800xbf16>
    %c0_1 = arith.constant 0 : index
    %c0_2 = arith.constant 0 : index
    %1 = vector.load %arg2[%c0_1, %c0_2] : memref<800x128xbf16, #tpu.memory_space<vmem>>, vector<800x128xbf16>
    %cst = arith.constant dense<0.000000e+00> : vector<448x128xf32>
    %2 = tpu.matmul %0, %1, %cst {dimension_numbers = #tpu.dot_dimension_numbers<[1], [0], [0], [1], [0, 0, 1, 1], [], []>} : vector<448x800xbf16>, vector<800x128xbf16>, vector<448x128xf32> -> vector<448x128xf32>
    %c0_3 = arith.constant 0 : index
    %c0_4 = arith.constant 0 : index
    %3 = vector.load %arg3[%c0_3, %c0_4] : memref<8x128xf32, #tpu.memory_space<vmem>>, vector<1x128xf32>
    %4 = vector.broadcast %3 : vector<1x128xf32> to vector<448x128xf32>
    %5 = arith.addf %2, %4 : vector<448x128xf32>
    %cst_5 = arith.constant 0.000000e+00 : f32
    %6 = vector.broadcast %cst_5 : f32 to vector<448x128xf32>
    %7 = arith.maximumf %5, %6 : vector<448x128xf32>
    %8 = arith.truncf %7 : vector<448x128xf32> to vector<448x128xbf16>
    %c0_6 = arith.constant 0 : index
    %c0_7 = arith.constant 0 : index
    %9 = vector.load %arg4[%c0_6, %c0_7] : memref<448x128xbf16, #tpu.memory_space<vmem>>, vector<448x128xbf16>
    tpu.vector_store %arg4[%c0_6, %c0_7], %8 {strides = array<i32>} : memref<448x128xbf16, #tpu.memory_space<vmem>>, vector<448x128xbf16>,
    %cst_8 = arith.constant 0.000000e+00 : f32
    %10 = vector.broadcast %cst_8 : f32 to vector<6x128xf32>
    %c1_i32 = arith.constant 1 : i32
    %11 = arith.cmpi slt, %arg0, %c1_i32 : i32
    %12 = arith.extui %11 : i1 to i32
    %c0_i32 = arith.constant 0 : i32
    %13 = arith.cmpi ne, %12, %c0_i32 : i32
    scf.if %13 {
      %cst_11 = arith.constant dense<0.000000e+00> : vector<128xf32>
      %17 = vector.multi_reduction <add>, %7, %cst_11 [0] : vector<448x128xf32> to vector<128xf32>
      %18 = vector.shape_cast %17 : vector<128xf32> to vector<1x128xf32>
      %19 = arith.mulf %7, %7 : vector<448x128xf32>
      %cst_12 = arith.constant dense<0.000000e+00> : vector<128xf32>
      %20 = vector.multi_reduction <add>, %19, %cst_12 [0] : vector<448x128xf32> to vector<128xf32>
      %21 = vector.shape_cast %20 : vector<128xf32> to vector<1x128xf32>
      %22 = tpu.concatenate %18, %21, %10 in 0 : vector<1x128xf32>, vector<1x128xf32>, vector<6x128xf32> -> vector<8x128xf32>
      %c0_13 = arith.constant 0 : index
      %c0_14 = arith.constant 0 : index
      %23 = vector.load %arg5[%c0_13, %c0_14] : memref<8x128xf32, #tpu.memory_space<vmem>>, vector<8x128xf32>
      tpu.vector_store %arg5[%c0_13, %c0_14], %22 {strides = array<i32>} : memref<8x128xf32, #tpu.memory_space<vmem>>, vector<8x128xf32>,
    } else {
    }
    %c1_i32_9 = arith.constant 1 : i32
    %14 = arith.cmpi eq, %arg0, %c1_i32_9 : i32
    %15 = arith.extui %14 : i1 to i32
    %c0_i32_10 = arith.constant 0 : i32
    %16 = arith.cmpi ne, %15, %c0_i32_10 : i32
    scf.if %16 {
      %17 = tpu.iota {dimensions = array<i32: 0>} : vector<448x1xi32>
      %c448_i32 = arith.constant 448 : i32
      %18 = arith.muli %arg0, %c448_i32 : i32
      %19 = vector.broadcast %18 : i32 to vector<448x1xi32>
      %20 = arith.addi %17, %19 : vector<448x1xi32>
      %c882_i32 = arith.constant 882 : i32
      %21 = vector.broadcast %c882_i32 : i32 to vector<448x1xi32>
      %22 = arith.cmpi slt, %20, %21 : vector<448x1xi32>
      %23 = arith.extui %22 : vector<448x1xi1> to vector<448x1xi32>
      %24 = arith.sitofp %23 : vector<448x1xi32> to vector<448x1xf32>
      %25 = vector.broadcast %24 : vector<448x1xf32> to vector<448x128xf32>
      %26 = arith.mulf %7, %25 : vector<448x128xf32>
      %cst_11 = arith.constant dense<0.000000e+00> : vector<128xf32>
      %27 = vector.multi_reduction <add>, %26, %cst_11 [0] : vector<448x128xf32> to vector<128xf32>
      %28 = vector.shape_cast %27 : vector<128xf32> to vector<1x128xf32>
      %29 = arith.mulf %26, %7 : vector<448x128xf32>
      %cst_12 = arith.constant dense<0.000000e+00> : vector<128xf32>
      %30 = vector.multi_reduction <add>, %29, %cst_12 [0] : vector<448x128xf32> to vector<128xf32>
      %31 = vector.shape_cast %30 : vector<128xf32> to vector<1x128xf32>
      %32 = tpu.concatenate %28, %31, %10 in 0 : vector<1x128xf32>, vector<1x128xf32>, vector<6x128xf32> -> vector<8x128xf32>
      %c0_13 = arith.constant 0 : index
      %c0_14 = arith.constant 0 : index
      %33 = vector.load %arg5[%c0_13, %c0_14] : memref<8x128xf32, #tpu.memory_space<vmem>>, vector<8x128xf32>
      tpu.vector_store %arg5[%c0_13, %c0_14], %32 {strides = array<i32>} : memref<8x128xf32, #tpu.memory_space<vmem>>, vector<8x128xf32>,
    } else {
    }
    return
  }
  func.func @transform_0(%arg0: i32) -> (i32, i32) {
    %c0_i32 = arith.constant 0 : i32
    %c0_i32_0 = arith.constant 0 : i32
    return %arg0, %c0_i32 : i32, i32
  }
  func.func @transform_1(%arg0: i32) -> (i32, i32) {
    %c0_i32 = arith.constant 0 : i32
    %c0_i32_0 = arith.constant 0 : i32
    %c0_i32_1 = arith.constant 0 : i32
    return %c0_i32, %c0_i32_0 : i32, i32
  }
  func.func @transform_2(%arg0: i32) -> (i32, i32) {
    %c0_i32 = arith.constant 0 : i32
    %c0_i32_0 = arith.constant 0 : i32
    %c0_i32_1 = arith.constant 0 : i32
    return %c0_i32, %c0_i32_0 : i32, i32
  }
  func.func @transform_3(%arg0: i32) -> (i32, i32) {
    %c0_i32 = arith.constant 0 : i32
    %c0_i32_0 = arith.constant 0 : i32
    return %arg0, %c0_i32 : i32, i32
  }
  func.func @transform_4(%arg0: i32) -> (i32, i32) {
    %c0_i32 = arith.constant 0 : i32
    %c0_i32_0 = arith.constant 0 : i32
    return %arg0, %c0_i32 : i32, i32
  }
}

module attributes {stable_mosaic.version = 11 : i64} {
  func.func @gemm_relu_stats_kernel(%arg0: i32, %arg1: memref<96x1600xbf16, #tpu.memory_space<vmem>>, %arg2: memref<1600x128xbf16, #tpu.memory_space<vmem>>, %arg3: memref<8x128xf32, #tpu.memory_space<vmem>>, %arg4: memref<96x128xbf16, #tpu.memory_space<vmem>>, %arg5: memref<8x128xf32, #tpu.memory_space<vmem>>) attributes {dimension_semantics = [#tpu.dimension_semantics<parallel>], iteration_bounds = array<i64: 2>, scalar_prefetch = 0 : i64, scratch_operands = 0 : i64, tpu.core_type = #tpu.core_type<tc>, window_params = [{transform_indices = @transform_0, window_bounds = array<i64: 96, 1600>}, {pipeline_mode = #tpu.pipeline_mode<synchronous>, transform_indices = @transform_1, window_bounds = array<i64: 1600, 128>}, {pipeline_mode = #tpu.pipeline_mode<synchronous>, transform_indices = @transform_2, window_bounds = array<i64: 8, 128>}, {transform_indices = @transform_3, window_bounds = array<i64: 96, 128>}, {transform_indices = @transform_4, window_bounds = array<i64: 8, 128>}]} {
    %c0 = arith.constant 0 : index
    %c0_0 = arith.constant 0 : index
    %0 = vector.load %arg1[%c0, %c0_0] : memref<96x1600xbf16, #tpu.memory_space<vmem>>, vector<96x1600xbf16>
    %c0_1 = arith.constant 0 : index
    %c0_2 = arith.constant 0 : index
    %1 = vector.load %arg2[%c0_1, %c0_2] : memref<1600x128xbf16, #tpu.memory_space<vmem>>, vector<1600x128xbf16>
    %cst = arith.constant dense<0.000000e+00> : vector<96x128xf32>
    %2 = tpu.matmul %0, %1, %cst {dimension_numbers = #tpu.dot_dimension_numbers<[1], [0], [0], [1], [0, 0, 1, 1], [], []>} : vector<96x1600xbf16>, vector<1600x128xbf16>, vector<96x128xf32> -> vector<96x128xf32>
    %c0_3 = arith.constant 0 : index
    %c0_4 = arith.constant 0 : index
    %3 = vector.load %arg3[%c0_3, %c0_4] : memref<8x128xf32, #tpu.memory_space<vmem>>, vector<1x128xf32>
    %4 = vector.broadcast %3 : vector<1x128xf32> to vector<96x128xf32>
    %5 = arith.addf %2, %4 : vector<96x128xf32>
    %cst_5 = arith.constant 0.000000e+00 : f32
    %6 = vector.broadcast %cst_5 : f32 to vector<96x128xf32>
    %7 = arith.maximumf %5, %6 : vector<96x128xf32>
    %8 = arith.truncf %7 : vector<96x128xf32> to vector<96x128xbf16>
    %c0_6 = arith.constant 0 : index
    %c0_7 = arith.constant 0 : index
    %9 = vector.load %arg4[%c0_6, %c0_7] : memref<96x128xbf16, #tpu.memory_space<vmem>>, vector<96x128xbf16>
    tpu.vector_store %arg4[%c0_6, %c0_7], %8 {strides = array<i32>} : memref<96x128xbf16, #tpu.memory_space<vmem>>, vector<96x128xbf16>,
    %cst_8 = arith.constant 0.000000e+00 : f32
    %10 = vector.broadcast %cst_8 : f32 to vector<6x128xf32>
    %c1_i32 = arith.constant 1 : i32
    %11 = arith.cmpi slt, %arg0, %c1_i32 : i32
    %12 = arith.extui %11 : i1 to i32
    %c0_i32 = arith.constant 0 : i32
    %13 = arith.cmpi ne, %12, %c0_i32 : i32
    scf.if %13 {
      %cst_11 = arith.constant dense<0.000000e+00> : vector<128xf32>
      %17 = vector.multi_reduction <add>, %7, %cst_11 [0] : vector<96x128xf32> to vector<128xf32>
      %18 = vector.shape_cast %17 : vector<128xf32> to vector<1x128xf32>
      %19 = arith.mulf %7, %7 : vector<96x128xf32>
      %cst_12 = arith.constant dense<0.000000e+00> : vector<128xf32>
      %20 = vector.multi_reduction <add>, %19, %cst_12 [0] : vector<96x128xf32> to vector<128xf32>
      %21 = vector.shape_cast %20 : vector<128xf32> to vector<1x128xf32>
      %22 = tpu.concatenate %18, %21, %10 in 0 : vector<1x128xf32>, vector<1x128xf32>, vector<6x128xf32> -> vector<8x128xf32>
      %c0_13 = arith.constant 0 : index
      %c0_14 = arith.constant 0 : index
      %23 = vector.load %arg5[%c0_13, %c0_14] : memref<8x128xf32, #tpu.memory_space<vmem>>, vector<8x128xf32>
      tpu.vector_store %arg5[%c0_13, %c0_14], %22 {strides = array<i32>} : memref<8x128xf32, #tpu.memory_space<vmem>>, vector<8x128xf32>,
    } else {
    }
    %c1_i32_9 = arith.constant 1 : i32
    %14 = arith.cmpi eq, %arg0, %c1_i32_9 : i32
    %15 = arith.extui %14 : i1 to i32
    %c0_i32_10 = arith.constant 0 : i32
    %16 = arith.cmpi ne, %15, %c0_i32_10 : i32
    scf.if %16 {
      %17 = tpu.iota {dimensions = array<i32: 0>} : vector<96x1xi32>
      %c96_i32 = arith.constant 96 : i32
      %18 = arith.muli %arg0, %c96_i32 : i32
      %19 = vector.broadcast %18 : i32 to vector<96x1xi32>
      %20 = arith.addi %17, %19 : vector<96x1xi32>
      %c162_i32 = arith.constant 162 : i32
      %21 = vector.broadcast %c162_i32 : i32 to vector<96x1xi32>
      %22 = arith.cmpi slt, %20, %21 : vector<96x1xi32>
      %23 = arith.extui %22 : vector<96x1xi1> to vector<96x1xi32>
      %24 = arith.sitofp %23 : vector<96x1xi32> to vector<96x1xf32>
      %25 = vector.broadcast %24 : vector<96x1xf32> to vector<96x128xf32>
      %26 = arith.mulf %7, %25 : vector<96x128xf32>
      %cst_11 = arith.constant dense<0.000000e+00> : vector<128xf32>
      %27 = vector.multi_reduction <add>, %26, %cst_11 [0] : vector<96x128xf32> to vector<128xf32>
      %28 = vector.shape_cast %27 : vector<128xf32> to vector<1x128xf32>
      %29 = arith.mulf %26, %7 : vector<96x128xf32>
      %cst_12 = arith.constant dense<0.000000e+00> : vector<128xf32>
      %30 = vector.multi_reduction <add>, %29, %cst_12 [0] : vector<96x128xf32> to vector<128xf32>
      %31 = vector.shape_cast %30 : vector<128xf32> to vector<1x128xf32>
      %32 = tpu.concatenate %28, %31, %10 in 0 : vector<1x128xf32>, vector<1x128xf32>, vector<6x128xf32> -> vector<8x128xf32>
      %c0_13 = arith.constant 0 : index
      %c0_14 = arith.constant 0 : index
      %33 = vector.load %arg5[%c0_13, %c0_14] : memref<8x128xf32, #tpu.memory_space<vmem>>, vector<8x128xf32>
      tpu.vector_store %arg5[%c0_13, %c0_14], %32 {strides = array<i32>} : memref<8x128xf32, #tpu.memory_space<vmem>>, vector<8x128xf32>,
    } else {
    }
    return
  }
  func.func @transform_0(%arg0: i32) -> (i32, i32) {
    %c0_i32 = arith.constant 0 : i32
    %c0_i32_0 = arith.constant 0 : i32
    return %arg0, %c0_i32 : i32, i32
  }
  func.func @transform_1(%arg0: i32) -> (i32, i32) {
    %c0_i32 = arith.constant 0 : i32
    %c0_i32_0 = arith.constant 0 : i32
    %c0_i32_1 = arith.constant 0 : i32
    return %c0_i32, %c0_i32_0 : i32, i32
  }
  func.func @transform_2(%arg0: i32) -> (i32, i32) {
    %c0_i32 = arith.constant 0 : i32
    %c0_i32_0 = arith.constant 0 : i32
    %c0_i32_1 = arith.constant 0 : i32
    return %c0_i32, %c0_i32_0 : i32, i32
  }
  func.func @transform_3(%arg0: i32) -> (i32, i32) {
    %c0_i32 = arith.constant 0 : i32
    %c0_i32_0 = arith.constant 0 : i32
    return %arg0, %c0_i32 : i32, i32
  }
  func.func @transform_4(%arg0: i32) -> (i32, i32) {
    %c0_i32 = arith.constant 0 : i32
    %c0_i32_0 = arith.constant 0 : i32
    return %arg0, %c0_i32 : i32, i32
  }
}

module attributes {stable_mosaic.version = 11 : i64} {
  func.func @gemm_relu_stats_kernel(%arg0: i32, %arg1: memref<16x1600xbf16, #tpu.memory_space<vmem>>, %arg2: memref<1600x128xbf16, #tpu.memory_space<vmem>>, %arg3: memref<8x128xf32, #tpu.memory_space<vmem>>, %arg4: memref<16x128xbf16, #tpu.memory_space<vmem>>, %arg5: memref<8x128xf32, #tpu.memory_space<vmem>>) attributes {dimension_semantics = [#tpu.dimension_semantics<parallel>], iteration_bounds = array<i64: 2>, scalar_prefetch = 0 : i64, scratch_operands = 0 : i64, tpu.core_type = #tpu.core_type<tc>, window_params = [{transform_indices = @transform_0, window_bounds = array<i64: 16, 1600>}, {pipeline_mode = #tpu.pipeline_mode<synchronous>, transform_indices = @transform_1, window_bounds = array<i64: 1600, 128>}, {pipeline_mode = #tpu.pipeline_mode<synchronous>, transform_indices = @transform_2, window_bounds = array<i64: 8, 128>}, {transform_indices = @transform_3, window_bounds = array<i64: 16, 128>}, {transform_indices = @transform_4, window_bounds = array<i64: 8, 128>}]} {
    %c0 = arith.constant 0 : index
    %c0_0 = arith.constant 0 : index
    %0 = vector.load %arg1[%c0, %c0_0] : memref<16x1600xbf16, #tpu.memory_space<vmem>>, vector<16x1600xbf16>
    %c0_1 = arith.constant 0 : index
    %c0_2 = arith.constant 0 : index
    %1 = vector.load %arg2[%c0_1, %c0_2] : memref<1600x128xbf16, #tpu.memory_space<vmem>>, vector<1600x128xbf16>
    %cst = arith.constant dense<0.000000e+00> : vector<16x128xf32>
    %2 = tpu.matmul %0, %1, %cst {dimension_numbers = #tpu.dot_dimension_numbers<[1], [0], [0], [1], [0, 0, 1, 1], [], []>} : vector<16x1600xbf16>, vector<1600x128xbf16>, vector<16x128xf32> -> vector<16x128xf32>
    %c0_3 = arith.constant 0 : index
    %c0_4 = arith.constant 0 : index
    %3 = vector.load %arg3[%c0_3, %c0_4] : memref<8x128xf32, #tpu.memory_space<vmem>>, vector<1x128xf32>
    %4 = vector.broadcast %3 : vector<1x128xf32> to vector<16x128xf32>
    %5 = arith.addf %2, %4 : vector<16x128xf32>
    %cst_5 = arith.constant 0.000000e+00 : f32
    %6 = vector.broadcast %cst_5 : f32 to vector<16x128xf32>
    %7 = arith.maximumf %5, %6 : vector<16x128xf32>
    %8 = arith.truncf %7 : vector<16x128xf32> to vector<16x128xbf16>
    %c0_6 = arith.constant 0 : index
    %c0_7 = arith.constant 0 : index
    %9 = vector.load %arg4[%c0_6, %c0_7] : memref<16x128xbf16, #tpu.memory_space<vmem>>, vector<16x128xbf16>
    tpu.vector_store %arg4[%c0_6, %c0_7], %8 {strides = array<i32>} : memref<16x128xbf16, #tpu.memory_space<vmem>>, vector<16x128xbf16>,
    %cst_8 = arith.constant 0.000000e+00 : f32
    %10 = vector.broadcast %cst_8 : f32 to vector<6x128xf32>
    %c1_i32 = arith.constant 1 : i32
    %11 = arith.cmpi slt, %arg0, %c1_i32 : i32
    %12 = arith.extui %11 : i1 to i32
    %c0_i32 = arith.constant 0 : i32
    %13 = arith.cmpi ne, %12, %c0_i32 : i32
    scf.if %13 {
      %cst_11 = arith.constant dense<0.000000e+00> : vector<128xf32>
      %17 = vector.multi_reduction <add>, %7, %cst_11 [0] : vector<16x128xf32> to vector<128xf32>
      %18 = vector.shape_cast %17 : vector<128xf32> to vector<1x128xf32>
      %19 = arith.mulf %7, %7 : vector<16x128xf32>
      %cst_12 = arith.constant dense<0.000000e+00> : vector<128xf32>
      %20 = vector.multi_reduction <add>, %19, %cst_12 [0] : vector<16x128xf32> to vector<128xf32>
      %21 = vector.shape_cast %20 : vector<128xf32> to vector<1x128xf32>
      %22 = tpu.concatenate %18, %21, %10 in 0 : vector<1x128xf32>, vector<1x128xf32>, vector<6x128xf32> -> vector<8x128xf32>
      %c0_13 = arith.constant 0 : index
      %c0_14 = arith.constant 0 : index
      %23 = vector.load %arg5[%c0_13, %c0_14] : memref<8x128xf32, #tpu.memory_space<vmem>>, vector<8x128xf32>
      tpu.vector_store %arg5[%c0_13, %c0_14], %22 {strides = array<i32>} : memref<8x128xf32, #tpu.memory_space<vmem>>, vector<8x128xf32>,
    } else {
    }
    %c1_i32_9 = arith.constant 1 : i32
    %14 = arith.cmpi eq, %arg0, %c1_i32_9 : i32
    %15 = arith.extui %14 : i1 to i32
    %c0_i32_10 = arith.constant 0 : i32
    %16 = arith.cmpi ne, %15, %c0_i32_10 : i32
    scf.if %16 {
      %17 = tpu.iota {dimensions = array<i32: 0>} : vector<16x1xi32>
      %c16_i32 = arith.constant 16 : i32
      %18 = arith.muli %arg0, %c16_i32 : i32
      %19 = vector.broadcast %18 : i32 to vector<16x1xi32>
      %20 = arith.addi %17, %19 : vector<16x1xi32>
      %c18_i32 = arith.constant 18 : i32
      %21 = vector.broadcast %c18_i32 : i32 to vector<16x1xi32>
      %22 = arith.cmpi slt, %20, %21 : vector<16x1xi32>
      %23 = arith.extui %22 : vector<16x1xi1> to vector<16x1xi32>
      %24 = arith.sitofp %23 : vector<16x1xi32> to vector<16x1xf32>
      %25 = vector.broadcast %24 : vector<16x1xf32> to vector<16x128xf32>
      %26 = arith.mulf %7, %25 : vector<16x128xf32>
      %cst_11 = arith.constant dense<0.000000e+00> : vector<128xf32>
      %27 = vector.multi_reduction <add>, %26, %cst_11 [0] : vector<16x128xf32> to vector<128xf32>
      %28 = vector.shape_cast %27 : vector<128xf32> to vector<1x128xf32>
      %29 = arith.mulf %26, %7 : vector<16x128xf32>
      %cst_12 = arith.constant dense<0.000000e+00> : vector<128xf32>
      %30 = vector.multi_reduction <add>, %29, %cst_12 [0] : vector<16x128xf32> to vector<128xf32>
      %31 = vector.shape_cast %30 : vector<128xf32> to vector<1x128xf32>
      %32 = tpu.concatenate %28, %31, %10 in 0 : vector<1x128xf32>, vector<1x128xf32>, vector<6x128xf32> -> vector<8x128xf32>
      %c0_13 = arith.constant 0 : index
      %c0_14 = arith.constant 0 : index
      %33 = vector.load %arg5[%c0_13, %c0_14] : memref<8x128xf32, #tpu.memory_space<vmem>>, vector<8x128xf32>
      tpu.vector_store %arg5[%c0_13, %c0_14], %32 {strides = array<i32>} : memref<8x128xf32, #tpu.memory_space<vmem>>, vector<8x128xf32>,
    } else {
    }
    return
  }
  func.func @transform_0(%arg0: i32) -> (i32, i32) {
    %c0_i32 = arith.constant 0 : i32
    %c0_i32_0 = arith.constant 0 : i32
    return %arg0, %c0_i32 : i32, i32
  }
  func.func @transform_1(%arg0: i32) -> (i32, i32) {
    %c0_i32 = arith.constant 0 : i32
    %c0_i32_0 = arith.constant 0 : i32
    %c0_i32_1 = arith.constant 0 : i32
    return %c0_i32, %c0_i32_0 : i32, i32
  }
  func.func @transform_2(%arg0: i32) -> (i32, i32) {
    %c0_i32 = arith.constant 0 : i32
    %c0_i32_0 = arith.constant 0 : i32
    %c0_i32_1 = arith.constant 0 : i32
    return %c0_i32, %c0_i32_0 : i32, i32
  }
  func.func @transform_3(%arg0: i32) -> (i32, i32) {
    %c0_i32 = arith.constant 0 : i32
    %c0_i32_0 = arith.constant 0 : i32
    return %arg0, %c0_i32 : i32, i32
  }
  func.func @transform_4(%arg0: i32) -> (i32, i32) {
    %c0_i32 = arith.constant 0 : i32
    %c0_i32_0 = arith.constant 0 : i32
    return %arg0, %c0_i32 : i32, i32
  }
}

module attributes {stable_mosaic.version = 11 : i64} {
  func.func @gemm_relu_stats_kernel(%arg0: i32, %arg1: memref<16x576xbf16, #tpu.memory_space<vmem>>, %arg2: memref<576x128xbf16, #tpu.memory_space<vmem>>, %arg3: memref<8x128xf32, #tpu.memory_space<vmem>>, %arg4: memref<16x128xbf16, #tpu.memory_space<vmem>>, %arg5: memref<8x128xf32, #tpu.memory_space<vmem>>) attributes {dimension_semantics = [#tpu.dimension_semantics<parallel>], iteration_bounds = array<i64: 1>, scalar_prefetch = 0 : i64, scratch_operands = 0 : i64, tpu.core_type = #tpu.core_type<tc>, window_params = [{transform_indices = @transform_0, window_bounds = array<i64: 16, 576>}, {pipeline_mode = #tpu.pipeline_mode<synchronous>, transform_indices = @transform_1, window_bounds = array<i64: 576, 128>}, {pipeline_mode = #tpu.pipeline_mode<synchronous>, transform_indices = @transform_2, window_bounds = array<i64: 8, 128>}, {transform_indices = @transform_3, window_bounds = array<i64: 16, 128>}, {transform_indices = @transform_4, window_bounds = array<i64: 8, 128>}]} {
    %c0 = arith.constant 0 : index
    %c0_0 = arith.constant 0 : index
    %0 = vector.load %arg1[%c0, %c0_0] : memref<16x576xbf16, #tpu.memory_space<vmem>>, vector<16x576xbf16>
    %c0_1 = arith.constant 0 : index
    %c0_2 = arith.constant 0 : index
    %1 = vector.load %arg2[%c0_1, %c0_2] : memref<576x128xbf16, #tpu.memory_space<vmem>>, vector<576x128xbf16>
    %cst = arith.constant dense<0.000000e+00> : vector<16x128xf32>
    %2 = tpu.matmul %0, %1, %cst {dimension_numbers = #tpu.dot_dimension_numbers<[1], [0], [0], [1], [0, 0, 1, 1], [], []>} : vector<16x576xbf16>, vector<576x128xbf16>, vector<16x128xf32> -> vector<16x128xf32>
    %c0_3 = arith.constant 0 : index
    %c0_4 = arith.constant 0 : index
    %3 = vector.load %arg3[%c0_3, %c0_4] : memref<8x128xf32, #tpu.memory_space<vmem>>, vector<1x128xf32>
    %4 = vector.broadcast %3 : vector<1x128xf32> to vector<16x128xf32>
    %5 = arith.addf %2, %4 : vector<16x128xf32>
    %cst_5 = arith.constant 0.000000e+00 : f32
    %6 = vector.broadcast %cst_5 : f32 to vector<16x128xf32>
    %7 = arith.maximumf %5, %6 : vector<16x128xf32>
    %8 = arith.truncf %7 : vector<16x128xf32> to vector<16x128xbf16>
    %c0_6 = arith.constant 0 : index
    %c0_7 = arith.constant 0 : index
    %9 = vector.load %arg4[%c0_6, %c0_7] : memref<16x128xbf16, #tpu.memory_space<vmem>>, vector<16x128xbf16>
    tpu.vector_store %arg4[%c0_6, %c0_7], %8 {strides = array<i32>} : memref<16x128xbf16, #tpu.memory_space<vmem>>, vector<16x128xbf16>,
    %cst_8 = arith.constant 0.000000e+00 : f32
    %10 = vector.broadcast %cst_8 : f32 to vector<6x128xf32>
    %c0_i32 = arith.constant 0 : i32
    %11 = arith.cmpi slt, %arg0, %c0_i32 : i32
    %12 = arith.extui %11 : i1 to i32
    %c0_i32_9 = arith.constant 0 : i32
    %13 = arith.cmpi ne, %12, %c0_i32_9 : i32
    scf.if %13 {
      %cst_12 = arith.constant dense<0.000000e+00> : vector<128xf32>
      %17 = vector.multi_reduction <add>, %7, %cst_12 [0] : vector<16x128xf32> to vector<128xf32>
      %18 = vector.shape_cast %17 : vector<128xf32> to vector<1x128xf32>
      %19 = arith.mulf %7, %7 : vector<16x128xf32>
      %cst_13 = arith.constant dense<0.000000e+00> : vector<128xf32>
      %20 = vector.multi_reduction <add>, %19, %cst_13 [0] : vector<16x128xf32> to vector<128xf32>
      %21 = vector.shape_cast %20 : vector<128xf32> to vector<1x128xf32>
      %22 = tpu.concatenate %18, %21, %10 in 0 : vector<1x128xf32>, vector<1x128xf32>, vector<6x128xf32> -> vector<8x128xf32>
      %c0_14 = arith.constant 0 : index
      %c0_15 = arith.constant 0 : index
      %23 = vector.load %arg5[%c0_14, %c0_15] : memref<8x128xf32, #tpu.memory_space<vmem>>, vector<8x128xf32>
      tpu.vector_store %arg5[%c0_14, %c0_15], %22 {strides = array<i32>} : memref<8x128xf32, #tpu.memory_space<vmem>>, vector<8x128xf32>,
    } else {
    }
    %c0_i32_10 = arith.constant 0 : i32
    %14 = arith.cmpi eq, %arg0, %c0_i32_10 : i32
    %15 = arith.extui %14 : i1 to i32
    %c0_i32_11 = arith.constant 0 : i32
    %16 = arith.cmpi ne, %15, %c0_i32_11 : i32
    scf.if %16 {
      %17 = tpu.iota {dimensions = array<i32: 0>} : vector<16x1xi32>
      %c16_i32 = arith.constant 16 : i32
      %18 = arith.muli %arg0, %c16_i32 : i32
      %19 = vector.broadcast %18 : i32 to vector<16x1xi32>
      %20 = arith.addi %17, %19 : vector<16x1xi32>
      %c2_i32 = arith.constant 2 : i32
      %21 = vector.broadcast %c2_i32 : i32 to vector<16x1xi32>
      %22 = arith.cmpi slt, %20, %21 : vector<16x1xi32>
      %23 = arith.extui %22 : vector<16x1xi1> to vector<16x1xi32>
      %24 = arith.sitofp %23 : vector<16x1xi32> to vector<16x1xf32>
      %25 = vector.broadcast %24 : vector<16x1xf32> to vector<16x128xf32>
      %26 = arith.mulf %7, %25 : vector<16x128xf32>
      %cst_12 = arith.constant dense<0.000000e+00> : vector<128xf32>
      %27 = vector.multi_reduction <add>, %26, %cst_12 [0] : vector<16x128xf32> to vector<128xf32>
      %28 = vector.shape_cast %27 : vector<128xf32> to vector<1x128xf32>
      %29 = arith.mulf %26, %7 : vector<16x128xf32>
      %cst_13 = arith.constant dense<0.000000e+00> : vector<128xf32>
      %30 = vector.multi_reduction <add>, %29, %cst_13 [0] : vector<16x128xf32> to vector<128xf32>
      %31 = vector.shape_cast %30 : vector<128xf32> to vector<1x128xf32>
      %32 = tpu.concatenate %28, %31, %10 in 0 : vector<1x128xf32>, vector<1x128xf32>, vector<6x128xf32> -> vector<8x128xf32>
      %c0_14 = arith.constant 0 : index
      %c0_15 = arith.constant 0 : index
      %33 = vector.load %arg5[%c0_14, %c0_15] : memref<8x128xf32, #tpu.memory_space<vmem>>, vector<8x128xf32>
      tpu.vector_store %arg5[%c0_14, %c0_15], %32 {strides = array<i32>} : memref<8x128xf32, #tpu.memory_space<vmem>>, vector<8x128xf32>,
    } else {
    }
    return
  }
  func.func @transform_0(%arg0: i32) -> (i32, i32) {
    %c0_i32 = arith.constant 0 : i32
    %c0_i32_0 = arith.constant 0 : i32
    return %arg0, %c0_i32 : i32, i32
  }
  func.func @transform_1(%arg0: i32) -> (i32, i32) {
    %c0_i32 = arith.constant 0 : i32
    %c0_i32_0 = arith.constant 0 : i32
    %c0_i32_1 = arith.constant 0 : i32
    return %c0_i32, %c0_i32_0 : i32, i32
  }
  func.func @transform_2(%arg0: i32) -> (i32, i32) {
    %c0_i32 = arith.constant 0 : i32
    %c0_i32_0 = arith.constant 0 : i32
    %c0_i32_1 = arith.constant 0 : i32
    return %c0_i32, %c0_i32_0 : i32, i32
  }
  func.func @transform_3(%arg0: i32) -> (i32, i32) {
    %c0_i32 = arith.constant 0 : i32
    %c0_i32_0 = arith.constant 0 : i32
    return %arg0, %c0_i32 : i32, i32
  }
  func.func @transform_4(%arg0: i32) -> (i32, i32) {
    %c0_i32 = arith.constant 0 : i32
    %c0_i32_0 = arith.constant 0 : i32
    return %arg0, %c0_i32 : i32, i32
  }
}

module attributes {stable_mosaic.version = 11 : i64} {
  func.func @linear_kernel(%arg0: memref<8x64xf32, #tpu.memory_space<vmem>>, %arg1: memref<64x128xf32, #tpu.memory_space<vmem>>, %arg2: memref<8x128xf32, #tpu.memory_space<vmem>>, %arg3: memref<8x128xf32, #tpu.memory_space<vmem>>) attributes {dimension_semantics = [], scalar_prefetch = 0 : i64, scratch_operands = 0 : i64, tpu.core_type = #tpu.core_type<tc>} {
    %c0 = arith.constant 0 : index
    %c0_0 = arith.constant 0 : index
    %0 = vector.load %arg0[%c0, %c0_0] : memref<8x64xf32, #tpu.memory_space<vmem>>, vector<8x64xf32>
    %c0_1 = arith.constant 0 : index
    %c0_2 = arith.constant 0 : index
    %1 = vector.load %arg1[%c0_1, %c0_2] : memref<64x128xf32, #tpu.memory_space<vmem>>, vector<64x128xf32>
    %cst = arith.constant dense<0.000000e+00> : vector<8x128xf32>
    %2 = tpu.matmul %0, %1, %cst {dimension_numbers = #tpu.dot_dimension_numbers<[1], [0], [0], [1], [0, 0, 1, 1], [], []>} : vector<8x64xf32>, vector<64x128xf32>, vector<8x128xf32> -> vector<8x128xf32>
    %c0_3 = arith.constant 0 : index
    %c0_4 = arith.constant 0 : index
    %3 = vector.load %arg2[%c0_3, %c0_4] : memref<8x128xf32, #tpu.memory_space<vmem>>, vector<1x128xf32>
    %4 = vector.broadcast %3 : vector<1x128xf32> to vector<8x128xf32>
    %5 = arith.addf %2, %4 : vector<8x128xf32>
    %c0_5 = arith.constant 0 : index
    %c0_6 = arith.constant 0 : index
    %6 = vector.load %arg3[%c0_5, %c0_6] : memref<8x128xf32, #tpu.memory_space<vmem>>, vector<8x128xf32>
    tpu.vector_store %arg3[%c0_5, %c0_6], %5 {strides = array<i32>} : memref<8x128xf32, #tpu.memory_space<vmem>>, vector<8x128xf32>,
    return
  }
}

</mosaic_0001>

<bundles_post_ra>
// kernel: encoder_forward.6
= control target key start
LH: loop header
LB: loop body
LE: loop exit
PB: predicated region body
PF: predicated region fallthrough
CT: control target
= control target key end

     0   :  { %s2780_s15 = smov 0   ;;  %s4006_s0 = inlined_call_operand.vmem [shape: bf16[4608,25], index: 0, kind: input, shape index: {}]   ;;  %s4007_s1 = inlined_call_operand.vmem [shape: bf16[25,128], index: 1, kind: input, shape index: {}]   ;;  %s4008_s2 = inlined_call_operand.vmem [shape: f32[8,128], index: 2, kind: input, shape index: {}]   ;;  %s4009_s3 = inlined_call_operand.vmem [shape: bf16[4608,128], index: 3, kind: output, shape index: {0}]   ;;  %s4010_s4 = inlined_call_operand.vmem [shape: f32[72,128], index: 4, kind: output, shape index: {1}]  }
   0x1 LB: > { %s2786_s16 = sadd.s32 4294967295, %s2751_s15   ;;  %p2134_p0 = scmp.ge.s32.totalorder %s2751_s15, 1  ;;  %s2751_s15 = sphi %s2780_s15, %s15_s15  }
   0x2   : > { %p166_p1 = scmp.lt.s32.totalorder %s2751_s15, 10 }
   0x4   : > { %p167_p2 = pnand %p2134_p0, %p166_p1 }
   0x6   : > { %170 = sbr.rel (%p167_p2) target bundleno = 655 (0x28f), region = 32 }
   0xd   : > { %p208_p3 = scmp.lt.s32.totalorder %s2786_s16, 8  ;;  %v2711_v0 = vld [vmem:[%s4007_s1] sm:$0xff]   ;;  %v2712_v1 = vld [vmem:[%s4007_s1 + $0x8] sm:$0x1f]   ;;  %vm554_vm0 = vcmask 1043456   ;;  %vm555_vm1 = vcmask 1044480  }
   0xe   : > { %2629 = vmatprep.subr.bf16.mxu0 %v2711_v0  ;;  %2697 = vmatprep.subr.bf16.mxu1 %v2711_v0  ;;  %v2753_v2 = vmov 65535   ;;  %s2135_s22 = sshll.u32 %s2786_s16, 6  ;;  %vm457_vm2 = vcmask 203776   ;;  %v2881_v38 = vld [vmem:[%s4008_s2] ss:$0 sm:$0xff]  ;;  %p2271_p5 = scmp.ge.s32.totalorder %s2786_s16, 8 }
   0xf   : > { %s209_s21 = scalar_select %p208_p3, %s2786_s16, 8  ;;  %2630 = vmatpush3.bf16.msra.mxu0 %v2711_v0  ;;  %2699 = vmatpush3.bf16.msra.mxu1 %v2711_v0  ;;  %v556_v3 = vsel %vm554_vm0, 4294967295, %v2753_v2 }
  0x10   : > { %v557_v4 = vsel %vm555_vm1, %v556_v3, 0  ;;  %p197_p4 = scmp.lt.s32.totalorder %s2135_s22, 575  ;;  %vm1440_vm3 = vcmask (!%p2271_p5), 1040384   ;;  %vm1442_vm4 = vcmask (!%p2271_p5), 1041408  }
  0x11   : > { %s2139_s23 = sshll.u32 %s209_s21, 3  ;;  %v559_v5 = vand.u32 %v2712_v1, %v557_v4 }
  0x12   : > { %s2802_s26 = scalar_lea.vmem %s4010_s4, %s2139_s23  ;;  %s4262_s22 = smov (!%p197_p4, %s2135_s22), 575 }
  0x13   : > { %2631 = vmatprep.subr.bf16.mxu0 %v559_v5  ;;  %2698 = vmatprep.subr.bf16.mxu1 %v559_v5  ;;  %s2136_s27 = sshll.u32 %s4262_s22, 2 }
  0x14   : > { %2632 = vmatpush3.bf16.msra.mxu0 %v559_v5  ;;  %2700 = vmatpush3.bf16.msra.mxu1 %v559_v5  ;;  %s2812_s30 = scalar_lea.vmem %s4006_s0, %s2136_s27  ;;  %s2904_s9 = scalar_lea.vmem %s4009_s3, %s2136_s27 }
  0x15   : > { %v2713_v6 = vld [vmem:[%s2812_s30] sm:$0xff]   ;;  %v2715_v8 = vld [vmem:[%s2812_s30 + $0x8] sm:$0xff]   ;;  %v2717_v10 = vld [vmem:[%s2812_s30 + $0x10] sm:$0xff]  }
  0x16   : > { %v2714_v7 = vld [vmem:[%s2812_s30 + $0x80] sm:$0xff]   ;;  %2633 = vmatprep.mubr.msk.bf16.mxu0 %vm457_vm2, %v2713_v6  ;;  %v2716_v9 = vld [vmem:[%s2812_s30 + $0x88] sm:$0xff]   ;;  %v2718_v11 = vld [vmem:[%s2812_s30 + $0x90] sm:$0xff]  }
  0x17   : > { %2665 = vmatprep.mubr.msk.bf16.mxu1 %vm457_vm2, %v2714_v7  ;;  %2634 = vmatmul.mubr.msk.bf16.vlgmr.msra.gmra.mrb[0].mxu0 %vm457_vm2, %v2715_v8  ;;  %v2719_v12 = vld [vmem:[%s2812_s30 + $0x18] sm:$0xff]   ;;  %v2721_v14 = vld [vmem:[%s2812_s30 + $0x20] sm:$0xff]   ;;  %v2723_v16 = vld [vmem:[%s2812_s30 + $0x28] sm:$0xff]  }
  0x18   : > { %2666 = vmatmul.mubr.msk.bf16.vlgmr.msra.gmra.mrb[0].mxu1 %vm457_vm2, %v2716_v9  ;;  %2637 = vmatprep.mubr.msk.bf16.mxu0 %vm457_vm2, %v2717_v10  ;;  %v2720_v13 = vld [vmem:[%s2812_s30 + $0x98] sm:$0xff]   ;;  %v2722_v15 = vld [vmem:[%s2812_s30 + $0xa0] sm:$0xff]   ;;  %v2724_v17 = vld [vmem:[%s2812_s30 + $0xa8] sm:$0xff]  }
  0x19   : > { %2669 = vmatprep.mubr.msk.bf16.mxu1 %vm457_vm2, %v2718_v11  ;;  %v2725_v18 = vld [vmem:[%s2812_s30 + $0x30] sm:$0xff]   ;;  %v2727_v20 = vld [vmem:[%s2812_s30 + $0x38] sm:$0xff]   ;;  %v2729_v22 = vld [vmem:[%s2812_s30 + $0x40] sm:$0xff]  }
  0x1a   : > { %v2726_v19 = vld [vmem:[%s2812_s30 + $0xb0] sm:$0xff]   ;;  %v2728_v21 = vld [vmem:[%s2812_s30 + $0xb8] sm:$0xff]   ;;  %v2730_v23 = vld [vmem:[%s2812_s30 + $0xc0] sm:$0xff]  }
  0x1b   : > { %v2731_v24 = vld [vmem:[%s2812_s30 + $0x48] sm:$0xff]   ;;  %v2733_v26 = vld [vmem:[%s2812_s30 + $0x50] sm:$0xff]   ;;  %v2735_v28 = vld [vmem:[%s2812_s30 + $0x58] sm:$0xff]  }
  0x1c   : > { %v2732_v25 = vld [vmem:[%s2812_s30 + $0xc8] sm:$0xff]   ;;  %v2734_v27 = vld [vmem:[%s2812_s30 + $0xd0] sm:$0xff]   ;;  %v2736_v29 = vld [vmem:[%s2812_s30 + $0xd8] sm:$0xff]  }
  0x1d   : > { %v2737_v30 = vld [vmem:[%s2812_s30 + $0x60] sm:$0xff]   ;;  %v2739_v32 = vld [vmem:[%s2812_s30 + $0x68] sm:$0xff]   ;;  %v2741_v34 = vld [vmem:[%s2812_s30 + $0x70] sm:$0xff]  }
  0x1e   : > { %v2738_v31 = vld [vmem:[%s2812_s30 + $0xe0] sm:$0xff]   ;;  %v2740_v33 = vld [vmem:[%s2812_s30 + $0xe8] sm:$0xff]   ;;  %v2742_v35 = vld [vmem:[%s2812_s30 + $0xf0] sm:$0xff]  }
  0x1f   : > { %2638 = vmatmul.mubr.msk.bf16.gmra.mrb[4].mxu0 %vm457_vm2, %v2719_v12  ;;  %v2743_v36 = vld [vmem:[%s2812_s30 + $0x78] sm:$0xff]  }
  0x20   : > { %2670 = vmatmul.mubr.msk.bf16.gmra.mrb[4].mxu1 %vm457_vm2, %v2720_v13  ;;  %2641 = vmatprep.mubr.msk.bf16.mxu0 %vm457_vm2, %v2721_v14  ;;  %v2744_v37 = vld [vmem:[%s2812_s30 + $0xf8] sm:$0xff]  }
  0x21   : > { %2673 = vmatprep.mubr.msk.bf16.mxu1 %vm457_vm2, %v2722_v15 }
  0x27   : > { %2642 = vmatmul.mubr.msk.bf16.gmra.mrb[8].mxu0 %vm457_vm2, %v2723_v16 }
  0x28   : > { %2674 = vmatmul.mubr.msk.bf16.gmra.mrb[8].mxu1 %vm457_vm2, %v2724_v17  ;;  %2645 = vmatprep.mubr.msk.bf16.mxu0 %vm457_vm2, %v2725_v18 }
  0x29   : > { %2677 = vmatprep.mubr.msk.bf16.mxu1 %vm457_vm2, %v2726_v19 }
  0x2f   : > { %2646 = vmatmul.mubr.msk.bf16.gmra.mrb[12].mxu0 %vm457_vm2, %v2727_v20 }
  0x30   : > { %2678 = vmatmul.mubr.msk.bf16.gmra.mrb[12].mxu1 %vm457_vm2, %v2728_v21  ;;  %2649 = vmatprep.mubr.msk.bf16.mxu0 %vm457_vm2, %v2729_v22 }
  0x31   : > { %2681 = vmatprep.mubr.msk.bf16.mxu1 %vm457_vm2, %v2730_v23 }
  0x37   : > { %2650 = vmatmul.mubr.msk.bf16.gmra.mrb[16].mxu0 %vm457_vm2, %v2731_v24 }
  0x38   : > { %2682 = vmatmul.mubr.msk.bf16.gmra.mrb[16].mxu1 %vm457_vm2, %v2732_v25  ;;  %2653 = vmatprep.mubr.msk.bf16.mxu0 %vm457_vm2, %v2733_v26 }
  0x39   : > { %2685 = vmatprep.mubr.msk.bf16.mxu1 %vm457_vm2, %v2734_v27 }
  0x3f   : > { %2654 = vmatmul.mubr.msk.bf16.gmra.mrb[20].mxu0 %vm457_vm2, %v2735_v28 }
  0x40   : > { %2686 = vmatmul.mubr.msk.bf16.gmra.mrb[20].mxu1 %vm457_vm2, %v2736_v29  ;;  %2657 = vmatprep.mubr.msk.bf16.mxu0 %vm457_vm2, %v2737_v30 }
  0x41   : > { %2689 = vmatprep.mubr.msk.bf16.mxu1 %vm457_vm2, %v2738_v31 }
  0x47   : > { %2658 = vmatmul.mubr.msk.bf16.gmra.mrb[24].mxu0 %vm457_vm2, %v2739_v32 }
  0x48   : > { %2690 = vmatmul.mubr.msk.bf16.gmra.mrb[24].mxu1 %vm457_vm2, %v2740_v33  ;;  %2661 = vmatprep.mubr.msk.bf16.mxu0 %vm457_vm2, %v2741_v34 }
  0x49   : > { %2693 = vmatprep.mubr.msk.bf16.mxu1 %vm457_vm2, %v2742_v35 }
  0x4f   : > { %2662 = vmatmul.mubr.msk.bf16.gmra.mrb[28].mxu0 %vm457_vm2, %v2743_v36 }
  0x50   : > { %2694 = vmatmul.mubr.msk.bf16.gmra.mrb[28].mxu1 %vm457_vm2, %v2744_v37 }
  0xea   : > { %v2635_v39 = vpop.f32.mrb[0].mxu0 }
  0xeb   : > { %v604_v40 = vadd.f32 %v2635_v39, %v2881_v38  ;;  %v2667_v41 = vpop.f32.mrb[0].mxu1  ;;  %v595_v42 = vpop.f32.mrb[1].mxu0 }
  0xec   : > { %v732_v43 = vadd.f32 %v2667_v41, %v2881_v38  ;;  %v596_v44 = vadd.f32 %v2881_v38, %v595_v42  ;;  %v723_v45 = vpop.f32.mrb[1].mxu1  ;;  %v2636_v46 = vpop.f32.mrb[2].mxu0 }
  0xed   : > { %v724_v47 = vadd.f32 %v2881_v38, %v723_v45  ;;  %v607_v48 = vadd.f32 %v2636_v46, %v2881_v38  ;;  %v2668_v49 = vpop.f32.mrb[2].mxu1  ;;  %v598_v50 = vpop.f32.mrb[3].mxu0  ;;  %v2890_v54 = vmax.f32 %v604_v40, 0.0 }
  0xee   : > { %v735_v51 = vadd.f32 %v2668_v49, %v2881_v38  ;;  %v599_v52 = vadd.f32 %v2881_v38, %v598_v50  ;;  %v726_v53 = vpop.f32.mrb[3].mxu1  ;;  %v2895_v57 = vmax.f32 %v732_v43, 0.0  ;;  %v2897_v58 = vmax.f32 %v596_v44, 0.0 }
  0xef   : > { %4105 = vst [vmem:[#allocation2_spill] sm:$0xff] %v2890_v54  ;;  %v2892_v55 = vmax.f32 %v607_v48, 0.0  ;;  %v727_v56 = vadd.f32 %v2881_v38, %v726_v53  ;;  %v2910_v61 = vmax.f32 %v724_v47, 0.0 }
  0xf0   : > { %4106 = vst [vmem:[#allocation3_spill] sm:$0xff] %v2895_v57  ;;  %4107 = vst [vmem:[#allocation4_spill] sm:$0xff] %v2897_v58  ;;  %v2906_v59 = vmax.f32 %v735_v51, 0.0  ;;  %v2908_v60 = vmax.f32 %v599_v52, 0.0 }
  0xf1   : > { %4110 = vst [vmem:[#allocation7_spill] sm:$0xff] %v2910_v61  ;;  %v2412_v62 = vpack.c.bf16 %v2892_v55, %v2890_v54  ;;  %v2914_v63 = vmax.f32 %v727_v56, 0.0 }
  0xf2   : > { %4108 = vst [vmem:[#allocation5_spill] sm:$0xff] %v2906_v59  ;;  %4109 = vst [vmem:[#allocation6_spill] sm:$0xff] %v2908_v60  ;;  %v2492_v0 = vpack.c.bf16 %v2906_v59, %v2895_v57  ;;  %v2407_v1 = vpack.c.bf16 %v2908_v60, %v2897_v58  ;;  %v2639_v2 = vpop.f32.mrb[4].mxu0 }
  0xf3   : > { %4111 = vst [vmem:[#allocation8_spill] sm:$0xff] %v2914_v63  ;;  %2564 = vst [vmem:[%s2904_s9 + $0x8] sm:$0xff] %v2412_v62   ;;  %v2487_v3 = vpack.c.bf16 %v2914_v63, %v2910_v61  ;;  %v620_v4 = vadd.f32 %v2639_v2, %v2881_v38  ;;  %v2671_v5 = vpop.f32.mrb[4].mxu1  ;;  %v611_v6 = vpop.f32.mrb[5].mxu0 }
  0xf4   : > { %2580 = vst [vmem:[%s2904_s9 + $0x88] sm:$0xff] %v2492_v0   ;;  %2408 = vst [vmem:[%s2904_s9] sm:$0xff] %v2407_v1   ;;  %v748_v7 = vadd.f32 %v2671_v5, %v2881_v38  ;;  %v612_v8 = vadd.f32 %v2881_v38, %v611_v6  ;;  %v739_v9 = vpop.f32.mrb[5].mxu1  ;;  %v2640_v10 = vpop.f32.mrb[6].mxu0 }
  0xf5   : > { %2579 = vst [vmem:[%s2904_s9 + $0x80] sm:$0xff] %v2487_v3   ;;  %v740_v11 = vadd.f32 %v2881_v38, %v739_v9  ;;  %v623_v12 = vadd.f32 %v2640_v10, %v2881_v38  ;;  %v2672_v13 = vpop.f32.mrb[6].mxu1  ;;  %v614_v14 = vpop.f32.mrb[7].mxu0  ;;  %v2933_v18 = vmax.f32 %v620_v4, 0.0 }
  0xf6   : > { %v751_v15 = vadd.f32 %v2672_v13, %v2881_v38  ;;  %v615_v16 = vadd.f32 %v2881_v38, %v614_v14  ;;  %v742_v17 = vpop.f32.mrb[7].mxu1  ;;  %v2938_v21 = vmax.f32 %v748_v7, 0.0  ;;  %v2940_v22 = vmax.f32 %v612_v8, 0.0 }
  0xf7   : > { %v2935_v19 = vmax.f32 %v623_v12, 0.0  ;;  %v743_v20 = vadd.f32 %v2881_v38, %v742_v17  ;;  %v2946_v25 = vmax.f32 %v740_v11, 0.0 }
  0xf8   : > { %4112 = vst [vmem:[#allocation9_spill] sm:$0xff] %v2938_v21  ;;  %v2942_v23 = vmax.f32 %v751_v15, 0.0  ;;  %v2944_v24 = vmax.f32 %v615_v16, 0.0 }
  0xf9   : > { %4114 = vst [vmem:[#allocation11_spill] sm:$0xff] %v2946_v25  ;;  %v2422_v26 = vpack.c.bf16 %v2935_v19, %v2933_v18  ;;  %v2950_v27 = vmax.f32 %v743_v20, 0.0 }
  0xfa   : > { %4113 = vst [vmem:[#allocation10_spill] sm:$0xff] %v2942_v23  ;;  %v2502_v28 = vpack.c.bf16 %v2942_v23, %v2938_v21  ;;  %v2417_v29 = vpack.c.bf16 %v2944_v24, %v2940_v22  ;;  %v2643_v30 = vpop.f32.mrb[8].mxu0 }
  0xfb   : > { %4115 = vst [vmem:[#allocation12_spill] sm:$0xff] %v2950_v27  ;;  %2566 = vst [vmem:[%s2904_s9 + $0x18] sm:$0xff] %v2422_v26   ;;  %v2497_v31 = vpack.c.bf16 %v2950_v27, %v2946_v25  ;;  %v636_v32 = vadd.f32 %v2643_v30, %v2881_v38  ;;  %v2675_v33 = vpop.f32.mrb[8].mxu1  ;;  %v627_v34 = vpop.f32.mrb[9].mxu0 }
  0xfc   : > { %2582 = vst [vmem:[%s2904_s9 + $0x98] sm:$0xff] %v2502_v28   ;;  %2565 = vst [vmem:[%s2904_s9 + $0x10] sm:$0xff] %v2417_v29   ;;  %v764_v35 = vadd.f32 %v2675_v33, %v2881_v38  ;;  %v628_v36 = vadd.f32 %v2881_v38, %v627_v34  ;;  %v755_v37 = vpop.f32.mrb[9].mxu1  ;;  %v2644_v39 = vpop.f32.mrb[10].mxu0 }
  0xfd   : > { %2581 = vst [vmem:[%s2904_s9 + $0x90] sm:$0xff] %v2497_v31   ;;  %v756_v40 = vadd.f32 %v2881_v38, %v755_v37  ;;  %v639_v41 = vadd.f32 %v2644_v39, %v2881_v38  ;;  %v2676_v42 = vpop.f32.mrb[10].mxu1  ;;  %v630_v43 = vpop.f32.mrb[11].mxu0  ;;  %v2969_v47 = vmax.f32 %v636_v32, 0.0 }
  0xfe   : > { %v767_v44 = vadd.f32 %v2676_v42, %v2881_v38  ;;  %v631_v45 = vadd.f32 %v2881_v38, %v630_v43  ;;  %v758_v46 = vpop.f32.mrb[11].mxu1  ;;  %v2974_v50 = vmax.f32 %v764_v35, 0.0  ;;  %v2976_v51 = vmax.f32 %v628_v36, 0.0 }
  0xff   : > { %v2971_v48 = vmax.f32 %v639_v41, 0.0  ;;  %v759_v49 = vadd.f32 %v2881_v38, %v758_v46  ;;  %v2982_v56 = vmax.f32 %v756_v40, 0.0 }
 0x100   : > { %4116 = vst [vmem:[#allocation13_spill] sm:$0xff] %v2974_v50  ;;  %v2978_v52 = vmax.f32 %v767_v44, 0.0  ;;  %v2980_v53 = vmax.f32 %v631_v45, 0.0 }
 0x101   : > { %4118 = vst [vmem:[#allocation15_spill] sm:$0xff] %v2982_v56  ;;  %v2432_v62 = vpack.c.bf16 %v2971_v48, %v2969_v47  ;;  %v2986_v0 = vmax.f32 %v759_v49, 0.0 }
 0x102   : > { %4117 = vst [vmem:[#allocation14_spill] sm:$0xff] %v2978_v52  ;;  %v2512_v1 = vpack.c.bf16 %v2978_v52, %v2974_v50  ;;  %v2427_v2 = vpack.c.bf16 %v2980_v53, %v2976_v51  ;;  %v2647_v3 = vpop.f32.mrb[12].mxu0 }
 0x103   : > { %4119 = vst [vmem:[#allocation16_spill] sm:$0xff] %v2986_v0  ;;  %2568 = vst [vmem:[%s2904_s9 + $0x28] sm:$0xff] %v2432_v62   ;;  %v2507_v4 = vpack.c.bf16 %v2986_v0, %v2982_v56  ;;  %v652_v5 = vadd.f32 %v2647_v3, %v2881_v38  ;;  %v2679_v6 = vpop.f32.mrb[12].mxu1  ;;  %v643_v7 = vpop.f32.mrb[13].mxu0 }
 0x104   : > { %2584 = vst [vmem:[%s2904_s9 + $0xa8] sm:$0xff] %v2512_v1   ;;  %2567 = vst [vmem:[%s2904_s9 + $0x20] sm:$0xff] %v2427_v2   ;;  %v780_v8 = vadd.f32 %v2679_v6, %v2881_v38  ;;  %v644_v9 = vadd.f32 %v2881_v38, %v643_v7  ;;  %v771_v10 = vpop.f32.mrb[13].mxu1  ;;  %v2648_v11 = vpop.f32.mrb[14].mxu0 }
 0x105   : > { %2583 = vst [vmem:[%s2904_s9 + $0xa0] sm:$0xff] %v2507_v4   ;;  %v772_v12 = vadd.f32 %v2881_v38, %v771_v10  ;;  %v655_v13 = vadd.f32 %v2648_v11, %v2881_v38  ;;  %v2680_v14 = vpop.f32.mrb[14].mxu1  ;;  %v646_v15 = vpop.f32.mrb[15].mxu0  ;;  %v3005_v26 = vmax.f32 %v652_v5, 0.0 }
 0x106   : > { %v783_v16 = vadd.f32 %v2680_v14, %v2881_v38  ;;  %v647_v17 = vadd.f32 %v2881_v38, %v646_v15  ;;  %v774_v20 = vpop.f32.mrb[15].mxu1  ;;  %v3010_v30 = vmax.f32 %v780_v8, 0.0  ;;  %v3012_v31 = vmax.f32 %v644_v9, 0.0 }
 0x107   : > { %v3007_v28 = vmax.f32 %v655_v13, 0.0  ;;  %v775_v29 = vadd.f32 %v2881_v38, %v774_v20  ;;  %v3018_v34 = vmax.f32 %v772_v12, 0.0 }
 0x108   : > { %4120 = vst [vmem:[#allocation17_spill] sm:$0xff] %v3010_v30  ;;  %v3014_v32 = vmax.f32 %v783_v16, 0.0  ;;  %v3016_v33 = vmax.f32 %v647_v17, 0.0 }
 0x109   : > { %4122 = vst [vmem:[#allocation19_spill] sm:$0xff] %v3018_v34  ;;  %v2442_v35 = vpack.c.bf16 %v3007_v28, %v3005_v26  ;;  %v3022_v36 = vmax.f32 %v775_v29, 0.0 }
 0x10a   : > { %4121 = vst [vmem:[#allocation18_spill] sm:$0xff] %v3014_v32  ;;  %v2522_v37 = vpack.c.bf16 %v3014_v32, %v3010_v30  ;;  %v2437_v39 = vpack.c.bf16 %v3016_v33, %v3012_v31  ;;  %v2651_v40 = vpop.f32.mrb[16].mxu0 }
 0x10b   : > { %4123 = vst [vmem:[#allocation20_spill] sm:$0xff] %v3022_v36  ;;  %2570 = vst [vmem:[%s2904_s9 + $0x38] sm:$0xff] %v2442_v35   ;;  %v2517_v41 = vpack.c.bf16 %v3022_v36, %v3018_v34  ;;  %v668_v42 = vadd.f32 %v2651_v40, %v2881_v38  ;;  %v2683_v43 = vpop.f32.mrb[16].mxu1  ;;  %v659_v44 = vpop.f32.mrb[17].mxu0 }
 0x10c   : > { %2586 = vst [vmem:[%s2904_s9 + $0xb8] sm:$0xff] %v2522_v37   ;;  %2569 = vst [vmem:[%s2904_s9 + $0x30] sm:$0xff] %v2437_v39   ;;  %v796_v45 = vadd.f32 %v2683_v43, %v2881_v38  ;;  %v660_v46 = vadd.f32 %v2881_v38, %v659_v44  ;;  %v787_v49 = vpop.f32.mrb[17].mxu1  ;;  %v2652_v62 = vpop.f32.mrb[18].mxu0 }
 0x10d   : > { %2585 = vst [vmem:[%s2904_s9 + $0xb0] sm:$0xff] %v2517_v41   ;;  %v788_v1 = vadd.f32 %v2881_v38, %v787_v49  ;;  %v671_v2 = vadd.f32 %v2652_v62, %v2881_v38  ;;  %v2684_v3 = vpop.f32.mrb[18].mxu1  ;;  %v662_v4 = vpop.f32.mrb[19].mxu0  ;;  %v3041_v8 = vmax.f32 %v668_v42, 0.0 }
 0x10e   : > { %v799_v5 = vadd.f32 %v2684_v3, %v2881_v38  ;;  %v663_v6 = vadd.f32 %v2881_v38, %v662_v4  ;;  %v790_v7 = vpop.f32.mrb[19].mxu1  ;;  %v3046_v11 = vmax.f32 %v796_v45, 0.0  ;;  %v3048_v12 = vmax.f32 %v660_v46, 0.0 }
 0x10f   : > { %v3043_v9 = vmax.f32 %v671_v2, 0.0  ;;  %v791_v10 = vadd.f32 %v2881_v38, %v790_v7  ;;  %v3054_v15 = vmax.f32 %v788_v1, 0.0 }
 0x110   : > { %4124 = vst [vmem:[#allocation21_spill] sm:$0xff] %v3046_v11  ;;  %v3050_v13 = vmax.f32 %v799_v5, 0.0  ;;  %v3052_v14 = vmax.f32 %v663_v6, 0.0 }
 0x111   : > { %4126 = vst [vmem:[#allocation23_spill] sm:$0xff] %v3054_v15  ;;  %v2452_v16 = vpack.c.bf16 %v3043_v9, %v3041_v8  ;;  %v3058_v17 = vmax.f32 %v791_v10, 0.0 }
 0x112   : > { %4125 = vst [vmem:[#allocation22_spill] sm:$0xff] %v3050_v13  ;;  %v2532_v20 = vpack.c.bf16 %v3050_v13, %v3046_v11  ;;  %v2447_v29 = vpack.c.bf16 %v3052_v14, %v3048_v12  ;;  %v2655_v35 = vpop.f32.mrb[20].mxu0 }
 0x113   : > { %4127 = vst [vmem:[#allocation24_spill] sm:$0xff] %v3058_v17  ;;  %2572 = vst [vmem:[%s2904_s9 + $0x48] sm:$0xff] %v2452_v16   ;;  %v2527_v37 = vpack.c.bf16 %v3058_v17, %v3054_v15  ;;  %v684_v39 = vadd.f32 %v2655_v35, %v2881_v38  ;;  %v2687_v40 = vpop.f32.mrb[20].mxu1  ;;  %v675_v41 = vpop.f32.mrb[21].mxu0 }
 0x114   : > { %2588 = vst [vmem:[%s2904_s9 + $0xc8] sm:$0xff] %v2532_v20   ;;  %2571 = vst [vmem:[%s2904_s9 + $0x40] sm:$0xff] %v2447_v29   ;;  %v812_v42 = vadd.f32 %v2687_v40, %v2881_v38  ;;  %v676_v43 = vadd.f32 %v2881_v38, %v675_v41  ;;  %v803_v44 = vpop.f32.mrb[21].mxu1  ;;  %v2656_v45 = vpop.f32.mrb[22].mxu0 }
 0x115   : > { %2587 = vst [vmem:[%s2904_s9 + $0xc0] sm:$0xff] %v2527_v37   ;;  %v804_v46 = vadd.f32 %v2881_v38, %v803_v44  ;;  %v687_v49 = vadd.f32 %v2656_v45, %v2881_v38  ;;  %v2688_v62 = vpop.f32.mrb[22].mxu1  ;;  %v678_v1 = vpop.f32.mrb[23].mxu0  ;;  %v3077_v5 = vmax.f32 %v684_v39, 0.0 }
 0x116   : > { %v815_v2 = vadd.f32 %v2688_v62, %v2881_v38  ;;  %v679_v3 = vadd.f32 %v2881_v38, %v678_v1  ;;  %v806_v4 = vpop.f32.mrb[23].mxu1  ;;  %v3082_v10 = vmax.f32 %v812_v42, 0.0  ;;  %v3084_v16 = vmax.f32 %v676_v43, 0.0 }
 0x117   : > { %v3079_v6 = vmax.f32 %v687_v49, 0.0  ;;  %v807_v7 = vadd.f32 %v2881_v38, %v806_v4  ;;  %v3090_v35 = vmax.f32 %v804_v46, 0.0 }
 0x118   : > { %4128 = vst [vmem:[#allocation25_spill] sm:$0xff] %v3082_v10  ;;  %v3086_v20 = vmax.f32 %v815_v2, 0.0  ;;  %v3088_v29 = vmax.f32 %v679_v3, 0.0 }
 0x119   : > { %4130 = vst [vmem:[#allocation27_spill] sm:$0xff] %v3090_v35  ;;  %v2462_v37 = vpack.c.bf16 %v3079_v6, %v3077_v5  ;;  %v3094_v39 = vmax.f32 %v807_v7, 0.0 }
 0x11a   : > { %4129 = vst [vmem:[#allocation26_spill] sm:$0xff] %v3086_v20  ;;  %v2542_v40 = vpack.c.bf16 %v3086_v20, %v3082_v10  ;;  %v2457_v41 = vpack.c.bf16 %v3088_v29, %v3084_v16  ;;  %v2659_v42 = vpop.f32.mrb[24].mxu0 }
 0x11b   : > { %4131 = vst [vmem:[#allocation28_spill] sm:$0xff] %v3094_v39  ;;  %2574 = vst [vmem:[%s2904_s9 + $0x58] sm:$0xff] %v2462_v37   ;;  %v2537_v43 = vpack.c.bf16 %v3094_v39, %v3090_v35  ;;  %v700_v44 = vadd.f32 %v2659_v42, %v2881_v38  ;;  %v2691_v45 = vpop.f32.mrb[24].mxu1  ;;  %v691_v46 = vpop.f32.mrb[25].mxu0 }
 0x11c   : > { %2590 = vst [vmem:[%s2904_s9 + $0xd8] sm:$0xff] %v2542_v40   ;;  %2573 = vst [vmem:[%s2904_s9 + $0x50] sm:$0xff] %v2457_v41   ;;  %v828_v49 = vadd.f32 %v2691_v45, %v2881_v38  ;;  %v692_v62 = vadd.f32 %v2881_v38, %v691_v46  ;;  %v819_v1 = vpop.f32.mrb[25].mxu1  ;;  %v2660_v2 = vpop.f32.mrb[26].mxu0 }
 0x11d   : > { %2589 = vst [vmem:[%s2904_s9 + $0xd0] sm:$0xff] %v2537_v43   ;;  %v820_v3 = vadd.f32 %v2881_v38, %v819_v1  ;;  %v703_v4 = vadd.f32 %v2660_v2, %v2881_v38  ;;  %v2692_v7 = vpop.f32.mrb[26].mxu1  ;;  %v694_v37 = vpop.f32.mrb[27].mxu0  ;;  %v3113_v41 = vmax.f32 %v700_v44, 0.0 }
 0x11e   : > { %v831_v20 = vadd.f32 %v2692_v7, %v2881_v38  ;;  %v695_v42 = vadd.f32 %v2881_v38, %v694_v37  ;;  %v822_v40 = vpop.f32.mrb[27].mxu1  ;;  %v3118_v43 = vmax.f32 %v828_v49, 0.0  ;;  %v3120_v1 = vmax.f32 %v692_v62, 0.0 }
 0x11f   : > { %v3115_v45 = vmax.f32 %v703_v4, 0.0  ;;  %v823_v46 = vadd.f32 %v2881_v38, %v822_v40  ;;  %v3126_v7 = vmax.f32 %v820_v3, 0.0 }
 0x120   : > { %4133 = vst [vmem:[#allocation30_spill] sm:$0xff] %v3118_v43  ;;  %v3122_v2 = vmax.f32 %v831_v20, 0.0  ;;  %v3124_v10 = vmax.f32 %v695_v42, 0.0 }
 0x121   : > { %4132 = vst [vmem:[#allocation29_spill] sm:$0xff] %v3115_v45  ;;  %4135 = vst [vmem:[#allocation32_spill] sm:$0xff] %v3126_v7  ;;  %v2472_v44 = vpack.c.bf16 %v3115_v45, %v3113_v41  ;;  %v3130_v4 = vmax.f32 %v823_v46, 0.0 }
 0x122   : > { %4134 = vst [vmem:[#allocation31_spill] sm:$0xff] %v3122_v2  ;;  %v2552_v37 = vpack.c.bf16 %v3122_v2, %v3118_v43  ;;  %v2467_v49 = vpack.c.bf16 %v3124_v10, %v3120_v1  ;;  %v2663_v62 = vpop.f32.mrb[28].mxu0 }
 0x123   : > { %4136 = vst [vmem:[#allocation33_spill] sm:$0xff] %v3130_v4  ;;  %2576 = vst [vmem:[%s2904_s9 + $0x68] sm:$0xff] %v2472_v44   ;;  %v2547_v20 = vpack.c.bf16 %v3130_v4, %v3126_v7  ;;  %v716_v3 = vadd.f32 %v2663_v62, %v2881_v38  ;;  %v2695_v42 = vpop.f32.mrb[28].mxu1  ;;  %v707_v40 = vpop.f32.mrb[29].mxu0 }
 0x124   : > { %2592 = vst [vmem:[%s2904_s9 + $0xe8] sm:$0xff] %v2552_v37   ;;  %2575 = vst [vmem:[%s2904_s9 + $0x60] sm:$0xff] %v2467_v49   ;;  %v844_v46 = vadd.f32 %v2695_v42, %v2881_v38  ;;  %v708_v39 = vadd.f32 %v2881_v38, %v707_v40  ;;  %v835_v35 = vpop.f32.mrb[29].mxu1  ;;  %v2664_v2 = vpop.f32.mrb[30].mxu0 }
 0x125   : > { %2591 = vst [vmem:[%s2904_s9 + $0xe0] sm:$0xff] %v2547_v20   ;;  %v836_v43 = vadd.f32 %v2881_v38, %v835_v35  ;;  %v719_v44 = vadd.f32 %v2664_v2, %v2881_v38  ;;  %v2696_v13 = vpop.f32.mrb[30].mxu1  ;;  %v710_v11 = vpop.f32.mrb[31].mxu0  ;;  %v3149_v49 = vmax.f32 %v716_v3, 0.0 }
 0x126   : > { %v847_v62 = vadd.f32 %v2696_v13, %v2881_v38  ;;  %v711_v4 = vadd.f32 %v2881_v38, %v710_v11  ;;  %v838_v37 = vpop.f32.mrb[31].mxu1  ;;  %v3154_v35 = vmax.f32 %v844_v46, 0.0  ;;  %v3156_v2 = vmax.f32 %v708_v39, 0.0 }
 0x127   : > { %4137 = vst [vmem:[#allocation34_spill] sm:$0xff] %v3149_v49  ;;  %v3151_v42 = vmax.f32 %v719_v44, 0.0  ;;  %v839_v20 = vadd.f32 %v2881_v38, %v838_v37  ;;  %v3162_v13 = vmax.f32 %v836_v43, 0.0  ;;  %1237 = sbr.rel (%p2271_p5) target bundleno = 448 (0x1c0), region = 36  ;;  %v1238_v43 = vadd.f32 (!%p2271_p5), %v2908_v60, %v2897_v58 }
 0x128   : > { %4139 = vst [vmem:[#allocation36_spill] sm:$0xff] %v3154_v35  ;;  %4140 = vst [vmem:[#allocation37_spill] sm:$0xff] %v3156_v2  ;;  %v3158_v40 = vmax.f32 %v847_v62, 0.0  ;;  %v3160_v7 = vmax.f32 %v711_v4, 0.0 }
 0x129   : > { %4138 = vst [vmem:[#allocation35_spill] sm:$0xff] %v3151_v42  ;;  %4143 = vst [vmem:[#allocation40_spill] sm:$0xff] %v3162_v13  ;;  %v2482_v11 = vpack.c.bf16 %v3151_v42, %v3149_v49  ;;  %v3166_v3 = vmax.f32 %v839_v20, 0.0  ;;  %v1239_v4 = vadd.f32 (!%p2271_p5), %v1238_v43, %v2890_v54 }
 0x12a   : > { %4141 = vst [vmem:[#allocation38_spill] sm:$0xff] %v3158_v40  ;;  %4142 = vst [vmem:[#allocation39_spill] sm:$0xff] %v3160_v7  ;;  %v2562_v44 = vpack.c.bf16 %v3158_v40, %v3154_v35  ;;  %v2477_v38 = vpack.c.bf16 %v3160_v7, %v3156_v2 }
 0x12b   : > { %4144 = vst [vmem:[#allocation41_spill] sm:$0xff] %v3166_v3  ;;  %2578 = vst [vmem:[%s2904_s9 + $0x78] sm:$0xff] %v2482_v11   ;;  %v2557_v39 = vpack.c.bf16 %v3166_v3, %v3162_v13  ;;  %v1240_v46 = vadd.f32 (!%p2271_p5), %v1239_v4, %v2892_v55  ;;  %v1309_v4 = vmul.f32 (!%p2271_p5), %v2890_v54, %v2890_v54 }
 0x12c   : > { %2594 = vst [vmem:[%s2904_s9 + $0xf8] sm:$0xff] %v2562_v44   ;;  %2577 = vst [vmem:[%s2904_s9 + $0x70] sm:$0xff] %v2477_v38   ;;  %v1307_v38 = vmul.f32 (!%p2271_p5), %v2897_v58, %v2897_v58 }
 0x12d   : > { %2593 = vst [vmem:[%s2904_s9 + $0xf0] sm:$0xff] %v2557_v39   ;;  %v1241_v62 = vadd.f32 (!%p2271_p5), %v1240_v46, %v2940_v22  ;;  %v1308_v39 = vmul.f32 (!%p2271_p5), %v2908_v60, %v2908_v60 }
 0x12f   : > { %v1242_v37 = vadd.f32 %v1241_v62, %v2944_v24  ;;  %v1310_v62 = vmul.f32 %v2892_v55, %v2892_v55 }
 0x131   : > { %v1243_v20 = vadd.f32 %v1242_v37, %v2933_v18  ;;  %v1371_v37 = vadd.f32 %v1308_v39, %v1307_v38  ;;  %v1314_v39 = vmul.f32 %v2935_v19, %v2935_v19 }
 0x133   : > { %v1244_v11 = vadd.f32 %v1243_v20, %v2935_v19  ;;  %v1372_v58 = vadd.f32 %v1371_v37, %v1309_v4  ;;  %v1315_v37 = vmul.f32 %v2976_v51, %v2976_v51 }
 0x135   : > { %v1245_v44 = vadd.f32 %v1244_v11, %v2976_v51  ;;  %v1311_v11 = vmul.f32 %v2940_v22, %v2940_v22  ;;  %v1373_v60 = vadd.f32 %v1372_v58, %v1310_v62 }
 0x137   : > { %v1246_v43 = vadd.f32 %v1245_v44, %v2980_v53  ;;  %v1312_v44 = vmul.f32 %v2944_v24, %v2944_v24  ;;  %v1374_v35 = vadd.f32 %v1373_v60, %v1311_v11 }
 0x139   : > { %v1247_v46 = vadd.f32 %v1246_v43, %v2969_v47  ;;  %v1313_v43 = vmul.f32 %v2933_v18, %v2933_v18 }
 0x13b   : > { %v1248_v20 = vadd.f32 %v1247_v46, %v2971_v48  ;;  %v1375_v46 = vadd.f32 %v1374_v35, %v1312_v44  ;;  %v1318_v44 = vmul.f32 %v2971_v48, %v2971_v48 }
 0x13d   : > { %v1249_v40 = vadd.f32 %v1248_v20, %v3012_v31  ;;  %v1376_v20 = vadd.f32 %v1375_v46, %v1313_v43  ;;  %v1319_v46 = vmul.f32 %v3012_v31, %v3012_v31 }
 0x13f   : > { %v1250_v54 = vadd.f32 %v1249_v40, %v3016_v33  ;;  %v1316_v40 = vmul.f32 %v2980_v53, %v2980_v53  ;;  %v1377_v62 = vadd.f32 %v1376_v20, %v1314_v39  ;;  %v1320_v20 = vmul.f32 %v3016_v33, %v3016_v33 }
 0x141   : > { %v1251_v38 = vadd.f32 %v1250_v54, %v3005_v26  ;;  %v1317_v54 = vmul.f32 %v2969_v47, %v2969_v47  ;;  %v1378_v11 = vadd.f32 %v1377_v62, %v1315_v37  ;;  %v1321_v62 = vmul.f32 %v3005_v26, %v3005_v26 }
 0x143   : > { %v1252_v4 = vadd.f32 %v1251_v38, %v3007_v28  ;;  %v1379_v38 = vadd.f32 %v1378_v11, %v1316_v40  ;;  %v1322_v11 = vmul.f32 %v3007_v28, %v3007_v28 }
 0x145   : > { %v1253_v58 = vadd.f32 %v1252_v4, %v3048_v12  ;;  %v1380_v4 = vadd.f32 %v1379_v38, %v1317_v54  ;;  %v1323_v38 = vmul.f32 %v3048_v12, %v3048_v12 }
 0x147   : > { %v1254_v60 = vadd.f32 %v1253_v58, %v3052_v14  ;;  %v1381_v58 = vadd.f32 %v1380_v4, %v1318_v44  ;;  %v1324_v4 = vmul.f32 %v3052_v14, %v3052_v14 }
 0x149   : > { %v1255_v35 = vadd.f32 %v1254_v60, %v3041_v8  ;;  %v1382_v60 = vadd.f32 %v1381_v58, %v1319_v46  ;;  %v1325_v58 = vmul.f32 %v3041_v8, %v3041_v8 }
 0x14b   : > { %v1256_v43 = vadd.f32 %v1255_v35, %v3043_v9  ;;  %v1383_v35 = vadd.f32 %v1382_v60, %v1320_v20  ;;  %v1326_v60 = vmul.f32 %v3043_v9, %v3043_v9 }
 0x14d   : > { %v1257_v39 = vadd.f32 %v1256_v43, %v3084_v16  ;;  %v1384_v43 = vadd.f32 %v1383_v35, %v1321_v62  ;;  %v1327_v35 = vmul.f32 %v3084_v16, %v3084_v16 }
 0x14f   : > { %v1258_v37 = vadd.f32 %v1257_v39, %v3088_v29  ;;  %v1385_v39 = vadd.f32 %v1384_v43, %v1322_v11  ;;  %v1328_v43 = vmul.f32 %v3088_v29, %v3088_v29 }
 0x151   : > { %v1259_v40 = vadd.f32 %v1258_v37, %v3077_v5  ;;  %v1386_v37 = vadd.f32 %v1385_v39, %v1323_v38  ;;  %v1329_v39 = vmul.f32 %v3077_v5, %v3077_v5 }
 0x153   : > { %v1260_v54 = vadd.f32 %v1259_v40, %v3079_v6  ;;  %v1387_v40 = vadd.f32 %v1386_v37, %v1324_v4  ;;  %v1330_v37 = vmul.f32 %v3079_v6, %v3079_v6 }
 0x155   : > { %v1261_v44 = vadd.f32 %v1260_v54, %v3120_v1  ;;  %v1388_v54 = vadd.f32 %v1387_v40, %v1325_v58  ;;  %v1331_v40 = vmul.f32 %v3120_v1, %v3120_v1 }
 0x157   : > { %v1262_v46 = vadd.f32 %v1261_v44, %v3124_v10  ;;  %v1389_v44 = vadd.f32 %v1388_v54, %v1326_v60  ;;  %v1332_v54 = vmul.f32 %v3124_v10, %v3124_v10 }
 0x159   : > { %v1263_v20 = vadd.f32 %v1262_v46, %v3113_v41  ;;  %v1390_v46 = vadd.f32 %v1389_v44, %v1327_v35  ;;  %v1333_v44 = vmul.f32 %v3113_v41, %v3113_v41 }
 0x15b   : > { %v1264_v62 = vadd.f32 %v1263_v20, %v3115_v45  ;;  %v1391_v20 = vadd.f32 %v1390_v46, %v1328_v43  ;;  %v1334_v46 = vmul.f32 %v3115_v45, %v3115_v45 }
 0x15d   : > { %v1265_v11 = vadd.f32 %v1264_v62, %v3156_v2  ;;  %v1392_v62 = vadd.f32 %v1391_v20, %v1329_v39  ;;  %v1335_v20 = vmul.f32 %v3156_v2, %v3156_v2 }
 0x15f   : > { %v1266_v38 = vadd.f32 %v1265_v11, %v3160_v7  ;;  %v1393_v11 = vadd.f32 %v1392_v62, %v1330_v37  ;;  %v1336_v62 = vmul.f32 %v3160_v7, %v3160_v7 }
 0x161   : > { %v1267_v4 = vadd.f32 %v1266_v38, %v3149_v49  ;;  %v1394_v38 = vadd.f32 %v1393_v11, %v1331_v40  ;;  %v1337_v11 = vmul.f32 %v3149_v49, %v3149_v49 }
 0x163   : > { %v1268_v58 = vadd.f32 %v1267_v4, %v3151_v42  ;;  %v1395_v4 = vadd.f32 %v1394_v38, %v1332_v54  ;;  %v1338_v38 = vmul.f32 %v3151_v42, %v3151_v42 }
 0x165   : > { %v1269_v60 = vadd.f32 %v1268_v58, %v2910_v61  ;;  %v1396_v58 = vadd.f32 %v1395_v4, %v1333_v44  ;;  %v1339_v4 = vmul.f32 %v2910_v61, %v2910_v61 }
 0x167   : > { %v1270_v35 = vadd.f32 %v1269_v60, %v2914_v63  ;;  %v1397_v60 = vadd.f32 %v1396_v58, %v1334_v46  ;;  %v1340_v58 = vmul.f32 %v2914_v63, %v2914_v63 }
 0x169   : > { %v1271_v43 = vadd.f32 %v1270_v35, %v2895_v57  ;;  %v1398_v35 = vadd.f32 %v1397_v60, %v1335_v20  ;;  %v1341_v60 = vmul.f32 %v2895_v57, %v2895_v57 }
 0x16b   : > { %v1272_v39 = vadd.f32 %v1271_v43, %v2906_v59  ;;  %v1399_v43 = vadd.f32 %v1398_v35, %v1336_v62  ;;  %v1342_v35 = vmul.f32 %v2906_v59, %v2906_v59 }
 0x16d   : > { %v1273_v37 = vadd.f32 %v1272_v39, %v2946_v25  ;;  %v1400_v39 = vadd.f32 %v1399_v43, %v1337_v11  ;;  %v1343_v43 = vmul.f32 %v2946_v25, %v2946_v25 }
 0x16f   : > { %v1274_v40 = vadd.f32 %v1273_v37, %v2950_v27  ;;  %v1401_v37 = vadd.f32 %v1400_v39, %v1338_v38  ;;  %v1344_v39 = vmul.f32 %v2950_v27, %v2950_v27 }
 0x171   : > { %v1275_v54 = vadd.f32 %v1274_v40, %v2938_v21  ;;  %v1402_v40 = vadd.f32 %v1401_v37, %v1339_v4  ;;  %v1345_v37 = vmul.f32 %v2938_v21, %v2938_v21 }
 0x173   : > { %v1276_v44 = vadd.f32 %v1275_v54, %v2942_v23  ;;  %v1403_v54 = vadd.f32 %v1402_v40, %v1340_v58  ;;  %v1346_v40 = vmul.f32 %v2942_v23, %v2942_v23  ;;  %v4145_v23 = vld [vmem:[#allocation21_spill] sm:$0xff] }
 0x175   : > { %v1277_v46 = vadd.f32 %v1276_v44, %v2982_v56  ;;  %v1404_v44 = vadd.f32 %v1403_v54, %v1341_v60  ;;  %v1347_v54 = vmul.f32 %v2982_v56, %v2982_v56  ;;  %v4146_v56 = vld [vmem:[#allocation22_spill] sm:$0xff] }
 0x177   : > { %v1278_v20 = vadd.f32 %v1277_v46, %v2986_v0  ;;  %v1405_v46 = vadd.f32 %v1404_v44, %v1342_v35  ;;  %v1348_v44 = vmul.f32 %v2986_v0, %v2986_v0  ;;  %v4147_v0 = vld [vmem:[#allocation27_spill] sm:$0xff] }
 0x179   : > { %v1279_v62 = vadd.f32 %v1278_v20, %v2974_v50  ;;  %v1406_v20 = vadd.f32 %v1405_v46, %v1343_v43  ;;  %v1349_v46 = vmul.f32 %v2974_v50, %v2974_v50  ;;  %v4148_v50 = vld [vmem:[#allocation28_spill] sm:$0xff] }
 0x17b   : > { %v1280_v11 = vadd.f32 %v1279_v62, %v2978_v52  ;;  %v1407_v62 = vadd.f32 %v1406_v20, %v1344_v39  ;;  %v1350_v20 = vmul.f32 %v2978_v52, %v2978_v52  ;;  %v4149_v52 = vld [vmem:[#allocation25_spill] sm:$0xff] }
 0x17d   : > { %v1281_v38 = vadd.f32 %v1280_v11, %v3018_v34  ;;  %v1408_v11 = vadd.f32 %v1407_v62, %v1345_v37  ;;  %v1351_v62 = vmul.f32 %v3018_v34, %v3018_v34  ;;  %v4150_v34 = vld [vmem:[#allocation26_spill] sm:$0xff] }
 0x17f   : > { %v1282_v4 = vadd.f32 %v1281_v38, %v3022_v36  ;;  %v1409_v38 = vadd.f32 %v1408_v11, %v1346_v40  ;;  %v1352_v11 = vmul.f32 %v3022_v36, %v3022_v36  ;;  %v4151_v36 = vld [vmem:[#allocation32_spill] sm:$0xff] }
 0x181   : > { %v1283_v58 = vadd.f32 %v1282_v4, %v3010_v30  ;;  %v1410_v4 = vadd.f32 %v1409_v38, %v1347_v54  ;;  %v1353_v38 = vmul.f32 %v3010_v30, %v3010_v30  ;;  %v4152_v30 = vld [vmem:[#allocation33_spill] sm:$0xff] }
 0x183   : > { %v1284_v60 = vadd.f32 %v1283_v58, %v3014_v32  ;;  %v1411_v58 = vadd.f32 %v1410_v4, %v1348_v44  ;;  %v1354_v4 = vmul.f32 %v3014_v32, %v3014_v32  ;;  %v4153_v32 = vld [vmem:[#allocation30_spill] sm:$0xff] }
 0x185   : > { %v1285_v35 = vadd.f32 %v1284_v60, %v3054_v15  ;;  %v1412_v60 = vadd.f32 %v1411_v58, %v1349_v46  ;;  %v1355_v58 = vmul.f32 %v3054_v15, %v3054_v15  ;;  %v4154_v15 = vld [vmem:[#allocation31_spill] sm:$0xff] }
 0x187   : > { %v1286_v43 = vadd.f32 %v1285_v35, %v3058_v17  ;;  %v1413_v35 = vadd.f32 %v1412_v60, %v1350_v20  ;;  %v1356_v60 = vmul.f32 %v3058_v17, %v3058_v17 }
 0x189   : > { %v1287_v39 = vadd.f32 %v1286_v43, %v4145_v23  ;;  %v1414_v43 = vadd.f32 %v1413_v35, %v1351_v62  ;;  %v1357_v35 = vmul.f32 %v4145_v23, %v4145_v23 }
 0x18b   : > { %v1288_v37 = vadd.f32 %v1287_v39, %v4146_v56  ;;  %v1415_v39 = vadd.f32 %v1414_v43, %v1352_v11  ;;  %v1358_v43 = vmul.f32 %v4146_v56, %v4146_v56  ;;  %v1362_v56 = vmul.f32 %v4150_v34, %v4150_v34 }
 0x18d   : > { %v1289_v40 = vadd.f32 %v1288_v37, %v4147_v0  ;;  %v1416_v37 = vadd.f32 %v1415_v39, %v1353_v38  ;;  %v1359_v39 = vmul.f32 %v4147_v0, %v4147_v0  ;;  %v1363_v0 = vmul.f32 %v4151_v36, %v4151_v36 }
 0x18f   : > { %v1290_v54 = vadd.f32 %v1289_v40, %v4148_v50  ;;  %v1417_v40 = vadd.f32 %v1416_v37, %v1354_v4  ;;  %v1360_v37 = vmul.f32 %v4148_v50, %v4148_v50  ;;  %v1364_v50 = vmul.f32 %v4152_v30, %v4152_v30 }
 0x191   : > { %v1291_v44 = vadd.f32 %v1290_v54, %v4149_v52  ;;  %v1418_v54 = vadd.f32 %v1417_v40, %v1355_v58  ;;  %v1361_v58 = vmul.f32 %v4149_v52, %v4149_v52  ;;  %v1365_v52 = vmul.f32 %v4153_v32, %v4153_v32 }
 0x193   : > { %v1292_v46 = vadd.f32 %v1291_v44, %v4150_v34  ;;  %v1419_v44 = vadd.f32 %v1418_v54, %v1356_v60  ;;  %v1366_v34 = vmul.f32 %v4154_v15, %v4154_v15 }
 0x195   : > { %v1293_v20 = vadd.f32 %v1292_v46, %v4151_v36  ;;  %v1420_v46 = vadd.f32 %v1419_v44, %v1357_v35 }
 0x197   : > { %v1294_v62 = vadd.f32 %v1293_v20, %v4152_v30  ;;  %v1421_v20 = vadd.f32 %v1420_v46, %v1358_v43  ;;  %v4156_v43 = vld [vmem:[#allocation38_spill] sm:$0xff] }
 0x199   : > { %v1295_v11 = vadd.f32 %v1294_v62, %v4153_v32  ;;  %v1422_v40 = vadd.f32 %v1421_v20, %v1359_v39  ;;  %v4155_v62 = vld [vmem:[#allocation36_spill] sm:$0xff]  ;;  %v1370_v32 = vmul.f32 %v4156_v43, %v4156_v43 }
 0x19b   : > { %v1296_v38 = vadd.f32 %v1295_v11, %v4154_v15  ;;  %v1423_v60 = vadd.f32 %v1422_v40, %v1360_v37  ;;  %v1368_v37 = vmul.f32 %v3166_v3, %v3166_v3 }
 0x19d   : > { %v1297_v4 = vadd.f32 %v1296_v38, %v3162_v13  ;;  %v1424_v35 = vadd.f32 %v1423_v60, %v1361_v58 }
 0x19f   : > { %v1298_v23 = vadd.f32 %v1297_v4, %v3166_v3  ;;  %v1425_v11 = vadd.f32 %v1424_v35, %v1362_v56  ;;  %v1367_v4 = vmul.f32 %v3162_v13, %v3162_v13 }
 0x1a1   : > { %v1299_v54 = vadd.f32 %v1298_v23, %v4155_v62  ;;  %v1426_v38 = vadd.f32 %v1425_v11, %v1363_v0  ;;  %v1369_v23 = vmul.f32 %v4155_v62, %v4155_v62 }
 0x1a3   : > { %v1300_v44 = vadd.f32 %v1299_v54, %v4156_v43  ;;  %v1427_v39 = vadd.f32 %v1426_v38, %v1364_v50 }
 0x1a5   : > { %v1301_v46 = vrot.slane %v1300_v44, 4  ;;  %v1428_v36 = vadd.f32 %v1427_v39, %v1365_v52 }
 0x1a7   : > { %v1429_v30 = vadd.f32 %v1428_v36, %v1366_v34  ;;  %v1302_v20 = vadd.f32 %v1301_v46, %v1300_v44 }
 0x1a9   : > { %v1430_v58 = vadd.f32 %v1429_v30, %v1367_v4  ;;  %v1303_v15 = vrot.slane %v1302_v20, 2 }
 0x1ab   : > { %v1431_v40 = vadd.f32 %v1430_v58, %v1368_v37  ;;  %v1304_v54 = vadd.f32 %v1303_v15, %v1302_v20 }
 0x1ad   : > { %v1432_v56 = vadd.f32 %v1431_v40, %v1369_v23  ;;  %v1305_v50 = vrot.slane %v1304_v54, 1 }
 0x1af   : > { %v1433_v60 = vadd.f32 %v1432_v56, %v1370_v32  ;;  %v1306_v38 = vadd.f32 %v1305_v50, %v1304_v54 }
 0x1b1   : > { %v1434_v0 = vrot.slane %v1433_v60, 4 }
 0x1b3   : > { %v1435_v35 = vadd.f32 %v1434_v0, %v1433_v60 }
 0x1b5   : > { %v1436_v11 = vrot.slane %v1435_v35, 2 }
 0x1b7   : > { %v1437_v52 = vadd.f32 %v1436_v11, %v1435_v35 }
 0x1b9   : > { %v1438_v44 = vrot.slane %v1437_v52, 1 }
 0x1bb   : > { %v1439_v34 = vadd.f32 %v1438_v44, %v1437_v52 }
 0x1bd   : > { %v1441_v62 = vsel %vm1440_vm3, %v1306_v38, %v1439_v34 }
 0x1be   : > { %v1443_v39 = vsel %vm1442_vm4, %v1441_v62, 0.0 }
 0x1bf   : > { %1444 = vst [vmem:[%s2802_s26] sm:$0xff] %v1443_v39 }
 0x1c0 PF: > { %p2272_p6 = scmp.ne.s32.totalorder %s2786_s16, 8 }
 0x1c2   : > { %1448 = sbr.rel (%p2272_p6) target bundleno = 655 (0x28f), region = 40 }
 0x1c9   : > { %v1449_v43 = vlaneseq  ;;  %s2273_s10 = sshll.u32 %s2786_s16, 9 }
 0x1ca   : > { %v3379_v30 = vstv %s2273_s10 }
 0x1cb   : > { %v3374_v46 = vshrl.u32 %v1449_v43, 7 }
 0x1cd   : > { %v1483_v4 = vadd.s32 264, %v3374_v46  ;;  %v1484_v36 = vadd.s32 272, %v3374_v46  ;;  %v1485_v37 = vadd.s32 280, %v3374_v46  ;;  %v1486_v20 = vadd.s32 288, %v3374_v46 }
 0x1ce   : > { %v1487_v23 = vadd.s32 296, %v3374_v46  ;;  %v1488_v58 = vadd.s32 304, %v3374_v46  ;;  %v1489_v32 = vadd.s32 312, %v3374_v46  ;;  %v1490_v40 = vadd.s32 320, %v3374_v46 }
 0x1cf   : > { %v1491_v15 = vadd.s32 328, %v3374_v46  ;;  %v1492_v56 = vadd.s32 336, %v3374_v46  ;;  %v1493_v60 = vadd.s32 344, %v3374_v46  ;;  %v1494_v54 = vadd.s32 352, %v3374_v46 }
 0x1d0   : > { %v1495_v0 = vadd.s32 360, %v3374_v46  ;;  %v1496_v35 = vadd.s32 368, %v3374_v46  ;;  %v1497_v50 = vadd.s32 376, %v3374_v46  ;;  %v1498_v11 = vadd.s32 384, %v3374_v46 }
 0x1d1   : > { %v1499_v52 = vadd.s32 392, %v3374_v46  ;;  %v1500_v38 = vadd.s32 400, %v3374_v46  ;;  %v1501_v44 = vadd.s32 408, %v3374_v46  ;;  %v1502_v34 = vadd.s32 416, %v3374_v46 }
 0x1d2   : > { %v1503_v62 = vadd.s32 424, %v3374_v46  ;;  %v1504_v39 = vadd.s32 432, %v3374_v46  ;;  %v1505_v43 = vadd.s32 440, %v3374_v46  ;;  %v1506_v3 = vadd.s32 448, %v3374_v46 }
 0x1d3   : > { %v1507_v13 = vadd.s32 456, %v3374_v46  ;;  %v1508_v17 = vadd.s32 464, %v3374_v46  ;;  %v1509_v21 = vadd.s32 472, %v3374_v46  ;;  %v1510_v27 = vadd.s32 480, %v3374_v46 }
 0x1d4   : > { %v1511_v25 = vadd.s32 488, %v3374_v46  ;;  %v1512_v59 = vadd.s32 496, %v3374_v46  ;;  %v1513_v57 = vadd.s32 504, %v3374_v46  ;;  %v3410_v63 = vadd.s32 %v3379_v30, %v1483_v4 }
 0x1d5   : > { %v3413_v61 = vadd.s32 %v3379_v30, %v1484_v36  ;;  %v3416_v42 = vadd.s32 %v3379_v30, %v1485_v37  ;;  %v3419_v49 = vadd.s32 %v3379_v30, %v1486_v20  ;;  %v3422_v7 = vadd.s32 %v3379_v30, %v1487_v23 }
 0x1d6   : > { %v3425_v2 = vadd.s32 %v3379_v30, %v1488_v58  ;;  %v3428_v45 = vadd.s32 %v3379_v30, %v1489_v32  ;;  %v3431_v4 = vadd.s32 %v3379_v30, %v1490_v40  ;;  %v3434_v36 = vadd.s32 %v3379_v30, %v1491_v15 }
 0x1d7   : > { %v3437_v37 = vadd.s32 %v3379_v30, %v1492_v56  ;;  %v3440_v20 = vadd.s32 %v3379_v30, %v1493_v60  ;;  %v3443_v23 = vadd.s32 %v3379_v30, %v1494_v54  ;;  %v3446_v58 = vadd.s32 %v3379_v30, %v1495_v0 }
 0x1d8   : > { %v3449_v32 = vadd.s32 %v3379_v30, %v1496_v35  ;;  %v3452_v40 = vadd.s32 %v3379_v30, %v1497_v50  ;;  %v3455_v15 = vadd.s32 %v3379_v30, %v1498_v11  ;;  %v3458_v56 = vadd.s32 %v3379_v30, %v1499_v52 }
 0x1d9   : > { %v3461_v60 = vadd.s32 %v3379_v30, %v1500_v38  ;;  %v3464_v54 = vadd.s32 %v3379_v30, %v1501_v44  ;;  %v3467_v0 = vadd.s32 %v3379_v30, %v1502_v34  ;;  %v3470_v35 = vadd.s32 %v3379_v30, %v1503_v62 }
 0x1da   : > { %v3473_v50 = vadd.s32 %v3379_v30, %v1504_v39  ;;  %v3476_v11 = vadd.s32 %v3379_v30, %v1505_v43  ;;  %v3479_v52 = vadd.s32 %v3379_v30, %v1506_v3  ;;  %v3482_v38 = vadd.s32 %v3379_v30, %v1507_v13 }
 0x1db   : > { %v3485_v44 = vadd.s32 %v3379_v30, %v1508_v17  ;;  %v3488_v34 = vadd.s32 %v3379_v30, %v1509_v21  ;;  %v3491_v62 = vadd.s32 %v3379_v30, %v1510_v27  ;;  %v3494_v39 = vadd.s32 %v3379_v30, %v1511_v25 }
 0x1dc   : > { %v3497_v43 = vadd.s32 %v3379_v30, %v1512_v59  ;;  %v3500_v3 = vadd.s32 %v3379_v30, %v1513_v57  ;;  %vm1613_vm5 = vcmp.lt.s32.totalorder %v3410_v63, 4232  ;;  %vm1614_vm6 = vcmp.lt.s32.totalorder %v3413_v61, 4232 }
 0x1dd   : > { %vm1615_vm7 = vcmp.lt.s32.totalorder %v3416_v42, 4232  ;;  %vm1616_vm8 = vcmp.lt.s32.totalorder %v3419_v49, 4232  ;;  %vm1617_vm9 = vcmp.lt.s32.totalorder %v3422_v7, 4232  ;;  %vm1618_vm10 = vcmp.lt.s32.totalorder %v3425_v2, 4232 }
 0x1de   : > { %vm1634_vm0 = vcmp.lt.s32.totalorder %v3473_v50, 4232  ;;  %vm1635_vm1 = vcmp.lt.s32.totalorder %v3476_v11, 4232  ;;  %vm1636_vm2 = vcmp.lt.s32.totalorder %v3479_v52, 4232  ;;  %vm1637_vm3 = vcmp.lt.s32.totalorder %v3482_v38, 4232 }
 0x1df   : > { %vm1638_vm4 = vcmp.lt.s32.totalorder %v3485_v44, 4232  ;;  %vm1639_vm11 = vcmp.lt.s32.totalorder %v3488_v34, 4232  ;;  %vm1640_vm12 = vcmp.lt.s32.totalorder %v3491_v62, 4232  ;;  %vm1641_vm13 = vcmp.lt.s32.totalorder %v3494_v39, 4232 }
 0x1e0   : > { %vm1642_vm14 = vcmp.lt.s32.totalorder %v3497_v43, 4232  ;;  %vm1643_vm15 = vcmp.lt.s32.totalorder %v3500_v3, 4232  ;;  %v4103_v57 = vmov 0.0   ;;  %v1451_v11 = vadd.s32 8, %v3374_v46 }
 0x1e1   : > { %v3536_v59 = vsel %vm1613_vm5, 1.0, %v4103_v57  ;;  %v3541_v21 = vsel %vm1614_vm6, 1.0, %v4103_v57  ;;  %v3546_v25 = vsel %vm1615_vm7, 1.0, %v4103_v57  ;;  %v3551_v27 = vsel %vm1616_vm8, 1.0, %v4103_v57 }
 0x1e2   : > { %v3556_v63 = vsel %vm1617_vm9, 1.0, %v4103_v57  ;;  %v3561_v61 = vsel %vm1618_vm10, 1.0, %v4103_v57  ;;  %vm4157_vm5 = vcmp.lt.s32.totalorder %v3428_v45, 4232  ;;  %vm4158_vm6 = vcmp.lt.s32.totalorder %v3431_v4, 4232 }
 0x1e3   : > { %v3566_v17 = vsel %vm4157_vm5, 1.0, %v4103_v57  ;;  %v3571_v49 = vsel %vm4158_vm6, 1.0, %v4103_v57  ;;  %vm4160_vm7 = vcmp.lt.s32.totalorder %v3434_v36, 4232  ;;  %vm4162_vm8 = vcmp.lt.s32.totalorder %v3437_v37, 4232 }
 0x1e4   : > { %4159 = vst [vmem:[#allocation42_spill] sm:$0xff] %v3571_v49  ;;  %v3576_v7 = vsel %vm4160_vm7, 1.0, %v4103_v57  ;;  %v3581_v42 = vsel %vm4162_vm8, 1.0, %v4103_v57  ;;  %vm4164_vm9 = vcmp.lt.s32.totalorder %v3440_v20, 4232  ;;  %vm4166_vm10 = vcmp.lt.s32.totalorder %v3443_v23, 4232 }
 0x1e5   : > { %4161 = vst [vmem:[#allocation43_spill] sm:$0xff] %v3576_v7  ;;  %4163 = vst [vmem:[#allocation44_spill] sm:$0xff] %v3581_v42  ;;  %v3586_v45 = vsel %vm4164_vm9, 1.0, %v4103_v57  ;;  %v3591_v2 = vsel %vm4166_vm10, 1.0, %v4103_v57  ;;  %vm4168_vm5 = vcmp.lt.s32.totalorder %v3446_v58, 4232  ;;  %vm4170_vm6 = vcmp.lt.s32.totalorder %v3449_v32, 4232 }
 0x1e6   : > { %4165 = vst [vmem:[#allocation45_spill] sm:$0xff] %v3586_v45  ;;  %4167 = vst [vmem:[#allocation46_spill] sm:$0xff] %v3591_v2  ;;  %v3596_v13 = vsel %vm4168_vm5, 1.0, %v4103_v57  ;;  %v3601_v4 = vsel %vm4170_vm6, 1.0, %v4103_v57  ;;  %vm4172_vm7 = vcmp.lt.s32.totalorder %v3452_v40, 4232  ;;  %vm4174_vm8 = vcmp.lt.s32.totalorder %v3455_v15, 4232 }
 0x1e7   : > { %4169 = vst [vmem:[#allocation47_spill] sm:$0xff] %v3596_v13  ;;  %4171 = vst [vmem:[#allocation48_spill] sm:$0xff] %v3601_v4  ;;  %v3606_v36 = vsel %vm4172_vm7, 1.0, %v4103_v57  ;;  %v3611_v37 = vsel %vm4174_vm8, 1.0, %v4103_v57  ;;  %vm4176_vm9 = vcmp.lt.s32.totalorder %v3458_v56, 4232  ;;  %vm4178_vm10 = vcmp.lt.s32.totalorder %v3461_v60, 4232 }
 0x1e8   : > { %4173 = vst [vmem:[#allocation49_spill] sm:$0xff] %v3606_v36  ;;  %4175 = vst [vmem:[#allocation50_spill] sm:$0xff] %v3611_v37  ;;  %v3616_v20 = vsel %vm4176_vm9, 1.0, %v4103_v57  ;;  %v3621_v23 = vsel %vm4178_vm10, 1.0, %v4103_v57  ;;  %vm4180_vm5 = vcmp.lt.s32.totalorder %v3464_v54, 4232  ;;  %vm4182_vm6 = vcmp.lt.s32.totalorder %v3467_v0, 4232 }
 0x1e9   : > { %4177 = vst [vmem:[#allocation51_spill] sm:$0xff] %v3616_v20  ;;  %4179 = vst [vmem:[#allocation52_spill] sm:$0xff] %v3621_v23  ;;  %v3626_v58 = vsel %vm4180_vm5, 1.0, %v4103_v57  ;;  %v3631_v32 = vsel %vm4182_vm6, 1.0, %v4103_v57  ;;  %vm4184_vm7 = vcmp.lt.s32.totalorder %v3470_v35, 4232  ;;  %v3641_v15 = vsel %vm1634_vm0, 1.0, %v4103_v57 }
 0x1ea   : > { %4181 = vst [vmem:[#allocation53_spill] sm:$0xff] %v3626_v58  ;;  %4183 = vst [vmem:[#allocation54_spill] sm:$0xff] %v3631_v32  ;;  %v3636_v40 = vsel %vm4184_vm7, 1.0, %v4103_v57  ;;  %v3646_v56 = vsel %vm1635_vm1, 1.0, %v4103_v57  ;;  %v3651_v60 = vsel %vm1636_vm2, 1.0, %v4103_v57  ;;  %v3656_v54 = vsel %vm1637_vm3, 1.0, %v4103_v57 }
 0x1eb   : > { %4185 = vst [vmem:[#allocation55_spill] sm:$0xff] %v3636_v40  ;;  %4186 = vst [vmem:[#allocation56_spill] sm:$0xff] %v3641_v15  ;;  %v3661_v0 = vsel %vm1638_vm4, 1.0, %v4103_v57  ;;  %v3666_v35 = vsel %vm1639_vm11, 1.0, %v4103_v57  ;;  %v3671_v50 = vsel %vm1640_vm12, 1.0, %v4103_v57  ;;  %v3677_v52 = vsel %vm1641_vm13, 1.0, %v4103_v57 }
 0x1ec   : > { %4187 = vst [vmem:[#allocation57_spill] sm:$0xff] %v3646_v56  ;;  %4188 = vst [vmem:[#allocation58_spill] sm:$0xff] %v3651_v60  ;;  %v3682_v38 = vsel %vm1642_vm14, 1.0, %v4103_v57  ;;  %v3687_v44 = vsel %vm1643_vm15, 1.0, %v4103_v57  ;;  %v1452_v34 = vadd.s32 16, %v3374_v46  ;;  %v1453_v62 = vadd.s32 24, %v3374_v46 }
 0x1ed   : > { %4189 = vst [vmem:[#allocation59_spill] sm:$0xff] %v3656_v54  ;;  %4190 = vst [vmem:[#allocation60_spill] sm:$0xff] %v3661_v0  ;;  %v1517_v39 = vadd.s32 %v3379_v30, %v1451_v11  ;;  %v1456_v3 = vadd.s32 48, %v3374_v46  ;;  %v1457_v11 = vadd.s32 56, %v3374_v46  ;;  %v1459_v15 = vadd.s32 72, %v3374_v46 }
 0x1ee   : > { %4191 = vst [vmem:[#allocation61_spill] sm:$0xff] %v3666_v35  ;;  %4192 = vst [vmem:[#allocation62_spill] sm:$0xff] %v3671_v50  ;;  %v1516_v50 = vadd.s32 %v3379_v30, %v3374_v46  ;;  %v1518_v43 = vadd.s32 %v3379_v30, %v1452_v34  ;;  %v1519_v35 = vadd.s32 %v3379_v30, %v1453_v62  ;;  %v1458_v34 = vadd.s32 64, %v3374_v46 }
 0x1ef   : > { %4193 = vst [vmem:[#allocation63_spill] sm:$0xff] %v3677_v52  ;;  %4194 = vst [vmem:[#allocation64_spill] sm:$0xff] %v3682_v38  ;;  %v1454_v52 = vadd.s32 32, %v3374_v46  ;;  %v1455_v38 = vadd.s32 40, %v3374_v46  ;;  %vm1581_vm12 = vcmp.lt.s32.totalorder %v1517_v39, 4232  ;;  %v4197_v39 = vld [vmem:[#allocation4_spill] sm:$0xff]  ;;  %v1523_v32 = vadd.s32 %v3379_v30, %v1457_v11 }
 0x1f0   : > { %4195 = vst [vmem:[#allocation65_spill] sm:$0xff] %v3687_v44  ;;  %vm1580_vm11 = vcmp.lt.s32.totalorder %v1516_v50, 4232  ;;  %vm1582_vm13 = vcmp.lt.s32.totalorder %v1518_v43, 4232  ;;  %v4196_v44 = vmov 0.0   ;;  %vm1583_vm14 = vcmp.lt.s32.totalorder %v1519_v35, 4232 }
 0x1f1   : > { %v1520_v57 = vadd.s32 %v3379_v30, %v1454_v52  ;;  %v2274_v0 = vsel %vm1580_vm11, 1.0, %v4196_v44  ;;  %v2275_v54 = vsel %vm1581_vm12, 1.0, %v4196_v44  ;;  %v1521_v60 = vadd.s32 %v3379_v30, %v1455_v38  ;;  %v4198_v52 = vld [vmem:[#allocation6_spill] sm:$0xff] }
 0x1f2   : > { %v2276_v62 = vsel %vm1582_vm13, 1.0, %v4196_v44  ;;  %v1522_v50 = vadd.s32 %v3379_v30, %v1456_v3  ;;  %v1772_v56 = vmul.f32 %v2274_v0, %v4197_v39  ;;  %v1773_v43 = vmul.f32 %v2275_v54, %v4198_v52  ;;  %v4199_v38 = vld [vmem:[#allocation2_spill] sm:$0xff] }
 0x1f3   : > { %vm1584_vm15 = vcmp.lt.s32.totalorder %v1520_v57, 4232  ;;  %v2277_v40 = vsel %vm1583_vm14, 1.0, %v4196_v44  ;;  %vm1585_vm0 = vcmp.lt.s32.totalorder %v1521_v60, 4232  ;;  %v1774_v35 = vmul.f32 %v2276_v62, %v4199_v38 }
 0x1f4   : > { %v1836_v58 = vadd.f32 %v1773_v43, %v1772_v56  ;;  %v1460_v23 = vadd.s32 80, %v3374_v46  ;;  %v2278_v20 = vsel %vm1584_vm15, 1.0, %v4196_v44  ;;  %v1524_v57 = vadd.s32 %v3379_v30, %v1458_v34 }
 0x1f5   : > { %vm1586_vm1 = vcmp.lt.s32.totalorder %v1522_v50, 4232  ;;  %v1775_v0 = vmul.f32 %v2277_v40, %v2892_v55  ;;  %v1461_v3 = vadd.s32 88, %v3374_v46  ;;  %v2279_v37 = vsel %vm1585_vm0, 1.0, %v4196_v44 }
 0x1f6   : > { %v1837_v54 = vadd.f32 %v1836_v58, %v1774_v35  ;;  %v1525_v11 = vadd.s32 %v3379_v30, %v1459_v15  ;;  %vm1587_vm2 = vcmp.lt.s32.totalorder %v1523_v32, 4232  ;;  %v1776_v60 = vmul.f32 %v2278_v20, %v2940_v22 }
 0x1f7   : > { %v1462_v36 = vadd.s32 96, %v3374_v46  ;;  %v2280_v4 = vsel %vm1586_vm1, 1.0, %v4196_v44  ;;  %v1526_v34 = vadd.s32 %v3379_v30, %v1460_v23  ;;  %vm1588_vm3 = vcmp.lt.s32.totalorder %v1524_v57, 4232 }
 0x1f8   : > { %v1838_v62 = vadd.f32 %v1837_v54, %v1775_v0  ;;  %v1777_v40 = vmul.f32 %v2279_v37, %v2944_v24  ;;  %v1463_v50 = vadd.s32 104, %v3374_v46  ;;  %v2281_v13 = vsel %vm1587_vm2, 1.0, %v4196_v44 }
 0x1f9   : > { %v1527_v15 = vadd.s32 %v3379_v30, %v1461_v3  ;;  %vm1589_vm4 = vcmp.lt.s32.totalorder %v1525_v11, 4232  ;;  %v1778_v20 = vmul.f32 %v2280_v4, %v2933_v18  ;;  %v1464_v54 = vadd.s32 112, %v3374_v46 }
 0x1fa   : > { %v1839_v58 = vadd.f32 %v1838_v62, %v1776_v60  ;;  %v2282_v2 = vsel %vm1588_vm3, 1.0, %v4196_v44  ;;  %v1528_v23 = vadd.s32 %v3379_v30, %v1462_v36  ;;  %vm1590_vm8 = vcmp.lt.s32.totalorder %v1526_v34, 4232 }
 0x1fb   : > { %v3733_v37 = vmul.f32 %v2281_v13, %v2935_v19  ;;  %v1465_v62 = vadd.s32 120, %v3374_v46  ;;  %v2283_v45 = vsel %vm1589_vm4, 1.0, %v4196_v44  ;;  %v1529_v3 = vadd.s32 %v3379_v30, %v1463_v50 }
 0x1fc   : > { %v1840_v32 = vadd.f32 %v1839_v58, %v1777_v40  ;;  %vm1591_vm9 = vcmp.lt.s32.totalorder %v1527_v15, 4232  ;;  %v3739_v4 = vmul.f32 %v2282_v2, %v2976_v51  ;;  %v1466_v58 = vadd.s32 128, %v3374_v46 }
 0x1fd   : > { %v2284_v36 = vsel %vm1590_vm8, 1.0, %v4196_v44  ;;  %v1530_v13 = vadd.s32 %v3379_v30, %v1464_v54  ;;  %vm1592_vm10 = vcmp.lt.s32.totalorder %v1528_v23, 4232  ;;  %v3746_v34 = vmul.f32 %v2283_v45, %v2980_v53 }
 0x1fe   : > { %v1841_v57 = vadd.f32 %v1840_v32, %v1778_v20  ;;  %v1467_v50 = vadd.s32 136, %v3374_v46  ;;  %v2285_v15 = vsel %vm1591_vm9, 1.0, %v4196_v44  ;;  %v1905_v2 = vmul.f32 %v1772_v56, %v4197_v39 }
 0x1ff   : > { %v1531_v42 = vadd.s32 %v3379_v30, %v1465_v62  ;;  %vm1593_vm5 = vcmp.lt.s32.totalorder %v1529_v3, 4232  ;;  %v3755_v7 = vmul.f32 %v2284_v36, %v2969_v47  ;;  %v1468_v45 = vadd.s32 144, %v3374_v46 }
 0x200   : > { %v1842_v11 = vadd.f32 %v1841_v57, %v3733_v37  ;;  %v1906_v57 = vmul.f32 %v1773_v43, %v4198_v52  ;;  %v2286_v23 = vsel %vm1592_vm10, 1.0, %v4196_v44  ;;  %v1532_v49 = vadd.s32 %v3379_v30, %v1466_v58 }
 0x201   : > { %vm1594_vm6 = vcmp.lt.s32.totalorder %v1530_v13, 4232  ;;  %v3763_v56 = vmul.f32 %v2285_v15, %v2971_v48  ;;  %v1469_v52 = vadd.s32 152, %v3374_v46  ;;  %v2287_v43 = vsel %vm1593_vm5, 1.0, %v4196_v44 }
 0x202   : > { %v1843_v32 = vadd.f32 %v1842_v11, %v3739_v4  ;;  %v1907_v11 = vmul.f32 %v1774_v35, %v4199_v38  ;;  %v1908_v62 = vmul.f32 %v1775_v0, %v2892_v55  ;;  %v1969_v3 = vadd.f32 %v1906_v57, %v1905_v2 }
 0x203   : > { %v1533_v36 = vadd.s32 %v3379_v30, %v1467_v50  ;;  %vm1595_vm7 = vcmp.lt.s32.totalorder %v1531_v42, 4232  ;;  %v3771_v38 = vmul.f32 %v2286_v23, %v3012_v31  ;;  %v1470_v58 = vadd.s32 160, %v3374_v46 }
 0x204   : > { %v1844_v54 = vadd.f32 %v1843_v32, %v3746_v34  ;;  %v2288_v13 = vsel %vm1594_vm6, 1.0, %v4196_v44  ;;  %v1909_v32 = vmul.f32 %v1776_v60, %v2940_v22  ;;  %v1970_v15 = vadd.f32 %v1969_v3, %v1907_v11 }
 0x205   : > { %vm1596_vm11 = vcmp.lt.s32.totalorder %v1532_v49, 4232  ;;  %v3779_v55 = vmul.f32 %v2287_v43, %v3016_v33  ;;  %v1471_v0 = vadd.s32 168, %v3374_v46  ;;  %v2289_v50 = vsel %vm1595_vm7, 1.0, %v4196_v44 }
 0x206   : > { %v1845_v39 = vadd.f32 %v1844_v54, %v3755_v7  ;;  %v1534_v54 = vadd.s32 %v3379_v30, %v1468_v45  ;;  %v1910_v2 = vmul.f32 %v1777_v40, %v2944_v24  ;;  %v1971_v57 = vadd.f32 %v1970_v15, %v1908_v62 }
 0x207   : > { %v1535_v23 = vadd.s32 %v3379_v30, %v1469_v52  ;;  %vm1597_vm12 = vcmp.lt.s32.totalorder %v1533_v36, 4232  ;;  %v3787_v22 = vmul.f32 %v2288_v13, %v3005_v26  ;;  %v1472_v60 = vadd.s32 176, %v3374_v46 }
 0x208   : > { %v1846_v35 = vadd.f32 %v1845_v39, %v3763_v56  ;;  %v2290_v45 = vsel %vm1596_vm11, 1.0, %v4196_v44  ;;  %v1911_v11 = vmul.f32 %v1778_v20, %v2933_v18  ;;  %v1972_v39 = vadd.f32 %v1971_v57, %v1909_v32 }
 0x209   : > { %v1536_v43 = vadd.s32 %v3379_v30, %v1470_v58  ;;  %vm1598_vm13 = vcmp.lt.s32.totalorder %v1534_v54, 4232  ;;  %v3795_v24 = vmul.f32 %v2289_v50, %v3007_v28  ;;  %v1473_v52 = vadd.s32 184, %v3374_v46 }
 0x20a   : > { %v1847_v42 = vadd.f32 %v1846_v35, %v3771_v38  ;;  %v2291_v62 = vsel %vm1597_vm12, 1.0, %v4196_v44  ;;  %v1912_v3 = vmul.f32 %v3733_v37, %v2935_v19  ;;  %v1973_v36 = vadd.f32 %v1972_v39, %v1910_v2 }
 0x20b   : > { %v1537_v35 = vadd.s32 %v3379_v30, %v1471_v0  ;;  %vm1599_vm14 = vcmp.lt.s32.totalorder %v1535_v23, 4232  ;;  %v3804_v18 = vmul.f32 %v2290_v45, %v3048_v12  ;;  %v1474_v58 = vadd.s32 192, %v3374_v46 }
 0x20c   : > { %v1848_v49 = vadd.f32 %v1847_v42, %v3779_v55  ;;  %v2292_v13 = vsel %vm1598_vm13, 1.0, %v4196_v44  ;;  %v1913_v32 = vmul.f32 %v3739_v4, %v2976_v51  ;;  %v1974_v15 = vadd.f32 %v1973_v36, %v1911_v11 }
 0x20d   : > { %v1538_v54 = vadd.s32 %v3379_v30, %v1472_v60  ;;  %vm1600_vm15 = vcmp.lt.s32.totalorder %v1536_v43, 4232  ;;  %v3813_v19 = vmul.f32 %v2291_v62, %v3052_v14  ;;  %v1475_v42 = vadd.s32 200, %v3374_v46 }
 0x20e   : > { %v1849_v40 = vadd.f32 %v1848_v49, %v3787_v22  ;;  %v2293_v0 = vsel %vm1599_vm14, 1.0, %v4196_v44  ;;  %v1914_v50 = vmul.f32 %v3746_v34, %v2980_v53  ;;  %v1975_v2 = vadd.f32 %v1974_v15, %v1912_v3 }
 0x20f   : > { %v1539_v57 = vadd.s32 %v3379_v30, %v1473_v52  ;;  %vm1601_vm0 = vcmp.lt.s32.totalorder %v1537_v35, 4232  ;;  %v3822_v51 = vmul.f32 %v2292_v13, %v3041_v8  ;;  %v1476_v23 = vadd.s32 208, %v3374_v46 }
 0x210   : > { %v1850_v20 = vadd.f32 %v1849_v40, %v3795_v24  ;;  %v2294_v49 = vsel %vm1600_vm15, 1.0, %v4196_v44  ;;  %v1915_v60 = vmul.f32 %v3755_v7, %v2969_v47  ;;  %v1976_v45 = vadd.f32 %v1975_v2, %v1913_v32 }
 0x211   : > { %v1540_v11 = vadd.s32 %v3379_v30, %v1474_v58  ;;  %vm1602_vm1 = vcmp.lt.s32.totalorder %v1538_v54, 4232  ;;  %v3831_v53 = vmul.f32 %v2293_v0, %v3043_v9  ;;  %v1477_v39 = vadd.s32 216, %v3374_v46 }
 0x212   : > { %v1851_v37 = vadd.f32 %v1850_v20, %v3804_v18  ;;  %v2295_v43 = vsel %vm1601_vm0, 1.0, %v4196_v44  ;;  %v1916_v40 = vmul.f32 %v3763_v56, %v2971_v48  ;;  %v1977_v52 = vadd.f32 %v1976_v45, %v1914_v50 }
 0x213   : > { %v1541_v62 = vadd.s32 %v3379_v30, %v1475_v42  ;;  %vm1603_vm2 = vcmp.lt.s32.totalorder %v1539_v57, 4232  ;;  %v3840_v47 = vmul.f32 %v2294_v49, %v3084_v16  ;;  %v1478_v3 = vadd.s32 224, %v3374_v46 }
 0x214   : > { %v1852_v4 = vadd.f32 %v1851_v37, %v3813_v19  ;;  %v2296_v36 = vsel %vm1602_vm1, 1.0, %v4196_v44  ;;  %v1917_v35 = vmul.f32 %v3771_v38, %v3012_v31  ;;  %v1978_v20 = vadd.f32 %v1977_v52, %v1915_v60 }
 0x215   : > { %v1542_v58 = vadd.s32 %v3379_v30, %v1476_v23  ;;  %vm1604_vm3 = vcmp.lt.s32.totalorder %v1540_v11, 4232  ;;  %v1793_v48 = vmul.f32 %v2295_v43, %v3088_v29  ;;  %v1479_v13 = vadd.s32 232, %v3374_v46 }
 0x216   : > { %v1853_v34 = vadd.f32 %v1852_v4, %v3822_v51  ;;  %v2297_v32 = vsel %vm1603_vm2, 1.0, %v4196_v44  ;;  %v1918_v15 = vmul.f32 %v3779_v55, %v3016_v33  ;;  %v1979_v54 = vadd.f32 %v1978_v20, %v1916_v40 }
 0x217   : > { %v1543_v37 = vadd.s32 %v3379_v30, %v1477_v39  ;;  %vm1605_vm4 = vcmp.lt.s32.totalorder %v1541_v62, 4232  ;;  %v1794_v31 = vmul.f32 %v2296_v36, %v3077_v5  ;;  %v1480_v42 = vadd.s32 240, %v3374_v46 }
 0x218   : > { %v1854_v7 = vadd.f32 %v1853_v34, %v3831_v53  ;;  %v2298_v0 = vsel %vm1604_vm3, 1.0, %v4196_v44  ;;  %v1919_v50 = vmul.f32 %v3787_v22, %v3005_v26  ;;  %v1980_v2 = vadd.f32 %v1979_v54, %v1917_v35 }
 0x219   : > { %v1544_v57 = vadd.s32 %v3379_v30, %v1478_v3  ;;  %vm1606_vm8 = vcmp.lt.s32.totalorder %v1542_v58, 4232  ;;  %v1795_v33 = vmul.f32 %v2297_v32, %v3079_v6  ;;  %v1481_v4 = vadd.s32 248, %v3374_v46  ;;  %v4200_v58 = vld [vmem:[#allocation29_spill] sm:$0xff] }
 0x21a   : > { %v1855_v56 = vadd.f32 %v1854_v7, %v3840_v47  ;;  %v2299_v23 = vsel %vm1605_vm4, 1.0, %v4196_v44  ;;  %v1920_v49 = vmul.f32 %v3795_v24, %v3007_v28  ;;  %v1981_v60 = vadd.f32 %v1980_v2, %v1918_v15  ;;  %v4201_v15 = vld [vmem:[#allocation37_spill] sm:$0xff] }
 0x21b   : > { %v1545_v45 = vadd.s32 %v3379_v30, %v1479_v13  ;;  %vm1607_vm9 = vcmp.lt.s32.totalorder %v1543_v37, 4232  ;;  %v1796_v26 = vmul.f32 %v2298_v0, %v3120_v1  ;;  %v1482_v11 = vadd.s32 256, %v3374_v46 }
 0x21c   : > { %v1856_v38 = vadd.f32 %v1855_v56, %v1793_v48  ;;  %v2300_v34 = vsel %vm1606_vm8, 1.0, %v4196_v44  ;;  %v1921_v39 = vmul.f32 %v3804_v18, %v3048_v12  ;;  %v1982_v43 = vadd.f32 %v1981_v60, %v1919_v50  ;;  %v4204_v60 = vld [vmem:[#allocation35_spill] sm:$0xff] }
 0x21d   : > { %v1546_v40 = vadd.s32 %v3379_v30, %v1480_v42  ;;  %vm1608_vm10 = vcmp.lt.s32.totalorder %v1544_v57, 4232  ;;  %v1797_v28 = vmul.f32 %v2299_v23, %v3124_v10  ;;  %v2301_v52 = vsel %vm1607_vm9, 1.0, %v4196_v44 }
 0x21e   : > { %v1857_v55 = vadd.f32 %v1856_v38, %v1794_v31  ;;  %v1922_v62 = vmul.f32 %v3813_v19, %v3052_v14  ;;  %v1983_v7 = vadd.f32 %v1982_v43, %v1920_v49  ;;  %v1547_v46 = vadd.s32 %v3379_v30, %v1481_v4  ;;  %v4206_v43 = vld [vmem:[#allocation8_spill] sm:$0xff] }
 0x21f   : > { %vm1609_vm5 = vcmp.lt.s32.totalorder %v1545_v45, 4232  ;;  %v1798_v3 = vmul.f32 %v2300_v34, %v3113_v41  ;;  %v2302_v12 = vsel %vm1608_vm10, 1.0, %v4196_v44  ;;  %v1923_v18 = vmul.f32 %v3822_v51, %v3041_v8  ;;  %v4202_v51 = vld [vmem:[#allocation39_spill] sm:$0xff] }
 0x220   : > { %v1858_v22 = vadd.f32 %v1857_v55, %v1795_v33  ;;  %v1984_v35 = vadd.f32 %v1983_v7, %v1921_v39  ;;  %v1548_v20 = vadd.s32 %v3379_v30, %v1482_v11  ;;  %vm1610_vm6 = vcmp.lt.s32.totalorder %v1546_v40, 4232  ;;  %v4205_v11 = vld [vmem:[#allocation7_spill] sm:$0xff]  ;;  %v4208_v7 = vld [vmem:[#allocation5_spill] sm:$0xff] }
 0x221   : > { %v1799_v56 = vmul.f32 %v2301_v52, %v4200_v58  ;;  %v2303_v14 = vsel %vm1609_vm5, 1.0, %v4196_v44  ;;  %v1924_v19 = vmul.f32 %v3831_v53, %v3043_v9  ;;  %vm1611_vm7 = vcmp.lt.s32.totalorder %v1547_v46, 4232  ;;  %v4203_v53 = vld [vmem:[#allocation34_spill] sm:$0xff] }
 0x222   : > { %v1859_v24 = vadd.f32 %v1858_v22, %v1796_v26  ;;  %v1985_v32 = vadd.f32 %v1984_v35, %v1922_v62  ;;  %v1800_v54 = vmul.f32 %v2302_v12, %v4201_v15  ;;  %v2304_v38 = vsel %vm1610_vm6, 1.0, %v4196_v44  ;;  %v4209_v12 = vld [vmem:[#allocation11_spill] sm:$0xff]  ;;  %v4210_v35 = vld [vmem:[#allocation12_spill] sm:$0xff] }
 0x223   : > { %v1925_v8 = vmul.f32 %v3840_v47, %v3084_v16  ;;  %vm1612_vm11 = vcmp.lt.s32.totalorder %v1548_v20, 4232  ;;  %v1801_v42 = vmul.f32 %v2303_v14, %v4202_v51  ;;  %v2305_v50 = vsel %vm1611_vm7, 1.0, %v4196_v44 }
 0x224   : > { %v1860_v36 = vadd.f32 %v1859_v24, %v1797_v28  ;;  %v1986_v30 = vadd.f32 %v1985_v32, %v1923_v18  ;;  %v1926_v2 = vmul.f32 %v1793_v48, %v3088_v29  ;;  %v1802_v57 = vmul.f32 %v2304_v38, %v4203_v53 }
 0x225   : > { %v2306_v4 = vsel %vm1612_vm11, 1.0, %v4196_v44  ;;  %v1927_v23 = vmul.f32 %v1794_v31, %v3077_v5  ;;  %v1803_v16 = vmul.f32 %v2305_v50, %v4204_v60  ;;  %v1928_v45 = vmul.f32 %v1795_v33, %v3079_v6  ;;  %v4207_v31 = vld [vmem:[#allocation3_spill] sm:$0xff] }
 0x226   : > { %v1861_v13 = vadd.f32 %v1860_v36, %v1798_v3  ;;  %v1987_v9 = vadd.f32 %v1986_v30, %v1924_v19  ;;  %v1804_v34 = vmul.f32 %v2306_v4, %v4205_v11  ;;  %v1929_v29 = vmul.f32 %v1796_v26, %v3120_v1  ;;  %v4212_v19 = vld [vmem:[#allocation10_spill] sm:$0xff] }
 0x227   : > { %v1805_v40 = vmul.f32 %v3536_v59, %v4206_v43  ;;  %v1930_v44 = vmul.f32 %v1797_v28, %v3124_v10  ;;  %v1806_v52 = vmul.f32 %v3541_v21, %v4207_v31  ;;  %v1931_v6 = vmul.f32 %v1798_v3, %v3113_v41 }
 0x228   : > { %v1862_v37 = vadd.f32 %v1861_v13, %v1799_v56  ;;  %v1988_v49 = vadd.f32 %v1987_v9, %v1925_v8  ;;  %v1807_v46 = vmul.f32 %v3546_v25, %v4208_v7  ;;  %v1932_v1 = vmul.f32 %v1799_v56, %v4200_v58  ;;  %v4211_v13 = vld [vmem:[#allocation9_spill] sm:$0xff] }
 0x229   : > { %v1808_v59 = vmul.f32 %v3551_v27, %v4209_v12  ;;  %v1933_v10 = vmul.f32 %v1800_v54, %v4201_v15  ;;  %v1809_v21 = vmul.f32 %v3556_v63, %v4210_v35  ;;  %v1934_v41 = vmul.f32 %v1801_v42, %v4202_v51  ;;  %v4214_v63 = vld [vmem:[#allocation42_spill] sm:$0xff] }
 0x22a   : > { %v1863_v0 = vadd.f32 %v1862_v37, %v1800_v54  ;;  %v1989_v22 = vadd.f32 %v1988_v49, %v1926_v2  ;;  %v1810_v25 = vmul.f32 %v3561_v61, %v4211_v13  ;;  %v1935_v58 = vmul.f32 %v1802_v57, %v4203_v53  ;;  %v4213_v37 = vld [vmem:[#allocation15_spill] sm:$0xff]  ;;  %v4217_v53 = vld [vmem:[#allocation13_spill] sm:$0xff]  ;;  %v4219_v49 = vld [vmem:[#allocation14_spill] sm:$0xff] }
 0x22b   : > { %v1811_v27 = vmul.f32 %v3566_v17, %v4212_v19  ;;  %v1936_v15 = vmul.f32 %v1803_v16, %v4204_v60  ;;  %v1812_v38 = vmul.f32 %v4214_v63, %v4213_v37  ;;  %v1937_v30 = vmul.f32 %v1804_v34, %v4205_v11  ;;  %v4216_v61 = vld [vmem:[#allocation43_spill] sm:$0xff]  ;;  %v4218_v17 = vld [vmem:[#allocation44_spill] sm:$0xff]  ;;  %v4220_v60 = vld [vmem:[#allocation45_spill] sm:$0xff] }
 0x22c   : > { %v1864_v55 = vadd.f32 %v1863_v0, %v1801_v42  ;;  %v1990_v48 = vadd.f32 %v1989_v22, %v1927_v23  ;;  %v4215_v42 = vld [vmem:[#allocation16_spill] sm:$0xff]  ;;  %v1938_v2 = vmul.f32 %v1805_v40, %v4206_v43  ;;  %v1939_v4 = vmul.f32 %v1806_v52, %v4207_v31  ;;  %v4221_v11 = vld [vmem:[#allocation19_spill] sm:$0xff] }
 0x22d   : > { %v1813_v0 = vmul.f32 %v4216_v61, %v4215_v42  ;;  %v1942_v31 = vmul.f32 %v1809_v21, %v4210_v35  ;;  %v1945_v35 = vmul.f32 %v1812_v38, %v4213_v37  ;;  %vm2038_vm12 = vcmask 1040384  }
 0x22e   : > { %v1865_v47 = vadd.f32 %v1864_v55, %v1802_v57  ;;  %v1991_v5 = vadd.f32 %v1990_v48, %v1928_v45  ;;  %v1814_v57 = vmul.f32 %v4218_v17, %v4217_v53  ;;  %v1940_v45 = vmul.f32 %v1807_v46, %v4208_v7 }
 0x22f   : > { %v1941_v48 = vmul.f32 %v1808_v59, %v4209_v12  ;;  %v1943_v7 = vmul.f32 %v1810_v25, %v4211_v13  ;;  %v1944_v12 = vmul.f32 %v1811_v27, %v4212_v19  ;;  %v1946_v13 = vmul.f32 %v1813_v0, %v4215_v42 }
 0x230   : > { %v1866_v39 = vadd.f32 %v1865_v47, %v1803_v16  ;;  %v1992_v33 = vadd.f32 %v1991_v5, %v1929_v29  ;;  %v1815_v16 = vmul.f32 %v4220_v60, %v4219_v49  ;;  %v1947_v19 = vmul.f32 %v1814_v57, %v4217_v53 }
 0x231   : > { %vm2040_vm13 = vcmask 1041408  }
 0x232   : > { %v1867_v24 = vadd.f32 %v1866_v39, %v1804_v34  ;;  %v1993_v26 = vadd.f32 %v1992_v33, %v1930_v44  ;;  %v4222_v34 = vld [vmem:[#allocation46_spill] sm:$0xff]  ;;  %v1948_v37 = vmul.f32 %v1815_v16, %v4219_v49 }
 0x233   : > { %v1816_v39 = vmul.f32 %v4222_v34, %v4221_v11 }
 0x234   : > { %v1868_v62 = vadd.f32 %v1867_v24, %v1805_v40  ;;  %v1994_v28 = vadd.f32 %v1993_v26, %v1931_v6  ;;  %v4223_v40 = vld [vmem:[#allocation20_spill] sm:$0xff]  ;;  %v4224_v24 = vld [vmem:[#allocation47_spill] sm:$0xff]  ;;  %v4228_v26 = vld [vmem:[#allocation49_spill] sm:$0xff] }
 0x235   : > { %v1817_v44 = vmul.f32 %v4224_v24, %v4223_v40  ;;  %v4226_v6 = vld [vmem:[#allocation48_spill] sm:$0xff]  ;;  %v1949_v42 = vmul.f32 %v1816_v39, %v4221_v11 }
 0x236   : > { %v1869_v36 = vadd.f32 %v1868_v62, %v1806_v52  ;;  %v1995_v3 = vadd.f32 %v1994_v28, %v1932_v1  ;;  %v4225_v62 = vld [vmem:[#allocation17_spill] sm:$0xff]  ;;  %v4227_v1 = vld [vmem:[#allocation18_spill] sm:$0xff]  ;;  %v4229_v28 = vld [vmem:[#allocation23_spill] sm:$0xff] }
 0x237   : > { %v1818_v33 = vmul.f32 %v4226_v6, %v4225_v62  ;;  %v1950_v53 = vmul.f32 %v1817_v44, %v4223_v40 }
 0x238   : > { %v1870_v18 = vadd.f32 %v1869_v36, %v1807_v46  ;;  %v1996_v56 = vadd.f32 %v1995_v3, %v1933_v10 }
 0x239   : > { %v1951_v49 = vmul.f32 %v1818_v33, %v4225_v62 }
 0x23a   : > { %v1871_v20 = vadd.f32 %v1870_v18, %v1808_v59  ;;  %v1997_v54 = vadd.f32 %v1996_v56, %v1934_v41  ;;  %v1819_v18 = vmul.f32 %v4228_v26, %v4227_v1 }
 0x23c   : > { %v1872_v14 = vadd.f32 %v1871_v20, %v1809_v21  ;;  %v1998_v51 = vadd.f32 %v1997_v54, %v1935_v58  ;;  %v4230_v20 = vld [vmem:[#allocation50_spill] sm:$0xff]  ;;  %v4232_v58 = vld [vmem:[#allocation51_spill] sm:$0xff]  ;;  %v4234_v54 = vld [vmem:[#allocation52_spill] sm:$0xff]  ;;  %v1952_v11 = vmul.f32 %v1819_v18, %v4227_v1 }
 0x23d   : > { %v1820_v41 = vmul.f32 %v4230_v20, %v4229_v28 }
 0x23e   : > { %v1873_v32 = vadd.f32 %v1872_v14, %v1810_v25  ;;  %v1999_v9 = vadd.f32 %v1998_v51, %v1936_v15  ;;  %v4231_v14 = vld [vmem:[#allocation24_spill] sm:$0xff]  ;;  %v4233_v15 = vld [vmem:[#allocation21_spill] sm:$0xff] }
 0x23f   : > { %v1821_v56 = vmul.f32 %v4232_v58, %v4231_v14  ;;  %v1822_v63 = vmul.f32 %v4234_v54, %v4233_v15  ;;  %v4236_v51 = vld [vmem:[#allocation53_spill] sm:$0xff]  ;;  %v1953_v40 = vmul.f32 %v1820_v41, %v4229_v28 }
 0x240   : > { %v1874_v8 = vadd.f32 %v1873_v32, %v1811_v27  ;;  %v2000_v23 = vadd.f32 %v1999_v9, %v1937_v30  ;;  %v4235_v30 = vld [vmem:[#allocation22_spill] sm:$0xff] }
 0x241   : > { %v1823_v61 = vmul.f32 %v4236_v51, %v4235_v30  ;;  %v4238_v9 = vld [vmem:[#allocation54_spill] sm:$0xff]  ;;  %v1954_v62 = vmul.f32 %v1821_v56, %v4231_v14  ;;  %v1955_v1 = vmul.f32 %v1822_v63, %v4233_v15 }
 0x242   : > { %v1875_v50 = vadd.f32 %v1874_v8, %v1812_v38  ;;  %v2001_v22 = vadd.f32 %v2000_v23, %v1938_v2  ;;  %v4237_v2 = vld [vmem:[#allocation27_spill] sm:$0xff] }
 0x243   : > { %v1824_v17 = vmul.f32 %v4238_v9, %v4237_v2  ;;  %v4240_v23 = vld [vmem:[#allocation55_spill] sm:$0xff]  ;;  %v1956_v28 = vmul.f32 %v1823_v61, %v4235_v30 }
 0x244   : > { %v1876_v55 = vadd.f32 %v1875_v50, %v1813_v0  ;;  %v2002_v43 = vadd.f32 %v2001_v22, %v1939_v4  ;;  %v4239_v4 = vld [vmem:[#allocation28_spill] sm:$0xff] }
 0x245   : > { %v1825_v60 = vmul.f32 %v4240_v23, %v4239_v4  ;;  %v4242_v22 = vld [vmem:[#allocation56_spill] sm:$0xff]  ;;  %v1957_v14 = vmul.f32 %v1824_v17, %v4237_v2 }
 0x246   : > { %v1877_v47 = vadd.f32 %v1876_v55, %v1814_v57  ;;  %v2003_v52 = vadd.f32 %v2002_v43, %v1940_v45  ;;  %v4241_v45 = vld [vmem:[#allocation25_spill] sm:$0xff] }
 0x247   : > { %v1826_v34 = vmul.f32 %v4242_v22, %v4241_v45  ;;  %v4244_v43 = vld [vmem:[#allocation57_spill] sm:$0xff]  ;;  %v1958_v15 = vmul.f32 %v1825_v60, %v4239_v4 }
 0x248   : > { %v1878_v29 = vadd.f32 %v1877_v47, %v1815_v16  ;;  %v2004_v46 = vadd.f32 %v2003_v52, %v1941_v48  ;;  %v4243_v48 = vld [vmem:[#allocation26_spill] sm:$0xff] }
 0x249   : > { %v1827_v24 = vmul.f32 %v4244_v43, %v4243_v48  ;;  %v4246_v52 = vld [vmem:[#allocation58_spill] sm:$0xff]  ;;  %v1959_v30 = vmul.f32 %v1826_v34, %v4241_v45 }
 0x24a   : > { %v1879_v5 = vadd.f32 %v1878_v29, %v1816_v39  ;;  %v2005_v59 = vadd.f32 %v2004_v46, %v1942_v31  ;;  %v4245_v31 = vld [vmem:[#allocation32_spill] sm:$0xff]  ;;  %v4248_v46 = vld [vmem:[#allocation59_spill] sm:$0xff] }
 0x24b   : > { %v1828_v6 = vmul.f32 %v4246_v52, %v4245_v31  ;;  %v1960_v2 = vmul.f32 %v1827_v24, %v4243_v48 }
 0x24c   : > { %v1880_v36 = vadd.f32 %v1879_v5, %v1817_v44  ;;  %v2006_v21 = vadd.f32 %v2005_v59, %v1943_v7  ;;  %v4247_v7 = vld [vmem:[#allocation33_spill] sm:$0xff]  ;;  %v4250_v59 = vld [vmem:[#allocation60_spill] sm:$0xff] }
 0x24d   : > { %v1829_v26 = vmul.f32 %v4248_v46, %v4247_v7 }
 0x24e   : > { %v1881_v10 = vadd.f32 %v1880_v36, %v1818_v33  ;;  %v2007_v25 = vadd.f32 %v2006_v21, %v1944_v12  ;;  %v4249_v12 = vld [vmem:[#allocation30_spill] sm:$0xff]  ;;  %v4252_v21 = vld [vmem:[#allocation61_spill] sm:$0xff] }
 0x24f   : > { %v1830_v20 = vmul.f32 %v4250_v59, %v4249_v12  ;;  %v1962_v4 = vmul.f32 %v1829_v26, %v4247_v7 }
 0x250   : > { %v1882_v3 = vadd.f32 %v1881_v10, %v1819_v18  ;;  %v2008_v27 = vadd.f32 %v2007_v25, %v1945_v35  ;;  %v4251_v35 = vld [vmem:[#allocation31_spill] sm:$0xff]  ;;  %v4254_v25 = vld [vmem:[#allocation62_spill] sm:$0xff] }
 0x251   : > { %v1831_v58 = vmul.f32 %v4252_v21, %v4251_v35 }
 0x252   : > { %v1883_v32 = vadd.f32 %v1882_v3, %v1820_v41  ;;  %v2009_v38 = vadd.f32 %v2008_v27, %v1946_v13  ;;  %v4253_v13 = vld [vmem:[#allocation40_spill] sm:$0xff]  ;;  %v4256_v27 = vld [vmem:[#allocation63_spill] sm:$0xff] }
 0x253   : > { %v1832_v54 = vmul.f32 %v4254_v25, %v4253_v13  ;;  %v1964_v45 = vmul.f32 %v1831_v58, %v4251_v35 }
 0x254   : > { %v1884_v8 = vadd.f32 %v1883_v32, %v1821_v56  ;;  %v2010_v0 = vadd.f32 %v2009_v38, %v1947_v19  ;;  %v4255_v19 = vld [vmem:[#allocation41_spill] sm:$0xff]  ;;  %v4258_v38 = vld [vmem:[#allocation64_spill] sm:$0xff] }
 0x255   : > { %v1833_v51 = vmul.f32 %v4256_v27, %v4255_v19  ;;  %v1965_v43 = vmul.f32 %v1832_v54, %v4253_v13 }
 0x256   : > { %v1885_v50 = vadd.f32 %v1884_v8, %v1822_v63  ;;  %v2011_v57 = vadd.f32 %v2010_v0, %v1948_v37  ;;  %v4257_v37 = vld [vmem:[#allocation36_spill] sm:$0xff]  ;;  %v4260_v0 = vld [vmem:[#allocation65_spill] sm:$0xff] }
 0x257   : > { %v1834_v9 = vmul.f32 %v4258_v38, %v4257_v37  ;;  %v1966_v48 = vmul.f32 %v1833_v51, %v4255_v19 }
 0x258   : > { %v1886_v55 = vadd.f32 %v1885_v50, %v1823_v61  ;;  %v2012_v16 = vadd.f32 %v2011_v57, %v1949_v42  ;;  %v4259_v42 = vld [vmem:[#allocation38_spill] sm:$0xff]  ;;  %v1961_v57 = vmul.f32 %v1828_v6, %v4245_v31 }
 0x259   : > { %v1835_v23 = vmul.f32 %v4260_v0, %v4259_v42 }
 0x25a   : > { %v1887_v47 = vadd.f32 %v1886_v55, %v1824_v17  ;;  %v2013_v39 = vadd.f32 %v2012_v16, %v1950_v53 }
 0x25b   : > { %v1968_v52 = vmul.f32 %v1835_v23, %v4259_v42 }
 0x25c   : > { %v1888_v29 = vadd.f32 %v1887_v47, %v1825_v60  ;;  %v2014_v44 = vadd.f32 %v2013_v39, %v1951_v49  ;;  %v1967_v39 = vmul.f32 %v1834_v9, %v4257_v37 }
 0x25e   : > { %v1889_v5 = vadd.f32 %v1888_v29, %v1826_v34  ;;  %v2015_v33 = vadd.f32 %v2014_v44, %v1952_v11  ;;  %v1963_v29 = vmul.f32 %v1830_v20, %v4249_v12 }
 0x260   : > { %v1890_v36 = vadd.f32 %v1889_v5, %v1827_v24  ;;  %v2016_v18 = vadd.f32 %v2015_v33, %v1953_v40 }
 0x262   : > { %v1891_v10 = vadd.f32 %v1890_v36, %v1828_v6  ;;  %v2017_v41 = vadd.f32 %v2016_v18, %v1954_v62 }
 0x264   : > { %v1892_v3 = vadd.f32 %v1891_v10, %v1829_v26  ;;  %v2018_v56 = vadd.f32 %v2017_v41, %v1955_v1 }
 0x266   : > { %v1893_v32 = vadd.f32 %v1892_v3, %v1830_v20  ;;  %v2019_v63 = vadd.f32 %v2018_v56, %v1956_v28 }
 0x268   : > { %v1894_v8 = vadd.f32 %v1893_v32, %v1831_v58  ;;  %v2020_v61 = vadd.f32 %v2019_v63, %v1957_v14 }
 0x26a   : > { %v1895_v50 = vadd.f32 %v1894_v8, %v1832_v54  ;;  %v2021_v17 = vadd.f32 %v2020_v61, %v1958_v15 }
 0x26c   : > { %v1896_v55 = vadd.f32 %v1895_v50, %v1833_v51  ;;  %v2022_v22 = vadd.f32 %v2021_v17, %v1959_v30 }
 0x26e   : > { %v1897_v47 = vadd.f32 %v1896_v55, %v1834_v9  ;;  %v2023_v60 = vadd.f32 %v2022_v22, %v1960_v2 }
 0x270   : > { %v1898_v53 = vadd.f32 %v1897_v47, %v1835_v23  ;;  %v2024_v49 = vadd.f32 %v2023_v60, %v1961_v57 }
 0x272   : > { %v2025_v34 = vadd.f32 %v2024_v49, %v1962_v4  ;;  %v1899_v16 = vrot.slane %v1898_v53, 4 }
 0x274   : > { %v2026_v5 = vadd.f32 %v2025_v34, %v1963_v29  ;;  %v1900_v11 = vadd.f32 %v1899_v16, %v1898_v53 }
 0x276   : > { %v2027_v24 = vadd.f32 %v2026_v5, %v1964_v45  ;;  %v1901_v36 = vrot.slane %v1900_v11, 2 }
 0x278   : > { %v2028_v31 = vadd.f32 %v2027_v24, %v1965_v43  ;;  %v1902_v7 = vadd.f32 %v1901_v36, %v1900_v11 }
 0x27a   : > { %v2029_v6 = vadd.f32 %v2028_v31, %v1966_v48  ;;  %v1903_v10 = vrot.slane %v1902_v7, 1 }
 0x27c   : > { %v2030_v40 = vadd.f32 %v2029_v6, %v1967_v39  ;;  %v1904_v12 = vadd.f32 %v1903_v10, %v1902_v7 }
 0x27e   : > { %v2031_v44 = vadd.f32 %v2030_v40, %v1968_v52 }
 0x280   : > { %v2032_v46 = vrot.slane %v2031_v44, 4 }
 0x282   : > { %v2033_v26 = vadd.f32 %v2032_v46, %v2031_v44 }
 0x284   : > { %v2034_v62 = vrot.slane %v2033_v26, 2 }
 0x286   : > { %v2035_v33 = vadd.f32 %v2034_v62, %v2033_v26 }
 0x288   : > { %v2036_v59 = vrot.slane %v2035_v33, 1 }
 0x28a   : > { %v2037_v20 = vadd.f32 %v2036_v59, %v2035_v33 }
 0x28c   : > { %v2039_v3 = vsel %vm2038_vm12, %v1904_v12, %v2037_v20 }
 0x28d   : > { %v2041_v1 = vsel %vm2040_vm13, %v2039_v3, 0.0 }
 0x28e   : > { %2042 = vst [vmem:[%s2802_s26] sm:$0xff] %v2041_v1 }
 0x28f PF: > { %s15_s15 = sadd.s32 1, %s2751_s15  }
 0x290   : > { %p12_p7 = scmp.ge.s32.totalorder %s15_s15, 11  }
 0x292   :  { %14 = sbr.rel (!%p12_p7) target bundleno = 1 (0x1), region = 82 }

// kernel: encoder_forward.7
= control target key start
LH: loop header
LB: loop body
LE: loop exit
PB: predicated region body
PF: predicated region fallthrough
CT: control target
= control target key end

     0   :  { %s5418_s15 = smov 0   ;;  %s7071_s0 = inlined_call_operand.vmem [shape: bf16[896,800], index: 0, kind: input, shape index: {}]   ;;  %s7072_s1 = inlined_call_operand.vmem [shape: bf16[800,128], index: 1, kind: input, shape index: {}]   ;;  %s7073_s2 = inlined_call_operand.vmem [shape: f32[8,128], index: 2, kind: input, shape index: {}]   ;;  %s7074_s3 = inlined_call_operand.vmem [shape: bf16[896,128], index: 3, kind: output, shape index: {0}]   ;;  %s7075_s4 = inlined_call_operand.vmem [shape: f32[16,128], index: 4, kind: output, shape index: {1}]  }
   0x1 LB: > { %s5424_s16 = sadd.s32 4294967295, %s5389_s15   ;;  %p4078_p0 = scmp.ge.s32.totalorder %s5389_s15, 1  ;;  %s5389_s15 = sphi %s5418_s15, %s15_s15  }
   0x2   : > { %p167_p1 = scmp.lt.s32.totalorder %s5389_s15, 3 }
   0x4   : > { %p168_p2 = pnand %p4078_p0, %p167_p1 }
   0x6   : > { %171 = sbr.rel (%p168_p2) target bundleno = 995 (0x3e3), region = 32 }
   0xd   : > { %p211_p3 = scmp.lt.s32.totalorder %s5424_s16, 1  ;;  %v5391_v0 = vmov 0   ;;  %v5053_v1 = vld [vmem:[%s7072_s1] sm:$0xff]   ;;  %v5055_v3 = vld [vmem:[%s7072_s1 + $0x8] sm:$0xff]   ;;  %v5057_v5 = vld [vmem:[%s7072_s1 + $0x10] sm:$0xff]   ;;  %s198_s12 = smul.u32 56, %s5424_s16 }
   0xe   : > { %1910 = vmatprep.subr.bf16.mxu1 %v5391_v0  ;;  %2167 = vmatprep.subr.bf16.mxu0 %v5391_v0  ;;  %v5438_v2 = vld [vmem:[%s7072_s1 + $0x80] sm:$0xff]   ;;  %v5448_v4 = vld [vmem:[%s7072_s1 + $0x88] sm:$0xff]   ;;  %v5464_v6 = vld [vmem:[%s7072_s1 + $0x90] sm:$0xff]   ;;  %vm1825_vm0 = vcmask 261120   ;;  %p4413_p5 = scmp.ge.s32.totalorder %s5424_s16, 1 }
   0xf   : > { %s212_s19 = scalar_select %p211_p3, %s5424_s16, 1  ;;  %1911 = vmatpush1.bf16.msra.mxu1 %v5053_v1  ;;  %2168 = vmatpush1.bf16.msra.mxu0 %v5438_v2  ;;  %v5059_v7 = vld [vmem:[%s7072_s1 + $0x18] sm:$0xff]   ;;  %v5061_v9 = vld [vmem:[%s7072_s1 + $0x20] sm:$0xff]   ;;  %v5063_v11 = vld [vmem:[%s7072_s1 + $0x28] sm:$0xff]  }
  0x10   : > { %1912 = vmatprep.subr.bf16.mxu1 %v5391_v0  ;;  %2169 = vmatprep.subr.bf16.mxu0 %v5391_v0  ;;  %v5475_v8 = vld [vmem:[%s7072_s1 + $0x98] sm:$0xff]   ;;  %v5487_v10 = vld [vmem:[%s7072_s1 + $0xa0] sm:$0xff]   ;;  %p199_p4 = scmp.lt.s32.totalorder %s198_s12, 111  ;;  %v5498_v12 = vld [vmem:[%s7072_s1 + $0xa8] sm:$0xff]   ;;  %vm3456_vm1 = vcmask (!%p4413_p5), 1040384   ;;  %vm3458_vm2 = vcmask (!%p4413_p5), 1041408  }
  0x11   : > { %s4081_s24 = sshll.u32 %s212_s19, 3  ;;  %v5065_v13 = vld [vmem:[%s7072_s1 + $0x30] sm:$0xff]   ;;  %v5067_v15 = vld [vmem:[%s7072_s1 + $0x38] sm:$0xff]   ;;  %v5069_v17 = vld [vmem:[%s7072_s1 + $0x40] sm:$0xff]  }
  0x12   : > { %s5453_s29 = scalar_lea.vmem %s7075_s4, %s4081_s24  ;;  %s7277_s12 = smov (!%p199_p4, %s198_s12), 111  ;;  %v5511_v14 = vld [vmem:[%s7072_s1 + $0xb0] sm:$0xff]   ;;  %v5523_v16 = vld [vmem:[%s7072_s1 + $0xb8] sm:$0xff]   ;;  %v5539_v18 = vld [vmem:[%s7072_s1 + $0xc0] sm:$0xff]  }
  0x13   : > { %1913 = vmatpush1.bf16.msra.mxu1 %v5055_v3  ;;  %2170 = vmatpush1.bf16.msra.mxu0 %v5448_v4  ;;  %s5042_s27 = smul.u32 28, %s7277_s12  ;;  %v5071_v21 = vld [vmem:[%s7072_s1 + $0x48] sm:$0xff]   ;;  %v5073_v23 = vld [vmem:[%s7072_s1 + $0x50] sm:$0xff]   ;;  %v5075_v25 = vld [vmem:[%s7072_s1 + $0x58] sm:$0xff]  }
  0x14   : > { %1914 = vmatprep.subr.bf16.mxu1 %v5391_v0  ;;  %2171 = vmatprep.subr.bf16.mxu0 %v5391_v0  ;;  %v5552_v22 = vld [vmem:[%s7072_s1 + $0xc8] sm:$0xff]   ;;  %v5563_v24 = vld [vmem:[%s7072_s1 + $0xd0] sm:$0xff]   ;;  %v5574_v26 = vld [vmem:[%s7072_s1 + $0xd8] sm:$0xff]  }
  0x15   : > { %s5529_s9 = scalar_lea.vmem %s7071_s0, %s5042_s27  ;;  %v5077_v27 = vld [vmem:[%s7072_s1 + $0x60] sm:$0xff]   ;;  %v5079_v29 = vld [vmem:[%s7072_s1 + $0x68] sm:$0xff]   ;;  %v5081_v31 = vld [vmem:[%s7072_s1 + $0x70] sm:$0xff]  }
  0x16   : > { %v5087_v19 = vld [vmem:[%s5529_s9 + $0x4] ss:$28 sps:$4 sm:$0xff]   ;;  %v5090_v20 = vld [vmem:[%s5529_s9 + $0xc] ss:$28 sps:$4 sm:$0xff]   ;;  %v5607_v32 = vld [vmem:[%s7072_s1 + $0xf0] sm:$0xff]  }
  0x17   : > { %1915 = vmatpush1.bf16.msra.mxu1 %v5057_v5  ;;  %2172 = vmatpush1.bf16.msra.mxu0 %v5464_v6  ;;  %v5585_v28 = vld [vmem:[%s7072_s1 + $0xe0] sm:$0xff]   ;;  %v5596_v30 = vld [vmem:[%s7072_s1 + $0xe8] sm:$0xff]   ;;  %v5083_v33 = vld [vmem:[%s7072_s1 + $0x78] sm:$0xff]  }
  0x18   : > { %1916 = vmatprep.subr.bf16.mxu1 %v5391_v0  ;;  %2173 = vmatprep.subr.bf16.mxu0 %v5391_v0  ;;  %v5618_v34 = vld [vmem:[%s7072_s1 + $0xf8] sm:$0xff]   ;;  %v5088_v36 = vld [vmem:[%s5529_s9 + $0x8] ss:$28 sps:$4 sm:$0xff]   ;;  %v5099_v43 = vld [vmem:[%s5529_s9 + $0x74] ss:$28 sps:$4 sm:$0xff]  }
  0x19   : > { %1942 = vmatprep.mubr.bf16.mxu1 %v5087_v19  ;;  %2199 = vmatprep.mubr.bf16.mxu0 %v5090_v20  ;;  %v5085_v35 = vld [vmem:[%s5529_s9] ss:$28 sps:$4 sm:$0xff]   ;;  %v5098_v40 = vld [vmem:[%s7072_s1 + $0x108] sm:$0xff]   ;;  %v5096_v41 = vld [vmem:[%s5529_s9 + $0x38] ss:$28 sps:$4 sm:$0xff]  }
  0x1a   : > { %v5091_v37 = vld [vmem:[%s7072_s1 + $0x100] sm:$0xff]   ;;  %v5092_v38 = vld [vmem:[%s5529_s9 + $0x3c] ss:$28 sps:$4 sm:$0xff]   ;;  %v5105_v45 = vld [vmem:[%s7072_s1 + $0x110] sm:$0xff]  }
  0x1b   : > { %1917 = vmatpush1.bf16.msra.mxu1 %v5059_v7  ;;  %2174 = vmatpush1.bf16.msra.mxu0 %v5475_v8  ;;  %v5094_v39 = vld [vmem:[%s5529_s9 + $0x44] ss:$28 sps:$4 sm:$0xff]   ;;  %v5101_v44 = vld [vmem:[%s5529_s9 + $0x7c] ss:$28 sps:$4 sm:$0xff]   ;;  %v5103_v47 = vld [vmem:[%s5529_s9 + $0x70] ss:$28 sps:$4 sm:$0xff]  }
  0x1c   : > { %1918 = vmatprep.subr.bf16.mxu1 %v5391_v0  ;;  %2175 = vmatprep.subr.bf16.mxu0 %v5391_v0  ;;  %v5097_v42 = vld [vmem:[%s5529_s9 + $0x40] ss:$28 sps:$4 sm:$0xff]   ;;  %v5104_v48 = vld [vmem:[%s5529_s9 + $0x78] ss:$28 sps:$4 sm:$0xff]   ;;  %v5106_v49 = vld [vmem:[%s5529_s9 + $0xac] ss:$28 sps:$4 sm:$0xff]  }
  0x1d   : > { %v5118_v46 = vld [vmem:[%s7072_s1 + $0x118] sm:$0xff]   ;;  %v5108_v50 = vld [vmem:[%s5529_s9 + $0xb4] ss:$28 sps:$4 sm:$0xff]   ;;  %v5125_v51 = vld [vmem:[%s7072_s1 + $0x120] sm:$0xff]  }
  0x1e   : > { %v5132_v52 = vld [vmem:[%s7072_s1 + $0x128] sm:$0xff]   ;;  %v5112_v55 = vld [vmem:[%s5529_s9 + $0xe4] ss:$28 sps:$4 sm:$0xff]   ;;  %v5145_v57 = vld [vmem:[%s7072_s1 + $0x130] sm:$0xff]  }
  0x1f   : > { %1919 = vmatpush1.bf16.msra.mxu1 %v5061_v9  ;;  %2176 = vmatpush1.bf16.msra.mxu0 %v5487_v10  ;;  %v5110_v53 = vld [vmem:[%s5529_s9 + $0xa8] ss:$28 sps:$4 sm:$0xff]   ;;  %v5111_v54 = vld [vmem:[%s5529_s9 + $0xb0] ss:$28 sps:$4 sm:$0xff]   ;;  %v5152_v58 = vld [vmem:[%s7072_s1 + $0x138] sm:$0xff]  }
  0x20   : > { %1920 = vmatprep.subr.bf16.mxu1 %v5391_v0  ;;  %2177 = vmatprep.subr.bf16.mxu0 %v5391_v0  ;;  %v5114_v56 = vld [vmem:[%s5529_s9 + $0xec] ss:$28 sps:$4 sm:$0xff]   ;;  %v5116_v59 = vld [vmem:[%s5529_s9 + $0xe0] ss:$28 sps:$4 sm:$0xff]   ;;  %v5131_v9 = vld [vmem:[%s5529_s9 + $0x158] ss:$28 sps:$4 sm:$0xff]  }
  0x21   : > { %v5117_v60 = vld [vmem:[%s5529_s9 + $0xe8] ss:$28 sps:$4 sm:$0xff]   ;;  %v5119_v61 = vld [vmem:[%s5529_s9 + $0x11c] ss:$28 sps:$4 sm:$0xff]   ;;  %v5130_v7 = vld [vmem:[%s5529_s9 + $0x150] ss:$28 sps:$4 sm:$0xff]  }
  0x22   : > { %v5121_v62 = vld [vmem:[%s5529_s9 + $0x124] ss:$28 sps:$4 sm:$0xff]   ;;  %v5172_v1 = vld [vmem:[%s7072_s1 + $0x148] sm:$0xff]   ;;  %v5128_v5 = vld [vmem:[%s5529_s9 + $0x15c] ss:$28 sps:$4 sm:$0xff]  }
  0x23   : > { %1921 = vmatpush1.bf16.msra.mxu1 %v5063_v11  ;;  %2178 = vmatpush1.bf16.msra.mxu0 %v5498_v12  ;;  %v5159_v63 = vld [vmem:[%s7072_s1 + $0x140] sm:$0xff]   ;;  %v5135_v11 = vld [vmem:[%s5529_s9 + $0x194] ss:$28 sps:$4 sm:$0xff]   ;;  %v5224_v20 = vld [vmem:[%s7072_s1 + $0x178] sm:$0xff]  }
  0x24   : > { %1922 = vmatprep.subr.bf16.mxu1 %v5391_v0  ;;  %2179 = vmatprep.subr.bf16.mxu0 %v5391_v0  ;;  %v5124_v3 = vld [vmem:[%s5529_s9 + $0x120] ss:$28 sps:$4 sm:$0xff]  }
  0x25   : > { %v5143_v19 = vld [vmem:[%s5529_s9 + $0x1c0] ss:$28 sps:$4 sm:$0xff]  }
  0x27   : > { %1923 = vmatpush1.bf16.msra.mxu1 %v5065_v13  ;;  %2180 = vmatpush1.bf16.msra.mxu0 %v5511_v14  ;;  %v5137_v13 = vld [vmem:[%s5529_s9 + $0x188] ss:$28 sps:$4 sm:$0xff]  }
  0x28   : > { %1924 = vmatprep.subr.bf16.mxu1 %v5391_v0  ;;  %2181 = vmatprep.subr.bf16.mxu0 %v5391_v0 }
  0x2b   : > { %1925 = vmatpush1.bf16.msra.mxu1 %v5067_v15  ;;  %2182 = vmatpush1.bf16.msra.mxu0 %v5523_v16  ;;  %v5138_v15 = vld [vmem:[%s5529_s9 + $0x190] ss:$28 sps:$4 sm:$0xff]  }
  0x2c   : > { %1926 = vmatprep.subr.bf16.mxu1 %v5391_v0  ;;  %2183 = vmatprep.subr.bf16.mxu0 %v5391_v0 }
  0x2f   : > { %1927 = vmatpush1.bf16.msra.mxu1 %v5069_v17  ;;  %2184 = vmatpush1.bf16.msra.mxu0 %v5539_v18  ;;  %v5141_v17 = vld [vmem:[%s5529_s9 + $0x1cc] ss:$28 sps:$4 sm:$0xff]  }
  0x30   : > { %1928 = vmatprep.subr.bf16.mxu1 %v5391_v0  ;;  %2185 = vmatprep.subr.bf16.mxu0 %v5391_v0 }
  0x33   : > { %1929 = vmatpush1.bf16.msra.mxu1 %v5071_v21  ;;  %2186 = vmatpush1.bf16.msra.mxu0 %v5552_v22  ;;  %v5144_v21 = vld [vmem:[%s5529_s9 + $0x1c8] ss:$28 sps:$4 sm:$0xff]  }
  0x34   : > { %1930 = vmatprep.subr.bf16.mxu1 %v5391_v0  ;;  %2187 = vmatprep.subr.bf16.mxu0 %v5391_v0 }
  0x37   : > { %1931 = vmatpush1.bf16.msra.mxu1 %v5073_v23  ;;  %2188 = vmatpush1.bf16.msra.mxu0 %v5563_v24  ;;  %v5148_v23 = vld [vmem:[%s5529_s9 + $0x204] ss:$28 sps:$4 sm:$0xff]  }
  0x38   : > { %1932 = vmatprep.subr.bf16.mxu1 %v5391_v0  ;;  %2189 = vmatprep.subr.bf16.mxu0 %v5391_v0 }
  0x3b   : > { %1933 = vmatpush1.bf16.msra.mxu1 %v5075_v25  ;;  %2190 = vmatpush1.bf16.msra.mxu0 %v5574_v26  ;;  %v5151_v25 = vld [vmem:[%s5529_s9 + $0x200] ss:$28 sps:$4 sm:$0xff]  }
  0x3c   : > { %1934 = vmatprep.subr.bf16.mxu1 %v5391_v0  ;;  %2191 = vmatprep.subr.bf16.mxu0 %v5391_v0 }
  0x3f   : > { %1935 = vmatpush1.bf16.msra.mxu1 %v5077_v27  ;;  %2192 = vmatpush1.bf16.msra.mxu0 %v5585_v28  ;;  %v5155_v27 = vld [vmem:[%s5529_s9 + $0x23c] ss:$28 sps:$4 sm:$0xff]  }
  0x40   : > { %1936 = vmatprep.subr.bf16.mxu1 %v5391_v0  ;;  %2193 = vmatprep.subr.bf16.mxu0 %v5391_v0 }
  0x43   : > { %1937 = vmatpush1.bf16.msra.mxu1 %v5079_v29  ;;  %2194 = vmatpush1.bf16.msra.mxu0 %v5596_v30  ;;  %v5160_v29 = vld [vmem:[%s5529_s9 + $0x26c] ss:$28 sps:$4 sm:$0xff]  }
  0x44   : > { %1938 = vmatprep.subr.bf16.mxu1 %v5391_v0  ;;  %2195 = vmatprep.subr.bf16.mxu0 %v5391_v0 }
  0x47   : > { %1939 = vmatpush1.bf16.msra.mxu1 %v5081_v31  ;;  %2196 = vmatpush1.bf16.msra.mxu0 %v5607_v32  ;;  %v5164_v31 = vld [vmem:[%s5529_s9 + $0x268] ss:$28 sps:$4 sm:$0xff]  }
  0x48   : > { %1940 = vmatprep.subr.bf16.mxu1 %v5391_v0  ;;  %2197 = vmatprep.subr.bf16.mxu0 %v5391_v0 }
  0x4b   : > { %1941 = vmatpush1.bf16.msra.mxu1 %v5083_v33  ;;  %2198 = vmatpush1.bf16.msra.mxu0 %v5618_v34  ;;  %v5166_v33 = vld [vmem:[%s5529_s9 + $0x2a4] ss:$28 sps:$4 sm:$0xff]  }
  0x4c   : > { %4786 = vmatprep.subr.bf16.mxu1 %v5391_v0  ;;  %2424 = vmatprep.subr.bf16.mxu0 %v5391_v0 }
  0x4e   : > { %1943 = vmatmul.mubr.bf16.vlgmr.msra.gmra.mrb[0].mxu1 %v5085_v35  ;;  %2200 = vmatmul.mubr.bf16.vlgmr.msra.gmra.mrb[0].mxu0 %v5088_v36  ;;  %v5170_v35 = vld [vmem:[%s5529_s9 + $0x2a0] ss:$28 sps:$4 sm:$0xff]   ;;  %v5171_v36 = vld [vmem:[%s5529_s9 + $0x2a8] ss:$28 sps:$4 sm:$0xff]  }
  0x4f   : > { %4802 = vmatpush1.bf16.msra.mxu1 %v5438_v2  ;;  %2425 = vmatpush1.bf16.msra.mxu0 %v5091_v37  ;;  %v5123_v2 = vld [vmem:[%s5529_s9 + $0x118] ss:$28 sps:$4 sm:$0xff]  }
  0x50   : > { %1950 = vmatprep.mubr.bf16.mxu1 %v5092_v38  ;;  %2207 = vmatprep.mubr.bf16.mxu0 %v5094_v39  ;;  %v5173_v37 = vld [vmem:[%s5529_s9 + $0x2dc] ss:$28 sps:$4 sm:$0xff]   ;;  %v5175_v38 = vld [vmem:[%s5529_s9 + $0x2e4] ss:$28 sps:$4 sm:$0xff]  }
  0x51   : > { %2426 = vmatprep.subr.bf16.mxu0 %v5391_v0  ;;  %4787 = vmatprep.subr.bf16.mxu1 %v5391_v0  ;;  %v5773_v39 = vld [vmem:[%s7072_s1 + $0x180] sm:$0xff]  }
  0x53   : > { %4803 = vmatpush1.bf16.msra.mxu1 %v5448_v4  ;;  %2427 = vmatpush1.bf16.msra.mxu0 %v5098_v40  ;;  %v5126_v4 = vld [vmem:[%s5529_s9 + $0x154] ss:$28 sps:$4 sm:$0xff]  }
  0x54   : > { %4788 = vmatprep.subr.bf16.mxu1 %v5391_v0  ;;  %2428 = vmatprep.subr.bf16.mxu0 %v5391_v0  ;;  %v5177_v40 = vld [vmem:[%s5529_s9 + $0x2d8] ss:$28 sps:$4 sm:$0xff]  }
  0x56   : > { %1951 = vmatmul.mubr.bf16.gmra.mrb[4].mxu1 %v5096_v41  ;;  %2208 = vmatmul.mubr.bf16.gmra.mrb[4].mxu0 %v5097_v42  ;;  %v5178_v41 = vld [vmem:[%s5529_s9 + $0x2e0] ss:$28 sps:$4 sm:$0xff]   ;;  %v5180_v42 = vld [vmem:[%s5529_s9 + $0x314] ss:$28 sps:$4 sm:$0xff]  }
  0x57   : > { %1958 = vmatprep.mubr.bf16.mxu1 %v5099_v43  ;;  %2215 = vmatprep.mubr.bf16.mxu0 %v5101_v44  ;;  %v5182_v43 = vld [vmem:[%s5529_s9 + $0x31c] ss:$28 sps:$4 sm:$0xff]   ;;  %v5184_v44 = vld [vmem:[%s5529_s9 + $0x310] ss:$28 sps:$4 sm:$0xff]  }
  0x58   : > { %2429 = vmatpush1.bf16.msra.mxu0 %v5105_v45  ;;  %4804 = vmatpush1.bf16.msra.mxu1 %v5464_v6  ;;  %v5179_v6 = vld [vmem:[%s7072_s1 + $0x150] sm:$0xff]  }
  0x59   : > { %2430 = vmatprep.subr.bf16.mxu0 %v5391_v0  ;;  %4789 = vmatprep.subr.bf16.mxu1 %v5391_v0  ;;  %v5185_v45 = vld [vmem:[%s5529_s9 + $0x318] ss:$28 sps:$4 sm:$0xff]  }
  0x5c   : > { %2431 = vmatpush1.bf16.msra.mxu0 %v5118_v46  ;;  %4805 = vmatpush1.bf16.msra.mxu1 %v5475_v8  ;;  %v5186_v8 = vld [vmem:[%s7072_s1 + $0x158] sm:$0xff]   ;;  %v5187_v46 = vld [vmem:[%s5529_s9 + $0x34c] ss:$28 sps:$4 sm:$0xff]  }
  0x5d   : > { %2432 = vmatprep.subr.bf16.mxu0 %v5391_v0  ;;  %4790 = vmatprep.subr.bf16.mxu1 %v5391_v0 }
  0x5e   : > { %1959 = vmatmul.mubr.bf16.gmra.mrb[8].mxu1 %v5103_v47  ;;  %2216 = vmatmul.mubr.bf16.gmra.mrb[8].mxu0 %v5104_v48  ;;  %v5189_v47 = vld [vmem:[%s5529_s9 + $0x354] ss:$28 sps:$4 sm:$0xff]   ;;  %v5191_v48 = vld [vmem:[%s5529_s9 + $0x348] ss:$28 sps:$4 sm:$0xff]  }
  0x5f   : > { %1966 = vmatprep.mubr.bf16.mxu1 %v5106_v49  ;;  %2223 = vmatprep.mubr.bf16.mxu0 %v5108_v50  ;;  %v5192_v49 = vld [vmem:[%s5529_s9 + $0x350] ss:$28 sps:$4 sm:$0xff]   ;;  %v5193_v50 = vld [vmem:[%s5529_s9 + $0x384] ss:$28 sps:$4 sm:$0xff]  }
  0x60   : > { %2433 = vmatpush1.bf16.msra.mxu0 %v5125_v51  ;;  %4806 = vmatpush1.bf16.msra.mxu1 %v5487_v10  ;;  %v5133_v10 = vld [vmem:[%s5529_s9 + $0x18c] ss:$28 sps:$4 sm:$0xff]  }
  0x61   : > { %2434 = vmatprep.subr.bf16.mxu0 %v5391_v0  ;;  %4791 = vmatprep.subr.bf16.mxu1 %v5391_v0  ;;  %v5195_v51 = vld [vmem:[%s5529_s9 + $0x38c] ss:$28 sps:$4 sm:$0xff]  }
  0x64   : > { %2435 = vmatpush1.bf16.msra.mxu0 %v5132_v52  ;;  %4807 = vmatpush1.bf16.msra.mxu1 %v5498_v12  ;;  %v5197_v12 = vld [vmem:[%s7072_s1 + $0x160] sm:$0xff]  }
  0x65   : > { %2436 = vmatprep.subr.bf16.mxu0 %v5391_v0  ;;  %4792 = vmatprep.subr.bf16.mxu1 %v5391_v0  ;;  %v5198_v52 = vld [vmem:[%s5529_s9 + $0x380] ss:$28 sps:$4 sm:$0xff]  }
  0x66   : > { %1967 = vmatmul.mubr.bf16.gmra.mrb[12].mxu1 %v5110_v53  ;;  %2224 = vmatmul.mubr.bf16.gmra.mrb[12].mxu0 %v5111_v54  ;;  %v5199_v53 = vld [vmem:[%s5529_s9 + $0x388] ss:$28 sps:$4 sm:$0xff]   ;;  %v5200_v54 = vld [vmem:[%s5529_s9 + $0x3bc] ss:$28 sps:$4 sm:$0xff]  }
  0x67   : > { %1974 = vmatprep.mubr.bf16.mxu1 %v5112_v55  ;;  %2231 = vmatprep.mubr.bf16.mxu0 %v5114_v56  ;;  %v5202_v55 = vld [vmem:[%s5529_s9 + $0x3c4] ss:$28 sps:$4 sm:$0xff]   ;;  %v5204_v56 = vld [vmem:[%s5529_s9 + $0x3b8] ss:$28 sps:$4 sm:$0xff]  }
  0x68   : > { %2437 = vmatpush1.bf16.msra.mxu0 %v5145_v57  ;;  %4808 = vmatpush1.bf16.msra.mxu1 %v5511_v14  ;;  %v5206_v14 = vld [vmem:[%s7072_s1 + $0x168] sm:$0xff]   ;;  %v5205_v57 = vld [vmem:[%s5529_s9 + $0x3c0] ss:$28 sps:$4 sm:$0xff]  }
  0x69   : > { %2438 = vmatprep.subr.bf16.mxu0 %v5391_v0  ;;  %4793 = vmatprep.subr.bf16.mxu1 %v5391_v0 }
  0x6c   : > { %2439 = vmatpush1.bf16.msra.mxu0 %v5152_v58  ;;  %4809 = vmatpush1.bf16.msra.mxu1 %v5523_v16  ;;  %v5139_v16 = vld [vmem:[%s5529_s9 + $0x1c4] ss:$28 sps:$4 sm:$0xff]   ;;  %v5207_v58 = vld [vmem:[%s5529_s9 + $0x3f4] ss:$28 sps:$4 sm:$0xff]  }
  0x6d   : > { %2440 = vmatprep.subr.bf16.mxu0 %v5391_v0  ;;  %4794 = vmatprep.subr.bf16.mxu1 %v5391_v0 }
  0x6e   : > { %1975 = vmatmul.mubr.bf16.gmra.mrb[16].mxu1 %v5116_v59  ;;  %2232 = vmatmul.mubr.bf16.gmra.mrb[16].mxu0 %v5117_v60  ;;  %v5209_v59 = vld [vmem:[%s5529_s9 + $0x3fc] ss:$28 sps:$4 sm:$0xff]   ;;  %v5211_v60 = vld [vmem:[%s5529_s9 + $0x3f0] ss:$28 sps:$4 sm:$0xff]  }
  0x6f   : > { %1982 = vmatprep.mubr.bf16.mxu1 %v5119_v61  ;;  %2239 = vmatprep.mubr.bf16.mxu0 %v5121_v62  ;;  %v5212_v61 = vld [vmem:[%s5529_s9 + $0x3f8] ss:$28 sps:$4 sm:$0xff]   ;;  %v5214_v62 = vld [vmem:[%s5529_s9 + $0x42c] ss:$28 sps:$4 sm:$0xff]  }
  0x70   : > { %2441 = vmatpush1.bf16.msra.mxu0 %v5159_v63  ;;  %4810 = vmatpush1.bf16.msra.mxu1 %v5539_v18  ;;  %v5213_v18 = vld [vmem:[%s7072_s1 + $0x170] sm:$0xff]  }
  0x71   : > { %2442 = vmatprep.subr.bf16.mxu0 %v5391_v0  ;;  %4795 = vmatprep.subr.bf16.mxu1 %v5391_v0  ;;  %v5216_v63 = vld [vmem:[%s5529_s9 + $0x434] ss:$28 sps:$4 sm:$0xff]  }
  0x74   : > { %2443 = vmatpush1.bf16.msra.mxu0 %v5172_v1  ;;  %4811 = vmatpush1.bf16.msra.mxu1 %v5552_v22  ;;  %v5146_v22 = vld [vmem:[%s5529_s9 + $0x1fc] ss:$28 sps:$4 sm:$0xff]   ;;  %v5218_v1 = vld [vmem:[%s5529_s9 + $0x428] ss:$28 sps:$4 sm:$0xff]  }
  0x75   : > { %2444 = vmatprep.subr.bf16.mxu0 %v5391_v0  ;;  %4796 = vmatprep.subr.bf16.mxu1 %v5391_v0 }
  0x76   : > { %1983 = vmatmul.mubr.bf16.gmra.mrb[20].mxu1 %v5123_v2  ;;  %2240 = vmatmul.mubr.bf16.gmra.mrb[20].mxu0 %v5124_v3  ;;  %v5219_v2 = vld [vmem:[%s5529_s9 + $0x430] ss:$28 sps:$4 sm:$0xff]   ;;  %v5220_v3 = vld [vmem:[%s5529_s9 + $0x464] ss:$28 sps:$4 sm:$0xff]  }
  0x77   : > { %1990 = vmatprep.mubr.bf16.mxu1 %v5126_v4  ;;  %2247 = vmatprep.mubr.bf16.mxu0 %v5128_v5  ;;  %v5222_v4 = vld [vmem:[%s5529_s9 + $0x46c] ss:$28 sps:$4 sm:$0xff]   ;;  %v5225_v5 = vld [vmem:[%s5529_s9 + $0x460] ss:$28 sps:$4 sm:$0xff]  }
  0x78   : > { %2445 = vmatpush1.bf16.msra.mxu0 %v5179_v6  ;;  %4812 = vmatpush1.bf16.msra.mxu1 %v5563_v24  ;;  %v5150_v24 = vld [vmem:[%s5529_s9 + $0x1f8] ss:$28 sps:$4 sm:$0xff]   ;;  %v5226_v6 = vld [vmem:[%s5529_s9 + $0x468] ss:$28 sps:$4 sm:$0xff]  }
  0x79   : > { %2446 = vmatprep.subr.bf16.mxu0 %v5391_v0  ;;  %4797 = vmatprep.subr.bf16.mxu1 %v5391_v0 }
  0x7c   : > { %2447 = vmatpush1.bf16.msra.mxu0 %v5186_v8  ;;  %4813 = vmatpush1.bf16.msra.mxu1 %v5574_v26  ;;  %v5153_v26 = vld [vmem:[%s5529_s9 + $0x234] ss:$28 sps:$4 sm:$0xff]  }
  0x7d   : > { %2448 = vmatprep.subr.bf16.mxu0 %v5391_v0  ;;  %4798 = vmatprep.subr.bf16.mxu1 %v5391_v0  ;;  %v5231_v8 = vld [vmem:[%s5529_s9 + $0x14] ss:$28 sps:$4 sm:$0xff]  }
  0x7e   : > { %1991 = vmatmul.mubr.bf16.gmra.mrb[24].mxu1 %v5130_v7  ;;  %2248 = vmatmul.mubr.bf16.gmra.mrb[24].mxu0 %v5131_v9  ;;  %v5227_v7 = vld [vmem:[%s5529_s9 + $0x49c] ss:$28 sps:$4 sm:$0xff]  }
  0x7f   : > { %1998 = vmatprep.mubr.bf16.mxu1 %v5133_v10  ;;  %2255 = vmatprep.mubr.bf16.mxu0 %v5135_v11  ;;  %v5232_v9 = vld [vmem:[%s5529_s9 + $0x498] ss:$28 sps:$4 sm:$0xff]   ;;  %v5229_v10 = vld [vmem:[%s5529_s9 + $0x10] ss:$28 sps:$4 sm:$0xff]  }
  0x80   : > { %2449 = vmatpush1.bf16.msra.mxu0 %v5197_v12  ;;  %4814 = vmatpush1.bf16.msra.mxu1 %v5585_v28  ;;  %v5158_v28 = vld [vmem:[%s5529_s9 + $0x238] ss:$28 sps:$4 sm:$0xff]   ;;  %v5235_v12 = vld [vmem:[%s5529_s9 + $0x4c] ss:$28 sps:$4 sm:$0xff]  }
  0x81   : > { %2450 = vmatprep.subr.bf16.mxu0 %v5391_v0  ;;  %4799 = vmatprep.subr.bf16.mxu1 %v5391_v0  ;;  %v5233_v11 = vld [vmem:[%s5529_s9 + $0x4d4] ss:$28 sps:$4 sm:$0xff]  }
  0x84   : > { %2451 = vmatpush1.bf16.msra.mxu0 %v5206_v14  ;;  %4815 = vmatpush1.bf16.msra.mxu1 %v5596_v30  ;;  %v5162_v30 = vld [vmem:[%s5529_s9 + $0x274] ss:$28 sps:$4 sm:$0xff]   ;;  %v5238_v14 = vld [vmem:[%s5529_s9 + $0x48] ss:$28 sps:$4 sm:$0xff]  }
  0x85   : > { %2452 = vmatprep.subr.bf16.mxu0 %v5391_v0  ;;  %4800 = vmatprep.subr.bf16.mxu1 %v5391_v0 }
  0x86   : > { %1999 = vmatmul.mubr.bf16.gmra.mrb[28].mxu1 %v5137_v13  ;;  %2256 = vmatmul.mubr.bf16.gmra.mrb[28].mxu0 %v5138_v15  ;;  %v5237_v13 = vld [vmem:[%s5529_s9 + $0x4d0] ss:$28 sps:$4 sm:$0xff]  }
  0x87   : > { %2006 = vmatprep.mubr.bf16.mxu1 %v5139_v16  ;;  %2263 = vmatprep.mubr.bf16.mxu0 %v5141_v17  ;;  %v5239_v15 = vld [vmem:[%s5529_s9 + $0x50c] ss:$28 sps:$4 sm:$0xff]   ;;  %v5241_v16 = vld [vmem:[%s5529_s9 + $0x84] ss:$28 sps:$4 sm:$0xff]  }
  0x88   : > { %2453 = vmatpush1.bf16.msra.mxu0 %v5213_v18  ;;  %4816 = vmatpush1.bf16.msra.mxu1 %v5607_v32  ;;  %v5165_v32 = vld [vmem:[%s5529_s9 + $0x270] ss:$28 sps:$4 sm:$0xff]   ;;  %v5243_v17 = vld [vmem:[%s5529_s9 + $0x508] ss:$28 sps:$4 sm:$0xff]   ;;  %v5244_v18 = vld [vmem:[%s5529_s9 + $0x80] ss:$28 sps:$4 sm:$0xff]  }
  0x89   : > { %2454 = vmatprep.subr.bf16.mxu0 %v5391_v0  ;;  %4801 = vmatprep.subr.bf16.mxu1 %v5391_v0  ;;  %v5157_v0 = vld [vmem:[%s5529_s9 + $0x230] ss:$28 sps:$4 sm:$0xff]  }
  0x8c   : > { %2455 = vmatpush1.bf16.msra.mxu0 %v5224_v20  ;;  %4817 = vmatpush1.bf16.msra.mxu1 %v5618_v34  ;;  %v5168_v34 = vld [vmem:[%s5529_s9 + $0x2ac] ss:$28 sps:$4 sm:$0xff]   ;;  %v5247_v20 = vld [vmem:[%s5529_s9 + $0xbc] ss:$28 sps:$4 sm:$0xff]  }
  0x8d   : > { %4726 = vmatprep.subr.bf16.mxu1 %v5773_v39 }
  0x8e   : > { %2007 = vmatmul.mubr.bf16.gmra.mrb[32].mxu1 %v5143_v19  ;;  %2264 = vmatmul.mubr.bf16.gmra.mrb[32].mxu0 %v5144_v21  ;;  %v5245_v19 = vld [vmem:[%s5529_s9 + $0x544] ss:$28 sps:$4 sm:$0xff]  }
  0x8f   : > { %2014 = vmatprep.mubr.bf16.mxu1 %v5146_v22  ;;  %2271 = vmatprep.mubr.bf16.mxu0 %v5148_v23  ;;  %v5249_v21 = vld [vmem:[%s5529_s9 + $0x540] ss:$28 sps:$4 sm:$0xff]   ;;  %v5250_v22 = vld [vmem:[%s5529_s9 + $0xb8] ss:$28 sps:$4 sm:$0xff]  }
  0x90   : > { %v5251_v23 = vld [vmem:[%s5529_s9 + $0x57c] ss:$28 sps:$4 sm:$0xff]  }
  0x96   : > { %2015 = vmatmul.mubr.bf16.gmra.mrb[36].mxu1 %v5150_v24  ;;  %2272 = vmatmul.mubr.bf16.gmra.mrb[36].mxu0 %v5151_v25  ;;  %v5253_v24 = vld [vmem:[%s5529_s9 + $0xf4] ss:$28 sps:$4 sm:$0xff]  }
  0x97   : > { %2022 = vmatprep.mubr.bf16.mxu1 %v5153_v26  ;;  %2279 = vmatprep.mubr.bf16.mxu0 %v5155_v27  ;;  %v5255_v25 = vld [vmem:[%s5529_s9 + $0x578] ss:$28 sps:$4 sm:$0xff]   ;;  %v5256_v26 = vld [vmem:[%s5529_s9 + $0xf0] ss:$28 sps:$4 sm:$0xff]  }
  0x98   : > { %v5257_v27 = vld [vmem:[%s5529_s9 + $0x5b4] ss:$28 sps:$4 sm:$0xff]  }
  0x9e   : > { %2023 = vmatmul.mubr.bf16.gmra.mrb[40].mxu1 %v5157_v0  ;;  %2280 = vmatmul.mubr.bf16.gmra.mrb[40].mxu0 %v5158_v28  ;;  %v5259_v0 = vld [vmem:[%s5529_s9 + $0x12c] ss:$28 sps:$4 sm:$0xff]  }
  0x9f   : > { %2030 = vmatprep.mubr.bf16.mxu1 %v5160_v29  ;;  %2287 = vmatprep.mubr.bf16.mxu0 %v5162_v30  ;;  %v5261_v28 = vld [vmem:[%s5529_s9 + $0x5b0] ss:$28 sps:$4 sm:$0xff]   ;;  %v5262_v29 = vld [vmem:[%s5529_s9 + $0x128] ss:$28 sps:$4 sm:$0xff]  }
  0xa0   : > { %v5263_v30 = vld [vmem:[%s5529_s9 + $0x5ec] ss:$28 sps:$4 sm:$0xff]  }
  0xa6   : > { %2031 = vmatmul.mubr.bf16.gmra.mrb[44].mxu1 %v5164_v31  ;;  %2288 = vmatmul.mubr.bf16.gmra.mrb[44].mxu0 %v5165_v32  ;;  %v5265_v31 = vld [vmem:[%s5529_s9 + $0x164] ss:$28 sps:$4 sm:$0xff]  }
  0xa7   : > { %2038 = vmatprep.mubr.bf16.mxu1 %v5166_v33  ;;  %2295 = vmatprep.mubr.bf16.mxu0 %v5168_v34  ;;  %v5267_v34 = vld [vmem:[%s5529_s9 + $0x5e8] ss:$28 sps:$4 sm:$0xff]  }
  0xae   : > { %2039 = vmatmul.mubr.bf16.gmra.mrb[48].mxu1 %v5170_v35  ;;  %2296 = vmatmul.mubr.bf16.gmra.mrb[48].mxu0 %v5171_v36  ;;  %v5268_v36 = vld [vmem:[%s5529_s9 + $0x160] ss:$28 sps:$4 sm:$0xff]  }
  0xaf   : > { %2046 = vmatprep.mubr.bf16.mxu1 %v5173_v37  ;;  %2303 = vmatprep.mubr.bf16.mxu0 %v5175_v38  ;;  %v5271_v37 = vld [vmem:[%s5529_s9 + $0x4a4] ss:$28 sps:$4 sm:$0xff]  }
  0xb6   : > { %2047 = vmatmul.mubr.bf16.gmra.mrb[52].mxu1 %v5177_v40  ;;  %2304 = vmatmul.mubr.bf16.gmra.mrb[52].mxu0 %v5178_v41  ;;  %v5272_v40 = vld [vmem:[%s5529_s9 + $0x19c] ss:$28 sps:$4 sm:$0xff]  }
  0xb7   : > { %2054 = vmatprep.mubr.bf16.mxu1 %v5180_v42  ;;  %2311 = vmatprep.mubr.bf16.mxu0 %v5182_v43  ;;  %v5269_v43 = vld [vmem:[%s5529_s9 + $0x4a0] ss:$28 sps:$4 sm:$0xff]  }
  0xbe   : > { %2055 = vmatmul.mubr.bf16.gmra.mrb[56].mxu1 %v5184_v44  ;;  %2312 = vmatmul.mubr.bf16.gmra.mrb[56].mxu0 %v5185_v45  ;;  %v5274_v45 = vld [vmem:[%s5529_s9 + $0x198] ss:$28 sps:$4 sm:$0xff]  }
  0xbf   : > { %2062 = vmatprep.mubr.bf16.mxu1 %v5187_v46  ;;  %2319 = vmatprep.mubr.bf16.mxu0 %v5189_v47  ;;  %v5276_v47 = vld [vmem:[%s5529_s9 + $0x4dc] ss:$28 sps:$4 sm:$0xff]  }
  0xc6   : > { %2063 = vmatmul.mubr.bf16.gmra.mrb[60].mxu1 %v5191_v48  ;;  %2320 = vmatmul.mubr.bf16.gmra.mrb[60].mxu0 %v5192_v49  ;;  %v5278_v48 = vld [vmem:[%s5529_s9 + $0x1d4] ss:$28 sps:$4 sm:$0xff]   ;;  %v5294_v49 = vld [vmem:[%s7072_s1 + $0x188] sm:$0xff]  }
  0xc7   : > { %2070 = vmatprep.mubr.bf16.mxu1 %v5193_v50  ;;  %2327 = vmatprep.mubr.bf16.mxu0 %v5195_v51 }
  0xce   : > { %2071 = vmatmul.mubr.bf16.gmra.mrb[64].mxu1 %v5198_v52  ;;  %2328 = vmatmul.mubr.bf16.gmra.mrb[64].mxu0 %v5199_v53  ;;  %v5280_v52 = vld [vmem:[%s5529_s9 + $0x4d8] ss:$28 sps:$4 sm:$0xff]  }
  0xcf   : > { %2078 = vmatprep.mubr.bf16.mxu1 %v5200_v54  ;;  %2335 = vmatprep.mubr.bf16.mxu0 %v5202_v55  ;;  %v5281_v54 = vld [vmem:[%s5529_s9 + $0x1d0] ss:$28 sps:$4 sm:$0xff]  }
  0xd0   : > { %v5282_v55 = vld [vmem:[%s5529_s9 + $0x514] ss:$28 sps:$4 sm:$0xff]  }
  0xd6   : > { %2079 = vmatmul.mubr.bf16.gmra.mrb[68].mxu1 %v5204_v56  ;;  %2336 = vmatmul.mubr.bf16.gmra.mrb[68].mxu0 %v5205_v57  ;;  %v5284_v57 = vld [vmem:[%s5529_s9 + $0x20c] ss:$28 sps:$4 sm:$0xff]  }
  0xd7   : > { %2086 = vmatprep.mubr.bf16.mxu1 %v5207_v58  ;;  %2343 = vmatprep.mubr.bf16.mxu0 %v5209_v59  ;;  %v5286_v59 = vld [vmem:[%s5529_s9 + $0x510] ss:$28 sps:$4 sm:$0xff]  }
  0xde   : > { %2087 = vmatmul.mubr.bf16.gmra.mrb[72].mxu1 %v5211_v60  ;;  %2344 = vmatmul.mubr.bf16.gmra.mrb[72].mxu0 %v5212_v61  ;;  %v5287_v61 = vld [vmem:[%s5529_s9 + $0x208] ss:$28 sps:$4 sm:$0xff]  }
  0xdf   : > { %2094 = vmatprep.mubr.bf16.mxu1 %v5214_v62  ;;  %2351 = vmatprep.mubr.bf16.mxu0 %v5216_v63  ;;  %v5288_v62 = vld [vmem:[%s5529_s9 + $0x54c] ss:$28 sps:$4 sm:$0xff]  }
  0xe6   : > { %2095 = vmatmul.mubr.bf16.gmra.mrb[76].mxu1 %v5218_v1  ;;  %2352 = vmatmul.mubr.bf16.gmra.mrb[76].mxu0 %v5219_v2  ;;  %v5290_v1 = vld [vmem:[%s5529_s9 + $0x244] ss:$28 sps:$4 sm:$0xff]  }
  0xe7   : > { %2102 = vmatprep.mubr.bf16.mxu1 %v5220_v3  ;;  %2359 = vmatprep.mubr.bf16.mxu0 %v5222_v4  ;;  %v5292_v4 = vld [vmem:[%s5529_s9 + $0x548] ss:$28 sps:$4 sm:$0xff]  }
  0xee   : > { %2103 = vmatmul.mubr.bf16.gmra.mrb[80].mxu1 %v5225_v5  ;;  %2360 = vmatmul.mubr.bf16.gmra.mrb[80].mxu0 %v5226_v6  ;;  %v5293_v6 = vld [vmem:[%s5529_s9 + $0x240] ss:$28 sps:$4 sm:$0xff]  }
  0xef   : > { %2110 = vmatprep.mubr.bf16.mxu1 %v5227_v7  ;;  %2456 = vmatprep.mubr.bf16.mxu0 %v5231_v8  ;;  %v5295_v7 = vld [vmem:[%s5529_s9 + $0x584] ss:$28 sps:$4 sm:$0xff]  }
  0xf6   : > { %2111 = vmatmul.mubr.bf16.gmra.mrb[84].mxu1 %v5232_v9  ;;  %2457 = vmatmul.mubr.bf16.vlgmr.msra.gmra.mrb[0].mxu0 %v5229_v10  ;;  %v5297_v9 = vld [vmem:[%s5529_s9 + $0x27c] ss:$28 sps:$4 sm:$0xff]  }
  0xf7   : > { %2118 = vmatprep.mubr.bf16.mxu1 %v5233_v11  ;;  %2464 = vmatprep.mubr.bf16.mxu0 %v5235_v12  ;;  %v5299_v12 = vld [vmem:[%s5529_s9 + $0x580] ss:$28 sps:$4 sm:$0xff]  }
  0xfe   : > { %2119 = vmatmul.mubr.bf16.gmra.mrb[88].mxu1 %v5237_v13  ;;  %2465 = vmatmul.mubr.bf16.gmra.mrb[4].mxu0 %v5238_v14  ;;  %v5300_v14 = vld [vmem:[%s5529_s9 + $0x278] ss:$28 sps:$4 sm:$0xff]  }
  0xff   : > { %2126 = vmatprep.mubr.bf16.mxu1 %v5239_v15  ;;  %2472 = vmatprep.mubr.bf16.mxu0 %v5241_v16  ;;  %v5301_v15 = vld [vmem:[%s5529_s9 + $0x5bc] ss:$28 sps:$4 sm:$0xff]  }
 0x106   : > { %2127 = vmatmul.mubr.bf16.gmra.mrb[92].mxu1 %v5243_v17  ;;  %2473 = vmatmul.mubr.bf16.gmra.mrb[8].mxu0 %v5244_v18  ;;  %v5303_v17 = vld [vmem:[%s5529_s9 + $0x2b4] ss:$28 sps:$4 sm:$0xff]  }
 0x107   : > { %2134 = vmatprep.mubr.bf16.mxu1 %v5245_v19  ;;  %2480 = vmatprep.mubr.bf16.mxu0 %v5247_v20  ;;  %v5305_v20 = vld [vmem:[%s5529_s9 + $0x5b8] ss:$28 sps:$4 sm:$0xff]  }
 0x10e   : > { %2135 = vmatmul.mubr.bf16.gmra.mrb[96].mxu1 %v5249_v21  ;;  %2481 = vmatmul.mubr.bf16.gmra.mrb[12].mxu0 %v5250_v22  ;;  %v5306_v22 = vld [vmem:[%s5529_s9 + $0x2b0] ss:$28 sps:$4 sm:$0xff]  }
 0x10f   : > { %2142 = vmatprep.mubr.bf16.mxu1 %v5251_v23  ;;  %2488 = vmatprep.mubr.bf16.mxu0 %v5253_v24  ;;  %v5307_v23 = vld [vmem:[%s5529_s9 + $0x5f4] ss:$28 sps:$4 sm:$0xff]  }
 0x116   : > { %2143 = vmatmul.mubr.bf16.gmra.mrb[100].mxu1 %v5255_v25  ;;  %2489 = vmatmul.mubr.bf16.gmra.mrb[16].mxu0 %v5256_v26  ;;  %v5309_v25 = vld [vmem:[%s5529_s9 + $0x2ec] ss:$28 sps:$4 sm:$0xff]  }
 0x117   : > { %2150 = vmatprep.mubr.bf16.mxu1 %v5257_v27  ;;  %2496 = vmatprep.mubr.bf16.mxu0 %v5259_v0  ;;  %v5311_v0 = vld [vmem:[%s5529_s9 + $0x5f0] ss:$28 sps:$4 sm:$0xff]  }
 0x11e   : > { %2151 = vmatmul.mubr.bf16.gmra.mrb[104].mxu1 %v5261_v28  ;;  %2497 = vmatmul.mubr.bf16.gmra.mrb[20].mxu0 %v5262_v29  ;;  %v5312_v29 = vld [vmem:[%s5529_s9 + $0x2e8] ss:$28 sps:$4 sm:$0xff]  }
 0x11f   : > { %2158 = vmatprep.mubr.bf16.mxu1 %v5263_v30  ;;  %2504 = vmatprep.mubr.bf16.mxu0 %v5265_v31  ;;  %v5315_v30 = vld [vmem:[%s5529_s9 + $0x18] ss:$28 sps:$4 sm:$0xff]  }
 0x121   : > { %v5832_v32 = vpop.f32.mrb[0].mxu1 }
 0x122   : > { %v1946_v33 = vpop.f32.mrb[1].mxu1 }
 0x123   : > { %v5835_v35 = vpop.f32.mrb[2].mxu1  ;;  %v5313_v33 = vld [vmem:[%s5529_s9 + $0x324] ss:$28 sps:$4 sm:$0xff]  }
 0x124   : > { %v1949_v38 = vpop.f32.mrb[3].mxu1 }
 0x126   : > { %2159 = vmatmul.mubr.bf16.gmra.mrb[108].mxu1 %v5267_v34  ;;  %2505 = vmatmul.mubr.bf16.gmra.mrb[24].mxu0 %v5268_v36 }
 0x127   : > { %2367 = vmatprep.mubr.bf16.mxu1 %v5271_v37  ;;  %2512 = vmatprep.mubr.bf16.mxu0 %v5272_v40  ;;  %v5317_v37 = vld [vmem:[%s5529_s9 + $0x50] ss:$28 sps:$4 sm:$0xff]   ;;  %v5316_v40 = vld [vmem:[%s5529_s9 + $0x320] ss:$28 sps:$4 sm:$0xff]  }
 0x129   : > { %v5840_v41 = vpop.f32.mrb[4].mxu1 }
 0x12a   : > { %v1954_v42 = vpop.f32.mrb[5].mxu1 }
 0x12b   : > { %v5843_v44 = vpop.f32.mrb[6].mxu1  ;;  %v5320_v42 = vld [vmem:[%s5529_s9 + $0x88] ss:$28 sps:$4 sm:$0xff]  }
 0x12c   : > { %v1957_v46 = vpop.f32.mrb[7].mxu1 }
 0x12e   : > { %2368 = vmatmul.mubr.bf16.vlgmr.msra.gmra.mrb[84].mxu1 %v5269_v43  ;;  %2513 = vmatmul.mubr.bf16.gmra.mrb[28].mxu0 %v5274_v45  ;;  %v5318_v45 = vld [vmem:[%s5529_s9 + $0x35c] ss:$28 sps:$4 sm:$0xff]  }
 0x12f   : > { %4727 = vmatpush3.bf16.msra.mxu1 %v5773_v39  ;;  %2375 = vmatprep.mubr.bf16.mxu1 %v5276_v47 }
 0x130   : > { %2520 = vmatprep.mubr.bf16.mxu0 %v5278_v48  ;;  %4728 = vmatprep.subr.bf16.mxu1 %v5294_v49  ;;  %v5322_v48 = vld [vmem:[%s5529_s9 + $0xc0] ss:$28 sps:$4 sm:$0xff]  }
 0x131   : > { %v5852_v50 = vpop.f32.mrb[8].mxu1 }
 0x132   : > { %v1962_v51 = vpop.f32.mrb[9].mxu1 }
 0x133   : > { %v5855_v53 = vpop.f32.mrb[10].mxu1  ;;  %4729 = vmatpush3.bf16.msra.mxu1 %v5294_v49  ;;  %v5321_v51 = vld [vmem:[%s5529_s9 + $0x358] ss:$28 sps:$4 sm:$0xff]  }
 0x134   : > { %v1965_v56 = vpop.f32.mrb[11].mxu1 }
 0x136   : > { %2376 = vmatmul.mubr.bf16.gmra.mrb[88].mxu1 %v5280_v52  ;;  %2521 = vmatmul.mubr.bf16.gmra.mrb[32].mxu0 %v5281_v54  ;;  %v5325_v52 = vld [vmem:[%s5529_s9 + $0xf8] ss:$28 sps:$4 sm:$0xff]  }
 0x137   : > { %2383 = vmatprep.mubr.bf16.mxu1 %v5282_v55  ;;  %2528 = vmatprep.mubr.bf16.mxu0 %v5284_v57  ;;  %v5323_v55 = vld [vmem:[%s5529_s9 + $0x394] ss:$28 sps:$4 sm:$0xff]  }
 0x139   : > { %v5860_v39 = vpop.f32.mrb[12].mxu1 }
 0x13a   : > { %v1970_v58 = vpop.f32.mrb[13].mxu1 }
 0x13b   : > { %v5863_v60 = vpop.f32.mrb[14].mxu1  ;;  %v5327_v58 = vld [vmem:[%s5529_s9 + $0x130] ss:$28 sps:$4 sm:$0xff]  }
 0x13c   : > { %v1973_v63 = vpop.f32.mrb[15].mxu1 }
 0x13e   : > { %2384 = vmatmul.mubr.bf16.gmra.mrb[92].mxu1 %v5286_v59  ;;  %2529 = vmatmul.mubr.bf16.gmra.mrb[36].mxu0 %v5287_v61  ;;  %v5326_v61 = vld [vmem:[%s5529_s9 + $0x390] ss:$28 sps:$4 sm:$0xff]  }
 0x13f   : > { %2391 = vmatprep.mubr.bf16.mxu1 %v5288_v62  ;;  %2536 = vmatprep.mubr.bf16.mxu0 %v5290_v1  ;;  %v5330_v62 = vld [vmem:[%s5529_s9 + $0x168] ss:$28 sps:$4 sm:$0xff]  }
 0x140   : > { %v5328_v1 = vld [vmem:[%s5529_s9 + $0x3cc] ss:$28 sps:$4 sm:$0xff]  }
 0x141   : > { %v5868_v2 = vpop.f32.mrb[16].mxu1 }
 0x142   : > { %v1978_v3 = vpop.f32.mrb[17].mxu1 }
 0x143   : > { %v5871_v5 = vpop.f32.mrb[18].mxu1 }
 0x144   : > { %v1981_v8 = vpop.f32.mrb[19].mxu1 }
 0x145   : > { %v5331_v8 = vld [vmem:[%s5529_s9 + $0x3c8] ss:$28 sps:$4 sm:$0xff]  }
 0x146   : > { %2392 = vmatmul.mubr.bf16.gmra.mrb[96].mxu1 %v5292_v4  ;;  %2537 = vmatmul.mubr.bf16.gmra.mrb[40].mxu0 %v5293_v6  ;;  %v5332_v6 = vld [vmem:[%s5529_s9 + $0x1a0] ss:$28 sps:$4 sm:$0xff]  }
 0x147   : > { %2399 = vmatprep.mubr.bf16.mxu1 %v5295_v7  ;;  %2544 = vmatprep.mubr.bf16.mxu0 %v5297_v9  ;;  %v5335_v9 = vld [vmem:[%s5529_s9 + $0x1d8] ss:$28 sps:$4 sm:$0xff]  }
 0x149   : > { %v5876_v10 = vpop.f32.mrb[20].mxu1 }
 0x14a   : > { %v1986_v11 = vpop.f32.mrb[21].mxu1 }
 0x14b   : > { %v5879_v13 = vpop.f32.mrb[22].mxu1 }
 0x14c   : > { %v1989_v16 = vpop.f32.mrb[23].mxu1 }
 0x14d   : > { %v5337_v16 = vld [vmem:[%s5529_s9 + $0x210] ss:$28 sps:$4 sm:$0xff]  }
 0x14e   : > { %2400 = vmatmul.mubr.bf16.gmra.mrb[100].mxu1 %v5299_v12  ;;  %2545 = vmatmul.mubr.bf16.gmra.mrb[44].mxu0 %v5300_v14  ;;  %v5333_v12 = vld [vmem:[%s5529_s9 + $0x404] ss:$28 sps:$4 sm:$0xff]  }
 0x14f   : > { %2407 = vmatprep.mubr.bf16.mxu1 %v5301_v15  ;;  %2552 = vmatprep.mubr.bf16.mxu0 %v5303_v17 }
 0x151   : > { %v5884_v18 = vpop.f32.mrb[24].mxu1 }
 0x152   : > { %v1994_v19 = vpop.f32.mrb[25].mxu1 }
 0x153   : > { %v5887_v21 = vpop.f32.mrb[26].mxu1  ;;  %v5336_v19 = vld [vmem:[%s5529_s9 + $0x400] ss:$28 sps:$4 sm:$0xff]  }
 0x154   : > { %v1997_v24 = vpop.f32.mrb[27].mxu1 }
 0x156   : > { %2408 = vmatmul.mubr.bf16.gmra.mrb[104].mxu1 %v5305_v20  ;;  %2553 = vmatmul.mubr.bf16.gmra.mrb[48].mxu0 %v5306_v22  ;;  %v5340_v20 = vld [vmem:[%s5529_s9 + $0x248] ss:$28 sps:$4 sm:$0xff]  }
 0x157   : > { %2415 = vmatprep.mubr.bf16.mxu1 %v5307_v23  ;;  %2560 = vmatprep.mubr.bf16.mxu0 %v5309_v25  ;;  %v5338_v23 = vld [vmem:[%s5529_s9 + $0x43c] ss:$28 sps:$4 sm:$0xff]  }
 0x159   : > { %v5892_v26 = vpop.f32.mrb[28].mxu1 }
 0x15a   : > { %v2002_v27 = vpop.f32.mrb[29].mxu1 }
 0x15b   : > { %v5895_v28 = vpop.f32.mrb[30].mxu1  ;;  %v5342_v27 = vld [vmem:[%s5529_s9 + $0x280] ss:$28 sps:$4 sm:$0xff]  }
 0x15c   : > { %v2005_v31 = vpop.f32.mrb[31].mxu1 }
 0x15e   : > { %2416 = vmatmul.mubr.bf16.gmra.mrb[108].mxu1 %v5311_v0  ;;  %2561 = vmatmul.mubr.bf16.gmra.mrb[52].mxu0 %v5312_v29  ;;  %v5341_v29 = vld [vmem:[%s5529_s9 + $0x438] ss:$28 sps:$4 sm:$0xff]  }
 0x15f   : > { %4730 = vmatprep.mubr.msk.bf16.mxu1 %vm1825_vm0, %v5315_v30  ;;  %2568 = vmatprep.mubr.bf16.mxu0 %v5313_v33  ;;  %v5345_v30 = vld [vmem:[%s5529_s9 + $0x2b8] ss:$28 sps:$4 sm:$0xff]  }
 0x160   : > { %v5343_v33 = vld [vmem:[%s5529_s9 + $0x474] ss:$28 sps:$4 sm:$0xff]  }
 0x161   : > { %v5901_v34 = vpop.f32.mrb[32].mxu1 }
 0x162   : > { %v2010_v36 = vpop.f32.mrb[33].mxu1 }
 0x163   : > { %v5904_v38 = vpop.f32.mrb[34].mxu1 }
 0x164   : > { %v2013_v43 = vpop.f32.mrb[35].mxu1 }
 0x165   : > { %v5346_v43 = vld [vmem:[%s5529_s9 + $0x470] ss:$28 sps:$4 sm:$0xff]  }
 0x166   : > { %4731 = vmatmul.mubr.msk.bf16.vlgmr.msra.gmra.mrb[112].mxu1 %vm1825_vm0, %v5317_v37  ;;  %2569 = vmatmul.mubr.bf16.gmra.mrb[56].mxu0 %v5316_v40  ;;  %v5347_v40 = vld [vmem:[%s5529_s9 + $0x2f0] ss:$28 sps:$4 sm:$0xff]  }
 0x167   : > { %4734 = vmatprep.mubr.msk.bf16.mxu1 %vm1825_vm0, %v5320_v42  ;;  %2576 = vmatprep.mubr.bf16.mxu0 %v5318_v45  ;;  %v5350_v45 = vld [vmem:[%s5529_s9 + $0x328] ss:$28 sps:$4 sm:$0xff]  }
 0x169   : > { %v5911_v46 = vpop.f32.mrb[36].mxu1 }
 0x16a   : > { %v2018_v47 = vpop.f32.mrb[37].mxu1 }
 0x16b   : > { %v5914_v49 = vpop.f32.mrb[38].mxu1 }
 0x16c   : > { %v2021_v54 = vpop.f32.mrb[39].mxu1 }
 0x16d   : > { %v5352_v54 = vld [vmem:[%s5529_s9 + $0x360] ss:$28 sps:$4 sm:$0xff]  }
 0x16e   : > { %4735 = vmatmul.mubr.msk.bf16.gmra.mrb[116].mxu1 %vm1825_vm0, %v5322_v48  ;;  %2577 = vmatmul.mubr.bf16.gmra.mrb[60].mxu0 %v5321_v51  ;;  %v5348_v48 = vld [vmem:[%s5529_s9 + $0x4ac] ss:$28 sps:$4 sm:$0xff]  }
 0x16f   : > { %4738 = vmatprep.mubr.msk.bf16.mxu1 %vm1825_vm0, %v5325_v52  ;;  %2584 = vmatprep.mubr.bf16.mxu0 %v5323_v55 }
 0x171   : > { %v5921_v56 = vpop.f32.mrb[40].mxu1 }
 0x172   : > { %v2026_v57 = vpop.f32.mrb[41].mxu1 }
 0x173   : > { %v5924_v59 = vpop.f32.mrb[42].mxu1  ;;  %v5351_v57 = vld [vmem:[%s5529_s9 + $0x4a8] ss:$28 sps:$4 sm:$0xff]  }
 0x174   : > { %v2029_v63 = vpop.f32.mrb[43].mxu1 }
 0x176   : > { %4739 = vmatmul.mubr.msk.bf16.gmra.mrb[120].mxu1 %vm1825_vm0, %v5327_v58  ;;  %2585 = vmatmul.mubr.bf16.gmra.mrb[64].mxu0 %v5326_v61  ;;  %v5355_v58 = vld [vmem:[%s5529_s9 + $0x398] ss:$28 sps:$4 sm:$0xff]  }
 0x177   : > { %4742 = vmatprep.mubr.msk.bf16.mxu1 %vm1825_vm0, %v5330_v62  ;;  %2592 = vmatprep.mubr.bf16.mxu0 %v5328_v1  ;;  %v5353_v62 = vld [vmem:[%s5529_s9 + $0x4e4] ss:$28 sps:$4 sm:$0xff]  }
 0x179   : > { %v5931_v3 = vpop.f32.mrb[44].mxu1 }
 0x17a   : > { %v2034_v4 = vpop.f32.mrb[45].mxu1 }
 0x17b   : > { %v5934_v7 = vpop.f32.mrb[46].mxu1  ;;  %v5357_v4 = vld [vmem:[%s5529_s9 + $0x3d0] ss:$28 sps:$4 sm:$0xff]  }
 0x17c   : > { %v2037_v11 = vpop.f32.mrb[47].mxu1 }
 0x17e   : > { %4743 = vmatmul.mubr.msk.bf16.gmra.mrb[124].mxu1 %vm1825_vm0, %v5332_v6  ;;  %2593 = vmatmul.mubr.bf16.gmra.mrb[68].mxu0 %v5331_v8  ;;  %v5356_v8 = vld [vmem:[%s5529_s9 + $0x4e0] ss:$28 sps:$4 sm:$0xff]  }
 0x17f   : > { %4746 = vmatprep.mubr.msk.bf16.mxu1 %vm1825_vm0, %v5335_v9  ;;  %2600 = vmatprep.mubr.bf16.mxu0 %v5333_v12  ;;  %v5360_v9 = vld [vmem:[%s5529_s9 + $0x408] ss:$28 sps:$4 sm:$0xff]   ;;  %v5358_v12 = vld [vmem:[%s5529_s9 + $0x51c] ss:$28 sps:$4 sm:$0xff]  }
 0x181   : > { %v5941_v14 = vpop.f32.mrb[48].mxu1 }
 0x182   : > { %v2042_v15 = vpop.f32.mrb[49].mxu1 }
 0x183   : > { %v5944_v17 = vpop.f32.mrb[50].mxu1 }
 0x184   : > { %v2045_v22 = vpop.f32.mrb[51].mxu1 }
 0x185   : > { %v5361_v22 = vld [vmem:[%s5529_s9 + $0x518] ss:$28 sps:$4 sm:$0xff]  }
 0x186   : > { %4747 = vmatmul.mubr.msk.bf16.gmra.mrb[128].mxu1 %vm1825_vm0, %v5337_v16  ;;  %2601 = vmatmul.mubr.bf16.gmra.mrb[72].mxu0 %v5336_v19  ;;  %v5362_v19 = vld [vmem:[%s5529_s9 + $0x440] ss:$28 sps:$4 sm:$0xff]  }
 0x187   : > { %4750 = vmatprep.mubr.msk.bf16.mxu1 %vm1825_vm0, %v5340_v20  ;;  %2608 = vmatprep.mubr.bf16.mxu0 %v5338_v23  ;;  %v5365_v23 = vld [vmem:[%s5529_s9 + $0x478] ss:$28 sps:$4 sm:$0xff]  }
 0x189   : > { %v5951_v24 = vpop.f32.mrb[52].mxu1 }
 0x18a   : > { %v2050_v25 = vpop.f32.mrb[53].mxu1 }
 0x18b   : > { %v5954_v0 = vpop.f32.mrb[54].mxu1 }
 0x18c   : > { %v2053_v31 = vpop.f32.mrb[55].mxu1 }
 0x18d   : > { %v5367_v31 = vld [vmem:[%s5529_s9 + $0x4b0] ss:$28 sps:$4 sm:$0xff]  }
 0x18e   : > { %4751 = vmatmul.mubr.msk.bf16.gmra.mrb[132].mxu1 %vm1825_vm0, %v5342_v27  ;;  %2609 = vmatmul.mubr.bf16.gmra.mrb[76].mxu0 %v5341_v29  ;;  %v5363_v27 = vld [vmem:[%s5529_s9 + $0x554] ss:$28 sps:$4 sm:$0xff]  }
 0x18f   : > { %4754 = vmatprep.mubr.msk.bf16.mxu1 %vm1825_vm0, %v5345_v30  ;;  %2616 = vmatprep.mubr.bf16.mxu0 %v5343_v33 }
 0x191   : > { %v5961_v36 = vpop.f32.mrb[56].mxu1 }
 0x192   : > { %v2058_v37 = vpop.f32.mrb[57].mxu1 }
 0x193   : > { %v5964_v42 = vpop.f32.mrb[58].mxu1  ;;  %v5366_v37 = vld [vmem:[%s5529_s9 + $0x550] ss:$28 sps:$4 sm:$0xff]  }
 0x194   : > { %v2061_v47 = vpop.f32.mrb[59].mxu1 }
 0x196   : > { %4755 = vmatmul.mubr.msk.bf16.gmra.mrb[136].mxu1 %vm1825_vm0, %v5347_v40  ;;  %2617 = vmatmul.mubr.bf16.gmra.mrb[80].mxu0 %v5346_v43  ;;  %v5370_v40 = vld [vmem:[%s5529_s9 + $0x4e8] ss:$28 sps:$4 sm:$0xff]  }
 0x197   : > { %4758 = vmatprep.mubr.msk.bf16.mxu1 %vm1825_vm0, %v5350_v45  ;;  %2624 = vmatprep.mubr.bf16.mxu0 %v5348_v48  ;;  %v5368_v45 = vld [vmem:[%s5529_s9 + $0x58c] ss:$28 sps:$4 sm:$0xff]  }
 0x199   : > { %v5971_v51 = vpop.f32.mrb[60].mxu1 }
 0x19a   : > { %v2066_v52 = vpop.f32.mrb[61].mxu1 }
 0x19b   : > { %v5974_v55 = vpop.f32.mrb[62].mxu1  ;;  %v5372_v52 = vld [vmem:[%s5529_s9 + $0x520] ss:$28 sps:$4 sm:$0xff]  }
 0x19c   : > { %v2069_v61 = vpop.f32.mrb[63].mxu1 }
 0x19e   : > { %4759 = vmatmul.mubr.msk.bf16.gmra.mrb[140].mxu1 %vm1825_vm0, %v5352_v54  ;;  %2625 = vmatmul.mubr.bf16.gmra.mrb[84].mxu0 %v5351_v57  ;;  %v5371_v57 = vld [vmem:[%s5529_s9 + $0x588] ss:$28 sps:$4 sm:$0xff]  }
 0x19f   : > { %4762 = vmatprep.mubr.msk.bf16.mxu1 %vm1825_vm0, %v5355_v58  ;;  %2632 = vmatprep.mubr.bf16.mxu0 %v5353_v62  ;;  %v5375_v58 = vld [vmem:[%s5529_s9 + $0x558] ss:$28 sps:$4 sm:$0xff]   ;;  %v5373_v62 = vld [vmem:[%s5529_s9 + $0x5c4] ss:$28 sps:$4 sm:$0xff]  }
 0x1a1   : > { %v5981_v63 = vpop.f32.mrb[64].mxu1 }
 0x1a2   : > { %v2074_v1 = vpop.f32.mrb[65].mxu1 }
 0x1a3   : > { %v5984_v6 = vpop.f32.mrb[66].mxu1 }
 0x1a4   : > { %v2077_v11 = vpop.f32.mrb[67].mxu1 }
 0x1a5   : > { %v5376_v11 = vld [vmem:[%s5529_s9 + $0x5c0] ss:$28 sps:$4 sm:$0xff]  }
 0x1a6   : > { %4763 = vmatmul.mubr.msk.bf16.gmra.mrb[144].mxu1 %vm1825_vm0, %v5357_v4  ;;  %2633 = vmatmul.mubr.bf16.gmra.mrb[88].mxu0 %v5356_v8  ;;  %v5377_v8 = vld [vmem:[%s5529_s9 + $0x590] ss:$28 sps:$4 sm:$0xff]  }
 0x1a7   : > { %4766 = vmatprep.mubr.msk.bf16.mxu1 %vm1825_vm0, %v5360_v9  ;;  %2640 = vmatprep.mubr.bf16.mxu0 %v5358_v12  ;;  %v5380_v12 = vld [vmem:[%s5529_s9 + $0x5c8] ss:$28 sps:$4 sm:$0xff]  }
 0x1a9   : > { %v5991_v15 = vpop.f32.mrb[68].mxu1 }
 0x1aa   : > { %v2082_v16 = vpop.f32.mrb[69].mxu1 }
 0x1ab   : > { %v5994_v20 = vpop.f32.mrb[70].mxu1 }
 0x1ac   : > { %v2085_v25 = vpop.f32.mrb[71].mxu1 }
 0x1ae   : > { %4767 = vmatmul.mubr.msk.bf16.gmra.mrb[148].mxu1 %vm1825_vm0, %v5362_v19  ;;  %2641 = vmatmul.mubr.bf16.gmra.mrb[92].mxu0 %v5361_v22  ;;  %v5378_v19 = vld [vmem:[%s5529_s9 + $0x5fc] ss:$28 sps:$4 sm:$0xff]   ;;  %v6032_v22 = vld [vmem:[%s7073_s2] ss:$0 sm:$0xff] }
 0x1af   : > { %4770 = vmatprep.mubr.msk.bf16.mxu1 %vm1825_vm0, %v5365_v23  ;;  %2648 = vmatprep.mubr.bf16.mxu0 %v5363_v27  ;;  %v1945_v23 = vadd.f32 %v6032_v22, %v5832_v32  ;;  %v5382_v27 = vld [vmem:[%s5529_s9 + $0x600] ss:$28 sps:$4 sm:$0xff]  }
 0x1b1   : > { %v6001_v29 = vpop.f32.mrb[72].mxu1 }
 0x1b2   : > { %v2090_v30 = vpop.f32.mrb[73].mxu1 }
 0x1b3   : > { %v6004_v33 = vpop.f32.mrb[74].mxu1  ;;  %v1948_v30 = vadd.f32 %v6032_v22, %v5835_v35 }
 0x1b4   : > { %v2093_v43 = vpop.f32.mrb[75].mxu1 }
 0x1b6   : > { %4771 = vmatmul.mubr.msk.bf16.gmra.mrb[152].mxu1 %vm1825_vm0, %v5367_v31  ;;  %2649 = vmatmul.mubr.bf16.gmra.mrb[96].mxu0 %v5366_v37 }
 0x1b7   : > { %4774 = vmatprep.mubr.msk.bf16.mxu1 %vm1825_vm0, %v5370_v40  ;;  %2656 = vmatprep.mubr.bf16.mxu0 %v5368_v45  ;;  %v5381_v40 = vld [vmem:[%s5529_s9 + $0x5f8] ss:$28 sps:$4 sm:$0xff]   ;;  %s4080_s9 = sshll.u32 %s7277_s12, 2 }
 0x1b8   : > { %s6201_s22 = scalar_lea.vmem %s7074_s3, %s4080_s9 }
 0x1b9   : > { %v6011_v47 = vpop.f32.mrb[76].mxu1 }
 0x1ba   : > { %v2098_v48 = vpop.f32.mrb[77].mxu1 }
 0x1bb   : > { %v6014_v54 = vpop.f32.mrb[78].mxu1 }
 0x1bc   : > { %v2101_v61 = vpop.f32.mrb[79].mxu1 }
 0x1be   : > { %4775 = vmatmul.mubr.msk.bf16.gmra.mrb[156].mxu1 %vm1825_vm0, %v5372_v52  ;;  %2657 = vmatmul.mubr.bf16.gmra.mrb[100].mxu0 %v5371_v57  ;;  %v1953_v52 = vadd.f32 %v6032_v22, %v5840_v41  ;;  %v1956_v57 = vadd.f32 %v6032_v22, %v5843_v44 }
 0x1bf   : > { %4778 = vmatprep.mubr.msk.bf16.mxu1 %vm1825_vm0, %v5375_v58  ;;  %2664 = vmatprep.mubr.bf16.mxu0 %v5373_v62 }
 0x1c1   : > { %v6021_v1 = vpop.f32.mrb[80].mxu1 }
 0x1c2   : > { %v2106_v4 = vpop.f32.mrb[81].mxu1 }
 0x1c3   : > { %v6024_v9 = vpop.f32.mrb[82].mxu1 }
 0x1c4   : > { %v2109_v16 = vpop.f32.mrb[83].mxu1 }
 0x1c6   : > { %4779 = vmatmul.mubr.msk.bf16.gmra.mrb[160].mxu1 %vm1825_vm0, %v5377_v8  ;;  %2665 = vmatmul.mubr.bf16.gmra.mrb[104].mxu0 %v5376_v11  ;;  %v1961_v8 = vadd.f32 %v6032_v22, %v5852_v50 }
 0x1c7   : > { %4782 = vmatprep.mubr.msk.bf16.mxu1 %vm1825_vm0, %v5380_v12  ;;  %2672 = vmatprep.mubr.bf16.mxu0 %v5378_v19  ;;  %v1964_v12 = vadd.f32 %v6032_v22, %v5855_v53 }
 0x1c9   : > { %v2458_v25 = vpop.f32.mrb[0].mxu0 }
 0x1ca   : > { %v6041_v31 = vadd.f32 %v2458_v25, %v1945_v23  ;;  %v2460_v37 = vpop.f32.mrb[1].mxu0  ;;  %v1969_v25 = vadd.f32 %v6032_v22, %v5860_v39 }
 0x1cb   : > { %v2461_v43 = vpop.f32.mrb[2].mxu0 }
 0x1cc   : > { %v6044_v45 = vadd.f32 %v2461_v43, %v1948_v30  ;;  %v2463_v48 = vpop.f32.mrb[3].mxu0  ;;  %v1972_v30 = vadd.f32 %v6032_v22, %v5863_v60 }
 0x1cd   : > { %v1977_v48 = vadd.f32 %v6032_v22, %v5868_v2 }
 0x1ce   : > { %4783 = vmatmul.mubr.msk.bf16.gmra.mrb[164].mxu1 %vm1825_vm0, %v5382_v27  ;;  %2673 = vmatmul.mubr.bf16.gmra.mrb[108].mxu0 %v5381_v40 }
 0x1d1   : > { %v2466_v32 = vpop.f32.mrb[4].mxu0 }
 0x1d2   : > { %v6051_v58 = vadd.f32 %v2466_v32, %v1953_v52  ;;  %v2468_v35 = vpop.f32.mrb[5].mxu0  ;;  %v1980_v32 = vadd.f32 %v6032_v22, %v5871_v5 }
 0x1d3   : > { %v2469_v61 = vpop.f32.mrb[6].mxu0 }
 0x1d4   : > { %v6053_v62 = vadd.f32 %v2469_v61, %v1956_v57  ;;  %v2471_v4 = vpop.f32.mrb[7].mxu0 }
 0x1d5   : > { %v1985_v4 = vadd.f32 %v6032_v22, %v5876_v10 }
 0x1d9   : > { %v2474_v11 = vpop.f32.mrb[8].mxu0 }
 0x1da   : > { %v6059_v16 = vadd.f32 %v2474_v11, %v1961_v8  ;;  %v2476_v41 = vpop.f32.mrb[9].mxu0  ;;  %v1988_v11 = vadd.f32 %v6032_v22, %v5879_v13 }
 0x1db   : > { %v2477_v19 = vpop.f32.mrb[10].mxu0 }
 0x1dc   : > { %v6061_v23 = vadd.f32 %v2477_v19, %v1964_v12  ;;  %v2479_v44 = vpop.f32.mrb[11].mxu0 }
 0x1dd   : > { %v1993_v44 = vadd.f32 %v6032_v22, %v5884_v18  ;;  %v2004_v18 = vadd.f32 %v6032_v22, %v5895_v28  ;;  %v2012_v28 = vadd.f32 %v6032_v22, %v5904_v38  ;;  %v2020_v38 = vadd.f32 %v6032_v22, %v5914_v49 }
 0x1de   : > { %v2028_v49 = vadd.f32 %v6032_v22, %v5924_v59  ;;  %v2036_v59 = vadd.f32 %v6032_v22, %v5934_v7  ;;  %v2044_v7 = vadd.f32 %v6032_v22, %v5944_v17  ;;  %v2052_v17 = vadd.f32 %v6032_v22, %v5954_v0 }
 0x1df   : > { %v2060_v0 = vadd.f32 %v6032_v22, %v5964_v42 }
 0x1e1   : > { %v2482_v27 = vpop.f32.mrb[12].mxu0 }
 0x1e2   : > { %v6067_v37 = vadd.f32 %v2482_v27, %v1969_v25  ;;  %v2484_v50 = vpop.f32.mrb[13].mxu0  ;;  %v1996_v27 = vadd.f32 %v6032_v22, %v5887_v21 }
 0x1e3   : > { %v2485_v40 = vpop.f32.mrb[14].mxu0 }
 0x1e4   : > { %v6069_v43 = vadd.f32 %v2485_v40, %v1972_v30  ;;  %v2487_v53 = vpop.f32.mrb[15].mxu0 }
 0x1e5   : > { %v2001_v53 = vadd.f32 %v6032_v22, %v5892_v26  ;;  %v2009_v26 = vadd.f32 %v6032_v22, %v5901_v34  ;;  %v2017_v34 = vadd.f32 %v6032_v22, %v5911_v46  ;;  %v2025_v46 = vadd.f32 %v6032_v22, %v5921_v56 }
 0x1e6   : > { %v2033_v56 = vadd.f32 %v6032_v22, %v5931_v3  ;;  %v2041_v3 = vadd.f32 %v6032_v22, %v5941_v14  ;;  %v2049_v14 = vadd.f32 %v6032_v22, %v5951_v24  ;;  %v2057_v24 = vadd.f32 %v6032_v22, %v5961_v36 }
 0x1e9   : > { %v2490_v52 = vpop.f32.mrb[16].mxu0 }
 0x1ea   : > { %v6075_v57 = vadd.f32 %v2490_v52, %v1977_v48  ;;  %v2492_v39 = vpop.f32.mrb[17].mxu0 }
 0x1eb   : > { %v2493_v35 = vpop.f32.mrb[18].mxu0 }
 0x1ec   : > { %v6077_v61 = vadd.f32 %v2493_v35, %v1980_v32  ;;  %v2495_v60 = vpop.f32.mrb[19].mxu0 }
 0x1f1   : > { %v2498_v8 = vpop.f32.mrb[20].mxu0 }
 0x1f2   : > { %v6083_v12 = vadd.f32 %v2498_v8, %v1985_v4  ;;  %v2500_v2 = vpop.f32.mrb[21].mxu0 }
 0x1f3   : > { %v2501_v41 = vpop.f32.mrb[22].mxu0 }
 0x1f4   : > { %v6085_v19 = vadd.f32 %v2501_v41, %v1988_v11  ;;  %v2503_v5 = vpop.f32.mrb[23].mxu0 }
 0x1f9   : > { %v2506_v25 = vpop.f32.mrb[24].mxu0 }
 0x1fa   : > { %v6091_v30 = vadd.f32 %v2506_v25, %v1993_v44  ;;  %v2508_v10 = vpop.f32.mrb[25].mxu0 }
 0x1fb   : > { %v2509_v50 = vpop.f32.mrb[26].mxu0 }
 0x1fc   : > { %v6093_v40 = vadd.f32 %v2509_v50, %v1996_v27  ;;  %v2511_v13 = vpop.f32.mrb[27].mxu0 }
 0x201   : > { %v6097_v48 = vpop.f32.mrb[84].mxu1  ;;  %v2514_v52 = vpop.f32.mrb[28].mxu0 }
 0x202   : > { %v2371_v32 = vpop.f32.mrb[85].mxu1  ;;  %v6101_v39 = vadd.f32 %v2514_v52, %v2001_v53  ;;  %v2516_v21 = vpop.f32.mrb[29].mxu0 }
 0x203   : > { %v6103_v35 = vpop.f32.mrb[86].mxu1  ;;  %v2517_v60 = vpop.f32.mrb[30].mxu0 }
 0x204   : > { %v2374_v4 = vpop.f32.mrb[87].mxu1  ;;  %v6105_v8 = vadd.f32 %v2517_v60, %v2004_v18  ;;  %v2519_v11 = vpop.f32.mrb[31].mxu0 }
 0x209   : > { %v6109_v2 = vpop.f32.mrb[88].mxu1  ;;  %v2522_v41 = vpop.f32.mrb[32].mxu0 }
 0x20a   : > { %v2379_v5 = vpop.f32.mrb[89].mxu1  ;;  %v6113_v44 = vadd.f32 %v2522_v41, %v2009_v26  ;;  %v2524_v25 = vpop.f32.mrb[33].mxu0 }
 0x20b   : > { %v6115_v27 = vpop.f32.mrb[90].mxu1  ;;  %v2525_v10 = vpop.f32.mrb[34].mxu0 }
 0x20c   : > { %v2382_v50 = vpop.f32.mrb[91].mxu1  ;;  %v6117_v13 = vadd.f32 %v2525_v10, %v2012_v28  ;;  %v2527_v53 = vpop.f32.mrb[35].mxu0 }
 0x211   : > { %v6121_v52 = vpop.f32.mrb[92].mxu1  ;;  %v2530_v32 = vpop.f32.mrb[36].mxu0 }
 0x212   : > { %v2387_v18 = vpop.f32.mrb[93].mxu1  ;;  %v6125_v21 = vadd.f32 %v2530_v32, %v2017_v34  ;;  %v2532_v60 = vpop.f32.mrb[37].mxu0 }
 0x213   : > { %v6127_v4 = vpop.f32.mrb[94].mxu1  ;;  %v2533_v11 = vpop.f32.mrb[38].mxu0 }
 0x214   : > { %v2390_v26 = vpop.f32.mrb[95].mxu1  ;;  %v6129_v41 = vadd.f32 %v2533_v11, %v2020_v38  ;;  %v2535_v5 = vpop.f32.mrb[39].mxu0 }
 0x219   : > { %v6133_v28 = vpop.f32.mrb[96].mxu1  ;;  %v2538_v25 = vpop.f32.mrb[40].mxu0 }
 0x21a   : > { %7144 = vst [vmem:[#allocation2_spill] sm:$0xff] %v6133_v28  ;;  %v2395_v10 = vpop.f32.mrb[97].mxu1  ;;  %v6137_v50 = vadd.f32 %v2538_v25, %v2025_v46  ;;  %v2540_v53 = vpop.f32.mrb[41].mxu0 }
 0x21b   : > { %v6139_v34 = vpop.f32.mrb[98].mxu1  ;;  %v2541_v32 = vpop.f32.mrb[42].mxu0 }
 0x21c   : > { %7145 = vst [vmem:[#allocation3_spill] sm:$0xff] %v6139_v34  ;;  %v2398_v18 = vpop.f32.mrb[99].mxu1  ;;  %v6141_v38 = vadd.f32 %v2541_v32, %v2028_v49  ;;  %v2543_v60 = vpop.f32.mrb[43].mxu0 }
 0x221   : > { %v6145_v11 = vpop.f32.mrb[100].mxu1  ;;  %v2546_v26 = vpop.f32.mrb[44].mxu0 }
 0x222   : > { %7146 = vst [vmem:[#allocation4_spill] sm:$0xff] %v6145_v11  ;;  %v2403_v5 = vpop.f32.mrb[101].mxu1  ;;  %v6149_v46 = vadd.f32 %v2546_v26, %v2033_v56  ;;  %v2548_v25 = vpop.f32.mrb[45].mxu0 }
 0x223   : > { %v6151_v10 = vpop.f32.mrb[102].mxu1  ;;  %v2549_v53 = vpop.f32.mrb[46].mxu0 }
 0x224   : > { %7147 = vst [vmem:[#allocation5_spill] sm:$0xff] %v6151_v10  ;;  %v2406_v18 = vpop.f32.mrb[103].mxu1  ;;  %v6153_v49 = vadd.f32 %v2549_v53, %v2036_v59  ;;  %v2551_v32 = vpop.f32.mrb[47].mxu0 }
 0x229   : > { %v6157_v60 = vpop.f32.mrb[104].mxu1  ;;  %v2554_v11 = vpop.f32.mrb[48].mxu0 }
 0x22a   : > { %7148 = vst [vmem:[#allocation6_spill] sm:$0xff] %v6157_v60  ;;  %v2411_v5 = vpop.f32.mrb[105].mxu1  ;;  %v6161_v56 = vadd.f32 %v2554_v11, %v2041_v3  ;;  %v2556_v26 = vpop.f32.mrb[49].mxu0 }
 0x22b   : > { %v6163_v25 = vpop.f32.mrb[106].mxu1  ;;  %v2557_v10 = vpop.f32.mrb[50].mxu0 }
 0x22c   : > { %7149 = vst [vmem:[#allocation7_spill] sm:$0xff] %v6163_v25  ;;  %v2414_v18 = vpop.f32.mrb[107].mxu1  ;;  %v6165_v59 = vadd.f32 %v2557_v10, %v2044_v7  ;;  %v2559_v53 = vpop.f32.mrb[51].mxu0 }
 0x231   : > { %v6169_v32 = vpop.f32.mrb[108].mxu1  ;;  %v2562_v60 = vpop.f32.mrb[52].mxu0 }
 0x232   : > { %7150 = vst [vmem:[#allocation8_spill] sm:$0xff] %v6169_v32  ;;  %v2419_v5 = vpop.f32.mrb[109].mxu1  ;;  %v6173_v11 = vadd.f32 %v2562_v60, %v2049_v14  ;;  %v2564_v3 = vpop.f32.mrb[53].mxu0 }
 0x233   : > { %v6175_v26 = vpop.f32.mrb[110].mxu1  ;;  %v2565_v18 = vpop.f32.mrb[54].mxu0 }
 0x234   : > { %7151 = vst [vmem:[#allocation9_spill] sm:$0xff] %v6175_v26  ;;  %v2422_v10 = vpop.f32.mrb[111].mxu1  ;;  %v6177_v7 = vadd.f32 %v2565_v18, %v2052_v17  ;;  %v2567_v53 = vpop.f32.mrb[55].mxu0 }
 0x239   : > { %v4732_v32 = vpop.f32.mrb[112].mxu1  ;;  %v2570_v25 = vpop.f32.mrb[56].mxu0 }
 0x23a   : > { %v2724_v5 = vadd.f32 %v6051_v58, %v4732_v32  ;;  %v2715_v34 = vpop.f32.mrb[113].mxu1  ;;  %v6184_v60 = vadd.f32 %v2570_v25, %v2057_v24  ;;  %v2572_v14 = vpop.f32.mrb[57].mxu0 }
 0x23b   : > { %v2716_v3 = vadd.f32 %v6041_v31, %v2715_v34  ;;  %v4733_v10 = vpop.f32.mrb[114].mxu1  ;;  %v2573_v17 = vpop.f32.mrb[58].mxu0 }
 0x23c   : > { %v2727_v18 = vadd.f32 %v6053_v62, %v4733_v10  ;;  %v2718_v53 = vpop.f32.mrb[115].mxu1  ;;  %v6189_v36 = vadd.f32 %v2573_v17, %v2060_v0  ;;  %v2575_v26 = vpop.f32.mrb[59].mxu0  ;;  %v6192_v32 = vmax.f32 %v2724_v5, 0.0  ;;  %v2068_v0 = vadd.f32 %v6032_v22, %v5974_v55 }
 0x23d   : > { %v2719_v58 = vadd.f32 %v6044_v45, %v2718_v53  ;;  %v6196_v42 = vmax.f32 %v2716_v3, 0.0  ;;  %v2065_v45 = vadd.f32 %v6032_v22, %v5971_v51 }
 0x23e   : > { %v6194_v28 = vmax.f32 %v2727_v18, 0.0 }
 0x23f   : > { %v6203_v31 = vmax.f32 %v2719_v58, 0.0 }
 0x240   : > { %v4537_v62 = vpack.c.bf16 %v6194_v28, %v6192_v32 }
 0x241   : > { %v4532_v34 = vpack.c.bf16 %v6203_v31, %v6196_v42  ;;  %v4736_v25 = vpop.f32.mrb[116].mxu1  ;;  %v2578_v26 = vpop.f32.mrb[60].mxu0 }
 0x242   : > { %4669 = vst [vmem:[%s6201_s22 + $0x8] sm:$0xff] %v4537_v62   ;;  %v2740_v24 = vadd.f32 %v6067_v37, %v4736_v25  ;;  %v2731_v5 = vpop.f32.mrb[117].mxu1  ;;  %v6216_v14 = vadd.f32 %v2578_v26, %v2065_v45  ;;  %v2580_v3 = vpop.f32.mrb[61].mxu0 }
 0x243   : > { %4533 = vst [vmem:[%s6201_s22] sm:$0xff] %v4532_v34   ;;  %v2732_v10 = vadd.f32 %v6059_v16, %v2731_v5  ;;  %v4737_v51 = vpop.f32.mrb[118].mxu1  ;;  %v2581_v17 = vpop.f32.mrb[62].mxu0  ;;  %v2076_v3 = vadd.f32 %v6032_v22, %v5984_v6 }
 0x244   : > { %v2743_v18 = vadd.f32 %v6069_v43, %v4737_v51  ;;  %v2734_v53 = vpop.f32.mrb[119].mxu1  ;;  %v6220_v58 = vadd.f32 %v2581_v17, %v2068_v0  ;;  %v2583_v37 = vpop.f32.mrb[63].mxu0  ;;  %v6223_v25 = vmax.f32 %v2740_v24, 0.0  ;;  %v2073_v43 = vadd.f32 %v6032_v22, %v5981_v63 }
 0x245   : > { %v2735_v62 = vadd.f32 %v6061_v23, %v2734_v53  ;;  %v6227_v45 = vmax.f32 %v2732_v10, 0.0 }
 0x246   : > { %v6225_v55 = vmax.f32 %v2743_v18, 0.0 }
 0x247   : > { %v6229_v34 = vmax.f32 %v2735_v62, 0.0 }
 0x248   : > { %v4547_v16 = vpack.c.bf16 %v6225_v55, %v6223_v25 }
 0x249   : > { %v4542_v26 = vpack.c.bf16 %v6229_v34, %v6227_v45  ;;  %v4740_v5 = vpop.f32.mrb[120].mxu1  ;;  %v2586_v23 = vpop.f32.mrb[64].mxu0 }
 0x24a   : > { %4671 = vst [vmem:[%s6201_s22 + $0x18] sm:$0xff] %v4547_v16   ;;  %v2756_v24 = vadd.f32 %v6083_v12, %v4740_v5  ;;  %v2747_v0 = vpop.f32.mrb[121].mxu1  ;;  %v6242_v10 = vadd.f32 %v2586_v23, %v2073_v43  ;;  %v2588_v51 = vpop.f32.mrb[65].mxu0 }
 0x24b   : > { %4670 = vst [vmem:[%s6201_s22 + $0x10] sm:$0xff] %v4542_v26   ;;  %v2748_v17 = vadd.f32 %v6075_v57, %v2747_v0  ;;  %v4741_v63 = vpop.f32.mrb[122].mxu1  ;;  %v2589_v18 = vpop.f32.mrb[66].mxu0  ;;  %v2084_v51 = vadd.f32 %v6032_v22, %v5994_v20 }
 0x24c   : > { %v2759_v53 = vadd.f32 %v6085_v19, %v4741_v63  ;;  %v2750_v37 = vpop.f32.mrb[123].mxu1  ;;  %v6246_v62 = vadd.f32 %v2589_v18, %v2076_v3  ;;  %v2591_v12 = vpop.f32.mrb[67].mxu0  ;;  %v6249_v5 = vmax.f32 %v2756_v24, 0.0  ;;  %v2081_v19 = vadd.f32 %v6032_v22, %v5991_v15 }
 0x24d   : > { %v2751_v16 = vadd.f32 %v6077_v61, %v2750_v37  ;;  %v6253_v43 = vmax.f32 %v2748_v17, 0.0 }
 0x24e   : > { %v6251_v6 = vmax.f32 %v2759_v53, 0.0 }
 0x24f   : > { %v6255_v26 = vmax.f32 %v2751_v16, 0.0 }
 0x250   : > { %v4557_v57 = vpack.c.bf16 %v6251_v6, %v6249_v5 }
 0x251   : > { %v4552_v23 = vpack.c.bf16 %v6255_v26, %v6253_v43  ;;  %v4744_v0 = vpop.f32.mrb[124].mxu1  ;;  %v2594_v61 = vpop.f32.mrb[68].mxu0 }
 0x252   : > { %4673 = vst [vmem:[%s6201_s22 + $0x28] sm:$0xff] %v4557_v57   ;;  %v2772_v24 = vadd.f32 %v6101_v39, %v4744_v0  ;;  %v2763_v3 = vpop.f32.mrb[125].mxu1  ;;  %v6268_v17 = vadd.f32 %v2594_v61, %v2081_v19  ;;  %v2596_v63 = vpop.f32.mrb[69].mxu0 }
 0x253   : > { %4672 = vst [vmem:[%s6201_s22 + $0x20] sm:$0xff] %v4552_v23   ;;  %v2764_v18 = vadd.f32 %v6091_v30, %v2763_v3  ;;  %v4745_v15 = vpop.f32.mrb[126].mxu1  ;;  %v2597_v53 = vpop.f32.mrb[70].mxu0  ;;  %v2092_v63 = vadd.f32 %v6032_v22, %v6004_v33 }
 0x254   : > { %v2775_v37 = vadd.f32 %v6105_v8, %v4745_v15  ;;  %v2766_v12 = vpop.f32.mrb[127].mxu1  ;;  %v6272_v16 = vadd.f32 %v2597_v53, %v2084_v51  ;;  %v2599_v39 = vpop.f32.mrb[71].mxu0  ;;  %v6275_v0 = vmax.f32 %v2772_v24, 0.0  ;;  %v2089_v8 = vadd.f32 %v6032_v22, %v6001_v29 }
 0x255   : > { %v2767_v57 = vadd.f32 %v6093_v40, %v2766_v12  ;;  %v6279_v19 = vmax.f32 %v2764_v18, 0.0 }
 0x256   : > { %v6277_v20 = vmax.f32 %v2775_v37, 0.0 }
 0x257   : > { %v6281_v23 = vmax.f32 %v2767_v57, 0.0 }
 0x258   : > { %v4567_v30 = vpack.c.bf16 %v6277_v20, %v6275_v0 }
 0x259   : > { %v4562_v61 = vpack.c.bf16 %v6281_v23, %v6279_v19  ;;  %v4748_v3 = vpop.f32.mrb[128].mxu1  ;;  %v2602_v40 = vpop.f32.mrb[72].mxu0 }
 0x25a   : > { %4675 = vst [vmem:[%s6201_s22 + $0x38] sm:$0xff] %v4567_v30   ;;  %v2788_v24 = vadd.f32 %v6125_v21, %v4748_v3  ;;  %v2779_v51 = vpop.f32.mrb[129].mxu1  ;;  %v6294_v18 = vadd.f32 %v2602_v40, %v2089_v8  ;;  %v2604_v15 = vpop.f32.mrb[73].mxu0 }
 0x25b   : > { %4674 = vst [vmem:[%s6201_s22 + $0x30] sm:$0xff] %v4562_v61   ;;  %v2780_v53 = vadd.f32 %v6113_v44, %v2779_v51  ;;  %v4749_v29 = vpop.f32.mrb[130].mxu1  ;;  %v2605_v37 = vpop.f32.mrb[74].mxu0  ;;  %v2100_v15 = vadd.f32 %v6032_v22, %v6014_v54 }
 0x25c   : > { %v2791_v12 = vadd.f32 %v6129_v41, %v4749_v29  ;;  %v2782_v39 = vpop.f32.mrb[131].mxu1  ;;  %v6298_v57 = vadd.f32 %v2605_v37, %v2092_v63  ;;  %v2607_v21 = vpop.f32.mrb[75].mxu0  ;;  %v6301_v3 = vmax.f32 %v2788_v24, 0.0  ;;  %v2097_v41 = vadd.f32 %v6032_v22, %v6011_v47 }
 0x25d   : > { %v2783_v30 = vadd.f32 %v6117_v13, %v2782_v39  ;;  %v6305_v8 = vmax.f32 %v2780_v53, 0.0 }
 0x25e   : > { %v6303_v33 = vmax.f32 %v2791_v12, 0.0 }
 0x25f   : > { %v6307_v61 = vmax.f32 %v2783_v30, 0.0 }
 0x260   : > { %v4577_v44 = vpack.c.bf16 %v6303_v33, %v6301_v3 }
 0x261   : > { %v4572_v40 = vpack.c.bf16 %v6307_v61, %v6305_v8  ;;  %v4752_v51 = vpop.f32.mrb[132].mxu1  ;;  %v2610_v13 = vpop.f32.mrb[76].mxu0 }
 0x262   : > { %4677 = vst [vmem:[%s6201_s22 + $0x48] sm:$0xff] %v4577_v44   ;;  %v2804_v24 = vadd.f32 %v6149_v46, %v4752_v51  ;;  %v2795_v63 = vpop.f32.mrb[133].mxu1  ;;  %v6320_v53 = vadd.f32 %v2610_v13, %v2097_v41  ;;  %v2612_v29 = vpop.f32.mrb[77].mxu0 }
 0x263   : > { %4676 = vst [vmem:[%s6201_s22 + $0x40] sm:$0xff] %v4572_v40   ;;  %v2796_v37 = vadd.f32 %v6137_v50, %v2795_v63  ;;  %v4753_v47 = vpop.f32.mrb[134].mxu1  ;;  %v2613_v12 = vpop.f32.mrb[78].mxu0  ;;  %v2108_v29 = vadd.f32 %v6032_v22, %v6024_v9 }
 0x264   : > { %v2807_v39 = vadd.f32 %v6153_v49, %v4753_v47  ;;  %v2798_v21 = vpop.f32.mrb[135].mxu1  ;;  %v6324_v30 = vadd.f32 %v2613_v12, %v2100_v15  ;;  %v2615_v46 = vpop.f32.mrb[79].mxu0  ;;  %v6327_v51 = vmax.f32 %v2804_v24, 0.0  ;;  %v2105_v49 = vadd.f32 %v6032_v22, %v6021_v1 }
 0x265   : > { %v2799_v44 = vadd.f32 %v6141_v38, %v2798_v21  ;;  %v6331_v41 = vmax.f32 %v2796_v37, 0.0 }
 0x266   : > { %v6329_v54 = vmax.f32 %v2807_v39, 0.0 }
 0x267   : > { %v6333_v40 = vmax.f32 %v2799_v44, 0.0 }
 0x268   : > { %v4587_v50 = vpack.c.bf16 %v6329_v54, %v6327_v51 }
 0x269   : > { %v4582_v13 = vpack.c.bf16 %v6333_v40, %v6331_v41  ;;  %v4756_v63 = vpop.f32.mrb[136].mxu1  ;;  %v2618_v38 = vpop.f32.mrb[80].mxu0 }
 0x26a   : > { %4679 = vst [vmem:[%s6201_s22 + $0x58] sm:$0xff] %v4587_v50   ;;  %v2820_v24 = vadd.f32 %v6173_v11, %v4756_v63  ;;  %v2811_v15 = vpop.f32.mrb[137].mxu1  ;;  %v6346_v37 = vadd.f32 %v2618_v38, %v2105_v49  ;;  %v2620_v47 = vpop.f32.mrb[81].mxu0 }
 0x26b   : > { %4678 = vst [vmem:[%s6201_s22 + $0x50] sm:$0xff] %v4582_v13   ;;  %v2812_v12 = vadd.f32 %v6161_v56, %v2811_v15  ;;  %v4757_v1 = vpop.f32.mrb[138].mxu1  ;;  %v2621_v39 = vpop.f32.mrb[82].mxu0  ;;  %v4904_v47 = vadd.f32 %v6032_v22, %v6103_v35 }
 0x26c   : > { %v2823_v21 = vadd.f32 %v6177_v7, %v4757_v1  ;;  %v2814_v46 = vpop.f32.mrb[139].mxu1  ;;  %v6350_v44 = vadd.f32 %v2621_v39, %v2108_v29  ;;  %v2623_v11 = vpop.f32.mrb[83].mxu0  ;;  %v6353_v63 = vmax.f32 %v2820_v24, 0.0  ;;  %v4902_v7 = vadd.f32 %v6032_v22, %v6097_v48 }
 0x26d   : > { %v2815_v50 = vadd.f32 %v6165_v59, %v2814_v46  ;;  %v6357_v49 = vmax.f32 %v2812_v12, 0.0 }
 0x26e   : > { %v6355_v9 = vmax.f32 %v2823_v21, 0.0 }
 0x26f   : > { %v6359_v13 = vmax.f32 %v2815_v50, 0.0 }
 0x270   : > { %v4597_v56 = vpack.c.bf16 %v6355_v9, %v6353_v63 }
 0x271   : > { %v4592_v38 = vpack.c.bf16 %v6359_v13, %v6357_v49  ;;  %v4760_v15 = vpop.f32.mrb[140].mxu1  ;;  %v2626_v59 = vpop.f32.mrb[84].mxu0 }
 0x272   : > { %4681 = vst [vmem:[%s6201_s22 + $0x68] sm:$0xff] %v4597_v56   ;;  %v2836_v24 = vadd.f32 %v6216_v14, %v4760_v15  ;;  %v2827_v29 = vpop.f32.mrb[141].mxu1  ;;  %v6372_v12 = vadd.f32 %v4902_v7, %v2626_v59  ;;  %v2628_v1 = vpop.f32.mrb[85].mxu0 }
 0x273   : > { %4680 = vst [vmem:[%s6201_s22 + $0x60] sm:$0xff] %v4592_v38   ;;  %v2828_v39 = vadd.f32 %v6184_v60, %v2827_v29  ;;  %v4761_v48 = vpop.f32.mrb[142].mxu1  ;;  %v2629_v21 = vpop.f32.mrb[86].mxu0  ;;  %v4908_v1 = vadd.f32 %v6032_v22, %v6115_v27 }
 0x274   : > { %v2839_v46 = vadd.f32 %v6220_v58, %v4761_v48  ;;  %v2830_v11 = vpop.f32.mrb[143].mxu1  ;;  %v6376_v50 = vadd.f32 %v4904_v47, %v2629_v21  ;;  %v2631_v14 = vpop.f32.mrb[87].mxu0  ;;  %v6379_v15 = vmax.f32 %v2836_v24, 0.0  ;;  %v4906_v58 = vadd.f32 %v6032_v22, %v6109_v2 }
 0x275   : > { %v2831_v56 = vadd.f32 %v6189_v36, %v2830_v11  ;;  %v6383_v7 = vmax.f32 %v2828_v39, 0.0 }
 0x276   : > { %7152 = vst [vmem:[#allocation10_spill] sm:$0xff] %v6379_v15  ;;  %v6381_v35 = vmax.f32 %v2839_v46, 0.0 }
 0x277   : > { %v6385_v38 = vmax.f32 %v2831_v56, 0.0 }
 0x278   : > { %7153 = vst [vmem:[#allocation11_spill] sm:$0xff] %v6381_v35  ;;  %v4607_v60 = vpack.c.bf16 %v6381_v35, %v6379_v15 }
 0x279   : > { %7154 = vst [vmem:[#allocation12_spill] sm:$0xff] %v6385_v38  ;;  %v4602_v59 = vpack.c.bf16 %v6385_v38, %v6383_v7  ;;  %v4764_v29 = vpop.f32.mrb[144].mxu1  ;;  %v2634_v36 = vpop.f32.mrb[88].mxu0 }
 0x27a   : > { %4683 = vst [vmem:[%s6201_s22 + $0x78] sm:$0xff] %v4607_v60   ;;  %v2852_v24 = vadd.f32 %v6268_v17, %v4764_v29  ;;  %v2843_v47 = vpop.f32.mrb[145].mxu1  ;;  %v6398_v39 = vadd.f32 %v4906_v58, %v2634_v36  ;;  %v2636_v48 = vpop.f32.mrb[89].mxu0 }
 0x27b   : > { %4682 = vst [vmem:[%s6201_s22 + $0x70] sm:$0xff] %v4602_v59   ;;  %v2844_v21 = vadd.f32 %v6242_v10, %v2843_v47  ;;  %v4765_v2 = vpop.f32.mrb[146].mxu1  ;;  %v2637_v46 = vpop.f32.mrb[90].mxu0  ;;  %v4912_v48 = vadd.f32 %v6032_v22, %v6127_v4 }
 0x27c   : > { %v2855_v11 = vadd.f32 %v6272_v16, %v4765_v2  ;;  %v2846_v14 = vpop.f32.mrb[147].mxu1  ;;  %v6402_v56 = vadd.f32 %v4908_v1, %v2637_v46  ;;  %v2639_v17 = vpop.f32.mrb[91].mxu0  ;;  %v6405_v29 = vmax.f32 %v2852_v24, 0.0  ;;  %v4910_v16 = vadd.f32 %v6032_v22, %v6121_v52 }
 0x27d   : > { %v2847_v60 = vadd.f32 %v6246_v62, %v2846_v14  ;;  %v6409_v58 = vmax.f32 %v2844_v21, 0.0 }
 0x27e   : > { %7155 = vst [vmem:[#allocation13_spill] sm:$0xff] %v6405_v29  ;;  %v6407_v27 = vmax.f32 %v2855_v11, 0.0 }
 0x27f   : > { %7157 = vst [vmem:[#allocation15_spill] sm:$0xff] %v6409_v58  ;;  %v6411_v59 = vmax.f32 %v2847_v60, 0.0 }
 0x280   : > { %7156 = vst [vmem:[#allocation14_spill] sm:$0xff] %v6407_v27  ;;  %v4617_v10 = vpack.c.bf16 %v6407_v27, %v6405_v29 }
 0x281   : > { %7158 = vst [vmem:[#allocation16_spill] sm:$0xff] %v6411_v59  ;;  %v4612_v36 = vpack.c.bf16 %v6411_v59, %v6409_v58  ;;  %v4768_v47 = vpop.f32.mrb[148].mxu1  ;;  %v2642_v62 = vpop.f32.mrb[92].mxu0 }
 0x282   : > { %4685 = vst [vmem:[%s6201_s22 + $0x88] sm:$0xff] %v4617_v10   ;;  %v2868_v24 = vadd.f32 %v6320_v53, %v4768_v47  ;;  %v2859_v1 = vpop.f32.mrb[149].mxu1  ;;  %v4911_v21 = vadd.f32 %v4910_v16, %v2642_v62  ;;  %v2644_v2 = vpop.f32.mrb[93].mxu0 }
 0x283   : > { %4684 = vst [vmem:[%s6201_s22 + $0x80] sm:$0xff] %v4612_v36   ;;  %v2860_v46 = vadd.f32 %v6294_v18, %v2859_v1  ;;  %v4769_v11 = vpop.f32.mrb[150].mxu1  ;;  %v2645_v52 = vpop.f32.mrb[94].mxu0  ;;  %v7163_v36 = vld [vmem:[#allocation2_spill] sm:$0xff]  ;;  %v7164_v2 = vld [vmem:[#allocation3_spill] sm:$0xff] }
 0x284   : > { %v2871_v14 = vadd.f32 %v6324_v30, %v4769_v11  ;;  %v2862_v17 = vpop.f32.mrb[151].mxu1  ;;  %v4913_v60 = vadd.f32 %v4912_v48, %v2645_v52  ;;  %v2647_v10 = vpop.f32.mrb[95].mxu0  ;;  %v6427_v47 = vmax.f32 %v2868_v24, 0.0  ;;  %v4914_v30 = vadd.f32 %v6032_v22, %v7163_v36 }
 0x285   : > { %v2863_v53 = vadd.f32 %v6298_v57, %v2862_v17  ;;  %v6431_v4 = vmax.f32 %v2860_v46, 0.0  ;;  %v4916_v46 = vadd.f32 %v6032_v22, %v7164_v2 }
 0x286   : > { %7159 = vst [vmem:[#allocation17_spill] sm:$0xff] %v6427_v47  ;;  %v6429_v27 = vmax.f32 %v2871_v14, 0.0 }
 0x287   : > { %7161 = vst [vmem:[#allocation19_spill] sm:$0xff] %v6431_v4  ;;  %v6433_v16 = vmax.f32 %v2863_v53, 0.0 }
 0x288   : > { %7160 = vst [vmem:[#allocation18_spill] sm:$0xff] %v6429_v27  ;;  %v4627_v18 = vpack.c.bf16 %v6429_v27, %v6427_v47 }
 0x289   : > { %7162 = vst [vmem:[#allocation20_spill] sm:$0xff] %v6433_v16  ;;  %v4622_v62 = vpack.c.bf16 %v6433_v16, %v6431_v4  ;;  %v4772_v1 = vpop.f32.mrb[152].mxu1  ;;  %v2650_v57 = vpop.f32.mrb[96].mxu0 }
 0x28a   : > { %4687 = vst [vmem:[%s6201_s22 + $0x98] sm:$0xff] %v4627_v18   ;;  %v2884_v24 = vadd.f32 %v6372_v12, %v4772_v1  ;;  %v2875_v48 = vpop.f32.mrb[153].mxu1  ;;  %v4915_v11 = vadd.f32 %v4914_v30, %v2650_v57  ;;  %v2652_v52 = vpop.f32.mrb[97].mxu0  ;;  %v7169_v57 = vld [vmem:[#allocation4_spill] sm:$0xff] }
 0x28b   : > { %4686 = vst [vmem:[%s6201_s22 + $0x90] sm:$0xff] %v4622_v62   ;;  %v2876_v14 = vadd.f32 %v6346_v37, %v2875_v48  ;;  %v4773_v17 = vpop.f32.mrb[154].mxu1  ;;  %v2653_v10 = vpop.f32.mrb[98].mxu0  ;;  %v7170_v52 = vld [vmem:[#allocation5_spill] sm:$0xff] }
 0x28c   : > { %v2887_v53 = vadd.f32 %v6376_v50, %v4773_v17  ;;  %v2878_v36 = vpop.f32.mrb[155].mxu1  ;;  %v4917_v27 = vadd.f32 %v4916_v46, %v2653_v10  ;;  %v2655_v18 = vpop.f32.mrb[99].mxu0  ;;  %v6449_v1 = vmax.f32 %v2884_v24, 0.0  ;;  %v4918_v50 = vadd.f32 %v6032_v22, %v7169_v57 }
 0x28d   : > { %v2879_v12 = vadd.f32 %v6350_v44, %v2878_v36  ;;  %v6453_v62 = vmax.f32 %v2876_v14, 0.0  ;;  %v4920_v14 = vadd.f32 %v6032_v22, %v7170_v52 }
 0x28e   : > { %7165 = vst [vmem:[#allocation2_spill] sm:$0xff] %v6449_v1  ;;  %v6451_v47 = vmax.f32 %v2887_v53, 0.0 }
 0x28f   : > { %7167 = vst [vmem:[#allocation21_spill] sm:$0xff] %v6453_v62  ;;  %v6455_v30 = vmax.f32 %v2879_v12, 0.0 }
 0x290   : > { %7166 = vst [vmem:[#allocation3_spill] sm:$0xff] %v6451_v47  ;;  %v4637_v37 = vpack.c.bf16 %v6451_v47, %v6449_v1 }
 0x291   : > { %7168 = vst [vmem:[#allocation22_spill] sm:$0xff] %v6455_v30  ;;  %v4632_v48 = vpack.c.bf16 %v6455_v30, %v6453_v62  ;;  %v4776_v2 = vpop.f32.mrb[156].mxu1  ;;  %v2658_v44 = vpop.f32.mrb[100].mxu0 }
 0x292   : > { %4689 = vst [vmem:[%s6201_s22 + $0xa8] sm:$0xff] %v4637_v37   ;;  %v2900_v24 = vadd.f32 %v4911_v21, %v4776_v2  ;;  %v2891_v46 = vpop.f32.mrb[157].mxu1  ;;  %v4919_v17 = vadd.f32 %v4918_v50, %v2658_v44  ;;  %v2660_v10 = vpop.f32.mrb[101].mxu0 }
 0x293   : > { %4688 = vst [vmem:[%s6201_s22 + $0xa0] sm:$0xff] %v4632_v48   ;;  %v2892_v53 = vadd.f32 %v6398_v39, %v2891_v46  ;;  %v4777_v36 = vpop.f32.mrb[158].mxu1  ;;  %v2661_v18 = vpop.f32.mrb[102].mxu0  ;;  %v7175_v48 = vld [vmem:[#allocation6_spill] sm:$0xff] }
 0x294   : > { %v2903_v12 = vadd.f32 %v4913_v60, %v4777_v36  ;;  %v2894_v57 = vpop.f32.mrb[159].mxu1  ;;  %v4921_v47 = vadd.f32 %v4920_v14, %v2661_v18  ;;  %v2663_v1 = vpop.f32.mrb[103].mxu0  ;;  %v6469_v21 = vmax.f32 %v2900_v24, 0.0  ;;  %v4922_v60 = vadd.f32 %v6032_v22, %v7175_v48  ;;  %v7176_v14 = vld [vmem:[#allocation7_spill] sm:$0xff] }
 0x295   : > { %v2895_v37 = vadd.f32 %v6402_v56, %v2894_v57  ;;  %v6473_v52 = vmax.f32 %v2892_v53, 0.0  ;;  %v4924_v10 = vadd.f32 %v6032_v22, %v7176_v14 }
 0x296   : > { %7171 = vst [vmem:[#allocation4_spill] sm:$0xff] %v6469_v21  ;;  %v6471_v2 = vmax.f32 %v2903_v12, 0.0 }
 0x297   : > { %7173 = vst [vmem:[#allocation23_spill] sm:$0xff] %v6473_v52  ;;  %v6475_v50 = vmax.f32 %v2895_v37, 0.0 }
 0x298   : > { %7172 = vst [vmem:[#allocation5_spill] sm:$0xff] %v6471_v2  ;;  %v4647_v39 = vpack.c.bf16 %v6471_v2, %v6469_v21 }
 0x299   : > { %7174 = vst [vmem:[#allocation24_spill] sm:$0xff] %v6475_v50  ;;  %v4642_v44 = vpack.c.bf16 %v6475_v50, %v6473_v52  ;;  %v4780_v1 = vpop.f32.mrb[160].mxu1  ;;  %v2666_v56 = vpop.f32.mrb[104].mxu0 }
 0x29a   : > { %4691 = vst [vmem:[%s6201_s22 + $0xb8] sm:$0xff] %v4647_v39   ;;  %v2916_v24 = vadd.f32 %v4919_v17, %v4780_v1  ;;  %v2907_v46 = vpop.f32.mrb[161].mxu1  ;;  %v4923_v53 = vadd.f32 %v4922_v60, %v2666_v56  ;;  %v2668_v36 = vpop.f32.mrb[105].mxu0  ;;  %v7181_v60 = vld [vmem:[#allocation8_spill] sm:$0xff] }
 0x29b   : > { %4690 = vst [vmem:[%s6201_s22 + $0xb0] sm:$0xff] %v4642_v44   ;;  %v2908_v18 = vadd.f32 %v4915_v11, %v2907_v46  ;;  %v4781_v12 = vpop.f32.mrb[162].mxu1  ;;  %v2669_v57 = vpop.f32.mrb[106].mxu0  ;;  %v4926_v44 = vadd.f32 %v6032_v22, %v7181_v60 }
 0x29c   : > { %v2919_v37 = vadd.f32 %v4921_v47, %v4781_v12  ;;  %v2910_v48 = vpop.f32.mrb[163].mxu1  ;;  %v4925_v2 = vadd.f32 %v4924_v10, %v2669_v57  ;;  %v2671_v21 = vpop.f32.mrb[107].mxu0  ;;  %v6487_v39 = vmax.f32 %v2916_v24, 0.0  ;;  %v7182_v24 = vld [vmem:[#allocation9_spill] sm:$0xff] }
 0x29d   : > { %v2911_v50 = vadd.f32 %v4917_v27, %v2910_v48  ;;  %v6491_v1 = vmax.f32 %v2908_v18, 0.0  ;;  %v4928_v46 = vadd.f32 %v6032_v22, %v7182_v24 }
 0x29e   : > { %7177 = vst [vmem:[#allocation6_spill] sm:$0xff] %v6487_v39  ;;  %v6489_v17 = vmax.f32 %v2919_v37, 0.0 }
 0x29f   : > { %7179 = vst [vmem:[#allocation25_spill] sm:$0xff] %v6491_v1  ;;  %v6493_v14 = vmax.f32 %v2911_v50, 0.0 }
 0x2a0   : > { %7178 = vst [vmem:[#allocation7_spill] sm:$0xff] %v6489_v17  ;;  %v4657_v11 = vpack.c.bf16 %v6489_v17, %v6487_v39 }
 0x2a1   : > { %7180 = vst [vmem:[#allocation26_spill] sm:$0xff] %v6493_v14  ;;  %v4652_v47 = vpack.c.bf16 %v6493_v14, %v6491_v1  ;;  %v4784_v56 = vpop.f32.mrb[164].mxu1  ;;  %v2674_v27 = vpop.f32.mrb[108].mxu0 }
 0x2a2   : > { %4693 = vst [vmem:[%s6201_s22 + $0xc8] sm:$0xff] %v4657_v11   ;;  %v2923_v21 = vpop.f32.mrb[165].mxu1  ;;  %v4927_v10 = vadd.f32 %v4926_v44, %v2674_v27  ;;  %v2676_v50 = vpop.f32.mrb[109].mxu0 }
 0x2a3   : > { %4692 = vst [vmem:[%s6201_s22 + $0xc0] sm:$0xff] %v4652_v47   ;;  %v2924_v36 = vadd.f32 %v4923_v53, %v2923_v21  ;;  %v4785_v18 = vpop.f32.mrb[166].mxu1  ;;  %v2677_v12 = vpop.f32.mrb[110].mxu0 }
 0x2a4   : > { %v2926_v57 = vpop.f32.mrb[167].mxu1  ;;  %v2932_v37 = vadd.f32 %v4927_v10, %v4784_v56  ;;  %v4929_v48 = vadd.f32 %v4928_v46, %v2677_v12  ;;  %v2679_v60 = vpop.f32.mrb[111].mxu0  ;;  %v3339_v46 = vmul.f32 (!%p4413_p5), %v6196_v42, %v6196_v42  ;;  %v3340_v10 = vmul.f32 (!%p4413_p5), %v6203_v31, %v6203_v31 }
 0x2a5   : > { %v2927_v17 = vadd.f32 %v4925_v2, %v2926_v57  ;;  %v6505_v39 = vmax.f32 %v2924_v36, 0.0  ;;  %v3278_v2 = vadd.f32 (!%p4413_p5), %v6203_v31, %v6196_v42  ;;  %v3341_v36 = vmul.f32 (!%p4413_p5), %v6192_v32, %v6192_v32 }
 0x2a6   : > { %v2935_v11 = vadd.f32 %v4929_v48, %v4785_v18  ;;  %v6509_v1 = vmax.f32 %v2932_v37, 0.0  ;;  %3277 = sbr.rel (%p4413_p5) target bundleno = 812 (0x32c), region = 36  ;;  %v3342_v12 = vmul.f32 (!%p4413_p5), %v6194_v28, %v6194_v28  ;;  %v3395_v57 = vadd.f32 (!%p4413_p5), %v3340_v10, %v3339_v46 }
 0x2a7   : > { %7183 = vst [vmem:[#allocation8_spill] sm:$0xff] %v6505_v39  ;;  %v6507_v14 = vmax.f32 %v2927_v17, 0.0  ;;  %v3279_v17 = vadd.f32 (!%p4413_p5), %v3278_v2, %v6192_v32  ;;  %v3343_v48 = vmul.f32 (!%p4413_p5), %v6227_v45, %v6227_v45  ;;  %v3347_v46 = vmul.f32 (!%p4413_p5), %v6253_v43, %v6253_v43 }
 0x2a8   : > { %7185 = vst [vmem:[#allocation27_spill] sm:$0xff] %v6509_v1  ;;  %v6511_v22 = vmax.f32 %v2935_v11, 0.0  ;;  %v3396_v60 = vadd.f32 (!%p4413_p5), %v3395_v57, %v3341_v36  ;;  %v3348_v36 = vmul.f32 (!%p4413_p5), %v6255_v26, %v6255_v26  ;;  %v3349_v57 = vmul.f32 (!%p4413_p5), %v6249_v5, %v6249_v5 }
 0x2a9   : > { %7184 = vst [vmem:[#allocation9_spill] sm:$0xff] %v6507_v14  ;;  %v4662_v53 = vpack.c.bf16 %v6507_v14, %v6505_v39  ;;  %v3280_v47 = vadd.f32 (!%p4413_p5), %v3279_v17, %v6194_v28  ;;  %v3345_v17 = vmul.f32 (!%p4413_p5), %v6223_v25, %v6223_v25 }
 0x2aa   : > { %7186 = vst [vmem:[#allocation28_spill] sm:$0xff] %v6511_v22  ;;  %v4667_v44 = vpack.c.bf16 %v6511_v22, %v6509_v1 }
 0x2ab   : > { %4694 = vst [vmem:[%s6201_s22 + $0xd0] sm:$0xff] %v4662_v53   ;;  %v3281_v56 = vadd.f32 (!%p4413_p5), %v3280_v47, %v6227_v45  ;;  %v3344_v53 = vmul.f32 (!%p4413_p5), %v6229_v34, %v6229_v34 }
 0x2ac   : > { %4695 = vst [vmem:[%s6201_s22 + $0xd8] sm:$0xff] %v4667_v44   ;;  %v3397_v44 = vadd.f32 (!%p4413_p5), %v3396_v60, %v3342_v12  ;;  %v3350_v60 = vmul.f32 (!%p4413_p5), %v6251_v6, %v6251_v6 }
 0x2ad   : > { %v3282_v27 = vadd.f32 %v3281_v56, %v6229_v34 }
 0x2ae   : > { %v3398_v47 = vadd.f32 %v3397_v44, %v3343_v48  ;;  %v3351_v44 = vmul.f32 %v6279_v19, %v6279_v19 }
 0x2af   : > { %v3283_v21 = vadd.f32 %v3282_v27, %v6223_v25  ;;  %v3346_v27 = vmul.f32 %v6225_v55, %v6225_v55 }
 0x2b1   : > { %v3284_v24 = vadd.f32 %v3283_v21, %v6225_v55  ;;  %v3399_v21 = vadd.f32 %v3398_v47, %v3344_v53  ;;  %v3352_v47 = vmul.f32 %v6281_v23, %v6281_v23 }
 0x2b3   : > { %v3285_v50 = vadd.f32 %v3284_v24, %v6253_v43  ;;  %v3400_v10 = vadd.f32 %v3399_v21, %v3345_v17  ;;  %v3353_v21 = vmul.f32 %v6275_v0, %v6275_v0 }
 0x2b5   : > { %v3286_v18 = vadd.f32 %v3285_v50, %v6255_v26 }
 0x2b7   : > { %v3287_v37 = vadd.f32 %v3286_v18, %v6249_v5  ;;  %v3401_v18 = vadd.f32 %v3400_v10, %v3346_v27  ;;  %v3354_v10 = vmul.f32 %v6277_v20, %v6277_v20 }
 0x2b9   : > { %v3288_v11 = vadd.f32 %v3287_v37, %v6251_v6  ;;  %v3402_v37 = vadd.f32 %v3401_v18, %v3347_v46  ;;  %v3355_v18 = vmul.f32 %v6305_v8, %v6305_v8 }
 0x2bb   : > { %v3289_v2 = vadd.f32 %v3288_v11, %v6279_v19  ;;  %v3403_v11 = vadd.f32 %v3402_v37, %v3348_v36  ;;  %v3356_v37 = vmul.f32 %v6307_v61, %v6307_v61 }
 0x2bd   : > { %v3290_v56 = vadd.f32 %v3289_v2, %v6281_v23  ;;  %v3404_v2 = vadd.f32 %v3403_v11, %v3349_v57  ;;  %v3357_v11 = vmul.f32 %v6301_v3, %v6301_v3 }
 0x2bf   : > { %v3291_v24 = vadd.f32 %v3290_v56, %v6275_v0  ;;  %v3405_v56 = vadd.f32 %v3404_v2, %v3350_v60  ;;  %v3358_v2 = vmul.f32 %v6303_v33, %v6303_v33 }
 0x2c1   : > { %v3292_v50 = vadd.f32 %v3291_v24, %v6277_v20  ;;  %v3406_v24 = vadd.f32 %v3405_v56, %v3351_v44  ;;  %v3359_v56 = vmul.f32 %v6331_v41, %v6331_v41 }
 0x2c3   : > { %v3293_v12 = vadd.f32 %v3292_v50, %v6305_v8  ;;  %v3407_v50 = vadd.f32 %v3406_v24, %v3352_v47  ;;  %v3360_v24 = vmul.f32 %v6333_v40, %v6333_v40 }
 0x2c5   : > { %v3294_v48 = vadd.f32 %v3293_v12, %v6307_v61  ;;  %v3408_v12 = vadd.f32 %v3407_v50, %v3353_v21  ;;  %v3361_v50 = vmul.f32 %v6327_v51, %v6327_v51 }
 0x2c7   : > { %v3295_v53 = vadd.f32 %v3294_v48, %v6301_v3  ;;  %v3409_v48 = vadd.f32 %v3408_v12, %v3354_v10  ;;  %v3362_v12 = vmul.f32 %v6329_v54, %v6329_v54 }
 0x2c9   : > { %v3296_v17 = vadd.f32 %v3295_v53, %v6303_v33  ;;  %v3410_v53 = vadd.f32 %v3409_v48, %v3355_v18  ;;  %v3363_v48 = vmul.f32 %v6357_v49, %v6357_v49 }
 0x2cb   : > { %v3297_v27 = vadd.f32 %v3296_v17, %v6331_v41  ;;  %v3411_v17 = vadd.f32 %v3410_v53, %v3356_v37  ;;  %v3364_v53 = vmul.f32 %v6359_v13, %v6359_v13 }
 0x2cd   : > { %v3298_v46 = vadd.f32 %v3297_v27, %v6333_v40  ;;  %v3412_v27 = vadd.f32 %v3411_v17, %v3357_v11  ;;  %v3365_v17 = vmul.f32 %v6353_v63, %v6353_v63 }
 0x2cf   : > { %v3299_v36 = vadd.f32 %v3298_v46, %v6327_v51  ;;  %v3413_v46 = vadd.f32 %v3412_v27, %v3358_v2  ;;  %v3366_v27 = vmul.f32 %v6355_v9, %v6355_v9 }
 0x2d1   : > { %v3300_v57 = vadd.f32 %v3299_v36, %v6329_v54  ;;  %v3414_v36 = vadd.f32 %v3413_v46, %v3359_v56  ;;  %v3367_v46 = vmul.f32 %v6383_v7, %v6383_v7 }
 0x2d3   : > { %v3301_v60 = vadd.f32 %v3300_v57, %v6357_v49  ;;  %v3415_v57 = vadd.f32 %v3414_v36, %v3360_v24 }
 0x2d5   : > { %v3302_v44 = vadd.f32 %v3301_v60, %v6359_v13  ;;  %v3416_v60 = vadd.f32 %v3415_v57, %v3361_v50  ;;  %v7187_v50 = vld [vmem:[#allocation14_spill] sm:$0xff] }
 0x2d7   : > { %v3303_v47 = vadd.f32 %v3302_v44, %v6353_v63  ;;  %v3417_v44 = vadd.f32 %v3416_v60, %v3362_v12 }
 0x2d9   : > { %v3304_v21 = vadd.f32 %v3303_v47, %v6355_v9  ;;  %v3418_v47 = vadd.f32 %v3417_v44, %v3363_v48  ;;  %v7188_v44 = vld [vmem:[#allocation17_spill] sm:$0xff] }
 0x2db   : > { %v3305_v10 = vadd.f32 %v3304_v21, %v6383_v7  ;;  %v3419_v21 = vadd.f32 %v3418_v47, %v3364_v53 }
 0x2dd   : > { %v3306_v18 = vadd.f32 %v3305_v10, %v6385_v38  ;;  %v3420_v10 = vadd.f32 %v3419_v21, %v3365_v17  ;;  %v3371_v17 = vmul.f32 %v6409_v58, %v6409_v58  ;;  %v3372_v21 = vmul.f32 %v6411_v59, %v6411_v59 }
 0x2df   : > { %v3307_v37 = vadd.f32 %v3306_v18, %v6379_v15  ;;  %v3368_v18 = vmul.f32 %v6385_v38, %v6385_v38  ;;  %v3421_v12 = vadd.f32 %v3420_v10, %v3366_v27  ;;  %v3373_v10 = vmul.f32 %v6405_v29, %v6405_v29 }
 0x2e1   : > { %v3308_v11 = vadd.f32 %v3307_v37, %v6381_v35  ;;  %v3369_v37 = vmul.f32 %v6379_v15, %v6379_v15  ;;  %v3422_v48 = vadd.f32 %v3421_v12, %v3367_v46  ;;  %v3374_v12 = vmul.f32 %v7187_v50, %v7187_v50 }
 0x2e3   : > { %v3309_v2 = vadd.f32 %v3308_v11, %v6409_v58  ;;  %v3370_v11 = vmul.f32 %v6381_v35, %v6381_v35  ;;  %v3423_v53 = vadd.f32 %v3422_v48, %v3368_v18  ;;  %v7190_v48 = vld [vmem:[#allocation2_spill] sm:$0xff] }
 0x2e5   : > { %v3310_v56 = vadd.f32 %v3309_v2, %v6411_v59  ;;  %v3424_v47 = vadd.f32 %v3423_v53, %v3369_v37 }
 0x2e7   : > { %v3311_v24 = vadd.f32 %v3310_v56, %v6405_v29  ;;  %v7189_v56 = vld [vmem:[#allocation18_spill] sm:$0xff] }
 0x2e9   : > { %v3312_v36 = vadd.f32 %v3311_v24, %v7187_v50  ;;  %v3425_v24 = vadd.f32 %v3424_v47, %v3370_v11  ;;  %v3376_v47 = vmul.f32 %v6433_v16, %v6433_v16  ;;  %v7192_v50 = vld [vmem:[#allocation24_spill] sm:$0xff] }
 0x2eb   : > { %v3313_v57 = vadd.f32 %v3312_v36, %v6431_v4  ;;  %v3426_v36 = vadd.f32 %v3425_v24, %v3371_v17  ;;  %v3377_v24 = vmul.f32 %v7188_v44, %v7188_v44 }
 0x2ed   : > { %v3314_v60 = vadd.f32 %v3313_v57, %v6433_v16  ;;  %v3427_v57 = vadd.f32 %v3426_v36, %v3372_v21  ;;  %v3378_v36 = vmul.f32 %v7189_v56, %v7189_v56  ;;  %v7194_v16 = vld [vmem:[#allocation5_spill] sm:$0xff] }
 0x2ef   : > { %v3315_v2 = vadd.f32 %v3314_v60, %v7188_v44  ;;  %v3375_v60 = vmul.f32 %v6431_v4, %v6431_v4  ;;  %v3428_v53 = vadd.f32 %v3427_v57, %v3373_v10  ;;  %v7193_v4 = vld [vmem:[#allocation4_spill] sm:$0xff]  ;;  %v3379_v57 = vmul.f32 %v6453_v62, %v6453_v62  ;;  %v7195_v44 = vld [vmem:[#allocation25_spill] sm:$0xff] }
 0x2f1   : > { %v3316_v27 = vadd.f32 %v3315_v2, %v7189_v56  ;;  %v7191_v2 = vld [vmem:[#allocation3_spill] sm:$0xff]  ;;  %v7196_v56 = vld [vmem:[#allocation26_spill] sm:$0xff] }
 0x2f3   : > { %v3317_v46 = vadd.f32 %v3316_v27, %v6453_v62  ;;  %v3429_v27 = vadd.f32 %v3428_v53, %v3374_v12  ;;  %v3380_v53 = vmul.f32 %v6455_v30, %v6455_v30  ;;  %v7197_v62 = vld [vmem:[#allocation6_spill] sm:$0xff] }
 0x2f5   : > { %v3318_v18 = vadd.f32 %v3317_v46, %v6455_v30  ;;  %v3430_v46 = vadd.f32 %v3429_v27, %v3375_v60  ;;  %v3381_v27 = vmul.f32 %v7190_v48, %v7190_v48  ;;  %v7198_v30 = vld [vmem:[#allocation7_spill] sm:$0xff] }
 0x2f7   : > { %v3319_v37 = vadd.f32 %v3318_v18, %v7190_v48  ;;  %v3431_v18 = vadd.f32 %v3430_v46, %v3376_v47  ;;  %v3382_v46 = vmul.f32 %v7191_v2, %v7191_v2 }
 0x2f9   : > { %v3320_v11 = vadd.f32 %v3319_v37, %v7191_v2  ;;  %v3432_v37 = vadd.f32 %v3431_v18, %v3377_v24  ;;  %v3383_v18 = vmul.f32 %v6473_v52, %v6473_v52 }
 0x2fb   : > { %v3321_v17 = vadd.f32 %v3320_v11, %v6473_v52  ;;  %v3433_v11 = vadd.f32 %v3432_v37, %v3378_v36  ;;  %v3384_v37 = vmul.f32 %v7192_v50, %v7192_v50 }
 0x2fd   : > { %v3322_v21 = vadd.f32 %v3321_v17, %v7192_v50  ;;  %v3434_v17 = vadd.f32 %v3433_v11, %v3379_v57  ;;  %v3385_v57 = vmul.f32 %v7193_v4, %v7193_v4  ;;  %v3388_v50 = vmul.f32 %v7196_v56, %v7196_v56 }
 0x2ff   : > { %v3323_v10 = vadd.f32 %v3322_v21, %v7193_v4  ;;  %v3435_v21 = vadd.f32 %v3434_v17, %v3380_v53  ;;  %v3386_v53 = vmul.f32 %v7194_v16, %v7194_v16  ;;  %v3387_v17 = vmul.f32 %v7195_v44, %v7195_v44 }
 0x300   : > { %v3389_v4 = vmul.f32 %v7197_v62, %v7197_v62 }
 0x301   : > { %v3324_v12 = vadd.f32 %v3323_v10, %v7194_v16  ;;  %v3436_v10 = vadd.f32 %v3435_v21, %v3381_v27  ;;  %v3390_v16 = vmul.f32 %v7198_v30, %v7198_v30 }
 0x303   : > { %v3325_v60 = vadd.f32 %v3324_v12, %v7195_v44  ;;  %v3437_v12 = vadd.f32 %v3436_v10, %v3382_v46 }
 0x305   : > { %v3326_v47 = vadd.f32 %v3325_v60, %v7196_v56  ;;  %v3438_v11 = vadd.f32 %v3437_v12, %v3383_v18 }
 0x307   : > { %v3327_v24 = vadd.f32 %v3326_v47, %v7197_v62  ;;  %v3439_v60 = vadd.f32 %v3438_v11, %v3384_v37  ;;  %v3392_v37 = vmul.f32 %v6507_v14, %v6507_v14  ;;  %v3394_v62 = vmul.f32 %v6511_v22, %v6511_v22 }
 0x309   : > { %v3328_v36 = vadd.f32 %v3327_v24, %v7198_v30  ;;  %v3440_v47 = vadd.f32 %v3439_v60, %v3385_v57 }
 0x30b   : > { %v3329_v48 = vadd.f32 %v3328_v36, %v6505_v39  ;;  %v3441_v46 = vadd.f32 %v3440_v47, %v3386_v53  ;;  %v3391_v36 = vmul.f32 %v6505_v39, %v6505_v39 }
 0x30d   : > { %v3330_v2 = vadd.f32 %v3329_v48, %v6507_v14  ;;  %v3442_v24 = vadd.f32 %v3441_v46, %v3387_v17  ;;  %v3393_v48 = vmul.f32 %v6509_v1, %v6509_v1 }
 0x30f   : > { %v3331_v27 = vadd.f32 %v3330_v2, %v6509_v1  ;;  %v3443_v18 = vadd.f32 %v3442_v24, %v3388_v50 }
 0x311   : > { %v3332_v21 = vadd.f32 %v3331_v27, %v6511_v22  ;;  %v3444_v44 = vadd.f32 %v3443_v18, %v3389_v4 }
 0x313   : > { %v3333_v10 = vrot.slane %v3332_v21, 4  ;;  %v3445_v56 = vadd.f32 %v3444_v44, %v3390_v16 }
 0x315   : > { %v3334_v12 = vadd.f32 %v3333_v10, %v3332_v21  ;;  %v3446_v57 = vadd.f32 %v3445_v56, %v3391_v36 }
 0x317   : > { %v3447_v11 = vadd.f32 %v3446_v57, %v3392_v37  ;;  %v3335_v30 = vrot.slane %v3334_v12, 2 }
 0x319   : > { %v3448_v2 = vadd.f32 %v3447_v11, %v3393_v48  ;;  %v3336_v60 = vadd.f32 %v3335_v30, %v3334_v12 }
 0x31b   : > { %v3449_v53 = vadd.f32 %v3448_v2, %v3394_v62  ;;  %v3337_v47 = vrot.slane %v3336_v60, 1 }
 0x31d   : > { %v3450_v27 = vrot.slane %v3449_v53, 4  ;;  %v3338_v4 = vadd.f32 %v3337_v47, %v3336_v60 }
 0x31f   : > { %v3451_v17 = vadd.f32 %v3450_v27, %v3449_v53 }
 0x321   : > { %v3452_v50 = vrot.slane %v3451_v17, 2 }
 0x323   : > { %v3453_v46 = vadd.f32 %v3452_v50, %v3451_v17 }
 0x325   : > { %v3454_v21 = vrot.slane %v3453_v46, 1 }
 0x327   : > { %v3455_v24 = vadd.f32 %v3454_v21, %v3453_v46 }
 0x329   : > { %v3457_v16 = vsel %vm3456_vm1, %v3338_v4, %v3455_v24 }
 0x32a   : > { %v3459_v18 = vsel %vm3458_vm2, %v3457_v16, 0.0 }
 0x32b   : > { %3460 = vst [vmem:[%s5453_s29] sm:$0xff] %v3459_v18 }
 0x32c PF: > { %p4414_p6 = scmp.ne.s32.totalorder %s5424_s16, 1 }
 0x32e   : > { %3464 = sbr.rel (%p4414_p6) target bundleno = 995 (0x3e3), region = 40 }
 0x335   : > { %v3465_v10 = vlaneseq  ;;  %s3522_s12 = smul.u32 448, %s5424_s16 }
 0x337   : > { %v6691_v36 = vshrl.u32 %v3465_v10, 7  ;;  %v6696_v12 = vstv %s3522_s12 }
 0x339   : > { %v3499_v44 = vadd.s32 264, %v6691_v36  ;;  %v3500_v37 = vadd.s32 272, %v6691_v36  ;;  %v3501_v56 = vadd.s32 280, %v6691_v36  ;;  %v3502_v48 = vadd.s32 288, %v6691_v36 }
 0x33a   : > { %v3503_v57 = vadd.s32 296, %v6691_v36  ;;  %v3504_v62 = vadd.s32 304, %v6691_v36  ;;  %v3505_v11 = vadd.s32 312, %v6691_v36  ;;  %v3506_v30 = vadd.s32 320, %v6691_v36 }
 0x33b   : > { %v3507_v2 = vadd.s32 328, %v6691_v36  ;;  %v3508_v53 = vadd.s32 336, %v6691_v36  ;;  %v3509_v60 = vadd.s32 344, %v6691_v36  ;;  %v3510_v27 = vadd.s32 352, %v6691_v36 }
 0x33c   : > { %v3511_v17 = vadd.s32 360, %v6691_v36  ;;  %v3512_v47 = vadd.s32 368, %v6691_v36  ;;  %v3513_v50 = vadd.s32 376, %v6691_v36  ;;  %v3514_v46 = vadd.s32 384, %v6691_v36 }
 0x33d   : > { %v3515_v4 = vadd.s32 392, %v6691_v36  ;;  %v3516_v21 = vadd.s32 400, %v6691_v36  ;;  %v3517_v24 = vadd.s32 408, %v6691_v36  ;;  %v3518_v16 = vadd.s32 416, %v6691_v36 }
 0x33e   : > { %v3519_v18 = vadd.s32 424, %v6691_v36  ;;  %v3520_v10 = vadd.s32 432, %v6691_v36  ;;  %v3521_v22 = vadd.s32 440, %v6691_v36  ;;  %v3557_v1 = vadd.s32 %v6696_v12, %v3499_v44 }
 0x33f   : > { %v3558_v14 = vadd.s32 %v6696_v12, %v3500_v37  ;;  %v3559_v39 = vadd.s32 %v6696_v12, %v3501_v56  ;;  %v3560_v52 = vadd.s32 %v6696_v12, %v3502_v48  ;;  %v3561_v29 = vadd.s32 %v6696_v12, %v3503_v57 }
 0x340   : > { %v3562_v59 = vadd.s32 %v6696_v12, %v3504_v62  ;;  %v3563_v58 = vadd.s32 %v6696_v12, %v3505_v11  ;;  %v3564_v35 = vadd.s32 %v6696_v12, %v3506_v30  ;;  %v3565_v15 = vadd.s32 %v6696_v12, %v3507_v2 }
 0x341   : > { %v3566_v38 = vadd.s32 %v6696_v12, %v3508_v53  ;;  %v3567_v44 = vadd.s32 %v6696_v12, %v3509_v60  ;;  %v3568_v37 = vadd.s32 %v6696_v12, %v3510_v27  ;;  %v3569_v56 = vadd.s32 %v6696_v12, %v3511_v17 }
 0x342   : > { %v3570_v48 = vadd.s32 %v6696_v12, %v3512_v47  ;;  %v3571_v57 = vadd.s32 %v6696_v12, %v3513_v50  ;;  %v3572_v62 = vadd.s32 %v6696_v12, %v3514_v46  ;;  %v3573_v11 = vadd.s32 %v6696_v12, %v3515_v4 }
 0x343   : > { %v3574_v30 = vadd.s32 %v6696_v12, %v3516_v21  ;;  %v3575_v2 = vadd.s32 %v6696_v12, %v3517_v24  ;;  %v3576_v53 = vadd.s32 %v6696_v12, %v3518_v16  ;;  %v3577_v60 = vadd.s32 %v6696_v12, %v3519_v18 }
 0x344   : > { %v3578_v27 = vadd.s32 %v6696_v12, %v3520_v10  ;;  %v3579_v17 = vadd.s32 %v6696_v12, %v3521_v22  ;;  %v3467_v47 = vadd.s32 8, %v6691_v36  ;;  %vm3621_vm11 = vcmp.lt.s32.totalorder %v3565_v15, 882 }
 0x345   : > { %vm3623_vm13 = vcmp.lt.s32.totalorder %v3567_v44, 882  ;;  %vm3624_vm14 = vcmp.lt.s32.totalorder %v3568_v37, 882  ;;  %vm3625_vm15 = vcmp.lt.s32.totalorder %v3569_v56, 882  ;;  %vm3627_vm1 = vcmp.lt.s32.totalorder %v3571_v57, 882 }
 0x346   : > { %vm3628_vm2 = vcmp.lt.s32.totalorder %v3572_v62, 882  ;;  %vm3629_vm3 = vcmp.lt.s32.totalorder %v3573_v11, 882  ;;  %vm3631_vm5 = vcmp.lt.s32.totalorder %v3575_v2, 882  ;;  %vm3632_vm6 = vcmp.lt.s32.totalorder %v3576_v53, 882 }
 0x347   : > { %vm3633_vm7 = vcmp.lt.s32.totalorder %v3577_v60, 882  ;;  %v7142_v22 = vmov 0.0   ;;  %vm7199_vm10 = vcmp.lt.s32.totalorder %v3557_v1, 882  ;;  %vm7200_vm12 = vcmp.lt.s32.totalorder %v3558_v14, 882 }
 0x348   : > { %v6744_v50 = vsel %vm7199_vm10, 1.0, %v7142_v22  ;;  %v6748_v46 = vsel %vm7200_vm12, 1.0, %v7142_v22  ;;  %vm7201_vm0 = vcmp.lt.s32.totalorder %v3559_v39, 882  ;;  %vm7202_vm4 = vcmp.lt.s32.totalorder %v3560_v52, 882 }
 0x349   : > { %v6752_v4 = vsel %vm7201_vm0, 1.0, %v7142_v22  ;;  %v6756_v21 = vsel %vm7202_vm4, 1.0, %v7142_v22  ;;  %vm7203_vm8 = vcmp.lt.s32.totalorder %v3561_v29, 882  ;;  %vm7204_vm9 = vcmp.lt.s32.totalorder %v3562_v59, 882 }
 0x34a   : > { %v6760_v24 = vsel %vm7203_vm8, 1.0, %v7142_v22  ;;  %v6764_v1 = vsel %vm7204_vm9, 1.0, %v7142_v22  ;;  %vm7206_vm10 = vcmp.lt.s32.totalorder %v3563_v58, 882  ;;  %vm7208_vm12 = vcmp.lt.s32.totalorder %v3564_v35, 882 }
 0x34b   : > { %7205 = vst [vmem:[#allocation29_spill] sm:$0xff] %v6764_v1  ;;  %v6768_v14 = vsel %vm7206_vm10, 1.0, %v7142_v22  ;;  %v6772_v39 = vsel %vm7208_vm12, 1.0, %v7142_v22  ;;  %v6776_v52 = vsel %vm3621_vm11, 1.0, %v7142_v22  ;;  %vm7211_vm4 = vcmp.lt.s32.totalorder %v3566_v38, 882 }
 0x34c   : > { %7207 = vst [vmem:[#allocation30_spill] sm:$0xff] %v6768_v14  ;;  %7209 = vst [vmem:[#allocation31_spill] sm:$0xff] %v6772_v39  ;;  %v6780_v29 = vsel %vm7211_vm4, 1.0, %v7142_v22  ;;  %v6784_v59 = vsel %vm3623_vm13, 1.0, %v7142_v22  ;;  %v6788_v58 = vsel %vm3624_vm14, 1.0, %v7142_v22  ;;  %v6792_v35 = vsel %vm3625_vm15, 1.0, %v7142_v22 }
 0x34d   : > { %7210 = vst [vmem:[#allocation32_spill] sm:$0xff] %v6776_v52  ;;  %7212 = vst [vmem:[#allocation33_spill] sm:$0xff] %v6780_v29  ;;  %vm7216_vm8 = vcmp.lt.s32.totalorder %v3570_v48, 882  ;;  %v6800_v38 = vsel %vm3627_vm1, 1.0, %v7142_v22  ;;  %v6804_v16 = vsel %vm3628_vm2, 1.0, %v7142_v22  ;;  %v6808_v18 = vsel %vm3629_vm3, 1.0, %v7142_v22 }
 0x34e   : > { %7213 = vst [vmem:[#allocation34_spill] sm:$0xff] %v6784_v59  ;;  %7214 = vst [vmem:[#allocation35_spill] sm:$0xff] %v6788_v58  ;;  %v6796_v15 = vsel %vm7216_vm8, 1.0, %v7142_v22  ;;  %vm7221_vm9 = vcmp.lt.s32.totalorder %v3574_v30, 882  ;;  %v6816_v44 = vsel %vm3631_vm5, 1.0, %v7142_v22  ;;  %v6820_v37 = vsel %vm3632_vm6, 1.0, %v7142_v22 }
 0x34f   : > { %7215 = vst [vmem:[#allocation36_spill] sm:$0xff] %v6792_v35  ;;  %7217 = vst [vmem:[#allocation37_spill] sm:$0xff] %v6796_v15  ;;  %v6812_v10 = vsel %vm7221_vm9, 1.0, %v7142_v22  ;;  %v3468_v56 = vadd.s32 16, %v6691_v36  ;;  %v6825_v48 = vsel %vm3633_vm7, 1.0, %v7142_v22  ;;  %vm7226_vm3 = vcmp.lt.s32.totalorder %v3578_v27, 882 }
 0x350   : > { %7218 = vst [vmem:[#allocation38_spill] sm:$0xff] %v6800_v38  ;;  %7219 = vst [vmem:[#allocation39_spill] sm:$0xff] %v6804_v16  ;;  %v6829_v57 = vsel %vm7226_vm3, 1.0, %v7142_v22  ;;  %vm7228_vm11 = vcmp.lt.s32.totalorder %v3579_v17, 882  ;;  %v3469_v11 = vadd.s32 24, %v6691_v36  ;;  %v3524_v30 = vadd.s32 %v6696_v12, %v6691_v36 }
 0x351   : > { %7220 = vst [vmem:[#allocation40_spill] sm:$0xff] %v6808_v18  ;;  %7222 = vst [vmem:[#allocation41_spill] sm:$0xff] %v6812_v10  ;;  %v6833_v62 = vsel %vm7228_vm11, 1.0, %v7142_v22  ;;  %v3525_v2 = vadd.s32 %v6696_v12, %v3467_v47  ;;  %v3470_v53 = vadd.s32 32, %v6691_v36  ;;  %v3526_v60 = vadd.s32 %v6696_v12, %v3468_v56 }
 0x352   : > { %7223 = vst [vmem:[#allocation42_spill] sm:$0xff] %v6816_v44  ;;  %7224 = vst [vmem:[#allocation43_spill] sm:$0xff] %v6820_v37  ;;  %v3527_v27 = vadd.s32 %v6696_v12, %v3469_v11  ;;  %vm3580_vm5 = vcmp.lt.s32.totalorder %v3524_v30, 882  ;;  %v3472_v17 = vadd.s32 48, %v6691_v36  ;;  %v3473_v47 = vadd.s32 56, %v6691_v36 }
 0x353   : > { %7225 = vst [vmem:[#allocation44_spill] sm:$0xff] %v6825_v48  ;;  %7227 = vst [vmem:[#allocation45_spill] sm:$0xff] %v6829_v57  ;;  %v3471_v48 = vadd.s32 40, %v6691_v36  ;;  %vm3581_vm6 = vcmp.lt.s32.totalorder %v3525_v2, 882  ;;  %v3528_v22 = vadd.s32 %v6696_v12, %v3470_v53  ;;  %vm3582_vm7 = vcmp.lt.s32.totalorder %v3526_v60, 882 }
 0x354   : > { %7229 = vst [vmem:[#allocation46_spill] sm:$0xff] %v6833_v62  ;;  %v7230_v62 = vmov 0.0   ;;  %vm3583_vm13 = vcmp.lt.s32.totalorder %v3527_v27, 882  ;;  %v3474_v56 = vadd.s32 64, %v6691_v36  ;;  %v3530_v30 = vadd.s32 %v6696_v12, %v3472_v17 }
 0x355   : > { %v4415_v57 = vsel %vm3580_vm5, 1.0, %v7230_v62  ;;  %v4416_v37 = vsel %vm3581_vm6, 1.0, %v7230_v62  ;;  %v3529_v44 = vadd.s32 %v6696_v12, %v3471_v48  ;;  %v4417_v11 = vsel %vm3582_vm7, 1.0, %v7230_v62 }
 0x356   : > { %vm3584_vm14 = vcmp.lt.s32.totalorder %v3528_v22, 882  ;;  %v3748_v2 = vmul.f32 %v4415_v57, %v6196_v42  ;;  %v3749_v53 = vmul.f32 %v4416_v37, %v6203_v31  ;;  %v3475_v60 = vadd.s32 72, %v6691_v36 }
 0x357   : > { %v4418_v10 = vsel %vm3583_vm13, 1.0, %v7230_v62  ;;  %v3531_v18 = vadd.s32 %v6696_v12, %v3473_v47  ;;  %vm3585_vm15 = vcmp.lt.s32.totalorder %v3529_v44, 882  ;;  %v3750_v48 = vmul.f32 %v4417_v11, %v6192_v32 }
 0x358   : > { %v3804_v27 = vadd.f32 %v3749_v53, %v3748_v2  ;;  %v3476_v16 = vadd.s32 80, %v6691_v36  ;;  %v4419_v38 = vsel %vm3584_vm14, 1.0, %v7230_v62  ;;  %v3532_v22 = vadd.s32 %v6696_v12, %v3474_v56 }
 0x359   : > { %vm3586_vm0 = vcmp.lt.s32.totalorder %v3530_v30, 882  ;;  %v3751_v57 = vmul.f32 %v4418_v10, %v6194_v28  ;;  %v3477_v17 = vadd.s32 88, %v6691_v36  ;;  %v4420_v15 = vsel %vm3585_vm15, 1.0, %v7230_v62 }
 0x35a   : > { %v3805_v37 = vadd.f32 %v3804_v27, %v3750_v48  ;;  %v3533_v47 = vadd.s32 %v6696_v12, %v3475_v60  ;;  %vm3587_vm1 = vcmp.lt.s32.totalorder %v3531_v18, 882  ;;  %v3752_v44 = vmul.f32 %v4419_v38, %v6227_v45 }
 0x35b   : > { %v3478_v35 = vadd.s32 96, %v6691_v36  ;;  %v4421_v58 = vsel %vm3586_vm0, 1.0, %v7230_v62  ;;  %v3534_v56 = vadd.s32 %v6696_v12, %v3476_v16  ;;  %vm3588_vm2 = vcmp.lt.s32.totalorder %v3532_v22, 882 }
 0x35c   : > { %v3806_v11 = vadd.f32 %v3805_v37, %v3751_v57  ;;  %v3753_v10 = vmul.f32 %v4420_v15, %v6229_v34  ;;  %v3479_v27 = vadd.s32 104, %v6691_v36  ;;  %v4422_v59 = vsel %vm3587_vm1, 1.0, %v7230_v62 }
 0x35d   : > { %v3535_v60 = vadd.s32 %v6696_v12, %v3477_v17  ;;  %vm3589_vm10 = vcmp.lt.s32.totalorder %v3533_v47, 882  ;;  %v3754_v38 = vmul.f32 %v4421_v58, %v6223_v25  ;;  %v3480_v37 = vadd.s32 112, %v6691_v36 }
 0x35e   : > { %v3807_v30 = vadd.f32 %v3806_v11, %v3752_v44  ;;  %v4423_v29 = vsel %vm3588_vm2, 1.0, %v7230_v62  ;;  %v3536_v16 = vadd.s32 %v6696_v12, %v3478_v35  ;;  %vm3590_vm12 = vcmp.lt.s32.totalorder %v3534_v56, 882 }
 0x35f   : > { %v3755_v15 = vmul.f32 %v4422_v59, %v6225_v55  ;;  %v3481_v11 = vadd.s32 120, %v6691_v36  ;;  %v4424_v52 = vsel %vm3589_vm10, 1.0, %v7230_v62  ;;  %v3537_v17 = vadd.s32 %v6696_v12, %v3479_v27 }
 0x360   : > { %v3808_v18 = vadd.f32 %v3807_v30, %v3753_v10  ;;  %vm3591_vm4 = vcmp.lt.s32.totalorder %v3535_v60, 882  ;;  %v3756_v58 = vmul.f32 %v4423_v29, %v6253_v43  ;;  %v3482_v30 = vadd.s32 128, %v6691_v36 }
 0x361   : > { %v4425_v39 = vsel %vm3590_vm12, 1.0, %v7230_v62  ;;  %v3865_v35 = vmul.f32 %v3748_v2, %v6196_v42  ;;  %v3866_v56 = vmul.f32 %v3749_v53, %v6203_v31  ;;  %v3538_v59 = vadd.s32 %v6696_v12, %v3480_v37 }
 0x362   : > { %v3809_v22 = vadd.f32 %v3808_v18, %v3754_v38  ;;  %vm3592_vm8 = vcmp.lt.s32.totalorder %v3536_v16, 882  ;;  %v3757_v18 = vmul.f32 %v4424_v52, %v6255_v26  ;;  %v3483_v27 = vadd.s32 136, %v6691_v36 }
 0x363   : > { %v4426_v60 = vsel %vm3591_vm4, 1.0, %v7230_v62  ;;  %v3867_v29 = vmul.f32 %v3750_v48, %v6192_v32  ;;  %vm3593_vm9 = vcmp.lt.s32.totalorder %v3537_v17, 882  ;;  %v3758_v1 = vmul.f32 %v4425_v39, %v6249_v5 }
 0x364   : > { %v3810_v47 = vadd.f32 %v3809_v22, %v3755_v15  ;;  %v3539_v22 = vadd.s32 %v6696_v12, %v3481_v11  ;;  %v3484_v31 = vadd.s32 144, %v6691_v36  ;;  %v4427_v2 = vsel %vm3592_vm8, 1.0, %v7230_v62 }
 0x365   : > { %v3868_v53 = vmul.f32 %v3751_v57, %v6194_v28  ;;  %v3921_v52 = vadd.f32 %v3866_v56, %v3865_v35  ;;  %v3540_v37 = vadd.s32 %v6696_v12, %v3482_v30  ;;  %vm3594_vm3 = vcmp.lt.s32.totalorder %v3538_v59, 882 }
 0x366   : > { %v3811_v14 = vadd.f32 %v3810_v47, %v3756_v58  ;;  %v3759_v16 = vmul.f32 %v4426_v60, %v6251_v6  ;;  %v3485_v32 = vadd.s32 152, %v6691_v36  ;;  %v4428_v48 = vsel %vm3593_vm9, 1.0, %v7230_v62 }
 0x367   : > { %v3869_v39 = vmul.f32 %v3752_v44, %v6227_v45  ;;  %v3541_v11 = vadd.s32 %v6696_v12, %v3483_v27  ;;  %vm3595_vm11 = vcmp.lt.s32.totalorder %v3539_v22, 882  ;;  %v3760_v17 = vmul.f32 %v4427_v2, %v6279_v19 }
 0x368   : > { %v3812_v42 = vadd.f32 %v3811_v14, %v3757_v18  ;;  %v3922_v14 = vadd.f32 %v3921_v52, %v3867_v29  ;;  %v3486_v57 = vadd.s32 160, %v6691_v36  ;;  %v4429_v30 = vsel %vm3594_vm3, 1.0, %v7230_v62 }
 0x369   : > { %v3870_v35 = vmul.f32 %v3753_v10, %v6229_v34  ;;  %v3542_v59 = vadd.s32 %v6696_v12, %v3484_v31  ;;  %vm3596_vm5 = vcmp.lt.s32.totalorder %v3540_v37, 882  ;;  %v3761_v60 = vmul.f32 %v4428_v48, %v6281_v23 }
 0x36a   : > { %v3813_v47 = vadd.f32 %v3812_v42, %v3758_v1  ;;  %v3923_v56 = vadd.f32 %v3922_v14, %v3868_v53  ;;  %v3487_v44 = vadd.s32 168, %v6691_v36  ;;  %v4430_v27 = vsel %vm3595_vm11, 1.0, %v7230_v62 }
 0x36b   : > { %v3871_v29 = vmul.f32 %v3754_v38, %v6223_v25  ;;  %v3543_v42 = vadd.s32 %v6696_v12, %v3485_v32  ;;  %vm3597_vm6 = vcmp.lt.s32.totalorder %v3541_v11, 882  ;;  %v3762_v2 = vmul.f32 %v4429_v30, %v6275_v0 }
 0x36c   : > { %v3814_v28 = vadd.f32 %v3813_v47, %v3759_v16  ;;  %v3924_v22 = vadd.f32 %v3923_v56, %v3869_v39  ;;  %v3488_v10 = vadd.s32 176, %v6691_v36  ;;  %v4431_v31 = vsel %vm3596_vm5, 1.0, %v7230_v62 }
 0x36d   : > { %v3872_v53 = vmul.f32 %v3755_v15, %v6225_v55  ;;  %v3544_v37 = vadd.s32 %v6696_v12, %v3486_v57  ;;  %vm3598_vm7 = vcmp.lt.s32.totalorder %v3542_v59, 882  ;;  %v3763_v47 = vmul.f32 %v4430_v27, %v6277_v20 }
 0x36e   : > { %v3815_v45 = vadd.f32 %v3814_v28, %v3760_v17  ;;  %v3925_v52 = vadd.f32 %v3924_v22, %v3870_v35  ;;  %v3489_v38 = vadd.s32 184, %v6691_v36  ;;  %v4432_v32 = vsel %vm3597_vm6, 1.0, %v7230_v62 }
 0x36f   : > { %v3873_v48 = vmul.f32 %v3756_v58, %v6253_v43  ;;  %v3545_v14 = vadd.s32 %v6696_v12, %v3487_v44  ;;  %vm3599_vm13 = vcmp.lt.s32.totalorder %v3543_v42, 882  ;;  %v3764_v11 = vmul.f32 %v4431_v31, %v6305_v8 }
 0x370   : > { %v3816_v34 = vadd.f32 %v3815_v45, %v3761_v60  ;;  %v3926_v39 = vadd.f32 %v3925_v52, %v3871_v29  ;;  %v3490_v15 = vadd.s32 192, %v6691_v36  ;;  %v4433_v28 = vsel %vm3598_vm7, 1.0, %v7230_v62 }
 0x371   : > { %v3874_v57 = vmul.f32 %v3757_v18, %v6255_v26  ;;  %v3546_v35 = vadd.s32 %v6696_v12, %v3488_v10  ;;  %vm3600_vm14 = vcmp.lt.s32.totalorder %v3544_v37, 882  ;;  %v3765_v56 = vmul.f32 %v4432_v32, %v6307_v61 }
 0x372   : > { %v3817_v25 = vadd.f32 %v3816_v34, %v3762_v2  ;;  %v3927_v30 = vadd.f32 %v3926_v39, %v3872_v53  ;;  %v3491_v58 = vadd.s32 200, %v6691_v36  ;;  %v4434_v59 = vsel %vm3599_vm13, 1.0, %v7230_v62 }
 0x373   : > { %v3875_v45 = vmul.f32 %v3758_v1, %v6249_v5  ;;  %v3547_v27 = vadd.s32 %v6696_v12, %v3489_v38  ;;  %vm3601_vm15 = vcmp.lt.s32.totalorder %v3545_v14, 882  ;;  %v3766_v29 = vmul.f32 %v4433_v28, %v6301_v3 }
 0x374   : > { %v3818_v55 = vadd.f32 %v3817_v25, %v3763_v47  ;;  %v3928_v44 = vadd.f32 %v3927_v30, %v3873_v48  ;;  %v3492_v18 = vadd.s32 208, %v6691_v36  ;;  %v4435_v22 = vsel %vm3600_vm14, 1.0, %v7230_v62 }
 0x375   : > { %v3876_v42 = vmul.f32 %v3759_v16, %v6251_v6  ;;  %v3548_v10 = vadd.s32 %v6696_v12, %v3490_v15  ;;  %vm3602_vm0 = vcmp.lt.s32.totalorder %v3546_v35, 882  ;;  %v3767_v31 = vmul.f32 %v4434_v59, %v6303_v33 }
 0x376   : > { %v3819_v43 = vadd.f32 %v3818_v55, %v3764_v11  ;;  %v3929_v34 = vadd.f32 %v3928_v44, %v3874_v57  ;;  %v3493_v1 = vadd.s32 216, %v6691_v36  ;;  %v4436_v53 = vsel %vm3601_vm15, 1.0, %v7230_v62 }
 0x377   : > { %v3877_v52 = vmul.f32 %v3760_v17, %v6279_v19  ;;  %v3549_v25 = vadd.s32 %v6696_v12, %v3491_v58  ;;  %vm3603_vm1 = vcmp.lt.s32.totalorder %v3547_v27, 882  ;;  %v3768_v38 = vmul.f32 %v4435_v22, %v6331_v41 }
 0x378   : > { %v3820_v26 = vadd.f32 %v3819_v43, %v3765_v56  ;;  %v3930_v37 = vadd.f32 %v3929_v34, %v3875_v45  ;;  %v3494_v16 = vadd.s32 224, %v6691_v36  ;;  %v4437_v32 = vsel %vm3602_vm0, 1.0, %v7230_v62 }
 0x379   : > { %v3878_v48 = vmul.f32 %v3761_v60, %v6281_v23  ;;  %v3550_v14 = vadd.s32 %v6696_v12, %v3492_v18  ;;  %vm3604_vm2 = vcmp.lt.s32.totalorder %v3548_v10, 882  ;;  %v3769_v55 = vmul.f32 %v4436_v53, %v6333_v40 }
 0x37a   : > { %v3821_v5 = vadd.f32 %v3820_v26, %v3766_v29  ;;  %v3931_v39 = vadd.f32 %v3930_v37, %v3876_v42  ;;  %v3495_v17 = vadd.s32 232, %v6691_v36  ;;  %v4438_v15 = vsel %vm3603_vm1, 1.0, %v7230_v62 }
 0x37b   : > { %v3879_v28 = vmul.f32 %v3762_v2, %v6275_v0  ;;  %v3551_v30 = vadd.s32 %v6696_v12, %v3493_v1  ;;  %vm3605_vm10 = vcmp.lt.s32.totalorder %v3549_v25, 882  ;;  %v3770_v35 = vmul.f32 %v4437_v32, %v6327_v51 }
 0x37c   : > { %v3822_v6 = vadd.f32 %v3821_v5, %v3767_v31  ;;  %v3932_v57 = vadd.f32 %v3931_v39, %v3877_v52  ;;  %v3496_v60 = vadd.s32 240, %v6691_v36  ;;  %v4439_v43 = vsel %vm3604_vm2, 1.0, %v7230_v62 }
 0x37d   : > { %v3880_v58 = vmul.f32 %v3763_v47, %v6277_v20  ;;  %v3552_v45 = vadd.s32 %v6696_v12, %v3494_v16  ;;  %vm3606_vm12 = vcmp.lt.s32.totalorder %v3550_v14, 882  ;;  %v3771_v44 = vmul.f32 %v4438_v15, %v6329_v54 }
 0x37e   : > { %v3823_v19 = vadd.f32 %v3822_v6, %v3768_v38  ;;  %v3933_v59 = vadd.f32 %v3932_v57, %v3878_v48  ;;  %v3497_v2 = vadd.s32 248, %v6691_v36  ;;  %v4440_v27 = vsel %vm3605_vm10, 1.0, %v7230_v62 }
 0x37f   : > { %v3881_v26 = vmul.f32 %v3764_v11, %v6305_v8  ;;  %v3553_v22 = vadd.s32 %v6696_v12, %v3495_v17  ;;  %vm3607_vm4 = vcmp.lt.s32.totalorder %v3551_v30, 882  ;;  %v3772_v42 = vmul.f32 %v4439_v43, %v6357_v49 }
 0x380   : > { %v3824_v23 = vadd.f32 %v3823_v19, %v3769_v55  ;;  %v3934_v18 = vadd.f32 %v3933_v59, %v3879_v28  ;;  %v3498_v47 = vadd.s32 256, %v6691_v36  ;;  %v4441_v34 = vsel %vm3606_vm12, 1.0, %v7230_v62 }
 0x381   : > { %v3882_v10 = vmul.f32 %v3765_v56, %v6307_v61  ;;  %v3554_v1 = vadd.s32 %v6696_v12, %v3496_v60  ;;  %vm3608_vm8 = vcmp.lt.s32.totalorder %v3552_v45, 882  ;;  %v3773_v53 = vmul.f32 %v4440_v27, %v6359_v13 }
 0x382   : > { %v3825_v0 = vadd.f32 %v3824_v23, %v3770_v35  ;;  %v3935_v5 = vadd.f32 %v3934_v18, %v3880_v58  ;;  %v4442_v11 = vsel %vm3607_vm4, 1.0, %v7230_v62  ;;  %v3883_v52 = vmul.f32 %v3766_v29, %v6301_v3 }
 0x383   : > { %v3555_v25 = vadd.s32 %v6696_v12, %v3497_v2  ;;  %vm3609_vm9 = vcmp.lt.s32.totalorder %v3553_v22, 882  ;;  %v3774_v36 = vmul.f32 %v4441_v34, %v6353_v63  ;;  %v4443_v61 = vsel %vm3608_vm8, 1.0, %v7230_v62 }
 0x384   : > { %v3826_v20 = vadd.f32 %v3825_v0, %v3771_v44  ;;  %v3936_v37 = vadd.f32 %v3935_v5, %v3881_v26  ;;  %v3884_v56 = vmul.f32 %v3767_v31, %v6303_v33  ;;  %v3556_v32 = vadd.s32 %v6696_v12, %v3498_v47  ;;  %v7231_v12 = vld [vmem:[#allocation12_spill] sm:$0xff]  ;;  %v7233_v0 = vld [vmem:[#allocation11_spill] sm:$0xff] }
 0x385   : > { %vm3610_vm3 = vcmp.lt.s32.totalorder %v3554_v1, 882  ;;  %v3775_v48 = vmul.f32 %v4442_v11, %v6355_v9  ;;  %v4444_v3 = vsel %vm3609_vm9, 1.0, %v7230_v62  ;;  %v3885_v29 = vmul.f32 %v3768_v38, %v6331_v41  ;;  %v7232_v41 = vld [vmem:[#allocation10_spill] sm:$0xff]  ;;  %v7234_v26 = vld [vmem:[#allocation15_spill] sm:$0xff] }
 0x386   : > { %v3827_v8 = vadd.f32 %v3826_v20, %v3772_v42  ;;  %v3937_v16 = vadd.f32 %v3936_v37, %v3882_v10  ;;  %vm3611_vm11 = vcmp.lt.s32.totalorder %v3555_v25, 882  ;;  %v3776_v19 = vmul.f32 %v4443_v61, %v6383_v7  ;;  %v7235_v20 = vld [vmem:[#allocation16_spill] sm:$0xff]  ;;  %v7237_v1 = vld [vmem:[#allocation14_spill] sm:$0xff] }
 0x387   : > { %v4445_v15 = vsel %vm3610_vm3, 1.0, %v7230_v62  ;;  %v3886_v33 = vmul.f32 %v3769_v55, %v6333_v40  ;;  %vm3612_vm5 = vcmp.lt.s32.totalorder %v3556_v32, 882  ;;  %v3777_v28 = vmul.f32 %v4444_v3, %v7231_v12 }
 0x388   : > { %v3828_v6 = vadd.f32 %v3827_v8, %v3773_v53  ;;  %v3938_v14 = vadd.f32 %v3937_v16, %v3883_v52  ;;  %v4446_v30 = vsel %vm3611_vm11, 1.0, %v7230_v62  ;;  %v3887_v23 = vmul.f32 %v3770_v35, %v6327_v51  ;;  %v7238_v52 = vld [vmem:[#allocation19_spill] sm:$0xff] }
 0x389   : > { %v3778_v38 = vmul.f32 %v4445_v15, %v7232_v41  ;;  %v4447_v58 = vsel %vm3612_vm5, 1.0, %v7230_v62  ;;  %v3888_v59 = vmul.f32 %v3771_v44, %v6329_v54  ;;  %v3779_v40 = vmul.f32 %v4446_v30, %v7233_v0  ;;  %v7236_v44 = vld [vmem:[#allocation13_spill] sm:$0xff] }
 0x38a   : > { %v3829_v39 = vadd.f32 %v3828_v6, %v3774_v36  ;;  %v3939_v31 = vadd.f32 %v3938_v14, %v3884_v56  ;;  %v3889_v2 = vmul.f32 %v3772_v42, %v6357_v49  ;;  %v3780_v18 = vmul.f32 %v4447_v58, %v7234_v26  ;;  %v7240_v56 = vld [vmem:[#allocation17_spill] sm:$0xff] }
 0x38b   : > { %v3890_v51 = vmul.f32 %v3773_v53, %v6359_v13  ;;  %v3781_v47 = vmul.f32 %v6744_v50, %v7235_v20  ;;  %v3891_v62 = vmul.f32 %v3774_v36, %v6353_v63  ;;  %v3782_v10 = vmul.f32 %v6748_v46, %v7236_v44  ;;  %v7239_v36 = vld [vmem:[#allocation20_spill] sm:$0xff] }
 0x38c   : > { %v3830_v17 = vadd.f32 %v3829_v39, %v3775_v48  ;;  %v3940_v60 = vadd.f32 %v3939_v31, %v3885_v29  ;;  %v3892_v49 = vmul.f32 %v3775_v48, %v6355_v9  ;;  %v3783_v8 = vmul.f32 %v6752_v4, %v7237_v1  ;;  %v7241_v4 = vld [vmem:[#allocation29_spill] sm:$0xff]  ;;  %v7242_v39 = vld [vmem:[#allocation18_spill] sm:$0xff] }
 0x38d   : > { %v3893_v13 = vmul.f32 %v3776_v19, %v6383_v7  ;;  %v3784_v50 = vmul.f32 %v6756_v21, %v7238_v52  ;;  %v3894_v63 = vmul.f32 %v3777_v28, %v7231_v12  ;;  %v3785_v46 = vmul.f32 %v6760_v24, %v7239_v36  ;;  %v7243_v21 = vld [vmem:[#allocation30_spill] sm:$0xff]  ;;  %v7245_v24 = vld [vmem:[#allocation31_spill] sm:$0xff] }
 0x38e   : > { %v3831_v57 = vadd.f32 %v3830_v17, %v3776_v19  ;;  %v3941_v45 = vadd.f32 %v3940_v60, %v3886_v33  ;;  %v3895_v9 = vmul.f32 %v3778_v38, %v7232_v41  ;;  %v3786_v16 = vmul.f32 %v7241_v4, %v7240_v56  ;;  %v7244_v17 = vld [vmem:[#allocation21_spill] sm:$0xff] }
 0x38f   : > { %v3896_v7 = vmul.f32 %v3779_v40, %v7233_v0  ;;  %v3787_v3 = vmul.f32 %v7243_v21, %v7242_v39  ;;  %v3897_v14 = vmul.f32 %v3780_v18, %v7234_v26  ;;  %v3788_v15 = vmul.f32 %v7245_v24, %v7244_v17 }
 0x390   : > { %v3832_v43 = vadd.f32 %v3831_v57, %v3777_v28  ;;  %v3942_v27 = vadd.f32 %v3941_v45, %v3887_v23  ;;  %v3898_v31 = vmul.f32 %v3781_v47, %v7235_v20  ;;  %v7246_v28 = vld [vmem:[#allocation22_spill] sm:$0xff]  ;;  %v7247_v57 = vld [vmem:[#allocation32_spill] sm:$0xff]  ;;  %v3899_v60 = vmul.f32 %v3782_v10, %v7236_v44 }
 0x391   : > { %v3789_v30 = vmul.f32 %v7247_v57, %v7246_v28  ;;  %v3900_v45 = vmul.f32 %v3783_v8, %v7237_v1  ;;  %v3901_v26 = vmul.f32 %v3784_v50, %v7238_v52  ;;  %v7257_v1 = vld [vmem:[#allocation37_spill] sm:$0xff]  ;;  %vm3982_vm6 = vcmask 1040384  }
 0x392   : > { %v3833_v55 = vadd.f32 %v3832_v43, %v3778_v38  ;;  %v3943_v35 = vadd.f32 %v3942_v27, %v3888_v59  ;;  %v7248_v38 = vld [vmem:[#allocation2_spill] sm:$0xff]  ;;  %v7249_v43 = vld [vmem:[#allocation33_spill] sm:$0xff]  ;;  %vm3984_vm7 = vcmask 1041408  }
 0x393   : > { %v3790_v58 = vmul.f32 %v7249_v43, %v7248_v38  ;;  %v7258_v52 = vld [vmem:[#allocation5_spill] sm:$0xff] }
 0x394   : > { %v3834_v22 = vadd.f32 %v3833_v55, %v3779_v40  ;;  %v3944_v54 = vadd.f32 %v3943_v35, %v3889_v2  ;;  %v7250_v40 = vld [vmem:[#allocation3_spill] sm:$0xff]  ;;  %v7251_v55 = vld [vmem:[#allocation34_spill] sm:$0xff] }
 0x395   : > { %v3791_v2 = vmul.f32 %v7251_v55, %v7250_v40 }
 0x396   : > { %v3835_v34 = vadd.f32 %v3834_v22, %v3780_v18  ;;  %v3945_v42 = vadd.f32 %v3944_v54, %v3890_v51  ;;  %v7252_v22 = vld [vmem:[#allocation23_spill] sm:$0xff]  ;;  %v7255_v54 = vld [vmem:[#allocation36_spill] sm:$0xff] }
 0x397   : > { %v7253_v51 = vld [vmem:[#allocation35_spill] sm:$0xff] }
 0x398   : > { %v3836_v5 = vadd.f32 %v3835_v34, %v3781_v47  ;;  %v3946_v53 = vadd.f32 %v3945_v42, %v3891_v62  ;;  %v3792_v35 = vmul.f32 %v7253_v51, %v7252_v22  ;;  %v3902_v47 = vmul.f32 %v3785_v46, %v7239_v36  ;;  %v7254_v62 = vld [vmem:[#allocation24_spill] sm:$0xff] }
 0x399   : > { %v3793_v44 = vmul.f32 %v7255_v54, %v7254_v62  ;;  %v7256_v42 = vld [vmem:[#allocation4_spill] sm:$0xff] }
 0x39a   : > { %v3837_v11 = vadd.f32 %v3836_v5, %v3782_v10  ;;  %v3947_v25 = vadd.f32 %v3946_v53, %v3892_v49  ;;  %v3903_v5 = vmul.f32 %v3786_v16, %v7240_v56  ;;  %v3906_v56 = vmul.f32 %v3789_v30, %v7246_v28 }
 0x39b   : > { %v3909_v28 = vmul.f32 %v3792_v35, %v7252_v22 }
 0x39c   : > { %v3838_v37 = vadd.f32 %v3837_v11, %v3783_v8  ;;  %v3948_v61 = vadd.f32 %v3947_v25, %v3893_v13  ;;  %v3794_v8 = vmul.f32 %v7257_v1, %v7256_v42  ;;  %v3904_v13 = vmul.f32 %v3787_v3, %v7242_v39 }
 0x39d   : > { %v3905_v25 = vmul.f32 %v3788_v15, %v7244_v17  ;;  %v3907_v39 = vmul.f32 %v3790_v58, %v7248_v38  ;;  %v3908_v17 = vmul.f32 %v3791_v2, %v7250_v40  ;;  %v3910_v38 = vmul.f32 %v3793_v44, %v7254_v62 }
 0x39e   : > { %v3839_v6 = vadd.f32 %v3838_v37, %v3784_v50  ;;  %v3949_v48 = vadd.f32 %v3948_v61, %v3894_v63  ;;  %v7259_v50 = vld [vmem:[#allocation38_spill] sm:$0xff]  ;;  %v3911_v40 = vmul.f32 %v3794_v8, %v7256_v42 }
 0x39f   : > { %v3795_v37 = vmul.f32 %v7259_v50, %v7258_v52 }
 0x3a0   : > { %v3840_v32 = vadd.f32 %v3839_v6, %v3785_v46  ;;  %v3950_v19 = vadd.f32 %v3949_v48, %v3895_v9  ;;  %v7260_v46 = vld [vmem:[#allocation25_spill] sm:$0xff]  ;;  %v7261_v6 = vld [vmem:[#allocation39_spill] sm:$0xff] }
 0x3a1   : > { %v3796_v9 = vmul.f32 %v7261_v6, %v7260_v46  ;;  %v3912_v22 = vmul.f32 %v3795_v37, %v7258_v52 }
 0x3a2   : > { %v3841_v29 = vadd.f32 %v3840_v32, %v3786_v16  ;;  %v3951_v12 = vadd.f32 %v3950_v19, %v3896_v7  ;;  %v7262_v16 = vld [vmem:[#allocation26_spill] sm:$0xff]  ;;  %v7263_v32 = vld [vmem:[#allocation40_spill] sm:$0xff] }
 0x3a3   : > { %v3797_v7 = vmul.f32 %v7263_v32, %v7262_v16  ;;  %v3913_v62 = vmul.f32 %v3796_v9, %v7260_v46 }
 0x3a4   : > { %v3842_v33 = vadd.f32 %v3841_v29, %v3787_v3  ;;  %v3952_v41 = vadd.f32 %v3951_v12, %v3897_v14  ;;  %v7264_v3 = vld [vmem:[#allocation6_spill] sm:$0xff]  ;;  %v7265_v29 = vld [vmem:[#allocation41_spill] sm:$0xff] }
 0x3a5   : > { %v3798_v14 = vmul.f32 %v7265_v29, %v7264_v3 }
 0x3a6   : > { %v3843_v23 = vadd.f32 %v3842_v33, %v3788_v15  ;;  %v3953_v0 = vadd.f32 %v3952_v41, %v3898_v31  ;;  %v7266_v15 = vld [vmem:[#allocation7_spill] sm:$0xff]  ;;  %v7267_v33 = vld [vmem:[#allocation42_spill] sm:$0xff] }
 0x3a7   : > { %v3799_v31 = vmul.f32 %v7267_v33, %v7266_v15 }
 0x3a8   : > { %v3844_v59 = vadd.f32 %v3843_v23, %v3789_v30  ;;  %v3954_v18 = vadd.f32 %v3953_v0, %v3899_v60  ;;  %v7268_v30 = vld [vmem:[#allocation8_spill] sm:$0xff]  ;;  %v7269_v23 = vld [vmem:[#allocation43_spill] sm:$0xff] }
 0x3a9   : > { %v3800_v60 = vmul.f32 %v7269_v23, %v7268_v30  ;;  %v3916_v1 = vmul.f32 %v3799_v31, %v7266_v15 }
 0x3aa   : > { %v3845_v27 = vadd.f32 %v3844_v59, %v3790_v58  ;;  %v3955_v34 = vadd.f32 %v3954_v18, %v3900_v45  ;;  %v7270_v58 = vld [vmem:[#allocation9_spill] sm:$0xff]  ;;  %v7271_v59 = vld [vmem:[#allocation44_spill] sm:$0xff] }
 0x3ab   : > { %v3801_v45 = vmul.f32 %v7271_v59, %v7270_v58 }
 0x3ac   : > { %v3846_v20 = vadd.f32 %v3845_v27, %v3791_v2  ;;  %v3956_v49 = vadd.f32 %v3955_v34, %v3901_v26  ;;  %v7272_v2 = vld [vmem:[#allocation27_spill] sm:$0xff]  ;;  %v7273_v27 = vld [vmem:[#allocation45_spill] sm:$0xff] }
 0x3ad   : > { %v3802_v26 = vmul.f32 %v7273_v27, %v7272_v2  ;;  %v3918_v52 = vmul.f32 %v3801_v45, %v7270_v58 }
 0x3ae   : > { %v3847_v10 = vadd.f32 %v3846_v20, %v3792_v35  ;;  %v3957_v53 = vadd.f32 %v3956_v49, %v3902_v47  ;;  %v7274_v35 = vld [vmem:[#allocation28_spill] sm:$0xff]  ;;  %v7275_v20 = vld [vmem:[#allocation46_spill] sm:$0xff]  ;;  %v3915_v49 = vmul.f32 %v3798_v14, %v7264_v3 }
 0x3af   : > { %v3803_v47 = vmul.f32 %v7275_v20, %v7274_v35 }
 0x3b0   : > { %v3848_v11 = vadd.f32 %v3847_v10, %v3793_v44  ;;  %v3958_v36 = vadd.f32 %v3957_v53, %v3903_v5  ;;  %v3914_v10 = vmul.f32 %v3797_v7, %v7262_v16 }
 0x3b2   : > { %v3849_v63 = vadd.f32 %v3848_v11, %v3794_v8  ;;  %v3959_v4 = vadd.f32 %v3958_v36, %v3904_v13  ;;  %v3917_v13 = vmul.f32 %v3800_v60, %v7268_v30  ;;  %v3920_v36 = vmul.f32 %v3803_v47, %v7274_v35 }
 0x3b4   : > { %v3850_v61 = vadd.f32 %v3849_v63, %v3795_v37  ;;  %v3960_v21 = vadd.f32 %v3959_v4, %v3905_v25  ;;  %v3919_v63 = vmul.f32 %v3802_v26, %v7272_v2 }
 0x3b6   : > { %v3851_v48 = vadd.f32 %v3850_v61, %v3796_v9  ;;  %v3961_v24 = vadd.f32 %v3960_v21, %v3906_v56 }
 0x3b8   : > { %v3852_v19 = vadd.f32 %v3851_v48, %v3797_v7  ;;  %v3962_v57 = vadd.f32 %v3961_v24, %v3907_v39 }
 0x3ba   : > { %v3853_v12 = vadd.f32 %v3852_v19, %v3798_v14  ;;  %v3963_v43 = vadd.f32 %v3962_v57, %v3908_v17 }
 0x3bc   : > { %v3854_v41 = vadd.f32 %v3853_v12, %v3799_v31  ;;  %v3964_v55 = vadd.f32 %v3963_v43, %v3909_v28 }
 0x3be   : > { %v3855_v0 = vadd.f32 %v3854_v41, %v3800_v60  ;;  %v3965_v51 = vadd.f32 %v3964_v55, %v3910_v38 }
 0x3c0   : > { %v3856_v18 = vadd.f32 %v3855_v0, %v3801_v45  ;;  %v3966_v54 = vadd.f32 %v3965_v51, %v3911_v40 }
 0x3c2   : > { %v3857_v34 = vadd.f32 %v3856_v18, %v3802_v26  ;;  %v3967_v5 = vadd.f32 %v3966_v54, %v3912_v22 }
 0x3c4   : > { %v3858_v44 = vadd.f32 %v3857_v34, %v3803_v47  ;;  %v3968_v42 = vadd.f32 %v3967_v5, %v3913_v62 }
 0x3c6   : > { %v3969_v8 = vadd.f32 %v3968_v42, %v3914_v10  ;;  %v3859_v11 = vrot.slane %v3858_v44, 4 }
 0x3c8   : > { %v3970_v53 = vadd.f32 %v3969_v8, %v3915_v49  ;;  %v3860_v37 = vadd.f32 %v3859_v11, %v3858_v44 }
 0x3ca   : > { %v3971_v50 = vadd.f32 %v3970_v53, %v3916_v1  ;;  %v3861_v6 = vrot.slane %v3860_v37, 2 }
 0x3cc   : > { %v3972_v25 = vadd.f32 %v3971_v50, %v3917_v13  ;;  %v3862_v56 = vadd.f32 %v3861_v6, %v3860_v37 }
 0x3ce   : > { %v3973_v46 = vadd.f32 %v3972_v25, %v3918_v52  ;;  %v3863_v32 = vrot.slane %v3862_v56, 1 }
 0x3d0   : > { %v3974_v9 = vadd.f32 %v3973_v46, %v3919_v63  ;;  %v3864_v39 = vadd.f32 %v3863_v32, %v3862_v56 }
 0x3d2   : > { %v3975_v61 = vadd.f32 %v3974_v9, %v3920_v36 }
 0x3d4   : > { %v3976_v4 = vrot.slane %v3975_v61, 4 }
 0x3d6   : > { %v3977_v16 = vadd.f32 %v3976_v4, %v3975_v61 }
 0x3d8   : > { %v3978_v7 = vrot.slane %v3977_v16, 2 }
 0x3da   : > { %v3979_v48 = vadd.f32 %v3978_v7, %v3977_v16 }
 0x3dc   : > { %v3980_v21 = vrot.slane %v3979_v48, 1 }
 0x3de   : > { %v3981_v3 = vadd.f32 %v3980_v21, %v3979_v48 }
 0x3e0   : > { %v3983_v29 = vsel %vm3982_vm6, %v3864_v39, %v3981_v3 }
 0x3e1   : > { %v3985_v14 = vsel %vm3984_vm7, %v3983_v29, 0.0 }
 0x3e2   : > { %3986 = vst [vmem:[%s5453_s29] sm:$0xff] %v3985_v14 }
 0x3e3 PF: > { %s15_s15 = sadd.s32 1, %s5389_s15  }
 0x3e4   : > { %p12_p7 = scmp.ge.s32.totalorder %s15_s15, 4  }
 0x3e6   :  { %14 = sbr.rel (!%p12_p7) target bundleno = 1 (0x1), region = 82 }

// kernel: encoder_forward.8
= control target key start
LH: loop header
LB: loop body
LE: loop exit
PB: predicated region body
PF: predicated region fallthrough
CT: control target
= control target key end

     0   :  { %s3301_s15 = smov 0   ;;  %s3917_s0 = inlined_call_operand.vmem [shape: bf16[192,1600], index: 0, kind: input, shape index: {}]   ;;  %s3918_s1 = inlined_call_operand.vmem [shape: bf16[1600,128], index: 1, kind: input, shape index: {}]   ;;  %s3919_s2 = inlined_call_operand.vmem [shape: f32[8,128], index: 2, kind: input, shape index: {}]   ;;  %s3920_s3 = inlined_call_operand.vmem [shape: bf16[192,128], index: 3, kind: output, shape index: {0}]   ;;  %s3921_s4 = inlined_call_operand.vmem [shape: f32[16,128], index: 4, kind: output, shape index: {1}]  }
   0x1 LB: > { %s3307_s16 = sadd.s32 4294967295, %s3273_s15   ;;  %p2429_p0 = scmp.ge.s32.totalorder %s3273_s15, 1  ;;  %s3273_s15 = sphi %s3301_s15, %s15_s15  }
   0x2   : > { %p167_p1 = scmp.lt.s32.totalorder %s3273_s15, 3 }
   0x4   : > { %p168_p2 = pnand %p2429_p0, %p167_p1 }
   0x5   : > { %p211_p3 = scmp.lt.s32.totalorder (!%p168_p2), %s3307_s16, 1  ;;  %v3053_v0 = vld [vmem:[%s3918_s1 + $0x40] sm:$0xff] (!%p168_p2)   ;;  %v3057_v4 = vld [vmem:[%s3918_s1 + $0x48] sm:$0xff] (!%p168_p2)   ;;  %v3061_v8 = vld [vmem:[%s3918_s1 + $0x50] sm:$0xff] (!%p168_p2)   ;;  %vm1495_vm0 = vcmask (!%p168_p2), 523264   ;;  %p2630_p5 = scmp.ge.s32.totalorder (!%p168_p2), %s3307_s16, 1 }
   0x6   : > { %171 = sbr.rel (%p168_p2) target bundleno = 498 (0x1f2), region = 32  ;;  %v3054_v1 = vld [vmem:[%s3918_s1 + $0xc0] sm:$0xff] (!%p168_p2)   ;;  %2693 = vmatprep.subr.bf16.mxu0 (!%p168_p2), %v3053_v0  ;;  %v3058_v5 = vld [vmem:[%s3918_s1 + $0xc8] sm:$0xff] (!%p168_p2)   ;;  %v3062_v9 = vld [vmem:[%s3918_s1 + $0xd0] sm:$0xff] (!%p168_p2)  }
   0x7   : > { %v3055_v2 = vld [vmem:[%s3918_s1] sm:$0xff] (!%p168_p2)   ;;  %2745 = vmatprep.subr.bf16.mxu1 (!%p168_p2), %v3054_v1  ;;  %v3059_v6 = vld [vmem:[%s3918_s1 + $0x8] sm:$0xff] (!%p168_p2)   ;;  %v3063_v10 = vld [vmem:[%s3918_s1 + $0x10] sm:$0xff] (!%p168_p2)  }
   0x8   : > { %v3056_v3 = vld [vmem:[%s3918_s1 + $0x80] sm:$0xff] (!%p168_p2)   ;;  %2694 = vmatpush3.bf16.msra.mxu0 (!%p168_p2), %v3055_v2  ;;  %v3060_v7 = vld [vmem:[%s3918_s1 + $0x88] sm:$0xff] (!%p168_p2)   ;;  %v3064_v11 = vld [vmem:[%s3918_s1 + $0x90] sm:$0xff] (!%p168_p2)  }
   0x9   : > { %2746 = vmatpush3.bf16.msra.mxu1 (!%p168_p2), %v3056_v3  ;;  %2695 = vmatprep.subr.bf16.mxu0 (!%p168_p2), %v3057_v4  ;;  %v3065_v12 = vld [vmem:[%s3918_s1 + $0x58] sm:$0xff] (!%p168_p2)   ;;  %v3069_v16 = vld [vmem:[%s3918_s1 + $0x60] sm:$0xff] (!%p168_p2)   ;;  %v3073_v20 = vld [vmem:[%s3918_s1 + $0x68] sm:$0xff] (!%p168_p2)  }
   0xa   : > { %2747 = vmatprep.subr.bf16.mxu1 (!%p168_p2), %v3058_v5  ;;  %v3066_v13 = vld [vmem:[%s3918_s1 + $0xd8] sm:$0xff] (!%p168_p2)   ;;  %v3070_v17 = vld [vmem:[%s3918_s1 + $0xe0] sm:$0xff] (!%p168_p2)   ;;  %v3074_v21 = vld [vmem:[%s3918_s1 + $0xe8] sm:$0xff] (!%p168_p2)  }
   0xb   : > { %v3067_v14 = vld [vmem:[%s3918_s1 + $0x18] sm:$0xff] (!%p168_p2)   ;;  %v3071_v18 = vld [vmem:[%s3918_s1 + $0x20] sm:$0xff] (!%p168_p2)   ;;  %v3075_v22 = vld [vmem:[%s3918_s1 + $0x28] sm:$0xff] (!%p168_p2)  }
   0xc   : > { %2696 = vmatpush3.bf16.msra.mxu0 (!%p168_p2), %v3059_v6  ;;  %v3068_v15 = vld [vmem:[%s3918_s1 + $0x98] sm:$0xff] (!%p168_p2)   ;;  %v3072_v19 = vld [vmem:[%s3918_s1 + $0xa0] sm:$0xff] (!%p168_p2)   ;;  %v3076_v23 = vld [vmem:[%s3918_s1 + $0xa8] sm:$0xff] (!%p168_p2)  }
   0xd   : > { %s212_s21 = scalar_select %p211_p3, %s3307_s16, 1  ;;  %2748 = vmatpush3.bf16.msra.mxu1 %v3060_v7  ;;  %2697 = vmatprep.subr.bf16.mxu0 %v3061_v8  ;;  %v3077_v24 = vld [vmem:[%s3918_s1 + $0x70] sm:$0xff]   ;;  %v3081_v28 = vld [vmem:[%s3918_s1 + $0x78] sm:$0xff]   ;;  %v3091_v36 = vld [vmem:[%s3918_s1 + $0x1c0] sm:$0xff]  }
   0xe   : > { %2749 = vmatprep.subr.bf16.mxu1 %v3062_v9  ;;  %v3078_v25 = vld [vmem:[%s3918_s1 + $0xf0] sm:$0xff]   ;;  %v3082_v29 = vld [vmem:[%s3918_s1 + $0xf8] sm:$0xff]   ;;  %v3092_v37 = vld [vmem:[%s3918_s1 + $0x180] sm:$0xff]   ;;  %vm2203_vm1 = vcmask (!%p2630_p5), 1040384   ;;  %vm2205_vm2 = vcmask (!%p2630_p5), 1041408  }
   0xf   : > { %s2432_s26 = sshll.u32 %s212_s21, 3  ;;  %v3079_v26 = vld [vmem:[%s3918_s1 + $0x30] sm:$0xff]   ;;  %v3083_v30 = vld [vmem:[%s3918_s1 + $0x38] sm:$0xff]   ;;  %v3093_v38 = vld [vmem:[%s3918_s1 + $0x1c8] sm:$0xff]  }
  0x10   : > { %s3331_s5 = scalar_lea.vmem %s3921_s4, %s2432_s26  ;;  %2698 = vmatpush3.bf16.msra.mxu0 %v3063_v10  ;;  %s198_s26 = smul.u32 12, %s3307_s16  ;;  %v3080_v27 = vld [vmem:[%s3918_s1 + $0xb0] sm:$0xff]   ;;  %v3084_v31 = vld [vmem:[%s3918_s1 + $0xb8] sm:$0xff]   ;;  %v3098_v41 = vld [vmem:[%s3918_s1 + $0x188] sm:$0xff]  }
  0x11   : > { %2750 = vmatpush3.bf16.msra.mxu1 %v3064_v11  ;;  %2699 = vmatprep.subr.bf16.mxu0 %v3065_v12  ;;  %v3101_v44 = vld [vmem:[%s3918_s1 + $0x140] sm:$0xff]   ;;  %v3103_v46 = vld [vmem:[%s3918_s1 + $0x1d0] sm:$0xff]   ;;  %v3105_v48 = vld [vmem:[%s3918_s1 + $0x148] sm:$0xff]  }
  0x12   : > { %2751 = vmatprep.subr.bf16.mxu1 %v3066_v13  ;;  %p199_p4 = scmp.lt.s32.totalorder %s198_s26, 23  ;;  %v3102_v45 = vld [vmem:[%s3918_s1 + $0x100] sm:$0xff]   ;;  %v3104_v47 = vld [vmem:[%s3918_s1 + $0x190] sm:$0xff]   ;;  %v3110_v51 = vld [vmem:[%s3918_s1 + $0x108] sm:$0xff]  }
  0x13   : > { %v3113_v54 = vld [vmem:[%s3918_s1 + $0x1d8] sm:$0xff]   ;;  %v3115_v56 = vld [vmem:[%s3918_s1 + $0x150] sm:$0xff]   ;;  %v3123_v62 = vld [vmem:[%s3918_s1 + $0x1e0] sm:$0xff]  }
  0x14   : > { %2700 = vmatpush3.bf16.msra.mxu0 %v3067_v14  ;;  %s3923_s26 = smov (!%p199_p4, %s198_s26), 23  ;;  %v3114_v55 = vld [vmem:[%s3918_s1 + $0x198] sm:$0xff]   ;;  %v3116_v57 = vld [vmem:[%s3918_s1 + $0x110] sm:$0xff]   ;;  %v3124_v63 = vld [vmem:[%s3918_s1 + $0x1a0] sm:$0xff]  }
  0x15   : > { %2752 = vmatpush3.bf16.msra.mxu1 %v3068_v15  ;;  %2701 = vmatprep.subr.bf16.mxu0 %v3069_v16  ;;  %s3043_s29 = smul.u32 52, %s3923_s26  ;;  %v3125_v0 = vld [vmem:[%s3918_s1 + $0x158] sm:$0xff]   ;;  %v3127_v2 = vld [vmem:[%s3918_s1 + $0x1e8] sm:$0xff]   ;;  %v3135_v8 = vld [vmem:[%s3918_s1 + $0x160] sm:$0xff]  }
  0x16   : > { %2753 = vmatprep.subr.bf16.mxu1 %v3070_v17  ;;  %v3126_v1 = vld [vmem:[%s3918_s1 + $0x118] sm:$0xff]   ;;  %v3132_v5 = vld [vmem:[%s3918_s1 + $0x1a8] sm:$0xff]   ;;  %v3136_v9 = vld [vmem:[%s3918_s1 + $0x120] sm:$0xff]  }
  0x17   : > { %s3415_s17 = scalar_lea.vmem %s3917_s0, %s3043_s29  ;;  %v3137_v10 = vld [vmem:[%s3918_s1 + $0x168] sm:$0xff]   ;;  %v3138_v11 = vld [vmem:[%s3918_s1 + $0x1f0] sm:$0xff]  }
  0x18   : > { %2702 = vmatpush3.bf16.msra.mxu0 %v3071_v18  ;;  %v3085_v32 = vld [vmem:[%s3415_s17] ss:$52 sps:$4 sm:$0xff]   ;;  %v3087_v33 = vld [vmem:[%s3415_s17 + $0x4] ss:$52 sps:$4 sm:$0xff]   ;;  %v3088_v34 = vld [vmem:[%s3415_s17 + $0x8] ss:$52 sps:$4 sm:$0xff]  }
  0x19   : > { %2754 = vmatpush3.bf16.msra.mxu1 %v3072_v19  ;;  %2703 = vmatprep.subr.bf16.mxu0 %v3073_v20  ;;  %v3090_v35 = vld [vmem:[%s3415_s17 + $0xc] ss:$52 sps:$4 sm:$0xff]   ;;  %v3096_v40 = vld [vmem:[%s3415_s17 + $0x74] ss:$52 sps:$4 sm:$0xff]   ;;  %v3100_v43 = vld [vmem:[%s3415_s17 + $0x70] ss:$52 sps:$4 sm:$0xff]  }
  0x1a   : > { %2755 = vmatprep.subr.bf16.mxu1 %v3074_v21  ;;  %1546 = vmatprep.mubr.bf16.mxu0 %v3087_v33  ;;  %v3094_v39 = vld [vmem:[%s3415_s17 + $0x6c] ss:$52 sps:$4 sm:$0xff]   ;;  %v3099_v42 = vld [vmem:[%s3415_s17 + $0x68] ss:$52 sps:$4 sm:$0xff]   ;;  %v3111_v52 = vld [vmem:[%s3415_s17 + $0xd0] ss:$52 sps:$4 sm:$0xff]  }
  0x1b   : > { %1627 = vmatprep.mubr.bf16.mxu1 %v3090_v35  ;;  %v3106_v49 = vld [vmem:[%s3415_s17 + $0xd4] ss:$52 sps:$4 sm:$0xff]   ;;  %v3108_v50 = vld [vmem:[%s3415_s17 + $0xdc] ss:$52 sps:$4 sm:$0xff]   ;;  %v3112_v53 = vld [vmem:[%s3415_s17 + $0xd8] ss:$52 sps:$4 sm:$0xff]  }
  0x1c   : > { %2704 = vmatpush3.bf16.msra.mxu0 %v3075_v22  ;;  %v3117_v58 = vld [vmem:[%s3415_s17 + $0x13c] ss:$52 sps:$4 sm:$0xff]   ;;  %v3119_v59 = vld [vmem:[%s3415_s17 + $0x144] ss:$52 sps:$4 sm:$0xff]   ;;  %v3122_v61 = vld [vmem:[%s3415_s17 + $0x140] ss:$52 sps:$4 sm:$0xff]  }
  0x1d   : > { %2756 = vmatpush3.bf16.msra.mxu1 %v3076_v23  ;;  %2705 = vmatprep.subr.bf16.mxu0 %v3077_v24  ;;  %v3121_v60 = vld [vmem:[%s3415_s17 + $0x138] ss:$52 sps:$4 sm:$0xff]   ;;  %v3133_v6 = vld [vmem:[%s3415_s17 + $0x1a0] ss:$52 sps:$4 sm:$0xff]   ;;  %v3134_v7 = vld [vmem:[%s3415_s17 + $0x1a8] ss:$52 sps:$4 sm:$0xff]  }
  0x1e   : > { %2757 = vmatprep.subr.bf16.mxu1 %v3078_v25  ;;  %v3128_v3 = vld [vmem:[%s3415_s17 + $0x1a4] ss:$52 sps:$4 sm:$0xff]   ;;  %v3130_v4 = vld [vmem:[%s3415_s17 + $0x1ac] ss:$52 sps:$4 sm:$0xff]   ;;  %v3140_v13 = vld [vmem:[%s3918_s1 + $0x1b0] sm:$0xff]  }
  0x1f   : > { %v3139_v12 = vld [vmem:[%s3918_s1 + $0x128] sm:$0xff]   ;;  %v3146_v17 = vld [vmem:[%s3415_s17 + $0x210] ss:$52 sps:$4 sm:$0xff]   ;;  %v3149_v20 = vld [vmem:[%s3918_s1 + $0x1f8] sm:$0xff]  }
  0x20   : > { %2706 = vmatpush3.bf16.msra.mxu0 %v3079_v26  ;;  %v3141_v14 = vld [vmem:[%s3415_s17 + $0x20c] ss:$52 sps:$4 sm:$0xff]   ;;  %v3143_v15 = vld [vmem:[%s3415_s17 + $0x214] ss:$52 sps:$4 sm:$0xff]   ;;  %v3150_v21 = vld [vmem:[%s3918_s1 + $0x1b8] sm:$0xff]  }
  0x21   : > { %2758 = vmatpush3.bf16.msra.mxu1 %v3080_v27  ;;  %2707 = vmatprep.subr.bf16.mxu0 %v3081_v28  ;;  %v3145_v16 = vld [vmem:[%s3415_s17 + $0x208] ss:$52 sps:$4 sm:$0xff]   ;;  %v3147_v18 = vld [vmem:[%s3918_s1 + $0x170] sm:$0xff]   ;;  %v3156_v26 = vld [vmem:[%s3415_s17 + $0x18] ss:$52 sps:$4 sm:$0xff]  }
  0x22   : > { %2759 = vmatprep.subr.bf16.mxu1 %v3082_v29  ;;  %v3148_v19 = vld [vmem:[%s3918_s1 + $0x130] sm:$0xff]   ;;  %v3151_v22 = vld [vmem:[%s3918_s1 + $0x178] sm:$0xff]   ;;  %v3159_v28 = vld [vmem:[%s3918_s1 + $0x2c0] sm:$0xff]  }
  0x23   : > { %v3152_v23 = vld [vmem:[%s3918_s1 + $0x138] sm:$0xff]   ;;  %v3153_v24 = vld [vmem:[%s3415_s17 + $0x10] ss:$52 sps:$4 sm:$0xff]   ;;  %v3155_v25 = vld [vmem:[%s3415_s17 + $0x14] ss:$52 sps:$4 sm:$0xff]  }
  0x24   : > { %2708 = vmatpush3.bf16.msra.mxu0 %v3083_v30  ;;  %v3158_v27 = vld [vmem:[%s3415_s17 + $0x1c] ss:$52 sps:$4 sm:$0xff]   ;;  %v3160_v29 = vld [vmem:[%s3918_s1 + $0x280] sm:$0xff]   ;;  %v3161_v30 = vld [vmem:[%s3918_s1 + $0x2c8] sm:$0xff]  }
  0x25   : > { %2760 = vmatpush3.bf16.msra.mxu1 %v3084_v31  ;;  %2797 = vmatprep.subr.bf16.mxu0 %v3101_v44  ;;  %v3162_v31 = vld [vmem:[%s3415_s17 + $0x7c] ss:$52 sps:$4 sm:$0xff]   ;;  %v3166_v33 = vld [vmem:[%s3918_s1 + $0x288] sm:$0xff]   ;;  %v3168_v35 = vld [vmem:[%s3415_s17 + $0x80] ss:$52 sps:$4 sm:$0xff]  }
  0x26   : > { %2849 = vmatprep.subr.bf16.mxu1 %v3091_v36  ;;  %v3169_v36 = vld [vmem:[%s3918_s1 + $0x240] sm:$0xff]  }
  0x27   : > { %1547 = vmatmul.mubr.bf16.vlgmr.msra.gmra.mrb[0].mxu0 %v3085_v32  ;;  %v3164_v32 = vld [vmem:[%s3415_s17 + $0x84] ss:$52 sps:$4 sm:$0xff]   ;;  %v3179_v44 = vld [vmem:[%s3415_s17 + $0xe0] ss:$52 sps:$4 sm:$0xff]  }
  0x28   : > { %1628 = vmatmul.mubr.bf16.vlgmr.msra.gmra.mrb[0].mxu1 %v3088_v34  ;;  %1554 = vmatprep.mubr.bf16.mxu0 %v3094_v39  ;;  %v3167_v34 = vld [vmem:[%s3415_s17 + $0x78] ss:$52 sps:$4 sm:$0xff]   ;;  %v3172_v39 = vld [vmem:[%s3918_s1 + $0x290] sm:$0xff]  }
  0x29   : > { %2850 = vmatpush3.bf16.msra.mxu1 %v3092_v37  ;;  %1635 = vmatprep.mubr.bf16.mxu1 %v3096_v40  ;;  %v3170_v37 = vld [vmem:[%s3918_s1 + $0x200] sm:$0xff]   ;;  %v3173_v40 = vld [vmem:[%s3918_s1 + $0x248] sm:$0xff]  }
  0x2a   : > { %2851 = vmatprep.subr.bf16.mxu1 %v3093_v38  ;;  %2798 = vmatpush3.bf16.msra.mxu0 %v3102_v45  ;;  %v3171_v38 = vld [vmem:[%s3918_s1 + $0x2d0] sm:$0xff]   ;;  %v3180_v45 = vld [vmem:[%s3415_s17 + $0xe8] ss:$52 sps:$4 sm:$0xff]  }
  0x2b   : > { %2799 = vmatprep.subr.bf16.mxu0 %v3105_v48  ;;  %v3183_v48 = vld [vmem:[%s3918_s1 + $0x250] sm:$0xff]  }
  0x2d   : > { %2852 = vmatpush3.bf16.msra.mxu1 %v3098_v41  ;;  %v3174_v41 = vld [vmem:[%s3415_s17 + $0xe4] ss:$52 sps:$4 sm:$0xff]  }
  0x2e   : > { %2853 = vmatprep.subr.bf16.mxu1 %v3103_v46  ;;  %2800 = vmatpush3.bf16.msra.mxu0 %v3110_v51  ;;  %v3181_v46 = vld [vmem:[%s3918_s1 + $0x2d8] sm:$0xff]   ;;  %v3187_v51 = vld [vmem:[%s3415_s17 + $0x154] ss:$52 sps:$4 sm:$0xff]  }
  0x2f   : > { %1555 = vmatmul.mubr.bf16.gmra.mrb[4].mxu0 %v3099_v42  ;;  %2801 = vmatprep.subr.bf16.mxu0 %v3115_v56  ;;  %v3176_v42 = vld [vmem:[%s3415_s17 + $0xec] ss:$52 sps:$4 sm:$0xff]   ;;  %v3193_v56 = vld [vmem:[%s3918_s1 + $0x258] sm:$0xff]  }
  0x30   : > { %1636 = vmatmul.mubr.bf16.gmra.mrb[4].mxu1 %v3100_v43  ;;  %1562 = vmatprep.mubr.bf16.mxu0 %v3106_v49  ;;  %v3178_v43 = vld [vmem:[%s3918_s1 + $0x208] sm:$0xff]   ;;  %v3184_v49 = vld [vmem:[%s3918_s1 + $0x210] sm:$0xff]  }
  0x31   : > { %2854 = vmatpush3.bf16.msra.mxu1 %v3104_v47  ;;  %1643 = vmatprep.mubr.bf16.mxu1 %v3108_v50  ;;  %v3182_v47 = vld [vmem:[%s3918_s1 + $0x298] sm:$0xff]   ;;  %v3185_v50 = vld [vmem:[%s3415_s17 + $0x14c] ss:$52 sps:$4 sm:$0xff]  }
  0x32   : > { %2855 = vmatprep.subr.bf16.mxu1 %v3113_v54  ;;  %2802 = vmatpush3.bf16.msra.mxu0 %v3116_v57  ;;  %v3191_v54 = vld [vmem:[%s3918_s1 + $0x2e0] sm:$0xff]   ;;  %v3194_v57 = vld [vmem:[%s3918_s1 + $0x218] sm:$0xff]  }
  0x33   : > { %2803 = vmatprep.subr.bf16.mxu0 %v3125_v0  ;;  %v3203_v0 = vld [vmem:[%s3918_s1 + $0x260] sm:$0xff]  }
  0x35   : > { %2856 = vmatpush3.bf16.msra.mxu1 %v3114_v55  ;;  %v3192_v55 = vld [vmem:[%s3918_s1 + $0x2a0] sm:$0xff]  }
  0x36   : > { %2857 = vmatprep.subr.bf16.mxu1 %v3123_v62  ;;  %2804 = vmatpush3.bf16.msra.mxu0 %v3126_v1  ;;  %v3201_v62 = vld [vmem:[%s3415_s17 + $0x1b0] ss:$52 sps:$4 sm:$0xff]  }
  0x37   : > { %1563 = vmatmul.mubr.bf16.gmra.mrb[8].mxu0 %v3111_v52  ;;  %2805 = vmatprep.subr.bf16.mxu0 %v3135_v8  ;;  %v3189_v52 = vld [vmem:[%s3415_s17 + $0x148] ss:$52 sps:$4 sm:$0xff]   ;;  %v3204_v1 = vld [vmem:[%s3918_s1 + $0x220] sm:$0xff]   ;;  %v3213_v8 = vld [vmem:[%s3415_s17 + $0x218] ss:$52 sps:$4 sm:$0xff]  }
  0x38   : > { %1644 = vmatmul.mubr.bf16.gmra.mrb[8].mxu1 %v3112_v53  ;;  %1570 = vmatprep.mubr.bf16.mxu0 %v3117_v58  ;;  %v3190_v53 = vld [vmem:[%s3415_s17 + $0x150] ss:$52 sps:$4 sm:$0xff]   ;;  %v3195_v58 = vld [vmem:[%s3918_s1 + $0x2e8] sm:$0xff]  }
  0x39   : > { %1651 = vmatprep.mubr.bf16.mxu1 %v3119_v59  ;;  %2858 = vmatpush3.bf16.msra.mxu1 %v3124_v63  ;;  %v3196_v59 = vld [vmem:[%s3415_s17 + $0x1b4] ss:$52 sps:$4 sm:$0xff]   ;;  %v3202_v63 = vld [vmem:[%s3415_s17 + $0x1b8] ss:$52 sps:$4 sm:$0xff]  }
  0x3a   : > { %2859 = vmatprep.subr.bf16.mxu1 %v3127_v2  ;;  %2806 = vmatpush3.bf16.msra.mxu0 %v3136_v9  ;;  %v3205_v2 = vld [vmem:[%s3918_s1 + $0x268] sm:$0xff]   ;;  %v3214_v9 = vld [vmem:[%s3415_s17 + $0x220] ss:$52 sps:$4 sm:$0xff]  }
  0x3b   : > { %2807 = vmatprep.subr.bf16.mxu0 %v3137_v10  ;;  %v3215_v10 = vld [vmem:[%s3918_s1 + $0x270] sm:$0xff]  }
  0x3d   : > { %2860 = vmatpush3.bf16.msra.mxu1 %v3132_v5  ;;  %v3208_v5 = vld [vmem:[%s3918_s1 + $0x2b0] sm:$0xff]  }
  0x3e   : > { %2861 = vmatprep.subr.bf16.mxu1 %v3138_v11  ;;  %2808 = vmatpush3.bf16.msra.mxu0 %v3139_v12  ;;  %v3216_v11 = vld [vmem:[%s3918_s1 + $0x230] sm:$0xff]   ;;  %v3217_v12 = vld [vmem:[%s3918_s1 + $0x2f8] sm:$0xff]  }
  0x3f   : > { %1571 = vmatmul.mubr.bf16.gmra.mrb[12].mxu0 %v3121_v60  ;;  %2809 = vmatprep.subr.bf16.mxu0 %v3147_v18  ;;  %v3198_v60 = vld [vmem:[%s3415_s17 + $0x1bc] ss:$52 sps:$4 sm:$0xff]  }
  0x40   : > { %1652 = vmatmul.mubr.bf16.gmra.mrb[12].mxu1 %v3122_v61  ;;  %1578 = vmatprep.mubr.bf16.mxu0 %v3128_v3  ;;  %v3200_v61 = vld [vmem:[%s3918_s1 + $0x2a8] sm:$0xff]   ;;  %v3206_v3 = vld [vmem:[%s3918_s1 + $0x2f0] sm:$0xff]  }
  0x41   : > { %1659 = vmatprep.mubr.bf16.mxu1 %v3130_v4  ;;  %2862 = vmatpush3.bf16.msra.mxu1 %v3140_v13  ;;  %v3207_v4 = vld [vmem:[%s3918_s1 + $0x228] sm:$0xff]   ;;  %v3218_v13 = vld [vmem:[%s3918_s1 + $0x2b8] sm:$0xff]  }
  0x42   : > { %2810 = vmatpush3.bf16.msra.mxu0 %v3148_v19  ;;  %2863 = vmatprep.subr.bf16.mxu1 %v3149_v20  ;;  %v3224_v18 = vld [vmem:[%s3415_s17 + $0x28] ss:$52 sps:$4 sm:$0xff]   ;;  %v3226_v19 = vld [vmem:[%s3415_s17 + $0x2c] ss:$52 sps:$4 sm:$0xff]  }
  0x43   : > { %2811 = vmatprep.subr.bf16.mxu0 %v3151_v22  ;;  %v3227_v20 = vld [vmem:[%s3918_s1 + $0x300] sm:$0xff]   ;;  %v3230_v22 = vld [vmem:[%s3415_s17 + $0x94] ss:$52 sps:$4 sm:$0xff]  }
  0x45   : > { %2864 = vmatpush3.bf16.msra.mxu1 %v3150_v21  ;;  %v3228_v21 = vld [vmem:[%s3415_s17 + $0x8c] ss:$52 sps:$4 sm:$0xff]  }
  0x46   : > { %2812 = vmatpush3.bf16.msra.mxu0 %v3152_v23  ;;  %2953 = vmatprep.subr.bf16.mxu1 %v3159_v28  ;;  %v3234_v23 = vld [vmem:[%s3918_s1 + $0x308] sm:$0xff]   ;;  %v3247_v28 = vld [vmem:[%s3918_s1 + $0x310] sm:$0xff]  }
  0x47   : > { %1579 = vmatmul.mubr.bf16.gmra.mrb[16].mxu0 %v3133_v6  ;;  %2901 = vmatprep.subr.bf16.mxu0 %v3169_v36  ;;  %v3209_v6 = vld [vmem:[%s3415_s17 + $0x21c] ss:$52 sps:$4 sm:$0xff]   ;;  %v3248_v36 = vld [vmem:[%s3415_s17 + $0x1c4] ss:$52 sps:$4 sm:$0xff]  }
  0x48   : > { %1660 = vmatmul.mubr.bf16.gmra.mrb[16].mxu1 %v3134_v7  ;;  %1586 = vmatprep.mubr.bf16.mxu0 %v3141_v14  ;;  %v3211_v7 = vld [vmem:[%s3415_s17 + $0x224] ss:$52 sps:$4 sm:$0xff]  }
  0x49   : > { %1667 = vmatprep.mubr.bf16.mxu1 %v3143_v15  ;;  %v3219_v14 = vld [vmem:[%s3918_s1 + $0x278] sm:$0xff]  }
  0x4a   : > { %v3220_v15 = vld [vmem:[%s3918_s1 + $0x238] sm:$0xff]  }
  0x4f   : > { %1587 = vmatmul.mubr.bf16.gmra.mrb[20].mxu0 %v3145_v16  ;;  %v3221_v16 = vld [vmem:[%s3415_s17 + $0x20] ss:$52 sps:$4 sm:$0xff]  }
  0x50   : > { %1668 = vmatmul.mubr.bf16.gmra.mrb[20].mxu1 %v3146_v17  ;;  %1708 = vmatprep.mubr.bf16.mxu0 %v3155_v25  ;;  %v3223_v17 = vld [vmem:[%s3415_s17 + $0x24] ss:$52 sps:$4 sm:$0xff]  }
  0x51   : > { %1789 = vmatprep.mubr.bf16.mxu1 %v3158_v27  ;;  %v3233_v25 = vld [vmem:[%s3415_s17 + $0x90] ss:$52 sps:$4 sm:$0xff]  }
  0x52   : > { %v3237_v27 = vld [vmem:[%s3415_s17 + $0xfc] ss:$52 sps:$4 sm:$0xff]  }
  0x57   : > { %1709 = vmatmul.mubr.bf16.vlgmr.msra.gmra.mrb[24].mxu0 %v3153_v24  ;;  %v3232_v24 = vld [vmem:[%s3415_s17 + $0x88] ss:$52 sps:$4 sm:$0xff]  }
  0x58   : > { %1790 = vmatmul.mubr.bf16.vlgmr.msra.gmra.mrb[24].mxu1 %v3156_v26  ;;  %1716 = vmatprep.mubr.bf16.mxu0 %v3162_v31  ;;  %v3235_v26 = vld [vmem:[%s3415_s17 + $0xf4] ss:$52 sps:$4 sm:$0xff]   ;;  %v3241_v31 = vld [vmem:[%s3415_s17 + $0x15c] ss:$52 sps:$4 sm:$0xff]  }
  0x59   : > { %2954 = vmatpush3.bf16.msra.mxu1 %v3160_v29  ;;  %1797 = vmatprep.mubr.bf16.mxu1 %v3164_v32  ;;  %v3239_v29 = vld [vmem:[%s3415_s17 + $0xf0] ss:$52 sps:$4 sm:$0xff]   ;;  %v3254_v32 = vld [vmem:[%s3918_s1 + $0x318] sm:$0xff]  }
  0x5a   : > { %2955 = vmatprep.subr.bf16.mxu1 %v3161_v30  ;;  %2902 = vmatpush3.bf16.msra.mxu0 %v3170_v37  ;;  %v3240_v30 = vld [vmem:[%s3415_s17 + $0xf8] ss:$52 sps:$4 sm:$0xff]  }
  0x5b   : > { %2903 = vmatprep.subr.bf16.mxu0 %v3173_v40  ;;  %v3250_v37 = vld [vmem:[%s3415_s17 + $0x1cc] ss:$52 sps:$4 sm:$0xff]  }
  0x5c   : > { %v3255_v40 = vld [vmem:[%s3415_s17 + $0x22c] ss:$52 sps:$4 sm:$0xff]  }
  0x5d   : > { %2956 = vmatpush3.bf16.msra.mxu1 %v3166_v33  ;;  %v3243_v33 = vld [vmem:[%s3415_s17 + $0x164] ss:$52 sps:$4 sm:$0xff]  }
  0x5e   : > { %2957 = vmatprep.subr.bf16.mxu1 %v3171_v38  ;;  %2904 = vmatpush3.bf16.msra.mxu0 %v3178_v43  ;;  %v3252_v38 = vld [vmem:[%s3415_s17 + $0x1c0] ss:$52 sps:$4 sm:$0xff]   ;;  %v3260_v43 = vld [vmem:[%s3415_s17 + $0x230] ss:$52 sps:$4 sm:$0xff]  }
  0x5f   : > { %1717 = vmatmul.mubr.bf16.gmra.mrb[28].mxu0 %v3167_v34  ;;  %2905 = vmatprep.subr.bf16.mxu0 %v3183_v48  ;;  %v3245_v34 = vld [vmem:[%s3415_s17 + $0x158] ss:$52 sps:$4 sm:$0xff]   ;;  %v3265_v48 = vld [vmem:[%s3415_s17 + $0x1d0] ss:$52 sps:$4 sm:$0xff]  }
  0x60   : > { %1798 = vmatmul.mubr.bf16.gmra.mrb[28].mxu1 %v3168_v35  ;;  %1724 = vmatprep.mubr.bf16.mxu0 %v3174_v41  ;;  %v3246_v35 = vld [vmem:[%s3415_s17 + $0x160] ss:$52 sps:$4 sm:$0xff]  }
  0x61   : > { %2958 = vmatpush3.bf16.msra.mxu1 %v3172_v39  ;;  %1805 = vmatprep.mubr.bf16.mxu1 %v3176_v42  ;;  %v3253_v39 = vld [vmem:[%s3415_s17 + $0x1c8] ss:$52 sps:$4 sm:$0xff]  }
  0x62   : > { %2959 = vmatprep.subr.bf16.mxu1 %v3181_v46  ;;  %2906 = vmatpush3.bf16.msra.mxu0 %v3184_v49  ;;  %v3257_v41 = vld [vmem:[%s3415_s17 + $0x234] ss:$52 sps:$4 sm:$0xff]   ;;  %v3263_v46 = vld [vmem:[%s3415_s17 + $0x98] ss:$52 sps:$4 sm:$0xff]  }
  0x63   : > { %2907 = vmatprep.subr.bf16.mxu0 %v3193_v56  ;;  %v3259_v42 = vld [vmem:[%s3415_s17 + $0x228] ss:$52 sps:$4 sm:$0xff]   ;;  %v3266_v49 = vld [vmem:[%s3415_s17 + $0x238] ss:$52 sps:$4 sm:$0xff]  }
  0x65   : > { %2960 = vmatpush3.bf16.msra.mxu1 %v3182_v47  ;;  %v3264_v47 = vld [vmem:[%s3415_s17 + $0x168] ss:$52 sps:$4 sm:$0xff]  }
  0x66   : > { %2961 = vmatprep.subr.bf16.mxu1 %v3191_v54  ;;  %2908 = vmatpush3.bf16.msra.mxu0 %v3194_v57 }
  0x67   : > { %1725 = vmatmul.mubr.bf16.gmra.mrb[32].mxu0 %v3179_v44  ;;  %2909 = vmatprep.subr.bf16.mxu0 %v3203_v0  ;;  %v3261_v44 = vld [vmem:[%s3415_s17 + $0x30] ss:$52 sps:$4 sm:$0xff]  }
  0x68   : > { %1806 = vmatmul.mubr.bf16.gmra.mrb[32].mxu1 %v3180_v45  ;;  %1732 = vmatprep.mubr.bf16.mxu0 %v3185_v50  ;;  %v3262_v45 = vld [vmem:[%s3415_s17 + $0x100] ss:$52 sps:$4 sm:$0xff]   ;;  %s2431_s17 = sshll.u32 %s3923_s26, 2 }
  0x69   : > { %1813 = vmatprep.mubr.bf16.mxu1 %v3187_v51  ;;  %2962 = vmatpush3.bf16.msra.mxu1 %v3192_v55  ;;  %s209_s11 = scalar_lea.vmem %s3920_s3, %s2431_s17 }
  0x6a   : > { %2963 = vmatprep.subr.bf16.mxu1 %v3195_v58  ;;  %2910 = vmatpush3.bf16.msra.mxu0 %v3204_v1 }
  0x6b   : > { %2911 = vmatprep.subr.bf16.mxu0 %v3205_v2 }
  0x6d   : > { %2964 = vmatpush3.bf16.msra.mxu1 %v3200_v61 }
  0x6e   : > { %2965 = vmatprep.subr.bf16.mxu1 %v3206_v3  ;;  %2912 = vmatpush3.bf16.msra.mxu0 %v3207_v4 }
  0x6f   : > { %1733 = vmatmul.mubr.bf16.gmra.mrb[36].mxu0 %v3189_v52  ;;  %2913 = vmatprep.subr.bf16.mxu0 %v3215_v10  ;;  %v3708_v52 = vld [vmem:[%s3919_s2] ss:$0 sm:$0xff] }
  0x70   : > { %1814 = vmatmul.mubr.bf16.gmra.mrb[36].mxu1 %v3190_v53  ;;  %1740 = vmatprep.mubr.bf16.mxu0 %v3196_v59 }
  0x71   : > { %1821 = vmatprep.mubr.bf16.mxu1 %v3198_v60  ;;  %2966 = vmatpush3.bf16.msra.mxu1 %v3208_v5 }
  0x72   : > { %2914 = vmatpush3.bf16.msra.mxu0 %v3216_v11  ;;  %2967 = vmatprep.subr.bf16.mxu1 %v3217_v12 }
  0x73   : > { %2915 = vmatprep.subr.bf16.mxu0 %v3219_v14 }
  0x75   : > { %2968 = vmatpush3.bf16.msra.mxu1 %v3218_v13 }
  0x76   : > { %2916 = vmatpush3.bf16.msra.mxu0 %v3220_v15  ;;  %3035 = vmatprep.subr.bf16.mxu1 %v3227_v20 }
  0x77   : > { %1741 = vmatmul.mubr.bf16.gmra.mrb[40].mxu0 %v3201_v62  ;;  %3015 = vmatprep.subr.bf16.mxu0 %v3227_v20 }
  0x78   : > { %1822 = vmatmul.mubr.bf16.gmra.mrb[40].mxu1 %v3202_v63  ;;  %1748 = vmatprep.mubr.bf16.mxu0 %v3209_v6 }
  0x79   : > { %1829 = vmatprep.mubr.bf16.mxu1 %v3211_v7 }
  0x7f   : > { %1749 = vmatmul.mubr.bf16.gmra.mrb[44].mxu0 %v3213_v8 }
  0x80   : > { %1830 = vmatmul.mubr.bf16.gmra.mrb[44].mxu1 %v3214_v9  ;;  %1870 = vmatprep.mubr.bf16.mxu0 %v3223_v17 }
  0x81   : > { %1951 = vmatprep.mubr.bf16.mxu1 %v3226_v19 }
  0x87   : > { %1871 = vmatmul.mubr.bf16.vlgmr.msra.gmra.mrb[48].mxu0 %v3221_v16 }
  0x88   : > { %1952 = vmatmul.mubr.bf16.vlgmr.msra.gmra.mrb[48].mxu1 %v3224_v18  ;;  %1878 = vmatprep.mubr.bf16.mxu0 %v3228_v21 }
  0x89   : > { %3039 = vmatpush3.bf16.msra.mxu1 %v3227_v20  ;;  %1959 = vmatprep.mubr.bf16.mxu1 %v3230_v22 }
  0x8a   : > { %3016 = vmatpush3.bf16.msra.mxu0 %v3227_v20  ;;  %3036 = vmatprep.subr.bf16.mxu1 %v3234_v23 }
  0x8b   : > { %3017 = vmatprep.subr.bf16.mxu0 %v3234_v23 }
  0x8d   : > { %3040 = vmatpush3.bf16.msra.mxu1 %v3234_v23 }
  0x8e   : > { %3018 = vmatpush3.bf16.msra.mxu0 %v3234_v23  ;;  %3037 = vmatprep.subr.bf16.mxu1 %v3247_v28 }
  0x8f   : > { %1879 = vmatmul.mubr.bf16.gmra.mrb[52].mxu0 %v3232_v24  ;;  %3019 = vmatprep.subr.bf16.mxu0 %v3247_v28 }
  0x90   : > { %1960 = vmatmul.mubr.bf16.gmra.mrb[52].mxu1 %v3233_v25  ;;  %1886 = vmatprep.mubr.bf16.mxu0 %v3235_v26 }
  0x91   : > { %1967 = vmatprep.mubr.bf16.mxu1 %v3237_v27  ;;  %3041 = vmatpush3.bf16.msra.mxu1 %v3247_v28 }
  0x92   : > { %3020 = vmatpush3.bf16.msra.mxu0 %v3247_v28  ;;  %3038 = vmatprep.subr.bf16.mxu1 %v3254_v32 }
  0x93   : > { %3021 = vmatprep.subr.bf16.mxu0 %v3254_v32 }
  0x95   : > { %3042 = vmatpush3.bf16.msra.mxu1 %v3254_v32 }
  0x96   : > { %3022 = vmatpush3.bf16.msra.mxu0 %v3254_v32 }
  0x97   : > { %1887 = vmatmul.mubr.bf16.gmra.mrb[56].mxu0 %v3239_v29 }
  0x98   : > { %1968 = vmatmul.mubr.bf16.gmra.mrb[56].mxu1 %v3240_v30  ;;  %1894 = vmatprep.mubr.bf16.mxu0 %v3241_v31 }
  0x99   : > { %1975 = vmatprep.mubr.bf16.mxu1 %v3243_v33 }
  0x9f   : > { %1895 = vmatmul.mubr.bf16.gmra.mrb[60].mxu0 %v3245_v34 }
  0xa0   : > { %1976 = vmatmul.mubr.bf16.gmra.mrb[60].mxu1 %v3246_v35  ;;  %1902 = vmatprep.mubr.bf16.mxu0 %v3248_v36 }
  0xa1   : > { %1983 = vmatprep.mubr.bf16.mxu1 %v3250_v37 }
  0xa7   : > { %1903 = vmatmul.mubr.bf16.gmra.mrb[64].mxu0 %v3252_v38 }
  0xa8   : > { %1984 = vmatmul.mubr.bf16.gmra.mrb[64].mxu1 %v3253_v39  ;;  %1910 = vmatprep.mubr.bf16.mxu0 %v3255_v40 }
  0xa9   : > { %1991 = vmatprep.mubr.bf16.mxu1 %v3257_v41 }
  0xaf   : > { %1911 = vmatmul.mubr.bf16.gmra.mrb[68].mxu0 %v3259_v42 }
  0xb0   : > { %1992 = vmatmul.mubr.bf16.gmra.mrb[68].mxu1 %v3260_v43  ;;  %3023 = vmatprep.mubr.msk.bf16.mxu0 %vm1495_vm0, %v3261_v44 }
  0xb1   : > { %3027 = vmatprep.mubr.msk.bf16.mxu1 %vm1495_vm0, %v3262_v45 }
  0xb7   : > { %3024 = vmatmul.mubr.msk.bf16.vlgmr.msra.gmra.mrb[72].mxu0 %vm1495_vm0, %v3263_v46 }
  0xb8   : > { %3028 = vmatmul.mubr.msk.bf16.vlgmr.msra.gmra.mrb[72].mxu1 %vm1495_vm0, %v3264_v47 }
  0xb9   : > { %3031 = vmatprep.mubr.msk.bf16.mxu1 %vm1495_vm0, %v3265_v48 }
  0xc0   : > { %3032 = vmatmul.mubr.msk.bf16.gmra.mrb[76].mxu1 %vm1495_vm0, %v3266_v49 }
  0xfa   : > { %v2709_v50 = vpop.f32.mrb[0].mxu0 }
  0xfb   : > { %v2761_v51 = vpop.f32.mrb[0].mxu1  ;;  %v2710_v53 = vpop.f32.mrb[1].mxu0 }
  0xfc   : > { %v2711_v54 = vadd.f32 %v2710_v53, %v2709_v50  ;;  %v2762_v55 = vpop.f32.mrb[1].mxu1  ;;  %v2712_v56 = vpop.f32.mrb[2].mxu0 }
  0xfd   : > { %v2763_v57 = vadd.f32 %v2762_v55, %v2761_v51  ;;  %v2764_v58 = vpop.f32.mrb[2].mxu1  ;;  %v2713_v59 = vpop.f32.mrb[3].mxu0 }
  0xfe   : > { %v1549_v60 = vadd.f32 %v2711_v54, %v3708_v52  ;;  %v2714_v61 = vadd.f32 %v2713_v59, %v2712_v56  ;;  %v2765_v62 = vpop.f32.mrb[3].mxu1 }
  0xff   : > { %v2766_v63 = vadd.f32 %v2765_v62, %v2764_v58 }
 0x100   : > { %v3711_v0 = vadd.f32 %v2763_v57, %v1549_v60  ;;  %v1552_v1 = vadd.f32 %v2714_v61, %v3708_v52 }
 0x102   : > { %v3714_v2 = vadd.f32 %v2766_v63, %v1552_v1  ;;  %v2715_v3 = vpop.f32.mrb[4].mxu0 }
 0x103   : > { %v2767_v4 = vpop.f32.mrb[4].mxu1  ;;  %v2716_v5 = vpop.f32.mrb[5].mxu0 }
 0x104   : > { %v2717_v6 = vadd.f32 %v2716_v5, %v2715_v3  ;;  %v2768_v7 = vpop.f32.mrb[5].mxu1  ;;  %v2718_v8 = vpop.f32.mrb[6].mxu0 }
 0x105   : > { %v2769_v9 = vadd.f32 %v2768_v7, %v2767_v4  ;;  %v2770_v10 = vpop.f32.mrb[6].mxu1  ;;  %v2719_v11 = vpop.f32.mrb[7].mxu0 }
 0x106   : > { %v1557_v12 = vadd.f32 %v2717_v6, %v3708_v52  ;;  %v2720_v13 = vadd.f32 %v2719_v11, %v2718_v8  ;;  %v2771_v14 = vpop.f32.mrb[7].mxu1 }
 0x107   : > { %v2772_v15 = vadd.f32 %v2771_v14, %v2770_v10 }
 0x108   : > { %v3717_v16 = vadd.f32 %v2769_v9, %v1557_v12  ;;  %v1560_v17 = vadd.f32 %v2720_v13, %v3708_v52 }
 0x10a   : > { %v3720_v18 = vadd.f32 %v2772_v15, %v1560_v17  ;;  %v2721_v19 = vpop.f32.mrb[8].mxu0 }
 0x10b   : > { %v2773_v20 = vpop.f32.mrb[8].mxu1  ;;  %v2722_v21 = vpop.f32.mrb[9].mxu0 }
 0x10c   : > { %v2723_v22 = vadd.f32 %v2722_v21, %v2721_v19  ;;  %v2774_v23 = vpop.f32.mrb[9].mxu1  ;;  %v2724_v24 = vpop.f32.mrb[10].mxu0 }
 0x10d   : > { %v2775_v25 = vadd.f32 %v2774_v23, %v2773_v20  ;;  %v2776_v26 = vpop.f32.mrb[10].mxu1  ;;  %v2725_v27 = vpop.f32.mrb[11].mxu0 }
 0x10e   : > { %v1565_v28 = vadd.f32 %v2723_v22, %v3708_v52  ;;  %v2726_v29 = vadd.f32 %v2725_v27, %v2724_v24  ;;  %v2777_v30 = vpop.f32.mrb[11].mxu1 }
 0x10f   : > { %v2778_v31 = vadd.f32 %v2777_v30, %v2776_v26 }
 0x110   : > { %v3723_v32 = vadd.f32 %v2775_v25, %v1565_v28  ;;  %v1568_v33 = vadd.f32 %v2726_v29, %v3708_v52 }
 0x112   : > { %v3726_v34 = vadd.f32 %v2778_v31, %v1568_v33  ;;  %v2727_v35 = vpop.f32.mrb[12].mxu0 }
 0x113   : > { %v2779_v36 = vpop.f32.mrb[12].mxu1  ;;  %v2728_v37 = vpop.f32.mrb[13].mxu0 }
 0x114   : > { %v2729_v38 = vadd.f32 %v2728_v37, %v2727_v35  ;;  %v2780_v39 = vpop.f32.mrb[13].mxu1  ;;  %v2730_v40 = vpop.f32.mrb[14].mxu0 }
 0x115   : > { %v2781_v41 = vadd.f32 %v2780_v39, %v2779_v36  ;;  %v2782_v42 = vpop.f32.mrb[14].mxu1  ;;  %v2731_v43 = vpop.f32.mrb[15].mxu0 }
 0x116   : > { %v1573_v44 = vadd.f32 %v2729_v38, %v3708_v52  ;;  %v2732_v45 = vadd.f32 %v2731_v43, %v2730_v40  ;;  %v2783_v46 = vpop.f32.mrb[15].mxu1 }
 0x117   : > { %v2784_v47 = vadd.f32 %v2783_v46, %v2782_v42 }
 0x118   : > { %v3729_v48 = vadd.f32 %v2781_v41, %v1573_v44  ;;  %v1576_v49 = vadd.f32 %v2732_v45, %v3708_v52 }
 0x11a   : > { %v3732_v50 = vadd.f32 %v2784_v47, %v1576_v49  ;;  %v2733_v51 = vpop.f32.mrb[16].mxu0 }
 0x11b   : > { %v2785_v53 = vpop.f32.mrb[16].mxu1  ;;  %v2734_v54 = vpop.f32.mrb[17].mxu0 }
 0x11c   : > { %v2735_v55 = vadd.f32 %v2734_v54, %v2733_v51  ;;  %v2786_v56 = vpop.f32.mrb[17].mxu1  ;;  %v2736_v57 = vpop.f32.mrb[18].mxu0 }
 0x11d   : > { %v2787_v58 = vadd.f32 %v2786_v56, %v2785_v53  ;;  %v2788_v59 = vpop.f32.mrb[18].mxu1  ;;  %v2737_v60 = vpop.f32.mrb[19].mxu0 }
 0x11e   : > { %v1581_v61 = vadd.f32 %v2735_v55, %v3708_v52  ;;  %v2738_v62 = vadd.f32 %v2737_v60, %v2736_v57  ;;  %v2789_v63 = vpop.f32.mrb[19].mxu1 }
 0x11f   : > { %v2790_v1 = vadd.f32 %v2789_v63, %v2788_v59 }
 0x120   : > { %v3735_v3 = vadd.f32 %v2787_v58, %v1581_v61  ;;  %v1584_v4 = vadd.f32 %v2738_v62, %v3708_v52 }
 0x122   : > { %v3738_v5 = vadd.f32 %v2790_v1, %v1584_v4  ;;  %v2739_v6 = vpop.f32.mrb[20].mxu0 }
 0x123   : > { %v2791_v7 = vpop.f32.mrb[20].mxu1  ;;  %v2740_v8 = vpop.f32.mrb[21].mxu0 }
 0x124   : > { %v2741_v9 = vadd.f32 %v2740_v8, %v2739_v6  ;;  %v2792_v10 = vpop.f32.mrb[21].mxu1  ;;  %v2742_v11 = vpop.f32.mrb[22].mxu0 }
 0x125   : > { %v2793_v12 = vadd.f32 %v2792_v10, %v2791_v7  ;;  %v2794_v13 = vpop.f32.mrb[22].mxu1  ;;  %v2743_v14 = vpop.f32.mrb[23].mxu0 }
 0x126   : > { %v1589_v15 = vadd.f32 %v2741_v9, %v3708_v52  ;;  %v2744_v17 = vadd.f32 %v2743_v14, %v2742_v11  ;;  %v2795_v19 = vpop.f32.mrb[23].mxu1 }
 0x127   : > { %v2796_v20 = vadd.f32 %v2795_v19, %v2794_v13 }
 0x128   : > { %v3741_v21 = vadd.f32 %v2793_v12, %v1589_v15  ;;  %v1592_v22 = vadd.f32 %v2744_v17, %v3708_v52 }
 0x12a   : > { %v3744_v23 = vadd.f32 %v2796_v20, %v1592_v22  ;;  %v2813_v24 = vpop.f32.mrb[24].mxu0 }
 0x12b   : > { %v2865_v25 = vpop.f32.mrb[24].mxu1  ;;  %v2814_v26 = vpop.f32.mrb[25].mxu0 }
 0x12c   : > { %v2815_v27 = vadd.f32 %v2814_v26, %v2813_v24  ;;  %v2866_v28 = vpop.f32.mrb[25].mxu1  ;;  %v2816_v29 = vpop.f32.mrb[26].mxu0 }
 0x12d   : > { %v2867_v30 = vadd.f32 %v2866_v28, %v2865_v25  ;;  %v2868_v31 = vpop.f32.mrb[26].mxu1  ;;  %v2817_v33 = vpop.f32.mrb[27].mxu0 }
 0x12e   : > { %v1711_v35 = vadd.f32 %v2815_v27, %v3711_v0  ;;  %v2818_v36 = vadd.f32 %v2817_v33, %v2816_v29  ;;  %v2869_v37 = vpop.f32.mrb[27].mxu1 }
 0x12f   : > { %v2870_v38 = vadd.f32 %v2869_v37, %v2868_v31 }
 0x130   : > { %v3747_v39 = vadd.f32 %v2867_v30, %v1711_v35  ;;  %v1714_v52 = vadd.f32 %v2818_v36, %v3714_v2 }
 0x132   : > { %v3750_v40 = vadd.f32 %v2870_v38, %v1714_v52  ;;  %v2819_v41 = vpop.f32.mrb[28].mxu0 }
 0x133   : > { %v2871_v42 = vpop.f32.mrb[28].mxu1  ;;  %v2820_v43 = vpop.f32.mrb[29].mxu0 }
 0x134   : > { %v2821_v44 = vadd.f32 %v2820_v43, %v2819_v41  ;;  %v2872_v45 = vpop.f32.mrb[29].mxu1  ;;  %v2822_v46 = vpop.f32.mrb[30].mxu0 }
 0x135   : > { %v2873_v47 = vadd.f32 %v2872_v45, %v2871_v42  ;;  %v2874_v49 = vpop.f32.mrb[30].mxu1  ;;  %v2823_v51 = vpop.f32.mrb[31].mxu0 }
 0x136   : > { %v1719_v0 = vadd.f32 %v2821_v44, %v3717_v16  ;;  %v2824_v53 = vadd.f32 %v2823_v51, %v2822_v46  ;;  %v2875_v54 = vpop.f32.mrb[31].mxu1 }
 0x137   : > { %v2876_v55 = vadd.f32 %v2875_v54, %v2874_v49 }
 0x138   : > { %v3753_v56 = vadd.f32 %v2873_v47, %v1719_v0  ;;  %v1722_v2 = vadd.f32 %v2824_v53, %v3720_v18 }
 0x13a   : > { %v3756_v57 = vadd.f32 %v2876_v55, %v1722_v2  ;;  %v2825_v58 = vpop.f32.mrb[32].mxu0 }
 0x13b   : > { %v2877_v59 = vpop.f32.mrb[32].mxu1  ;;  %v2826_v60 = vpop.f32.mrb[33].mxu0 }
 0x13c   : > { %v2827_v61 = vadd.f32 %v2826_v60, %v2825_v58  ;;  %v2878_v62 = vpop.f32.mrb[33].mxu1  ;;  %v2828_v63 = vpop.f32.mrb[34].mxu0 }
 0x13d   : > { %v2879_v1 = vadd.f32 %v2878_v62, %v2877_v59  ;;  %v2880_v4 = vpop.f32.mrb[34].mxu1  ;;  %v2829_v6 = vpop.f32.mrb[35].mxu0 }
 0x13e   : > { %v1727_v16 = vadd.f32 %v2827_v61, %v3723_v32  ;;  %v2830_v7 = vadd.f32 %v2829_v6, %v2828_v63  ;;  %v2881_v8 = vpop.f32.mrb[35].mxu1 }
 0x13f   : > { %v2882_v9 = vadd.f32 %v2881_v8, %v2880_v4 }
 0x140   : > { %v3759_v10 = vadd.f32 %v2879_v1, %v1727_v16  ;;  %v1730_v18 = vadd.f32 %v2830_v7, %v3726_v34 }
 0x142   : > { %v3762_v11 = vadd.f32 %v2882_v9, %v1730_v18  ;;  %v2831_v12 = vpop.f32.mrb[36].mxu0 }
 0x143   : > { %v2883_v13 = vpop.f32.mrb[36].mxu1  ;;  %v2832_v14 = vpop.f32.mrb[37].mxu0 }
 0x144   : > { %v2833_v15 = vadd.f32 %v2832_v14, %v2831_v12  ;;  %v2884_v17 = vpop.f32.mrb[37].mxu1  ;;  %v2834_v19 = vpop.f32.mrb[38].mxu0 }
 0x145   : > { %v2885_v20 = vadd.f32 %v2884_v17, %v2883_v13  ;;  %v2886_v22 = vpop.f32.mrb[38].mxu1  ;;  %v2835_v24 = vpop.f32.mrb[39].mxu0 }
 0x146   : > { %v1735_v32 = vadd.f32 %v2833_v15, %v3729_v48  ;;  %v2836_v25 = vadd.f32 %v2835_v24, %v2834_v19  ;;  %v2887_v26 = vpop.f32.mrb[39].mxu1 }
 0x147   : > { %v2888_v27 = vadd.f32 %v2887_v26, %v2886_v22 }
 0x148   : > { %v3765_v28 = vadd.f32 %v2885_v20, %v1735_v32  ;;  %v1738_v34 = vadd.f32 %v2836_v25, %v3732_v50 }
 0x14a   : > { %v3768_v29 = vadd.f32 %v2888_v27, %v1738_v34  ;;  %v2837_v30 = vpop.f32.mrb[40].mxu0 }
 0x14b   : > { %v2889_v31 = vpop.f32.mrb[40].mxu1  ;;  %v2838_v33 = vpop.f32.mrb[41].mxu0 }
 0x14c   : > { %v2839_v35 = vadd.f32 %v2838_v33, %v2837_v30  ;;  %v2890_v36 = vpop.f32.mrb[41].mxu1  ;;  %v2840_v37 = vpop.f32.mrb[42].mxu0 }
 0x14d   : > { %v2891_v38 = vadd.f32 %v2890_v36, %v2889_v31  ;;  %v2892_v52 = vpop.f32.mrb[42].mxu1  ;;  %v2841_v41 = vpop.f32.mrb[43].mxu0 }
 0x14e   : > { %v1743_v48 = vadd.f32 %v2839_v35, %v3735_v3  ;;  %v2842_v42 = vadd.f32 %v2841_v41, %v2840_v37  ;;  %v2893_v43 = vpop.f32.mrb[43].mxu1 }
 0x14f   : > { %v2894_v44 = vadd.f32 %v2893_v43, %v2892_v52 }
 0x150   : > { %v3771_v45 = vadd.f32 %v2891_v38, %v1743_v48  ;;  %v1746_v50 = vadd.f32 %v2842_v42, %v3738_v5 }
 0x152   : > { %v3774_v46 = vadd.f32 %v2894_v44, %v1746_v50  ;;  %v2843_v47 = vpop.f32.mrb[44].mxu0 }
 0x153   : > { %v2895_v49 = vpop.f32.mrb[44].mxu1  ;;  %v2844_v51 = vpop.f32.mrb[45].mxu0 }
 0x154   : > { %v2845_v0 = vadd.f32 %v2844_v51, %v2843_v47  ;;  %v2896_v53 = vpop.f32.mrb[45].mxu1  ;;  %v2846_v54 = vpop.f32.mrb[46].mxu0 }
 0x155   : > { %v2897_v55 = vadd.f32 %v2896_v53, %v2895_v49  ;;  %v2898_v2 = vpop.f32.mrb[46].mxu1  ;;  %v2847_v58 = vpop.f32.mrb[47].mxu0 }
 0x156   : > { %v1751_v3 = vadd.f32 %v2845_v0, %v3741_v21  ;;  %v2848_v59 = vadd.f32 %v2847_v58, %v2846_v54  ;;  %v2899_v60 = vpop.f32.mrb[47].mxu1 }
 0x157   : > { %v2900_v61 = vadd.f32 %v2899_v60, %v2898_v2 }
 0x158   : > { %v3777_v62 = vadd.f32 %v2897_v55, %v1751_v3  ;;  %v1754_v5 = vadd.f32 %v2848_v59, %v3744_v23 }
 0x15a   : > { %v3780_v63 = vadd.f32 %v2900_v61, %v1754_v5  ;;  %v2917_v1 = vpop.f32.mrb[48].mxu0 }
 0x15b   : > { %v2969_v4 = vpop.f32.mrb[48].mxu1  ;;  %v2918_v6 = vpop.f32.mrb[49].mxu0 }
 0x15c   : > { %v2919_v16 = vadd.f32 %v2918_v6, %v2917_v1  ;;  %v2970_v7 = vpop.f32.mrb[49].mxu1  ;;  %v2920_v8 = vpop.f32.mrb[50].mxu0 }
 0x15d   : > { %v2971_v9 = vadd.f32 %v2970_v7, %v2969_v4  ;;  %v2972_v18 = vpop.f32.mrb[50].mxu1  ;;  %v2921_v12 = vpop.f32.mrb[51].mxu0 }
 0x15e   : > { %v1873_v21 = vadd.f32 %v2919_v16, %v3747_v39  ;;  %v2922_v13 = vadd.f32 %v2921_v12, %v2920_v8  ;;  %v2973_v14 = vpop.f32.mrb[51].mxu1 }
 0x15f   : > { %v2974_v15 = vadd.f32 %v2973_v14, %v2972_v18 }
 0x160   : > { %v1876_v17 = vadd.f32 %v2922_v13, %v3750_v40  ;;  %v3784_v19 = vadd.f32 %v2971_v9, %v1873_v21 }
 0x162   : > { %v2923_v23 = vpop.f32.mrb[52].mxu0  ;;  %v3786_v20 = vadd.f32 %v2974_v15, %v1876_v17 }
 0x163   : > { %v2975_v22 = vpop.f32.mrb[52].mxu1  ;;  %v2924_v24 = vpop.f32.mrb[53].mxu0 }
 0x164   : > { %v2925_v32 = vadd.f32 %v2924_v24, %v2923_v23  ;;  %v2976_v25 = vpop.f32.mrb[53].mxu1  ;;  %v2926_v26 = vpop.f32.mrb[54].mxu0 }
 0x165   : > { %v2977_v27 = vadd.f32 %v2976_v25, %v2975_v22  ;;  %v2978_v34 = vpop.f32.mrb[54].mxu1  ;;  %v2927_v30 = vpop.f32.mrb[55].mxu0 }
 0x166   : > { %v1881_v39 = vadd.f32 %v2925_v32, %v3753_v56  ;;  %v2928_v31 = vadd.f32 %v2927_v30, %v2926_v26  ;;  %v2979_v33 = vpop.f32.mrb[55].mxu1 }
 0x167   : > { %v2980_v35 = vadd.f32 %v2979_v33, %v2978_v34 }
 0x168   : > { %v1884_v40 = vadd.f32 %v2928_v31, %v3756_v57  ;;  %v3790_v36 = vadd.f32 %v2977_v27, %v1881_v39 }
 0x16a   : > { %v2929_v37 = vpop.f32.mrb[56].mxu0  ;;  %v3792_v38 = vadd.f32 %v2980_v35, %v1884_v40 }
 0x16b   : > { %v2981_v52 = vpop.f32.mrb[56].mxu1  ;;  %v2930_v41 = vpop.f32.mrb[57].mxu0 }
 0x16c   : > { %v2931_v48 = vadd.f32 %v2930_v41, %v2929_v37  ;;  %v2982_v42 = vpop.f32.mrb[57].mxu1  ;;  %v2932_v43 = vpop.f32.mrb[58].mxu0 }
 0x16d   : > { %v2983_v44 = vadd.f32 %v2982_v42, %v2981_v52  ;;  %v2984_v50 = vpop.f32.mrb[58].mxu1  ;;  %v2933_v47 = vpop.f32.mrb[59].mxu0 }
 0x16e   : > { %v1889_v56 = vadd.f32 %v2931_v48, %v3759_v10  ;;  %v2934_v49 = vadd.f32 %v2933_v47, %v2932_v43  ;;  %v2985_v51 = vpop.f32.mrb[59].mxu1 }
 0x16f   : > { %v2986_v0 = vadd.f32 %v2985_v51, %v2984_v50 }
 0x170   : > { %v1892_v57 = vadd.f32 %v2934_v49, %v3762_v11  ;;  %v1970_v53 = vadd.f32 %v2983_v44, %v1889_v56 }
 0x172   : > { %v2935_v54 = vpop.f32.mrb[60].mxu0  ;;  %v3796_v55 = vadd.f32 %v2986_v0, %v1892_v57 }
 0x173   : > { %v2987_v2 = vpop.f32.mrb[60].mxu1  ;;  %v2936_v58 = vpop.f32.mrb[61].mxu0 }
 0x174   : > { %v2937_v3 = vadd.f32 %v2936_v58, %v2935_v54  ;;  %v2988_v59 = vpop.f32.mrb[61].mxu1  ;;  %v2938_v60 = vpop.f32.mrb[62].mxu0 }
 0x175   : > { %v2989_v61 = vadd.f32 %v2988_v59, %v2987_v2  ;;  %v2990_v5 = vpop.f32.mrb[62].mxu1  ;;  %v2939_v1 = vpop.f32.mrb[63].mxu0 }
 0x176   : > { %v1897_v4 = vadd.f32 %v2937_v3, %v3765_v28  ;;  %v2940_v10 = vadd.f32 %v2939_v1, %v2938_v60  ;;  %v2991_v6 = vpop.f32.mrb[63].mxu1 }
 0x177   : > { %v2992_v16 = vadd.f32 %v2991_v6, %v2990_v5 }
 0x178   : > { %v1900_v7 = vadd.f32 %v2940_v10, %v3768_v29  ;;  %v1978_v11 = vadd.f32 %v2989_v61, %v1897_v4 }
 0x17a   : > { %v2941_v8 = vpop.f32.mrb[64].mxu0  ;;  %v1981_v9 = vadd.f32 %v2992_v16, %v1900_v7 }
 0x17b   : > { %v2993_v18 = vpop.f32.mrb[64].mxu1  ;;  %v2942_v12 = vpop.f32.mrb[65].mxu0 }
 0x17c   : > { %v2943_v21 = vadd.f32 %v2942_v12, %v2941_v8  ;;  %v2994_v13 = vpop.f32.mrb[65].mxu1  ;;  %v2944_v14 = vpop.f32.mrb[66].mxu0 }
 0x17d   : > { %v2995_v15 = vadd.f32 %v2994_v13, %v2993_v18  ;;  %v2996_v17 = vpop.f32.mrb[66].mxu1  ;;  %v2945_v23 = vpop.f32.mrb[67].mxu0 }
 0x17e   : > { %v1905_v22 = vadd.f32 %v2943_v21, %v3771_v45  ;;  %v2946_v24 = vadd.f32 %v2945_v23, %v2944_v14  ;;  %v2997_v28 = vpop.f32.mrb[67].mxu1 }
 0x17f   : > { %v2998_v32 = vadd.f32 %v2997_v28, %v2996_v17 }
 0x180   : > { %v1908_v25 = vadd.f32 %v2946_v24, %v3774_v46  ;;  %v1986_v26 = vadd.f32 %v2995_v15, %v1905_v22 }
 0x182   : > { %v2947_v29 = vpop.f32.mrb[68].mxu0  ;;  %v1989_v27 = vadd.f32 %v2998_v32, %v1908_v25 }
 0x183   : > { %v2999_v34 = vpop.f32.mrb[68].mxu1  ;;  %v2948_v30 = vpop.f32.mrb[69].mxu0 }
 0x184   : > { %v2949_v39 = vadd.f32 %v2948_v30, %v2947_v29  ;;  %v3000_v31 = vpop.f32.mrb[69].mxu1  ;;  %v2950_v33 = vpop.f32.mrb[70].mxu0 }
 0x185   : > { %v3001_v35 = vadd.f32 %v3000_v31, %v2999_v34  ;;  %v3002_v40 = vpop.f32.mrb[70].mxu1  ;;  %v2951_v37 = vpop.f32.mrb[71].mxu0 }
 0x186   : > { %v1913_v52 = vadd.f32 %v2949_v39, %v3777_v62  ;;  %v2952_v45 = vadd.f32 %v2951_v37, %v2950_v33  ;;  %v3003_v41 = vpop.f32.mrb[71].mxu1 }
 0x187   : > { %v3004_v48 = vadd.f32 %v3003_v41, %v3002_v40 }
 0x188   : > { %v1916_v42 = vadd.f32 %v2952_v45, %v3780_v63  ;;  %v1994_v46 = vadd.f32 %v3001_v35, %v1913_v52 }
 0x18a   : > { %v3025_v43 = vpop.f32.mrb[72].mxu0  ;;  %v1997_v44 = vadd.f32 %v3004_v48, %v1916_v42 }
 0x18b   : > { %v2043_v50 = vadd.f32 %v3025_v43, %v3790_v36  ;;  %v3029_v47 = vpop.f32.mrb[72].mxu1  ;;  %v2034_v56 = vpop.f32.mrb[73].mxu0 }
 0x18c   : > { %v2059_v49 = vadd.f32 %v3029_v47, %v1978_v11  ;;  %v2035_v51 = vadd.f32 %v2034_v56, %v3784_v19  ;;  %v2050_v0 = vpop.f32.mrb[73].mxu1  ;;  %v3026_v57 = vpop.f32.mrb[74].mxu0 }
 0x18d   : > { %v2051_v54 = vadd.f32 %v2050_v0, %v1970_v53  ;;  %v2046_v62 = vadd.f32 %v3026_v57, %v3792_v38  ;;  %v3030_v2 = vpop.f32.mrb[74].mxu1  ;;  %v2037_v58 = vpop.f32.mrb[75].mxu0  ;;  %v3809_v60 = vmax.f32 %v2043_v50, 0.0 }
 0x18e   : > { %v2062_v3 = vadd.f32 %v3030_v2, %v1981_v9  ;;  %v2038_v63 = vadd.f32 %v2037_v58, %v3786_v20  ;;  %v2053_v59 = vpop.f32.mrb[75].mxu1  ;;  %v3814_v5 = vmax.f32 %v2059_v49, 0.0  ;;  %v3816_v19 = vmax.f32 %v2035_v51, 0.0 }
 0x18f   : > { %v3811_v36 = vmax.f32 %v2046_v62, 0.0  ;;  %v2054_v61 = vadd.f32 %v2053_v59, %v3796_v55  ;;  %v3825_v20 = vmax.f32 %v2051_v54, 0.0  ;;  %v2176_v25 = vmul.f32 (!%p2630_p5), %v3809_v60, %v3809_v60 }
 0x190   : > { %v3821_v38 = vmax.f32 %v2062_v3, 0.0  ;;  %v3823_v53 = vmax.f32 %v2038_v63, 0.0  ;;  %v2174_v28 = vmul.f32 (!%p2630_p5), %v3816_v19, %v3816_v19  ;;  %v2180_v37 = vmul.f32 (!%p2630_p5), %v3814_v5, %v3814_v5 }
 0x191   : > { %v2666_v1 = vpack.c.bf16 %v3811_v36, %v3809_v60  ;;  %v3829_v4 = vmax.f32 %v2054_v61, 0.0  ;;  %v2177_v29 = vmul.f32 (!%p2630_p5), %v3811_v36, %v3811_v36  ;;  %v2178_v30 = vmul.f32 (!%p2630_p5), %v3825_v20, %v3825_v20 }
 0x192   : > { %v2676_v55 = vpack.c.bf16 %v3821_v38, %v3814_v5  ;;  %v2661_v10 = vpack.c.bf16 %v3823_v53, %v3816_v19  ;;  %v2157_v24 = vadd.f32 (!%p2630_p5), %v3823_v53, %v3816_v19  ;;  %v2175_v32 = vmul.f32 (!%p2630_p5), %v3823_v53, %v3823_v53 }
 0x193   : > { %2688 = vst [vmem:[%s209_s11 + $0x8] sm:$0xff] %v2666_v1   ;;  %v2671_v6 = vpack.c.bf16 %v3829_v4, %v3825_v20  ;;  %v3033_v16 = vpop.f32.mrb[76].mxu1  ;;  %v2179_v33 = vmul.f32 (!%p2630_p5), %v3829_v4, %v3829_v4  ;;  %v2181_v41 = vmul.f32 (!%p2630_p5), %v3821_v38, %v3821_v38 }
 0x194   : > { %2690 = vst [vmem:[%s209_s11 + $0x18] sm:$0xff] %v2676_v55   ;;  %2662 = vst [vmem:[%s209_s11] sm:$0xff] %v2661_v10   ;;  %v2075_v7 = vadd.f32 %v3033_v16, %v1994_v46  ;;  %v2066_v11 = vpop.f32.mrb[77].mxu1 }
 0x195   : > { %2689 = vst [vmem:[%s209_s11 + $0x10] sm:$0xff] %v2671_v6   ;;  %v2067_v8 = vadd.f32 %v2066_v11, %v1986_v26  ;;  %v3034_v9 = vpop.f32.mrb[78].mxu1  ;;  %v2158_v26 = vadd.f32 (!%p2630_p5), %v2157_v24, %v3809_v60 }
 0x196   : > { %v2078_v18 = vadd.f32 %v3034_v9, %v1997_v44  ;;  %v2069_v12 = vpop.f32.mrb[79].mxu1  ;;  %v3837_v13 = vmax.f32 %v2075_v7, 0.0 }
 0x197   : > { %v2070_v21 = vadd.f32 %v2069_v12, %v1989_v27  ;;  %v3841_v15 = vmax.f32 %v2067_v8, 0.0  ;;  %2156 = sbr.rel (%p2630_p5) target bundleno = 444 (0x1bc), region = 36  ;;  %v2186_v27 = vadd.f32 (!%p2630_p5), %v2175_v32, %v2174_v28  ;;  %v2159_v34 = vadd.f32 (!%p2630_p5), %v2158_v26, %v3811_v36 }
 0x198   : > { %v3839_v14 = vmax.f32 %v2078_v18, 0.0  ;;  %v2184_v49 = vmul.f32 (!%p2630_p5), %v3837_v13, %v3837_v13 }
 0x199   : > { %v3843_v17 = vmax.f32 %v2070_v21, 0.0  ;;  %v2187_v39 = vadd.f32 (!%p2630_p5), %v2186_v27, %v2176_v25  ;;  %v2160_v31 = vadd.f32 (!%p2630_p5), %v2159_v34, %v3825_v20  ;;  %v2182_v46 = vmul.f32 (!%p2630_p5), %v3841_v15, %v3841_v15 }
 0x19a   : > { %v2686_v23 = vpack.c.bf16 %v3839_v14, %v3837_v13  ;;  %v2185_v57 = vmul.f32 (!%p2630_p5), %v3839_v14, %v3839_v14 }
 0x19b   : > { %v2681_v22 = vpack.c.bf16 %v3843_v17, %v3841_v15  ;;  %v2188_v35 = vadd.f32 (!%p2630_p5), %v2187_v39, %v2177_v29  ;;  %v2161_v40 = vadd.f32 (!%p2630_p5), %v2160_v31, %v3829_v4  ;;  %v2183_v50 = vmul.f32 (!%p2630_p5), %v3843_v17, %v3843_v17 }
 0x19c   : > { %2692 = vst [vmem:[%s209_s11 + $0x28] sm:$0xff] %v2686_v23  }
 0x19d   : > { %2691 = vst [vmem:[%s209_s11 + $0x20] sm:$0xff] %v2681_v22   ;;  %v2189_v52 = vadd.f32 (!%p2630_p5), %v2188_v35, %v2178_v30  ;;  %v2162_v45 = vadd.f32 (!%p2630_p5), %v2161_v40, %v3814_v5 }
 0x19f   : > { %v2190_v48 = vadd.f32 %v2189_v52, %v2179_v33  ;;  %v2163_v42 = vadd.f32 %v2162_v45, %v3821_v38 }
 0x1a1   : > { %v2191_v43 = vadd.f32 %v2190_v48, %v2180_v37  ;;  %v2164_v44 = vadd.f32 %v2163_v42, %v3841_v15 }
 0x1a3   : > { %v2192_v47 = vadd.f32 %v2191_v43, %v2181_v41  ;;  %v2165_v56 = vadd.f32 %v2164_v44, %v3843_v17 }
 0x1a5   : > { %v2193_v51 = vadd.f32 %v2192_v47, %v2182_v46  ;;  %v2166_v0 = vadd.f32 %v2165_v56, %v3837_v13 }
 0x1a7   : > { %v2194_v54 = vadd.f32 %v2193_v51, %v2183_v50  ;;  %v2167_v62 = vadd.f32 %v2166_v0, %v3839_v14 }
 0x1a9   : > { %v2195_v2 = vadd.f32 %v2194_v54, %v2184_v49  ;;  %v2168_v58 = vrot.slane %v2167_v62, 4 }
 0x1ab   : > { %v2196_v3 = vadd.f32 %v2195_v2, %v2185_v57  ;;  %v2169_v63 = vadd.f32 %v2168_v58, %v2167_v62 }
 0x1ad   : > { %v2197_v59 = vrot.slane %v2196_v3, 4  ;;  %v2170_v61 = vrot.slane %v2169_v63, 2 }
 0x1af   : > { %v2198_v1 = vadd.f32 %v2197_v59, %v2196_v3  ;;  %v2171_v55 = vadd.f32 %v2170_v61, %v2169_v63 }
 0x1b1   : > { %v2199_v10 = vrot.slane %v2198_v1, 2  ;;  %v2172_v6 = vrot.slane %v2171_v55, 1 }
 0x1b3   : > { %v2200_v16 = vadd.f32 %v2199_v10, %v2198_v1  ;;  %v2173_v7 = vadd.f32 %v2172_v6, %v2171_v55 }
 0x1b5   : > { %v2201_v11 = vrot.slane %v2200_v16, 1 }
 0x1b7   : > { %v2202_v8 = vadd.f32 %v2201_v11, %v2200_v16 }
 0x1b9   : > { %v2204_v9 = vsel %vm2203_vm1, %v2173_v7, %v2202_v8 }
 0x1ba   : > { %v2206_v18 = vsel %vm2205_vm2, %v2204_v9, 0.0 }
 0x1bb   : > { %2207 = vst [vmem:[%s3331_s5] sm:$0xff] %v2206_v18 }
 0x1bc PF: > { %p2631_p6 = scmp.ne.s32.totalorder %s3307_s16, 1 }
 0x1bd   : > { %v2212_v12 = vlaneseq (!%p2631_p6)  ;;  %s2225_s12 = smul.u32 (!%p2631_p6), 96, %s3307_s16  ;;  %v3275_v35 = vmov (!%p2631_p6), 0.0   ;;  %vm2333_vm15 = vcmask (!%p2631_p6), 1040384   ;;  %vm2335_vm0 = vcmask (!%p2631_p6), 1041408  }
 0x1be   : > { %2211 = sbr.rel (%p2631_p6) target bundleno = 498 (0x1f2), region = 40 }
 0x1bf   : > { %v2213_v21 = vshrl.u32 (!%p2631_p6), %v2212_v12, 7  ;;  %v2226_v23 = vstv (!%p2631_p6), %s2225_s12 }
 0x1c1   : > { %v2214_v22 = vadd.s32 (!%p2631_p6), 8, %v2213_v21  ;;  %v2215_v24 = vadd.s32 (!%p2631_p6), 16, %v2213_v21  ;;  %v2216_v28 = vadd.s32 (!%p2631_p6), 24, %v2213_v21  ;;  %v2217_v32 = vadd.s32 (!%p2631_p6), 32, %v2213_v21 }
 0x1c2   : > { %v2227_v25 = vadd.s32 (!%p2631_p6), %v2226_v23, %v2213_v21  ;;  %v2218_v27 = vadd.s32 (!%p2631_p6), 40, %v2213_v21  ;;  %v2219_v30 = vadd.s32 (!%p2631_p6), 48, %v2213_v21  ;;  %v2220_v31 = vadd.s32 (!%p2631_p6), 56, %v2213_v21 }
 0x1c3   : > { %v2228_v26 = vadd.s32 (!%p2631_p6), %v2226_v23, %v2214_v22  ;;  %v2229_v29 = vadd.s32 (!%p2631_p6), %v2226_v23, %v2215_v24  ;;  %v2230_v34 = vadd.s32 (!%p2631_p6), %v2226_v23, %v2216_v28  ;;  %v2231_v39 = vadd.s32 (!%p2631_p6), %v2226_v23, %v2217_v32 }
 0x1c4   : > { %vm2239_vm3 = vcmp.lt.s32.totalorder (!%p2631_p6), %v2227_v25, 162  ;;  %v2232_v33 = vadd.s32 (!%p2631_p6), %v2226_v23, %v2218_v27  ;;  %v2221_v37 = vadd.s32 (!%p2631_p6), 64, %v2213_v21  ;;  %v2233_v41 = vadd.s32 (!%p2631_p6), %v2226_v23, %v2219_v30 }
 0x1c5   : > { %vm2240_vm4 = vcmp.lt.s32.totalorder %v2228_v26, 162  ;;  %vm2241_vm5 = vcmp.lt.s32.totalorder %v2229_v29, 162  ;;  %vm2242_vm6 = vcmp.lt.s32.totalorder %v2230_v34, 162  ;;  %v2632_v40 = vsel %vm2239_vm3, 1.0, %v3275_v35 }
 0x1c6   : > { %v2633_v52 = vsel %vm2240_vm4, 1.0, %v3275_v35  ;;  %v2634_v45 = vsel %vm2241_vm5, 1.0, %v3275_v35  ;;  %vm2243_vm7 = vcmp.lt.s32.totalorder %v2231_v39, 162  ;;  %v2222_v48 = vadd.s32 72, %v2213_v21 }
 0x1c7   : > { %v2635_v42 = vsel %vm2242_vm6, 1.0, %v3275_v35  ;;  %v2275_v46 = vmul.f32 %v2632_v40, %v3816_v19  ;;  %v2234_v43 = vadd.s32 %v2226_v23, %v2220_v31  ;;  %vm2244_vm8 = vcmp.lt.s32.totalorder %v2232_v33, 162 }
 0x1c8   : > { %v2276_v44 = vmul.f32 %v2633_v52, %v3823_v53  ;;  %v2277_v50 = vmul.f32 %v2634_v45, %v3809_v60  ;;  %v2223_v47 = vadd.s32 80, %v2213_v21  ;;  %v2235_v56 = vadd.s32 %v2226_v23, %v2221_v37 }
 0x1c9   : > { %v2636_v49 = vsel %vm2243_vm7, 1.0, %v3275_v35  ;;  %v2224_v51 = vadd.s32 88, %v2213_v21  ;;  %vm2245_vm9 = vcmp.lt.s32.totalorder %v2233_v41, 162  ;;  %v2278_v0 = vmul.f32 %v2635_v42, %v3811_v36 }
 0x1ca   : > { %v2287_v57 = vadd.f32 %v2276_v44, %v2275_v46  ;;  %v2236_v54 = vadd.s32 %v2226_v23, %v2222_v48  ;;  %v2637_v62 = vsel %vm2244_vm8, 1.0, %v3275_v35  ;;  %v2304_v2 = vmul.f32 %v2275_v46, %v3816_v19 }
 0x1cb   : > { %v2305_v58 = vmul.f32 %v2276_v44, %v3823_v53  ;;  %vm2246_vm10 = vcmp.lt.s32.totalorder %v2234_v43, 162  ;;  %v2279_v3 = vmul.f32 %v2636_v49, %v3825_v20  ;;  %v2306_v59 = vmul.f32 %v2277_v50, %v3809_v60 }
 0x1cc   : > { %v2288_v63 = vadd.f32 %v2287_v57, %v2277_v50  ;;  %v2237_v61 = vadd.s32 %v2226_v23, %v2223_v47  ;;  %vm2247_vm11 = vcmp.lt.s32.totalorder %v2235_v56, 162  ;;  %v2638_v1 = vsel %vm2245_vm9, 1.0, %v3275_v35 }
 0x1cd   : > { %v2280_v55 = vmul.f32 %v2637_v62, %v3829_v4  ;;  %v2307_v6 = vmul.f32 %v2278_v0, %v3811_v36  ;;  %v2316_v16 = vadd.f32 %v2305_v58, %v2304_v2  ;;  %v2238_v7 = vadd.s32 %v2226_v23, %v2224_v51 }
 0x1ce   : > { %v2289_v10 = vadd.f32 %v2288_v63, %v2278_v0  ;;  %vm2248_vm12 = vcmp.lt.s32.totalorder %v2236_v54, 162  ;;  %v2639_v19 = vsel %vm2246_vm10, 1.0, %v3275_v35  ;;  %v2281_v53 = vmul.f32 %v2638_v1, %v3814_v5 }
 0x1cf   : > { %v2308_v8 = vmul.f32 %v2279_v3, %v3825_v20  ;;  %v2317_v9 = vadd.f32 %v2316_v16, %v2306_v59  ;;  %vm2249_vm13 = vcmp.lt.s32.totalorder %v2237_v61, 162  ;;  %v2640_v60 = vsel %vm2247_vm11, 1.0, %v3275_v35 }
 0x1d0   : > { %v2290_v11 = vadd.f32 %v2289_v10, %v2279_v3  ;;  %v2282_v18 = vmul.f32 %v2639_v19, %v3821_v38  ;;  %v2309_v21 = vmul.f32 %v2280_v55, %v3829_v4  ;;  %vm2250_vm14 = vcmp.lt.s32.totalorder %v2238_v7, 162 }
 0x1d1   : > { %v2318_v22 = vadd.f32 %v2317_v9, %v2307_v6  ;;  %v2641_v36 = vsel %vm2248_vm12, 1.0, %v3275_v35  ;;  %v2283_v23 = vmul.f32 %v2640_v60, %v3841_v15  ;;  %v2310_v28 = vmul.f32 %v2281_v53, %v3814_v5 }
 0x1d2   : > { %v2291_v12 = vadd.f32 %v2290_v11, %v2280_v55  ;;  %v2642_v25 = vsel %vm2249_vm13, 1.0, %v3275_v35  ;;  %v2284_v20 = vmul.f32 %v2641_v36, %v3843_v17  ;;  %v2311_v29 = vmul.f32 %v2282_v18, %v3821_v38 }
 0x1d3   : > { %v2319_v32 = vadd.f32 %v2318_v22, %v2308_v8  ;;  %v2643_v34 = vsel %vm2250_vm14, 1.0, %v3275_v35  ;;  %v2285_v30 = vmul.f32 %v2642_v25, %v3837_v13  ;;  %v2312_v39 = vmul.f32 %v2283_v23, %v3841_v15 }
 0x1d4   : > { %v2292_v24 = vadd.f32 %v2291_v12, %v2281_v53  ;;  %v2286_v33 = vmul.f32 %v2643_v34, %v3839_v14  ;;  %v2313_v5 = vmul.f32 %v2284_v20, %v3843_v17 }
 0x1d5   : > { %v2320_v27 = vadd.f32 %v2319_v32, %v2309_v21  ;;  %v2314_v45 = vmul.f32 %v2285_v30, %v3837_v13 }
 0x1d6   : > { %v2293_v26 = vadd.f32 %v2292_v24, %v2282_v18  ;;  %v2315_v38 = vmul.f32 %v2286_v33, %v3839_v14 }
 0x1d7   : > { %v2321_v31 = vadd.f32 %v2320_v27, %v2310_v28 }
 0x1d8   : > { %v2294_v4 = vadd.f32 %v2293_v26, %v2283_v23 }
 0x1d9   : > { %v2322_v37 = vadd.f32 %v2321_v31, %v2311_v29 }
 0x1da   : > { %v2295_v40 = vadd.f32 %v2294_v4, %v2284_v20 }
 0x1db   : > { %v2323_v41 = vadd.f32 %v2322_v37, %v2312_v39 }
 0x1dc   : > { %v2296_v52 = vadd.f32 %v2295_v40, %v2285_v30 }
 0x1dd   : > { %v2324_v35 = vadd.f32 %v2323_v41, %v2313_v5 }
 0x1de   : > { %v2297_v48 = vadd.f32 %v2296_v52, %v2286_v33 }
 0x1df   : > { %v2325_v46 = vadd.f32 %v2324_v35, %v2314_v45 }
 0x1e0   : > { %v2298_v42 = vrot.slane %v2297_v48, 4 }
 0x1e1   : > { %v2326_v15 = vadd.f32 %v2325_v46, %v2315_v38 }
 0x1e2   : > { %v2299_v43 = vadd.f32 %v2298_v42, %v2297_v48 }
 0x1e3   : > { %v2327_v50 = vrot.slane %v2326_v15, 4 }
 0x1e4   : > { %v2300_v44 = vrot.slane %v2299_v43, 2 }
 0x1e5   : > { %v2328_v56 = vadd.f32 %v2327_v50, %v2326_v15 }
 0x1e6   : > { %v2301_v47 = vadd.f32 %v2300_v44, %v2299_v43 }
 0x1e7   : > { %v2329_v17 = vrot.slane %v2328_v56, 2 }
 0x1e8   : > { %v2302_v49 = vrot.slane %v2301_v47, 1 }
 0x1e9   : > { %v2330_v51 = vadd.f32 %v2329_v17, %v2328_v56 }
 0x1ea   : > { %v2303_v0 = vadd.f32 %v2302_v49, %v2301_v47 }
 0x1eb   : > { %v2331_v57 = vrot.slane %v2330_v51, 1 }
 0x1ed   : > { %v2332_v13 = vadd.f32 %v2331_v57, %v2330_v51 }
 0x1ef   : > { %v2334_v54 = vsel %vm2333_vm15, %v2303_v0, %v2332_v13 }
 0x1f0   : > { %v2336_v14 = vsel %vm2335_vm0, %v2334_v54, 0.0 }
 0x1f1   : > { %2337 = vst [vmem:[%s3331_s5] sm:$0xff] %v2336_v14 }
 0x1f2 PF: > { %s15_s15 = sadd.s32 1, %s3273_s15  }
 0x1f3   : > { %p12_p7 = scmp.ge.s32.totalorder %s15_s15, 4  }
 0x1f5   :  { %14 = sbr.rel (!%p12_p7) target bundleno = 1 (0x1), region = 82 }

// kernel: encoder_forward.9
= control target key start
LH: loop header
LB: loop body
LE: loop exit
PB: predicated region body
PF: predicated region fallthrough
CT: control target
= control target key end

     0   :  { %s2012_s15 = smov 0   ;;  %s2366_s0 = inlined_call_operand.vmem [shape: bf16[32,1600], index: 0, kind: input, shape index: {}]   ;;  %s2367_s1 = inlined_call_operand.vmem [shape: bf16[1600,128], index: 1, kind: input, shape index: {}]   ;;  %s2368_s2 = inlined_call_operand.vmem [shape: f32[8,128], index: 2, kind: input, shape index: {}]   ;;  %s2369_s3 = inlined_call_operand.vmem [shape: bf16[32,128], index: 3, kind: output, shape index: {0}]   ;;  %s2370_s4 = inlined_call_operand.vmem [shape: f32[16,128], index: 4, kind: output, shape index: {1}]  }
   0x1 LB: > { %s2018_s16 = sadd.s32 4294967295, %s1982_s15   ;;  %p1559_p0 = scmp.ge.s32.totalorder %s1982_s15, 1  ;;  %s1982_s15 = sphi %s2012_s15, %s15_s15  }
   0x2   : > { %p167_p1 = scmp.lt.s32.totalorder %s1982_s15, 3 }
   0x4   : > { %p168_p2 = pnand %p1559_p0, %p167_p1 }
   0x5   : > { %p211_p3 = scmp.lt.s32.totalorder (!%p168_p2), %s2018_s16, 1  ;;  %v1857_v0 = vld [vmem:[%s2367_s1 + $0x40] sm:$0xff] (!%p168_p2)   ;;  %v1861_v4 = vld [vmem:[%s2367_s1 + $0x48] sm:$0xff] (!%p168_p2)   ;;  %v1865_v8 = vld [vmem:[%s2367_s1 + $0x50] sm:$0xff] (!%p168_p2)   ;;  %vm1985_vm0 = vmmov (!%p168_p2), 0   ;;  %vm1100_vm1 = vcmask (!%p168_p2), 523264  }
   0x6   : > { %171 = sbr.rel (%p168_p2) target bundleno = 387 (0x183), region = 32  ;;  %v1858_v1 = vld [vmem:[%s2367_s1] sm:$0xff] (!%p168_p2)   ;;  %1696 = vmatprep.subr.bf16.mxu0 (!%p168_p2), %v1857_v0  ;;  %v1862_v5 = vld [vmem:[%s2367_s1 + $0x8] sm:$0xff] (!%p168_p2)   ;;  %v1866_v9 = vld [vmem:[%s2367_s1 + $0x10] sm:$0xff] (!%p168_p2)   ;;  %p1682_p5 = scmp.ge.s32.totalorder (!%p168_p2), %s2018_s16, 1 }
   0x7   : > { %v1859_v2 = vld [vmem:[%s2367_s1 + $0xc0] sm:$0xff] (!%p168_p2)   ;;  %1697 = vmatpush3.bf16.msra.mxu0 (!%p168_p2), %v1858_v1  ;;  %v1863_v6 = vld [vmem:[%s2367_s1 + $0xc8] sm:$0xff] (!%p168_p2)   ;;  %v1867_v10 = vld [vmem:[%s2367_s1 + $0xd0] sm:$0xff] (!%p168_p2)  }
   0x8   : > { %v1860_v3 = vld [vmem:[%s2367_s1 + $0x80] sm:$0xff] (!%p168_p2)   ;;  %1718 = vmatprep.subr.bf16.mxu1 (!%p168_p2), %v1859_v2  ;;  %1698 = vmatprep.subr.bf16.mxu0 (!%p168_p2), %v1861_v4  ;;  %v1864_v7 = vld [vmem:[%s2367_s1 + $0x88] sm:$0xff] (!%p168_p2)   ;;  %v1868_v11 = vld [vmem:[%s2367_s1 + $0x90] sm:$0xff] (!%p168_p2)  }
   0x9   : > { %1719 = vmatpush3.bf16.msra.mxu1 (!%p168_p2), %v1860_v3  ;;  %v1869_v12 = vld [vmem:[%s2367_s1 + $0x58] sm:$0xff] (!%p168_p2)   ;;  %v1873_v16 = vld [vmem:[%s2367_s1 + $0x60] sm:$0xff] (!%p168_p2)   ;;  %v1877_v20 = vld [vmem:[%s2367_s1 + $0x68] sm:$0xff] (!%p168_p2)  }
   0xa   : > { %1720 = vmatprep.subr.bf16.mxu1 (!%p168_p2), %v1863_v6  ;;  %v1870_v13 = vld [vmem:[%s2367_s1 + $0x18] sm:$0xff] (!%p168_p2)   ;;  %v1874_v17 = vld [vmem:[%s2367_s1 + $0x20] sm:$0xff] (!%p168_p2)   ;;  %v1878_v21 = vld [vmem:[%s2367_s1 + $0x28] sm:$0xff] (!%p168_p2)  }
   0xb   : > { %1699 = vmatpush3.bf16.msra.mxu0 (!%p168_p2), %v1862_v5  ;;  %v1871_v14 = vld [vmem:[%s2367_s1 + $0xd8] sm:$0xff] (!%p168_p2)   ;;  %v1875_v18 = vld [vmem:[%s2367_s1 + $0xe0] sm:$0xff] (!%p168_p2)   ;;  %v1879_v22 = vld [vmem:[%s2367_s1 + $0xe8] sm:$0xff] (!%p168_p2)  }
   0xc   : > { %1700 = vmatprep.subr.bf16.mxu0 (!%p168_p2), %v1865_v8  ;;  %v1872_v15 = vld [vmem:[%s2367_s1 + $0x98] sm:$0xff] (!%p168_p2)   ;;  %v1876_v19 = vld [vmem:[%s2367_s1 + $0xa0] sm:$0xff] (!%p168_p2)   ;;  %v1880_v23 = vld [vmem:[%s2367_s1 + $0xa8] sm:$0xff] (!%p168_p2)  }
   0xd   : > { %s212_s21 = scalar_select %p211_p3, %s2018_s16, 1  ;;  %1721 = vmatpush3.bf16.msra.mxu1 %v1864_v7  ;;  %v1881_v24 = vld [vmem:[%s2367_s1 + $0x70] sm:$0xff]   ;;  %v1885_v28 = vld [vmem:[%s2367_s1 + $0x78] sm:$0xff]   ;;  %v1892_v34 = vld [vmem:[%s2367_s1 + $0x140] sm:$0xff]  }
   0xe   : > { %1722 = vmatprep.subr.bf16.mxu1 %v1867_v10  ;;  %v1882_v25 = vld [vmem:[%s2367_s1 + $0x30] sm:$0xff]   ;;  %v1886_v29 = vld [vmem:[%s2367_s1 + $0x38] sm:$0xff]   ;;  %v1896_v37 = vld [vmem:[%s2367_s1 + $0x100] sm:$0xff]   ;;  %vm1423_vm2 = vcmask (!%p1682_p5), 1040384   ;;  %vm1425_vm3 = vcmask (!%p1682_p5), 1041408  }
   0xf   : > { %s1564_s26 = sshll.u32 %s212_s21, 3  ;;  %1701 = vmatpush3.bf16.msra.mxu0 %v1866_v9  ;;  %v1883_v26 = vld [vmem:[%s2367_s1 + $0xf0] sm:$0xff]   ;;  %v1887_v30 = vld [vmem:[%s2367_s1 + $0xf8] sm:$0xff]   ;;  %v1897_v38 = vld [vmem:[%s2367_s1 + $0x1c0] sm:$0xff]  }
  0x10   : > { %s2042_s5 = scalar_lea.vmem %s2370_s4, %s1564_s26  ;;  %s1560_s26 = sshll.u32 %s2018_s16, 1  ;;  %1702 = vmatprep.subr.bf16.mxu0 %v1869_v12  ;;  %v1884_v27 = vld [vmem:[%s2367_s1 + $0xb0] sm:$0xff]   ;;  %v1891_v33 = vld [vmem:[%s2367_s1 + $0xb8] sm:$0xff]   ;;  %v1898_v39 = vld [vmem:[%s2367_s1 + $0x180] sm:$0xff]  }
  0x11   : > { %1723 = vmatpush3.bf16.msra.mxu1 %v1868_v11  ;;  %p199_p4 = scmp.lt.s32.totalorder %s1560_s26, 3  ;;  %v1899_v40 = vld [vmem:[%s2367_s1 + $0x148] sm:$0xff]   ;;  %v1903_v44 = vld [vmem:[%s2367_s1 + $0x150] sm:$0xff]   ;;  %v1907_v48 = vld [vmem:[%s2367_s1 + $0x158] sm:$0xff]  }
  0x12   : > { %1724 = vmatprep.subr.bf16.mxu1 %v1871_v14  ;;  %v1900_v41 = vld [vmem:[%s2367_s1 + $0x108] sm:$0xff]   ;;  %v1904_v45 = vld [vmem:[%s2367_s1 + $0x110] sm:$0xff]   ;;  %v1908_v49 = vld [vmem:[%s2367_s1 + $0x118] sm:$0xff]  }
  0x13   : > { %1703 = vmatpush3.bf16.msra.mxu0 %v1870_v13  ;;  %s2372_s26 = smov (!%p199_p4, %s1560_s26), 3  ;;  %v1901_v42 = vld [vmem:[%s2367_s1 + $0x1c8] sm:$0xff]   ;;  %v1905_v46 = vld [vmem:[%s2367_s1 + $0x1d0] sm:$0xff]   ;;  %v1909_v50 = vld [vmem:[%s2367_s1 + $0x1d8] sm:$0xff]  }
  0x14   : > { %1704 = vmatprep.subr.bf16.mxu0 %v1873_v16  ;;  %s1845_s27 = smul.u32 52, %s2372_s26  ;;  %v1902_v43 = vld [vmem:[%s2367_s1 + $0x188] sm:$0xff]   ;;  %v1906_v47 = vld [vmem:[%s2367_s1 + $0x190] sm:$0xff]   ;;  %v1910_v51 = vld [vmem:[%s2367_s1 + $0x198] sm:$0xff]  }
  0x15   : > { %1725 = vmatpush3.bf16.msra.mxu1 %v1872_v15  ;;  %v1911_v52 = vld [vmem:[%s2367_s1 + $0x160] sm:$0xff]   ;;  %v1915_v56 = vld [vmem:[%s2367_s1 + $0x168] sm:$0xff]   ;;  %v1919_v60 = vld [vmem:[%s2367_s1 + $0x170] sm:$0xff]  }
  0x16   : > { %1726 = vmatprep.subr.bf16.mxu1 %v1875_v18  ;;  %s2123_s13 = scalar_lea.vmem %s2366_s0, %s1845_s27  ;;  %v1912_v53 = vld [vmem:[%s2367_s1 + $0x120] sm:$0xff]   ;;  %v1916_v57 = vld [vmem:[%s2367_s1 + $0x128] sm:$0xff]   ;;  %v1920_v61 = vld [vmem:[%s2367_s1 + $0x130] sm:$0xff]  }
  0x17   : > { %1705 = vmatpush3.bf16.msra.mxu0 %v1874_v17  ;;  %v1888_v31 = vld [vmem:[%s2123_s13] ss:$52 sps:$4 sm:$0xff]   ;;  %v1890_v32 = vld [vmem:[%s2123_s13 + $0x4] ss:$52 sps:$4 sm:$0xff]   ;;  %v1893_v35 = vld [vmem:[%s2123_s13 + $0x8] ss:$52 sps:$4 sm:$0xff]  }
  0x18   : > { %1706 = vmatprep.subr.bf16.mxu0 %v1877_v20  ;;  %1136 = vmatprep.mubr.bf16.mxu0 %v1890_v32  ;;  %v1895_v36 = vld [vmem:[%s2123_s13 + $0xc] ss:$52 sps:$4 sm:$0xff]   ;;  %v1921_v62 = vld [vmem:[%s2367_s1 + $0x1f0] sm:$0xff]   ;;  %v1923_v0 = vld [vmem:[%s2367_s1 + $0x178] sm:$0xff]  }
  0x19   : > { %1727 = vmatpush3.bf16.msra.mxu1 %v1876_v19  ;;  %1177 = vmatprep.mubr.bf16.mxu1 %v1895_v36  ;;  %v1913_v54 = vld [vmem:[%s2367_s1 + $0x1e0] sm:$0xff]   ;;  %v1917_v58 = vld [vmem:[%s2367_s1 + $0x1e8] sm:$0xff]   ;;  %v1922_v63 = vld [vmem:[%s2367_s1 + $0x1b0] sm:$0xff]  }
  0x1a   : > { %1728 = vmatprep.subr.bf16.mxu1 %v1879_v22  ;;  %v1914_v55 = vld [vmem:[%s2367_s1 + $0x1a0] sm:$0xff]   ;;  %v1918_v59 = vld [vmem:[%s2367_s1 + $0x1a8] sm:$0xff]   ;;  %v1924_v1 = vld [vmem:[%s2367_s1 + $0x138] sm:$0xff]  }
  0x1b   : > { %1707 = vmatpush3.bf16.msra.mxu0 %v1878_v21  ;;  %v1925_v2 = vld [vmem:[%s2367_s1 + $0x1f8] sm:$0xff]   ;;  %v1926_v3 = vld [vmem:[%s2123_s13 + $0x10] ss:$52 sps:$4 sm:$0xff]   ;;  %v1928_v4 = vld [vmem:[%s2123_s13 + $0x14] ss:$52 sps:$4 sm:$0xff]  }
  0x1c   : > { %1708 = vmatprep.subr.bf16.mxu0 %v1881_v24  ;;  %v1929_v5 = vld [vmem:[%s2367_s1 + $0x1b8] sm:$0xff]   ;;  %v1930_v6 = vld [vmem:[%s2367_s1 + $0x240] sm:$0xff]   ;;  %v1937_v12 = vld [vmem:[%s2367_s1 + $0x248] sm:$0xff]  }
  0x1d   : > { %1729 = vmatpush3.bf16.msra.mxu1 %v1880_v23  ;;  %v1931_v7 = vld [vmem:[%s2123_s13 + $0x18] ss:$52 sps:$4 sm:$0xff]   ;;  %v1933_v8 = vld [vmem:[%s2123_s13 + $0x1c] ss:$52 sps:$4 sm:$0xff]   ;;  %v1934_v9 = vld [vmem:[%s2367_s1 + $0x200] sm:$0xff]  }
  0x1e   : > { %1730 = vmatprep.subr.bf16.mxu1 %v1883_v26  ;;  %v1935_v10 = vld [vmem:[%s2367_s1 + $0x2c0] sm:$0xff]   ;;  %v1938_v13 = vld [vmem:[%s2367_s1 + $0x208] sm:$0xff]   ;;  %v1941_v16 = vld [vmem:[%s2367_s1 + $0x250] sm:$0xff]  }
  0x1f   : > { %1709 = vmatpush3.bf16.msra.mxu0 %v1882_v25  ;;  %v1936_v11 = vld [vmem:[%s2367_s1 + $0x280] sm:$0xff]   ;;  %v1939_v14 = vld [vmem:[%s2367_s1 + $0x2c8] sm:$0xff]   ;;  %v1942_v17 = vld [vmem:[%s2367_s1 + $0x210] sm:$0xff]  }
  0x20   : > { %1710 = vmatprep.subr.bf16.mxu0 %v1885_v28  ;;  %v1940_v15 = vld [vmem:[%s2367_s1 + $0x288] sm:$0xff]   ;;  %v1943_v18 = vld [vmem:[%s2367_s1 + $0x2d0] sm:$0xff]   ;;  %v1945_v20 = vld [vmem:[%s2367_s1 + $0x258] sm:$0xff]  }
  0x21   : > { %1731 = vmatpush3.bf16.msra.mxu1 %v1884_v27  ;;  %v1944_v19 = vld [vmem:[%s2367_s1 + $0x290] sm:$0xff]   ;;  %v1946_v21 = vld [vmem:[%s2367_s1 + $0x218] sm:$0xff]   ;;  %v1949_v24 = vld [vmem:[%s2367_s1 + $0x260] sm:$0xff]  }
  0x22   : > { %1732 = vmatprep.subr.bf16.mxu1 %v1887_v30  ;;  %v1947_v22 = vld [vmem:[%s2367_s1 + $0x2d8] sm:$0xff]   ;;  %v1950_v25 = vld [vmem:[%s2367_s1 + $0x220] sm:$0xff]   ;;  %v1953_v28 = vld [vmem:[%s2367_s1 + $0x268] sm:$0xff]  }
  0x23   : > { %1711 = vmatpush3.bf16.msra.mxu0 %v1886_v29  ;;  %v1948_v23 = vld [vmem:[%s2367_s1 + $0x298] sm:$0xff]   ;;  %v1951_v26 = vld [vmem:[%s2367_s1 + $0x2e0] sm:$0xff]   ;;  %v1954_v29 = vld [vmem:[%s2367_s1 + $0x228] sm:$0xff]  }
  0x24   : > { %1740 = vmatprep.subr.bf16.mxu0 %v1892_v34  ;;  %v1952_v27 = vld [vmem:[%s2367_s1 + $0x2a0] sm:$0xff]   ;;  %v1955_v30 = vld [vmem:[%s2367_s1 + $0x2e8] sm:$0xff]   ;;  %v1957_v32 = vld [vmem:[%s2367_s1 + $0x270] sm:$0xff]  }
  0x25   : > { %1733 = vmatpush3.bf16.msra.mxu1 %v1891_v33  ;;  %v1958_v33 = vld [vmem:[%s2367_s1 + $0x230] sm:$0xff]   ;;  %v1961_v36 = vld [vmem:[%s2367_s1 + $0x278] sm:$0xff]  }
  0x26   : > { %1137 = vmatmul.mubr.bf16.vlgmr.msra.gmra.mrb[0].mxu0 %v1888_v31  ;;  %1762 = vmatprep.subr.bf16.mxu1 %v1897_v38  ;;  %v1956_v31 = vld [vmem:[%s2367_s1 + $0x2a8] sm:$0xff]   ;;  %v1959_v34 = vld [vmem:[%s2367_s1 + $0x2f0] sm:$0xff]   ;;  %v1963_v38 = vld [vmem:[%s2367_s1 + $0x2f8] sm:$0xff]  }
  0x27   : > { %1741 = vmatpush3.bf16.msra.mxu0 %v1896_v37  ;;  %1218 = vmatprep.mubr.bf16.mxu0 %v1928_v4  ;;  %v1962_v37 = vld [vmem:[%s2367_s1 + $0x238] sm:$0xff]  }
  0x28   : > { %1178 = vmatmul.mubr.bf16.vlgmr.msra.gmra.mrb[0].mxu1 %v1893_v35  ;;  %1742 = vmatprep.subr.bf16.mxu0 %v1899_v40  ;;  %v1960_v35 = vld [vmem:[%s2367_s1 + $0x2b0] sm:$0xff]   ;;  %v1966_v40 = vld [vmem:[%s2123_s13 + $0x24] ss:$52 sps:$4 sm:$0xff]  }
  0x29   : > { %1763 = vmatpush3.bf16.msra.mxu1 %v1898_v39  ;;  %1259 = vmatprep.mubr.bf16.mxu1 %v1933_v8  ;;  %v1964_v39 = vld [vmem:[%s2123_s13 + $0x20] ss:$52 sps:$4 sm:$0xff]  }
  0x2a   : > { %1764 = vmatprep.subr.bf16.mxu1 %v1901_v42  ;;  %v1984_v42 = vmov 0.0  }
  0x2b   : > { %1743 = vmatpush3.bf16.msra.mxu0 %v1900_v41  ;;  %v1967_v41 = vld [vmem:[%s2367_s1 + $0x2b8] sm:$0xff]  }
  0x2c   : > { %1744 = vmatprep.subr.bf16.mxu0 %v1903_v44  ;;  %v1970_v44 = vld [vmem:[%s2123_s13 + $0x2c] ss:$52 sps:$4 sm:$0xff]  }
  0x2d   : > { %1765 = vmatpush3.bf16.msra.mxu1 %v1902_v43  ;;  %v1968_v43 = vld [vmem:[%s2123_s13 + $0x28] ss:$52 sps:$4 sm:$0xff]  }
  0x2e   : > { %1766 = vmatprep.subr.bf16.mxu1 %v1905_v46  ;;  %v1972_v46 = vld [vmem:[%s2367_s1 + $0x308] sm:$0xff]  }
  0x2f   : > { %1745 = vmatpush3.bf16.msra.mxu0 %v1904_v45  ;;  %v1971_v45 = vld [vmem:[%s2367_s1 + $0x300] sm:$0xff]  }
  0x30   : > { %1746 = vmatprep.subr.bf16.mxu0 %v1907_v48  ;;  %v1974_v48 = vld [vmem:[%s2367_s1 + $0x318] sm:$0xff]  }
  0x31   : > { %1767 = vmatpush3.bf16.msra.mxu1 %v1906_v47  ;;  %v1973_v47 = vld [vmem:[%s2367_s1 + $0x310] sm:$0xff]  }
  0x32   : > { %1768 = vmatprep.subr.bf16.mxu1 %v1909_v50 }
  0x33   : > { %1747 = vmatpush3.bf16.msra.mxu0 %v1908_v49  ;;  %v1975_v49 = vld [vmem:[%s2123_s13 + $0x30] ss:$52 sps:$4 sm:$0xff]   ;;  %s1563_s13 = sshll.u32 %s2372_s26, 2 }
  0x34   : > { %1748 = vmatprep.subr.bf16.mxu0 %v1911_v52  ;;  %s209_s12 = scalar_lea.vmem %s2369_s3, %s1563_s13 }
  0x35   : > { %1769 = vmatpush3.bf16.msra.mxu1 %v1910_v51  ;;  %v1565_v51 = vld [vmem:[%s2368_s2] ss:$0 sm:$0xff] }
  0x36   : > { %1770 = vmatprep.subr.bf16.mxu1 %v1913_v54 }
  0x37   : > { %1749 = vmatpush3.bf16.msra.mxu0 %v1912_v53 }
  0x38   : > { %1750 = vmatprep.subr.bf16.mxu0 %v1915_v56 }
  0x39   : > { %1771 = vmatpush3.bf16.msra.mxu1 %v1914_v55 }
  0x3a   : > { %1772 = vmatprep.subr.bf16.mxu1 %v1917_v58 }
  0x3b   : > { %1751 = vmatpush3.bf16.msra.mxu0 %v1916_v57 }
  0x3c   : > { %1752 = vmatprep.subr.bf16.mxu0 %v1919_v60 }
  0x3d   : > { %1773 = vmatpush3.bf16.msra.mxu1 %v1918_v59 }
  0x3e   : > { %1774 = vmatprep.subr.bf16.mxu1 %v1921_v62 }
  0x3f   : > { %1753 = vmatpush3.bf16.msra.mxu0 %v1920_v61 }
  0x40   : > { %1754 = vmatprep.subr.bf16.mxu0 %v1923_v0 }
  0x41   : > { %1775 = vmatpush3.bf16.msra.mxu1 %v1922_v63 }
  0x42   : > { %1776 = vmatprep.subr.bf16.mxu1 %v1925_v2 }
  0x43   : > { %1755 = vmatpush3.bf16.msra.mxu0 %v1924_v1 }
  0x44   : > { %1784 = vmatprep.subr.bf16.mxu0 %v1930_v6 }
  0x45   : > { %1777 = vmatpush3.bf16.msra.mxu1 %v1929_v5 }
  0x46   : > { %1219 = vmatmul.mubr.bf16.vlgmr.msra.gmra.mrb[4].mxu0 %v1926_v3  ;;  %1806 = vmatprep.subr.bf16.mxu1 %v1935_v10 }
  0x47   : > { %1785 = vmatpush3.bf16.msra.mxu0 %v1934_v9  ;;  %1300 = vmatprep.mubr.bf16.mxu0 %v1966_v40 }
  0x48   : > { %1260 = vmatmul.mubr.bf16.vlgmr.msra.gmra.mrb[4].mxu1 %v1931_v7  ;;  %1786 = vmatprep.subr.bf16.mxu0 %v1937_v12 }
  0x49   : > { %1807 = vmatpush3.bf16.msra.mxu1 %v1936_v11  ;;  %1341 = vmatprep.mubr.bf16.mxu1 %v1970_v44 }
  0x4a   : > { %1808 = vmatprep.subr.bf16.mxu1 %v1939_v14 }
  0x4b   : > { %1787 = vmatpush3.bf16.msra.mxu0 %v1938_v13 }
  0x4c   : > { %1788 = vmatprep.subr.bf16.mxu0 %v1941_v16 }
  0x4d   : > { %1809 = vmatpush3.bf16.msra.mxu1 %v1940_v15 }
  0x4e   : > { %1810 = vmatprep.subr.bf16.mxu1 %v1943_v18 }
  0x4f   : > { %1789 = vmatpush3.bf16.msra.mxu0 %v1942_v17 }
  0x50   : > { %1790 = vmatprep.subr.bf16.mxu0 %v1945_v20 }
  0x51   : > { %1811 = vmatpush3.bf16.msra.mxu1 %v1944_v19 }
  0x52   : > { %1812 = vmatprep.subr.bf16.mxu1 %v1947_v22 }
  0x53   : > { %1791 = vmatpush3.bf16.msra.mxu0 %v1946_v21 }
  0x54   : > { %1792 = vmatprep.subr.bf16.mxu0 %v1949_v24 }
  0x55   : > { %1813 = vmatpush3.bf16.msra.mxu1 %v1948_v23 }
  0x56   : > { %1814 = vmatprep.subr.bf16.mxu1 %v1951_v26 }
  0x57   : > { %1793 = vmatpush3.bf16.msra.mxu0 %v1950_v25 }
  0x58   : > { %1794 = vmatprep.subr.bf16.mxu0 %v1953_v28 }
  0x59   : > { %1815 = vmatpush3.bf16.msra.mxu1 %v1952_v27 }
  0x5a   : > { %1816 = vmatprep.subr.bf16.mxu1 %v1955_v30 }
  0x5b   : > { %1795 = vmatpush3.bf16.msra.mxu0 %v1954_v29 }
  0x5c   : > { %1796 = vmatprep.subr.bf16.mxu0 %v1957_v32 }
  0x5d   : > { %1817 = vmatpush3.bf16.msra.mxu1 %v1956_v31 }
  0x5e   : > { %1818 = vmatprep.subr.bf16.mxu1 %v1959_v34 }
  0x5f   : > { %1797 = vmatpush3.bf16.msra.mxu0 %v1958_v33 }
  0x60   : > { %1798 = vmatprep.subr.bf16.mxu0 %v1961_v36 }
  0x61   : > { %1819 = vmatpush3.bf16.msra.mxu1 %v1960_v35 }
  0x62   : > { %1820 = vmatprep.subr.bf16.mxu1 %v1963_v38 }
  0x63   : > { %1799 = vmatpush3.bf16.msra.mxu0 %v1962_v37 }
  0x64   : > { %1833 = vmatprep.subr.bf16.mxu0 %v1984_v42 }
  0x65   : > { %1821 = vmatpush3.bf16.msra.mxu1 %v1967_v41 }
  0x66   : > { %1301 = vmatmul.mubr.bf16.vlgmr.msra.gmra.mrb[8].mxu0 %v1964_v39 }
  0x67   : > { %1841 = vmatprep.mubr.msk.bf16.mxu0 %vm1985_vm0, %v1984_v42  ;;  %1834 = vmatpush3.bf16.msra.mxu0 %v1971_v45 }
  0x68   : > { %1342 = vmatmul.mubr.bf16.vlgmr.msra.gmra.mrb[8].mxu1 %v1968_v43  ;;  %1835 = vmatprep.subr.bf16.mxu0 %v1984_v42 }
  0x6b   : > { %1836 = vmatpush3.bf16.msra.mxu0 %v1972_v46 }
  0x6c   : > { %1837 = vmatprep.subr.bf16.mxu0 %v1984_v42 }
  0x6f   : > { %1838 = vmatpush3.bf16.msra.mxu0 %v1973_v47 }
  0x70   : > { %1839 = vmatprep.subr.bf16.mxu0 %v1984_v42 }
  0x73   : > { %1840 = vmatpush3.bf16.msra.mxu0 %v1974_v48 }
  0x76   : > { %1842 = vmatmul.mubr.msk.bf16.vlgmr.msra.gmra.mrb[12].mxu0 %vm1100_vm1, %v1975_v49 }
  0xf9   : > { %v1712_v50 = vpop.f32.mrb[0].mxu0 }
  0xfa   : > { %v1713_v52 = vpop.f32.mrb[1].mxu0 }
  0xfb   : > { %v1714_v53 = vadd.f32 %v1713_v52, %v1712_v50  ;;  %v1715_v54 = vpop.f32.mrb[2].mxu0  ;;  %v1734_v55 = vpop.f32.mrb[0].mxu1 }
  0xfc   : > { %v1716_v56 = vpop.f32.mrb[3].mxu0  ;;  %v1735_v59 = vpop.f32.mrb[1].mxu1 }
  0xfd   : > { %v1139_v57 = vadd.f32 %v1714_v53, %v1565_v51  ;;  %v1717_v58 = vadd.f32 %v1716_v56, %v1715_v54  ;;  %v1736_v60 = vadd.f32 %v1735_v59, %v1734_v55  ;;  %v1737_v61 = vpop.f32.mrb[2].mxu1 }
  0xfe   : > { %v1738_v63 = vpop.f32.mrb[3].mxu1 }
  0xff   : > { %v1142_v62 = vadd.f32 %v1717_v58, %v1565_v51  ;;  %v1180_v0 = vadd.f32 %v1736_v60, %v1139_v57  ;;  %v1739_v1 = vadd.f32 %v1738_v63, %v1737_v61 }
 0x101   : > { %v1183_v2 = vadd.f32 %v1739_v1, %v1142_v62 }
 0x119   : > { %v1756_v3 = vpop.f32.mrb[4].mxu0 }
 0x11a   : > { %v1757_v4 = vpop.f32.mrb[5].mxu0 }
 0x11b   : > { %v1758_v5 = vadd.f32 %v1757_v4, %v1756_v3  ;;  %v1759_v6 = vpop.f32.mrb[6].mxu0  ;;  %v1778_v9 = vpop.f32.mrb[4].mxu1 }
 0x11c   : > { %v1760_v7 = vpop.f32.mrb[7].mxu0  ;;  %v1779_v11 = vpop.f32.mrb[5].mxu1 }
 0x11d   : > { %v1221_v8 = vadd.f32 %v1758_v5, %v1180_v0  ;;  %v1761_v10 = vadd.f32 %v1760_v7, %v1759_v6  ;;  %v1780_v13 = vadd.f32 %v1779_v11, %v1778_v9  ;;  %v1781_v14 = vpop.f32.mrb[6].mxu1 }
 0x11e   : > { %v1782_v15 = vpop.f32.mrb[7].mxu1 }
 0x11f   : > { %v1224_v12 = vadd.f32 %v1761_v10, %v1183_v2  ;;  %v1262_v16 = vadd.f32 %v1780_v13, %v1221_v8  ;;  %v1783_v17 = vadd.f32 %v1782_v15, %v1781_v14 }
 0x121   : > { %v1265_v18 = vadd.f32 %v1783_v17, %v1224_v12 }
 0x139   : > { %v1800_v19 = vpop.f32.mrb[8].mxu0 }
 0x13a   : > { %v1801_v20 = vpop.f32.mrb[9].mxu0 }
 0x13b   : > { %v1802_v21 = vadd.f32 %v1801_v20, %v1800_v19  ;;  %v1803_v22 = vpop.f32.mrb[10].mxu0  ;;  %v1822_v23 = vpop.f32.mrb[8].mxu1 }
 0x13c   : > { %v1804_v24 = vpop.f32.mrb[11].mxu0  ;;  %v1823_v27 = vpop.f32.mrb[9].mxu1 }
 0x13d   : > { %v1303_v25 = vadd.f32 %v1802_v21, %v1262_v16  ;;  %v1805_v26 = vadd.f32 %v1804_v24, %v1803_v22  ;;  %v1824_v28 = vadd.f32 %v1823_v27, %v1822_v23  ;;  %v1825_v29 = vpop.f32.mrb[10].mxu1 }
 0x13e   : > { %v1826_v31 = vpop.f32.mrb[11].mxu1 }
 0x13f   : > { %v1306_v30 = vadd.f32 %v1805_v26, %v1265_v18  ;;  %v1827_v32 = vadd.f32 %v1826_v31, %v1825_v29  ;;  %v1344_v33 = vadd.f32 %v1824_v28, %v1303_v25 }
 0x141   : > { %v1347_v34 = vadd.f32 %v1827_v32, %v1306_v30 }
 0x149   : > { %v1384_v35 = vpop.f32.mrb[12].mxu0 }
 0x14a   : > { %v1385_v36 = vadd.f32 %v1384_v35, %v1344_v33  ;;  %v1843_v37 = vpop.f32.mrb[13].mxu0 }
 0x14b   : > { %v1387_v38 = vpop.f32.mrb[14].mxu0 }
 0x14c   : > { %v1388_v39 = vadd.f32 %v1387_v38, %v1347_v34  ;;  %v1844_v40 = vpop.f32.mrb[15].mxu0  ;;  %v1391_v41 = vmax.f32 %v1385_v36, 0.0  ;;  %1406 = sbr.rel (%p1682_p5) target bundleno = 355 (0x163), region = 36 }
 0x14e   : > { %v1392_v42 = vmax.f32 %v1388_v39, 0.0  ;;  %v1414_v45 = vmul.f32 (!%p1682_p5), %v1391_v41, %v1391_v41 }
 0x150   : > { %v1694_v43 = vpack.c.bf16 %v1392_v42, %v1391_v41  ;;  %v1407_v44 = vadd.f32 (!%p1682_p5), %v1392_v42, %v1391_v41  ;;  %v1415_v46 = vmul.f32 (!%p1682_p5), %v1392_v42, %v1392_v42 }
 0x152   : > { %1695 = vst [vmem:[%s209_s12] sm:$0xff] %v1694_v43   ;;  %v1408_v47 = vrot.slane (!%p1682_p5), %v1407_v44, 4  ;;  %v1416_v48 = vadd.f32 (!%p1682_p5), %v1415_v46, %v1414_v45 }
 0x154   : > { %v1409_v49 = vadd.f32 %v1408_v47, %v1407_v44  ;;  %v1417_v50 = vrot.slane %v1416_v48, 4 }
 0x156   : > { %v1410_v51 = vrot.slane %v1409_v49, 2  ;;  %v1418_v52 = vadd.f32 %v1417_v50, %v1416_v48 }
 0x158   : > { %v1411_v53 = vadd.f32 %v1410_v51, %v1409_v49  ;;  %v1419_v54 = vrot.slane %v1418_v52, 2 }
 0x15a   : > { %v1412_v55 = vrot.slane %v1411_v53, 1  ;;  %v1420_v56 = vadd.f32 %v1419_v54, %v1418_v52 }
 0x15c   : > { %v1413_v57 = vadd.f32 %v1412_v55, %v1411_v53  ;;  %v1421_v58 = vrot.slane %v1420_v56, 1 }
 0x15e   : > { %v1422_v59 = vadd.f32 %v1421_v58, %v1420_v56 }
 0x160   : > { %v1424_v60 = vsel %vm1423_vm2, %v1413_v57, %v1422_v59 }
 0x161   : > { %v1426_v61 = vsel %vm1425_vm3, %v1424_v60, 0.0 }
 0x162   : > { %1427 = vst [vmem:[%s2042_s5] sm:$0xff] %v1426_v61 }
 0x163 PF: > { %p1683_p6 = scmp.ne.s32.totalorder %s2018_s16, 1 }
 0x164   : > { %v1432_v62 = vlaneseq (!%p1683_p6)  ;;  %s1684_s26 = sshll.u32 (!%p1683_p6), %s2018_s16, 4  ;;  %v1986_v4 = vmov (!%p1683_p6), 0.0   ;;  %vm1463_vm6 = vcmask (!%p1683_p6), 1040384   ;;  %vm1465_vm7 = vcmask (!%p1683_p6), 1041408  }
 0x165   : > { %1431 = sbr.rel (%p1683_p6) target bundleno = 387 (0x183), region = 40  ;;  %v1436_v63 = vstv (!%p1683_p6), %s1684_s26 }
 0x166   : > { %v1433_v0 = vshrl.u32 (!%p1683_p6), %v1432_v62, 7 }
 0x168   : > { %v1434_v1 = vadd.s32 (!%p1683_p6), 8, %v1433_v0  ;;  %v1437_v2 = vadd.s32 (!%p1683_p6), %v1436_v63, %v1433_v0 }
 0x16a   : > { %v1438_v3 = vadd.s32 (!%p1683_p6), %v1436_v63, %v1434_v1  ;;  %vm1439_vm4 = vcmp.lt.s32.totalorder (!%p1683_p6), %v1437_v2, 18 }
 0x16b   : > { %v1685_v5 = vsel (!%p1683_p6), %vm1439_vm4, 1.0, %v1986_v4 }
 0x16c   : > { %vm1440_vm5 = vcmp.lt.s32.totalorder %v1438_v3, 18  ;;  %v1445_v6 = vmul.f32 %v1685_v5, %v1391_v41 }
 0x16d   : > { %v1686_v7 = vsel %vm1440_vm5, 1.0, %v1986_v4 }
 0x16e   : > { %v1446_v8 = vmul.f32 %v1686_v7, %v1392_v42  ;;  %v1454_v9 = vmul.f32 %v1445_v6, %v1391_v41 }
 0x170   : > { %v1447_v10 = vadd.f32 %v1446_v8, %v1445_v6  ;;  %v1455_v11 = vmul.f32 %v1446_v8, %v1392_v42 }
 0x172   : > { %v1448_v12 = vrot.slane %v1447_v10, 4  ;;  %v1456_v13 = vadd.f32 %v1455_v11, %v1454_v9 }
 0x174   : > { %v1449_v14 = vadd.f32 %v1448_v12, %v1447_v10  ;;  %v1457_v15 = vrot.slane %v1456_v13, 4 }
 0x176   : > { %v1450_v16 = vrot.slane %v1449_v14, 2  ;;  %v1458_v17 = vadd.f32 %v1457_v15, %v1456_v13 }
 0x178   : > { %v1451_v18 = vadd.f32 %v1450_v16, %v1449_v14  ;;  %v1459_v19 = vrot.slane %v1458_v17, 2 }
 0x17a   : > { %v1452_v20 = vrot.slane %v1451_v18, 1  ;;  %v1460_v21 = vadd.f32 %v1459_v19, %v1458_v17 }
 0x17c   : > { %v1453_v22 = vadd.f32 %v1452_v20, %v1451_v18  ;;  %v1461_v23 = vrot.slane %v1460_v21, 1 }
 0x17e   : > { %v1462_v24 = vadd.f32 %v1461_v23, %v1460_v21 }
 0x180   : > { %v1464_v25 = vsel %vm1463_vm6, %v1453_v22, %v1462_v24 }
 0x181   : > { %v1466_v26 = vsel %vm1465_vm7, %v1464_v25, 0.0 }
 0x182   : > { %1467 = vst [vmem:[%s2042_s5] sm:$0xff] %v1466_v26 }
 0x183 PF: > { %s15_s15 = sadd.s32 1, %s1982_s15  }
 0x184   : > { %p12_p7 = scmp.ge.s32.totalorder %s15_s15, 4  }
 0x186   :  { %14 = sbr.rel (!%p12_p7) target bundleno = 1 (0x1), region = 82 }

// kernel: encoder_forward.11
= control target key start
LH: loop header
LB: loop body
LE: loop exit
PB: predicated region body
PF: predicated region fallthrough
CT: control target
= control target key end

     0   :  { %v152_v0 = vmov 0.0|0.0   ;;  %vm153_vm0 = vmmov 0   ;;  %v154_v4 = vmov 0.0   ;;  %vm28_vm1 = vcmask 523264   ;;  %s208_s1 = inlined_call_operand.vmem [shape: f32[64,128], index: 1, kind: input, shape index: {}]   ;;  %s209_s0 = inlined_call_operand.vmem [shape: f32[8,64], index: 0, kind: input, shape index: {}]   ;;  %s210_s2 = inlined_call_operand.vmem [shape: f32[8,128], index: 2, kind: input, shape index: {}]   ;;  %s211_s3 = inlined_call_operand.vmem [shape: f32[8,128], index: 3, kind: output, shape index: {}]  }
   0x1   :  { %137 = vmatprep.subr.bf16.mxu0 %v152_v0  ;;  %v15_v1 = vld [vmem:[%s208_s1] sm:$0xff]  ;;  %v16_v2 = vld [vmem:[%s208_s1 + $0x8] sm:$0xff]  ;;  %v17_v3 = vld [vmem:[%s208_s1 + $0x10] sm:$0xff]  ;;  %134 = vmatprep.mubr.msk.f32.mxu0 %vm153_vm0, %v154_v4 }
   0x2   :  { %v138_v5 = vpack.c.bf16 %v16_v2, %v15_v1  ;;  %v18_v6 = vld [vmem:[%s208_s1 + $0x18] sm:$0xff]  ;;  %v19_v8 = vld [vmem:[%s208_s1 + $0x20] sm:$0xff]  ;;  %v20_v9 = vld [vmem:[%s208_s1 + $0x28] sm:$0xff] }
   0x3   :  { %v141_v7 = vpack.c.bf16 %v18_v6, %v17_v3  ;;  %v144_v10 = vpack.c.bf16 %v20_v9, %v19_v8  ;;  %v21_v11 = vld [vmem:[%s208_s1 + $0x30] sm:$0xff]  ;;  %v22_v12 = vld [vmem:[%s208_s1 + $0x38] sm:$0xff]  ;;  %v14_v14 = vld [vmem:[%s209_s0] sm:$0xff] }
   0x4   :  { %139 = vmatpush3.bf16.msra.mxu0 %v138_v5  ;;  %v147_v13 = vpack.c.bf16 %v22_v12, %v21_v11  ;;  %v107_v15 = vld [vmem:[%s210_s2] ss:$0 sm:$0xff] }
   0x5   :  { %140 = vmatprep.subr.bf16.mxu0 %v152_v0 }
   0x8   :  { %142 = vmatpush3.bf16.msra.mxu0 %v141_v7 }
   0x9   :  { %143 = vmatprep.subr.bf16.mxu0 %v152_v0 }
   0xc   :  { %145 = vmatpush3.bf16.msra.mxu0 %v144_v10 }
   0xd   :  { %146 = vmatprep.subr.bf16.mxu0 %v152_v0 }
  0x10   :  { %148 = vmatpush3.bf16.msra.mxu0 %v147_v13 }
  0x13   :  { %135 = vmatmul.mubr.msk.f32.vlgmr.msra.gmra.mrb[0].mxu0 %vm28_vm1, %v14_v14 }
  0xe6   :  { %v98_v16 = vpop.f32.mrb[0].mxu0 }
  0xe7   :  { %v99_v17 = vadd.f32 %v107_v15, %v98_v16  ;;  %v136_v18 = vpop.f32.mrb[1].mxu0 }
  0xe9   :  { %102 = vst [vmem:[%s211_s3] sm:$0xff] %v99_v17 }

// kernel: encoder_forward.10
= control target key start
LH: loop header
LB: loop body
LE: loop exit
PB: predicated region body
PF: predicated region fallthrough
CT: control target
= control target key end

     0   :  { %v712_v33 = vmov 0.0   ;;  %vm713_vm0 = vmmov 0   ;;  %vm341_vm1 = vcmask 523264   ;;  %v509_v58 = vlaneseq  ;;  %s871_s1 = inlined_call_operand.vmem [shape: bf16[576,128], index: 1, kind: input, shape index: {}]   ;;  %s872_s0 = inlined_call_operand.vmem [shape: bf16[16,576], index: 0, kind: input, shape index: {}]   ;;  %s873_s2 = inlined_call_operand.vmem [shape: f32[8,128], index: 2, kind: input, shape index: {}]   ;;  %s874_s3 = inlined_call_operand.vmem [shape: bf16[16,128], index: 3, kind: output, shape index: {0}]   ;;  %s875_s4 = inlined_call_operand.vmem [shape: f32[8,128], index: 4, kind: output, shape index: {1}]  }
   0x1   :  { %v669_v0 = vld [vmem:[%s871_s1 + $0x40] sm:$0xff]   ;;  %v673_v4 = vld [vmem:[%s871_s1 + $0x48] sm:$0xff]   ;;  %v677_v8 = vld [vmem:[%s871_s1 + $0x50] sm:$0xff]   ;;  %vm540_vm3 = vcmask 1040384   ;;  %vm542_vm4 = vcmask 1041408  }
   0x2   :  { %v670_v1 = vld [vmem:[%s871_s1] sm:$0xff]   ;;  %606 = vmatprep.subr.bf16.mxu0 %v669_v0  ;;  %v674_v5 = vld [vmem:[%s871_s1 + $0x8] sm:$0xff]   ;;  %v678_v9 = vld [vmem:[%s871_s1 + $0x10] sm:$0xff]   ;;  %v510_v60 = vshrl.u32 %v509_v58, 7 }
   0x3   :  { %v671_v2 = vld [vmem:[%s871_s1 + $0xc0] sm:$0xff]   ;;  %607 = vmatpush3.bf16.msra.mxu0 %v670_v1  ;;  %v675_v6 = vld [vmem:[%s871_s1 + $0xc8] sm:$0xff]   ;;  %v679_v10 = vld [vmem:[%s871_s1 + $0xd0] sm:$0xff]  }
   0x4   :  { %v672_v3 = vld [vmem:[%s871_s1 + $0x80] sm:$0xff]   ;;  %628 = vmatprep.subr.bf16.mxu1 %v671_v2  ;;  %608 = vmatprep.subr.bf16.mxu0 %v673_v4  ;;  %v676_v7 = vld [vmem:[%s871_s1 + $0x88] sm:$0xff]   ;;  %v680_v11 = vld [vmem:[%s871_s1 + $0x90] sm:$0xff]   ;;  %vm516_vm2 = vcmp.lt.s32.totalorder %v510_v60, 2 }
   0x5   :  { %629 = vmatpush3.bf16.msra.mxu1 %v672_v3  ;;  %v681_v12 = vld [vmem:[%s871_s1 + $0x58] sm:$0xff]   ;;  %v685_v16 = vld [vmem:[%s871_s1 + $0x60] sm:$0xff]   ;;  %v689_v20 = vld [vmem:[%s871_s1 + $0x68] sm:$0xff]   ;;  %v598_v0 = vsel %vm516_vm2, 1.0, %v712_v33 }
   0x6   :  { %630 = vmatprep.subr.bf16.mxu1 %v675_v6  ;;  %v682_v13 = vld [vmem:[%s871_s1 + $0x18] sm:$0xff]   ;;  %v686_v17 = vld [vmem:[%s871_s1 + $0x20] sm:$0xff]   ;;  %v690_v21 = vld [vmem:[%s871_s1 + $0x28] sm:$0xff]  }
   0x7   :  { %609 = vmatpush3.bf16.msra.mxu0 %v674_v5  ;;  %v683_v14 = vld [vmem:[%s871_s1 + $0xd8] sm:$0xff]   ;;  %v687_v18 = vld [vmem:[%s871_s1 + $0xe0] sm:$0xff]   ;;  %v691_v22 = vld [vmem:[%s871_s1 + $0xe8] sm:$0xff]  }
   0x8   :  { %610 = vmatprep.subr.bf16.mxu0 %v677_v8  ;;  %v684_v15 = vld [vmem:[%s871_s1 + $0x98] sm:$0xff]   ;;  %v688_v19 = vld [vmem:[%s871_s1 + $0xa0] sm:$0xff]   ;;  %v692_v23 = vld [vmem:[%s871_s1 + $0xa8] sm:$0xff]  }
   0x9   :  { %631 = vmatpush3.bf16.msra.mxu1 %v676_v7  ;;  %v693_v24 = vld [vmem:[%s871_s1 + $0x70] sm:$0xff]   ;;  %v697_v28 = vld [vmem:[%s871_s1 + $0x78] sm:$0xff]   ;;  %v706_v36 = vld [vmem:[%s872_s0 + $0xc] ss:$20 sps:$4 sm:$0xff]  }
   0xa   :  { %632 = vmatprep.subr.bf16.mxu1 %v679_v10  ;;  %v694_v25 = vld [vmem:[%s871_s1 + $0x30] sm:$0xff]   ;;  %v698_v29 = vld [vmem:[%s871_s1 + $0x38] sm:$0xff]   ;;  %v707_v37 = vld [vmem:[%s871_s1 + $0x100] sm:$0xff]   ;;  %418 = vmatprep.mubr.bf16.mxu1 %v706_v36 }
   0xb   :  { %611 = vmatpush3.bf16.msra.mxu0 %v678_v9  ;;  %v695_v26 = vld [vmem:[%s871_s1 + $0xf0] sm:$0xff]   ;;  %v699_v30 = vld [vmem:[%s871_s1 + $0xf8] sm:$0xff]   ;;  %v708_v38 = vld [vmem:[%s871_s1 + $0x108] sm:$0xff]  }
   0xc   :  { %612 = vmatprep.subr.bf16.mxu0 %v681_v12  ;;  %v696_v27 = vld [vmem:[%s871_s1 + $0xb0] sm:$0xff]   ;;  %v702_v32 = vld [vmem:[%s872_s0 + $0x4] ss:$20 sps:$4 sm:$0xff]   ;;  %v704_v35 = vld [vmem:[%s872_s0 + $0x8] ss:$20 sps:$4 sm:$0xff]  }
   0xd   :  { %633 = vmatpush3.bf16.msra.mxu1 %v680_v11  ;;  %v700_v31 = vld [vmem:[%s872_s0] ss:$20 sps:$4 sm:$0xff]   ;;  %v703_v34 = vld [vmem:[%s871_s1 + $0xb8] sm:$0xff]   ;;  %377 = vmatprep.mubr.bf16.mxu0 %v702_v32  ;;  %v711_v41 = vld [vmem:[%s872_s0 + $0x10] ss:$20 sps:$4 sm:$0xff]  }
   0xe   :  { %634 = vmatprep.subr.bf16.mxu1 %v683_v14  ;;  %v709_v39 = vld [vmem:[%s871_s1 + $0x110] sm:$0xff]   ;;  %v710_v40 = vld [vmem:[%s871_s1 + $0x118] sm:$0xff]   ;;  %v553_v43 = vld [vmem:[%s873_s2] ss:$0 sm:$0xff] }
   0xf   :  { %613 = vmatpush3.bf16.msra.mxu0 %v682_v13 }
  0x10   :  { %614 = vmatprep.subr.bf16.mxu0 %v685_v16 }
  0x11   :  { %635 = vmatpush3.bf16.msra.mxu1 %v684_v15 }
  0x12   :  { %636 = vmatprep.subr.bf16.mxu1 %v687_v18 }
  0x13   :  { %615 = vmatpush3.bf16.msra.mxu0 %v686_v17 }
  0x14   :  { %616 = vmatprep.subr.bf16.mxu0 %v689_v20 }
  0x15   :  { %637 = vmatpush3.bf16.msra.mxu1 %v688_v19 }
  0x16   :  { %638 = vmatprep.subr.bf16.mxu1 %v691_v22 }
  0x17   :  { %617 = vmatpush3.bf16.msra.mxu0 %v690_v21 }
  0x18   :  { %618 = vmatprep.subr.bf16.mxu0 %v693_v24 }
  0x19   :  { %639 = vmatpush3.bf16.msra.mxu1 %v692_v23 }
  0x1a   :  { %640 = vmatprep.subr.bf16.mxu1 %v695_v26 }
  0x1b   :  { %619 = vmatpush3.bf16.msra.mxu0 %v694_v25 }
  0x1c   :  { %620 = vmatprep.subr.bf16.mxu0 %v697_v28 }
  0x1d   :  { %641 = vmatpush3.bf16.msra.mxu1 %v696_v27 }
  0x1e   :  { %642 = vmatprep.subr.bf16.mxu1 %v699_v30 }
  0x1f   :  { %621 = vmatpush3.bf16.msra.mxu0 %v698_v29 }
  0x20   :  { %655 = vmatprep.subr.bf16.mxu0 %v712_v33 }
  0x21   :  { %643 = vmatpush3.bf16.msra.mxu1 %v703_v34 }
  0x22   :  { %378 = vmatmul.mubr.bf16.vlgmr.msra.gmra.mrb[0].mxu0 %v700_v31 }
  0x23   :  { %663 = vmatprep.mubr.msk.bf16.mxu0 %vm713_vm0, %v712_v33  ;;  %656 = vmatpush3.bf16.msra.mxu0 %v707_v37 }
  0x24   :  { %419 = vmatmul.mubr.bf16.vlgmr.msra.gmra.mrb[0].mxu1 %v704_v35  ;;  %657 = vmatprep.subr.bf16.mxu0 %v712_v33 }
  0x27   :  { %658 = vmatpush3.bf16.msra.mxu0 %v708_v38 }
  0x28   :  { %659 = vmatprep.subr.bf16.mxu0 %v712_v33 }
  0x2b   :  { %660 = vmatpush3.bf16.msra.mxu0 %v709_v39 }
  0x2c   :  { %661 = vmatprep.subr.bf16.mxu0 %v712_v33 }
  0x2f   :  { %662 = vmatpush3.bf16.msra.mxu0 %v710_v40 }
  0x32   :  { %664 = vmatmul.mubr.msk.bf16.vlgmr.msra.gmra.mrb[4].mxu0 %vm341_vm1, %v711_v41 }
  0xf5   :  { %v622_v42 = vpop.f32.mrb[0].mxu0 }
  0xf6   :  { %v623_v44 = vpop.f32.mrb[1].mxu0 }
  0xf7   :  { %v624_v45 = vadd.f32 %v623_v44, %v622_v42  ;;  %v625_v46 = vpop.f32.mrb[2].mxu0  ;;  %v644_v47 = vpop.f32.mrb[0].mxu1 }
  0xf8   :  { %v626_v48 = vpop.f32.mrb[3].mxu0  ;;  %v645_v51 = vpop.f32.mrb[1].mxu1 }
  0xf9   :  { %v380_v49 = vadd.f32 %v624_v45, %v553_v43  ;;  %v627_v50 = vadd.f32 %v626_v48, %v625_v46  ;;  %v646_v52 = vadd.f32 %v645_v51, %v644_v47  ;;  %v647_v53 = vpop.f32.mrb[2].mxu1 }
  0xfa   :  { %v648_v55 = vpop.f32.mrb[3].mxu1 }
  0xfb   :  { %v383_v54 = vadd.f32 %v627_v50, %v553_v43  ;;  %v649_v56 = vadd.f32 %v648_v55, %v647_v53  ;;  %v421_v57 = vadd.f32 %v646_v52, %v380_v49 }
  0xfd   :  { %v424_v59 = vadd.f32 %v649_v56, %v383_v54 }
 0x105   :  { %v461_v61 = vpop.f32.mrb[4].mxu0 }
 0x106   :  { %v462_v62 = vadd.f32 %v461_v61, %v421_v57  ;;  %v665_v63 = vpop.f32.mrb[5].mxu0 }
 0x107   :  { %v464_v1 = vpop.f32.mrb[6].mxu0 }
 0x108   :  { %v468_v2 = vmax.f32 %v462_v62, 0.0  ;;  %v465_v3 = vadd.f32 %v464_v1, %v424_v59  ;;  %v666_v4 = vpop.f32.mrb[7].mxu0 }
 0x10a   :  { %v522_v5 = vmul.f32 %v598_v0, %v468_v2  ;;  %v469_v6 = vmax.f32 %v465_v3, 0.0 }
 0x10c   :  { %v604_v7 = vpack.c.bf16 %v469_v6, %v468_v2  ;;  %v523_v8 = vmul.f32 0.0, %v469_v6  ;;  %v531_v9 = vmul.f32 %v522_v5, %v468_v2 }
 0x10e   :  { %605 = vst [vmem:[%s874_s3] sm:$0xff] %v604_v7   ;;  %v524_v10 = vadd.f32 %v523_v8, %v522_v5  ;;  %v532_v11 = vmul.f32 %v523_v8, %v469_v6 }
 0x110   :  { %v525_v12 = vrot.slane %v524_v10, 4  ;;  %v533_v13 = vadd.f32 %v532_v11, %v531_v9 }
 0x112   :  { %v526_v14 = vadd.f32 %v525_v12, %v524_v10  ;;  %v534_v15 = vrot.slane %v533_v13, 4 }
 0x114   :  { %v527_v16 = vrot.slane %v526_v14, 2  ;;  %v535_v17 = vadd.f32 %v534_v15, %v533_v13 }
 0x116   :  { %v528_v18 = vadd.f32 %v527_v16, %v526_v14  ;;  %v536_v19 = vrot.slane %v535_v17, 2 }
 0x118   :  { %v529_v20 = vrot.slane %v528_v18, 1  ;;  %v537_v21 = vadd.f32 %v536_v19, %v535_v17 }
 0x11a   :  { %v538_v22 = vrot.slane %v537_v21, 1  ;;  %v530_v23 = vadd.f32 %v529_v20, %v528_v18 }
 0x11c   :  { %v539_v24 = vadd.f32 %v538_v22, %v537_v21 }
 0x11e   :  { %v541_v25 = vsel %vm540_vm3, %v530_v23, %v539_v24 }
 0x11f   :  { %v543_v26 = vsel %vm542_vm4, %v541_v25, 0.0 }
 0x120   :  { %544 = vst [vmem:[%s875_s4] sm:$0xff] %v543_v26 }

</bundles_post_ra>
